<compile_context>
chip_gen: v5e
topology: v5e:2x2
jax: 0.10.0
libtpu: 0.0.40
codegen_flags: <defaults>
</compile_context>

<pallas_src>
import math

import jax
import jax.numpy as jnp
from jax.experimental import pallas as pl
from jax.experimental.pallas import tpu as pltpu


H1, H2, H3 = 256, 512, 120
N_OUT = 4 * 108 * 192  # 82944 = 648 * 128


def _generator_kernel(x_ref, w1_ref, b1_ref, w2_ref, b2_ref, w3_ref, b3_ref,
                      w4_ref, b4_ref, o_ref):
    """Fused Generator forward for one column tile of the final layer."""
    # --- tiny front MLP (recomputed per step, hidden under the w4 DMA) ---
    h = x_ref[...]
    h = jnp.dot(h, w1_ref[...], preferred_element_type=jnp.float32) + b1_ref[...]
    h = jnp.where(h > 0, h, 0.01 * h)
    h = jnp.dot(h, w2_ref[...], preferred_element_type=jnp.float32) + b2_ref[...]
    h = jnp.where(h > 0, h, 0.01 * h)
    h = jnp.dot(h, w3_ref[...], preferred_element_type=jnp.float32) + b3_ref[...]
    h = jnp.where(h > 0, h, 0.01 * h)
    # --- HBM-bound final layer: bf16 weights, f32 accumulation on the MXU ---
    y = jnp.dot(h.astype(w4_ref.dtype), w4_ref[...],
                preferred_element_type=jnp.float32) + b4_ref[...]
    o_ref[...] = jnp.tanh(y).astype(o_ref.dtype)


def generator_forward(params, x, *, tile_n=20736):
    """Full Generator forward pass in a single pallas_call."""
    (w1, b1), (w2, b2), (w3, b3), (w4, b4) = params
    B, Z = x.shape
    assert w1.shape == (Z, H1) and w2.shape == (H1, H2) and w3.shape == (H2, H3)
    K4, N = w4.shape
    assert K4 == H3 and b4.shape == (1, N)
    assert N % tile_n == 0 and tile_n % 128 == 0
    n_steps = N // tile_n

    # Advisory cost estimate so XLA can schedule around this mem-bound call.
    flops = int(2 * B * (Z * H1 + H1 * H2 + H2 * H3) * n_steps
                + 2 * B * H3 * N)
    bytes_accessed = int(
        w4.size * jnp.dtype(w4.dtype).itemsize
        + (w1.size + w2.size + w3.size) * 4
        + (b1.size + b2.size + b3.size + b4.size) * 4
        + x.size * 4
        + B * N * 4)
    cost = pl.CostEstimate(flops=flops, transcendentals=int(B * N),
                           bytes_accessed=bytes_accessed)

    return pl.pallas_call(
        _generator_kernel,
        out_shape=jax.ShapeDtypeStruct((B, N), jnp.float32),
        grid_spec=pltpu.PrefetchScalarGridSpec(
            num_scalar_prefetch=0,
            grid=(n_steps,),
            in_specs=[
                # Small operands: full block, resident across all grid steps.
                pl.BlockSpec(x.shape, lambda j: (0, 0)),    # x  (B, Z)
                pl.BlockSpec(w1.shape, lambda j: (0, 0)),   # w1 (Z, 256)
                pl.BlockSpec(b1.shape, lambda j: (0, 0)),   # b1 (1, 256)
                pl.BlockSpec(w2.shape, lambda j: (0, 0)),   # w2 (256, 512)
                pl.BlockSpec(b2.shape, lambda j: (0, 0)),   # b2 (1, 512)
                pl.BlockSpec(w3.shape, lambda j: (0, 0)),   # w3 (512, 120)
                pl.BlockSpec(b3.shape, lambda j: (0, 0)),   # b3 (1, 120)
                # Streamed operands: one column tile per grid step.
                pl.BlockSpec((H3, tile_n), lambda j: (0, j)),  # w4 tile
                pl.BlockSpec((1, tile_n), lambda j: (0, j)),   # b4 tile
            ],
            out_specs=pl.BlockSpec((B, tile_n), lambda j: (0, j)),
        ),
        compiler_params=pltpu.CompilerParams(
            dimension_semantics=("parallel",),   # lets v7x shard tiles over 2 TCs
            vmem_limit_bytes=32 * 1024 * 1024,   # room for the bigger tiles on v5e
        ),
        cost_estimate=cost,
    )(x, w1, b1, w2, b2, w3, b3, w4, b4)


def init_generator_params(key, z_dim, *, w4_dtype=jnp.bfloat16):
    """Deterministic init matching PyTorch nn.Linear default (uniform +-1/sqrt(fan_in))."""
    dims = [z_dim, H1, H2, H3, N_OUT]
    params = []
    for i in range(4):
        k_in, k_out = dims[i], dims[i + 1]
        key, kw, kb = jax.random.split(key, 3)
        bound = 1.0 / math.sqrt(k_in)
        w = jax.random.uniform(kw, (k_in, k_out), jnp.float32, -bound, bound)
        b = jax.random.uniform(kb, (1, k_out), jnp.float32, -bound, bound)
        if i == 3:
            # Final layer is purely HBM-bandwidth bound on its weight read;
            # bf16 storage halves that traffic (f32 accumulation kept).
            w = w.astype(w4_dtype)
        params.append((w, b))
    return params


def generator_reference(params, x):
    """Pure-JAX reference using the exact same (bf16) w4 for an apples-to-apples check."""
    (w1, b1), (w2, b2), (w3, b3), (w4, b4) = params
    h = jax.nn.leaky_relu(x @ w1 + b1, 0.01)
    h = jax.nn.leaky_relu(h @ w2 + b2, 0.01)
    h = jax.nn.leaky_relu(h @ w3 + b3, 0.01)
    y = jnp.dot(h.astype(w4.dtype), w4, preferred_element_type=jnp.float32) + b4
    return jnp.tanh(y)


if __name__ == "__main__":
    z_dim = 32
    batch = 2
    key = jax.random.PRNGKey(0)
    key_p, key_x = jax.random.split(key)

    params = init_generator_params(key_p, z_dim)
    x = jax.random.normal(key_x, (batch, z_dim), jnp.float32)

    out = jax.block_until_ready(generator_forward(params, x))
    assert out.shape == (batch, N_OUT), out.shape

    ref = jax.block_until_ready(generator_reference(params, x))
    # bf16 final-layer weights => modestly loosened tolerance vs an f32 check.
    assert jnp.allclose(out, ref, atol=5e-3, rtol=5e-3), float(
        jnp.max(jnp.abs(out - ref)))

    print("KERNEL_OK")
</pallas_src>

<mosaic_0001>
module attributes {stable_mosaic.version = 11 : i64} {
  func.func @_generator_kernel(%arg0: i32, %arg1: memref<2x32xf32, #tpu.memory_space<vmem>>, %arg2: memref<32x256xf32, #tpu.memory_space<vmem>>, %arg3: memref<1x256xf32, #tpu.memory_space<vmem>>, %arg4: memref<256x512xf32, #tpu.memory_space<vmem>>, %arg5: memref<1x512xf32, #tpu.memory_space<vmem>>, %arg6: memref<512x120xf32, #tpu.memory_space<vmem>>, %arg7: memref<1x120xf32, #tpu.memory_space<vmem>>, %arg8: memref<120x20736xbf16, #tpu.memory_space<vmem>>, %arg9: memref<1x20736xf32, #tpu.memory_space<vmem>>, %arg10: memref<2x20736xf32, #tpu.memory_space<vmem>>) attributes {dimension_semantics = [#tpu.dimension_semantics<parallel>], iteration_bounds = array<i64: 4>, scalar_prefetch = 0 : i64, scratch_operands = 0 : i64, tpu.core_type = #tpu.core_type<tc>, window_params = [{pipeline_mode = #tpu.pipeline_mode<synchronous>, transform_indices = @transform_0, window_bounds = array<i64: 2, 32>}, {pipeline_mode = #tpu.pipeline_mode<synchronous>, transform_indices = @transform_1, window_bounds = array<i64: 32, 256>}, {pipeline_mode = #tpu.pipeline_mode<synchronous>, transform_indices = @transform_2, window_bounds = array<i64: 1, 256>}, {pipeline_mode = #tpu.pipeline_mode<synchronous>, transform_indices = @transform_3, window_bounds = array<i64: 256, 512>}, {pipeline_mode = #tpu.pipeline_mode<synchronous>, transform_indices = @transform_4, window_bounds = array<i64: 1, 512>}, {pipeline_mode = #tpu.pipeline_mode<synchronous>, transform_indices = @transform_5, window_bounds = array<i64: 512, 120>}, {pipeline_mode = #tpu.pipeline_mode<synchronous>, transform_indices = @transform_6, window_bounds = array<i64: 1, 120>}, {transform_indices = @transform_7, window_bounds = array<i64: 120, 20736>}, {transform_indices = @transform_8, window_bounds = array<i64: 1, 20736>}, {transform_indices = @transform_9, window_bounds = array<i64: 2, 20736>}]} {
    %c0 = arith.constant 0 : index
    %c0_0 = arith.constant 0 : index
    %0 = vector.load %arg1[%c0, %c0_0] : memref<2x32xf32, #tpu.memory_space<vmem>>, vector<2x32xf32>
    %c0_1 = arith.constant 0 : index
    %c0_2 = arith.constant 0 : index
    %1 = vector.load %arg2[%c0_1, %c0_2] : memref<32x256xf32, #tpu.memory_space<vmem>>, vector<32x256xf32>
    %cst = arith.constant dense<0.000000e+00> : vector<2x256xf32>
    %2 = tpu.matmul %0, %1, %cst {dimension_numbers = #tpu.dot_dimension_numbers<[1], [0], [0], [1], [0, 0, 1, 1], [], []>} : vector<2x32xf32>, vector<32x256xf32>, vector<2x256xf32> -> vector<2x256xf32>
    %c0_3 = arith.constant 0 : index
    %c0_4 = arith.constant 0 : index
    %3 = vector.load %arg3[%c0_3, %c0_4] : memref<1x256xf32, #tpu.memory_space<vmem>>, vector<1x256xf32>
    %4 = vector.broadcast %3 : vector<1x256xf32> to vector<2x256xf32>
    %5 = arith.addf %2, %4 : vector<2x256xf32>
    %cst_5 = arith.constant 0.000000e+00 : f32
    %6 = vector.broadcast %cst_5 : f32 to vector<2x256xf32>
    %7 = arith.cmpf ogt, %5, %6 : vector<2x256xf32>
    %cst_6 = arith.constant 0.00999999977 : f32
    %8 = vector.broadcast %cst_6 : f32 to vector<2x256xf32>
    %9 = arith.mulf %8, %5 : vector<2x256xf32>
    %10 = arith.select %7, %5, %9 : vector<2x256xi1>, vector<2x256xf32>
    %c0_7 = arith.constant 0 : index
    %c0_8 = arith.constant 0 : index
    %11 = vector.load %arg4[%c0_7, %c0_8] : memref<256x512xf32, #tpu.memory_space<vmem>>, vector<256x512xf32>
    %cst_9 = arith.constant dense<0.000000e+00> : vector<2x512xf32>
    %12 = tpu.matmul %10, %11, %cst_9 {dimension_numbers = #tpu.dot_dimension_numbers<[1], [0], [0], [1], [0, 0, 1, 1], [], []>} : vector<2x256xf32>, vector<256x512xf32>, vector<2x512xf32> -> vector<2x512xf32>
    %c0_10 = arith.constant 0 : index
    %c0_11 = arith.constant 0 : index
    %13 = vector.load %arg5[%c0_10, %c0_11] : memref<1x512xf32, #tpu.memory_space<vmem>>, vector<1x512xf32>
    %14 = vector.broadcast %13 : vector<1x512xf32> to vector<2x512xf32>
    %15 = arith.addf %12, %14 : vector<2x512xf32>
    %cst_12 = arith.constant 0.000000e+00 : f32
    %16 = vector.broadcast %cst_12 : f32 to vector<2x512xf32>
    %17 = arith.cmpf ogt, %15, %16 : vector<2x512xf32>
    %cst_13 = arith.constant 0.00999999977 : f32
    %18 = vector.broadcast %cst_13 : f32 to vector<2x512xf32>
    %19 = arith.mulf %18, %15 : vector<2x512xf32>
    %20 = arith.select %17, %15, %19 : vector<2x512xi1>, vector<2x512xf32>
    %c0_14 = arith.constant 0 : index
    %c0_15 = arith.constant 0 : index
    %21 = vector.load %arg6[%c0_14, %c0_15] : memref<512x120xf32, #tpu.memory_space<vmem>>, vector<512x120xf32>
    %cst_16 = arith.constant dense<0.000000e+00> : vector<2x120xf32>
    %22 = tpu.matmul %20, %21, %cst_16 {dimension_numbers = #tpu.dot_dimension_numbers<[1], [0], [0], [1], [0, 0, 1, 1], [], []>} : vector<2x512xf32>, vector<512x120xf32>, vector<2x120xf32> -> vector<2x120xf32>
    %c0_17 = arith.constant 0 : index
    %c0_18 = arith.constant 0 : index
    %23 = vector.load %arg7[%c0_17, %c0_18] : memref<1x120xf32, #tpu.memory_space<vmem>>, vector<1x120xf32>
    %24 = vector.broadcast %23 : vector<1x120xf32> to vector<2x120xf32>
    %25 = arith.addf %22, %24 : vector<2x120xf32>
    %cst_19 = arith.constant 0.000000e+00 : f32
    %26 = vector.broadcast %cst_19 : f32 to vector<2x120xf32>
    %27 = arith.cmpf ogt, %25, %26 : vector<2x120xf32>
    %cst_20 = arith.constant 0.00999999977 : f32
    %28 = vector.broadcast %cst_20 : f32 to vector<2x120xf32>
    %29 = arith.mulf %28, %25 : vector<2x120xf32>
    %30 = arith.select %27, %25, %29 : vector<2x120xi1>, vector<2x120xf32>
    %31 = arith.truncf %30 : vector<2x120xf32> to vector<2x120xbf16>
    %c0_21 = arith.constant 0 : index
    %c0_22 = arith.constant 0 : index
    %32 = vector.load %arg8[%c0_21, %c0_22] : memref<120x20736xbf16, #tpu.memory_space<vmem>>, vector<120x20736xbf16>
    %cst_23 = arith.constant dense<0.000000e+00> : vector<2x20736xf32>
    %33 = tpu.matmul %31, %32, %cst_23 {dimension_numbers = #tpu.dot_dimension_numbers<[1], [0], [0], [1], [0, 0, 1, 1], [], []>} : vector<2x120xbf16>, vector<120x20736xbf16>, vector<2x20736xf32> -> vector<2x20736xf32>
    %c0_24 = arith.constant 0 : index
    %c0_25 = arith.constant 0 : index
    %34 = vector.load %arg9[%c0_24, %c0_25] : memref<1x20736xf32, #tpu.memory_space<vmem>>, vector<1x20736xf32>
    %35 = vector.broadcast %34 : vector<1x20736xf32> to vector<2x20736xf32>
    %36 = arith.addf %33, %35 : vector<2x20736xf32>
    %37 = math.tanh %36 : vector<2x20736xf32>
    %c0_26 = arith.constant 0 : index
    %c0_27 = arith.constant 0 : index
    %38 = vector.load %arg10[%c0_26, %c0_27] : memref<2x20736xf32, #tpu.memory_space<vmem>>, vector<2x20736xf32>
    tpu.vector_store %arg10[%c0_26, %c0_27], %37 {strides = array<i32>} : memref<2x20736xf32, #tpu.memory_space<vmem>>, vector<2x20736xf32>,
    return
  }
  func.func @transform_0(%arg0: i32) -> (i32, i32) {
    %c0_i32 = arith.constant 0 : i32
    %c0_i32_0 = arith.constant 0 : i32
    %c0_i32_1 = arith.constant 0 : i32
    return %c0_i32, %c0_i32_0 : i32, i32
  }
  func.func @transform_1(%arg0: i32) -> (i32, i32) {
    %c0_i32 = arith.constant 0 : i32
    %c0_i32_0 = arith.constant 0 : i32
    %c0_i32_1 = arith.constant 0 : i32
    return %c0_i32, %c0_i32_0 : i32, i32
  }
  func.func @transform_2(%arg0: i32) -> (i32, i32) {
    %c0_i32 = arith.constant 0 : i32
    %c0_i32_0 = arith.constant 0 : i32
    %c0_i32_1 = arith.constant 0 : i32
    return %c0_i32, %c0_i32_0 : i32, i32
  }
  func.func @transform_3(%arg0: i32) -> (i32, i32) {
    %c0_i32 = arith.constant 0 : i32
    %c0_i32_0 = arith.constant 0 : i32
    %c0_i32_1 = arith.constant 0 : i32
    return %c0_i32, %c0_i32_0 : i32, i32
  }
  func.func @transform_4(%arg0: i32) -> (i32, i32) {
    %c0_i32 = arith.constant 0 : i32
    %c0_i32_0 = arith.constant 0 : i32
    %c0_i32_1 = arith.constant 0 : i32
    return %c0_i32, %c0_i32_0 : i32, i32
  }
  func.func @transform_5(%arg0: i32) -> (i32, i32) {
    %c0_i32 = arith.constant 0 : i32
    %c0_i32_0 = arith.constant 0 : i32
    %c0_i32_1 = arith.constant 0 : i32
    return %c0_i32, %c0_i32_0 : i32, i32
  }
  func.func @transform_6(%arg0: i32) -> (i32, i32) {
    %c0_i32 = arith.constant 0 : i32
    %c0_i32_0 = arith.constant 0 : i32
    %c0_i32_1 = arith.constant 0 : i32
    return %c0_i32, %c0_i32_0 : i32, i32
  }
  func.func @transform_7(%arg0: i32) -> (i32, i32) {
    %c0_i32 = arith.constant 0 : i32
    %c0_i32_0 = arith.constant 0 : i32
    return %c0_i32, %arg0 : i32, i32
  }
  func.func @transform_8(%arg0: i32) -> (i32, i32) {
    %c0_i32 = arith.constant 0 : i32
    %c0_i32_0 = arith.constant 0 : i32
    return %c0_i32, %arg0 : i32, i32
  }
  func.func @transform_9(%arg0: i32) -> (i32, i32) {
    %c0_i32 = arith.constant 0 : i32
    %c0_i32_0 = arith.constant 0 : i32
    return %c0_i32, %arg0 : i32, i32
  }
}

</mosaic_0001>

<bundles_post_ra>
// kernel: tpu_custom_call.1
= control target key start
LH: loop header
LB: loop body
LE: loop exit
PB: predicated region body
PF: predicated region fallthrough
CT: control target
= control target key end

     0   :  { %s22382_s0 = inlined_call_operand.hbm [shape: f32[2,32], index: 0, kind: input, shape index: {}]   ;;  %s22383_s1 = inlined_call_operand.hbm [shape: f32[32,256], index: 1, kind: input, shape index: {}]   ;;  %s22384_s2 = inlined_call_operand.hbm [shape: f32[1,256], index: 2, kind: input, shape index: {}]   ;;  %s22385_s3 = inlined_call_operand.hbm [shape: f32[256,512], index: 3, kind: input, shape index: {}]   ;;  %s22386_s4 = inlined_call_operand.hbm [shape: f32[1,512], index: 4, kind: input, shape index: {}]   ;;  %s22387_s5 = inlined_call_operand.vmem [shape: f32[512,120], index: 5, kind: input, shape index: {}]   ;;  %s22388_s6 = inlined_call_operand.hbm [shape: f32[1,120], index: 6, kind: input, shape index: {}]   ;;  %s22389_s7 = inlined_call_operand.hbm [shape: bf16[120,82944], index: 7, kind: input, shape index: {}]   ;;  %s22390_s8 = inlined_call_operand.hbm [shape: f32[1,82944], index: 8, kind: input, shape index: {}]   ;;  %s22391_s9 = inlined_call_operand.hbm [shape: f32[2,82944], index: 9, kind: output, shape index: {}]  }
   0x1   :  { %22398 = sst [smem:[#allocation26_spill]] %s22382_s0 }
   0x2   :  { %22399 = sst [smem:[#allocation27_spill]] %s22383_s1 }
   0x3   :  { %22400 = sst [smem:[#allocation28_spill]] %s22385_s3 }
   0x4   :  { %22401 = sst [smem:[#allocation29_spill]] %s22389_s7 }
   0x5   :  { %14 = vsyncpa [#allocation3], 0 }
   0x6   :  { %15 = vsyncpa [#allocation6], 0 }
   0x7   :  { %16 = vsyncpa [#allocation9], 0 }
   0x8   :  { %17 = vsyncpa [#allocation12], 0 }
   0x9   :  { %18 = vsyncpa [#allocation4], 0 }
   0xa   :  { %20 = vsyncpa [#allocation4 + $0x1], 0  ;;  %s18767_s30 = smov 0   ;;  %s18769_s10 = smov 0  }
   0xb   :  { %s18771_s11 = smov 0   ;;  %s18773_s12 = smov 0  }
   0xc LB: > { %22402 = sst [smem:[#allocation22_spill]] %s18690_s30  ;;  %s18791_s16 = sadd.s32 4294967295, %s18702_s12   ;;  %s18702_s12 = sphi %s18773_s12, %s22427_s12   ;;  %s18698_s11 = sphi %s18771_s11, %s22431_s11   ;;  %s18694_s10 = sphi %s18769_s10, %s22430_s10   ;;  %s18690_s30 = sphi %s18767_s30, %s22429_s30  }
   0xd   : > { %s22403_s0 = sld [smem:[#allocation26_spill]]  ;;  %p12076_p0 = scmp.ge.s32.totalorder %s18702_s12, 1 }
   0xe   : > { %p22393_p1 = scmp.eq.s32.totalorder %s18791_s16, 0  ;;  %p256_p2 = scmp.lt.s32.totalorder %s18702_s12, 5 }
   0xf   : > { %s18704_s18 = smov [#allocation2]   ;;  %s22405_s1 = sld [smem:[#allocation27_spill]] }
  0x10   : > { %p18796_p3 = pnand %p12076_p0, %p256_p2  ;;  %s270_s19 = sshll.u32 %s18704_s18, 4  ;;  %s271_s19 = int_to_ptr.vmem [resolvable:$true] %s270_s19 }
  0x11   : > { %s18705_s24 = smov [#allocation5]   ;;  %s18706_s26 = smov 256  }
  0x12   : > { %p17966_p4 = pneg %p18796_p3  ;;  %s281_s25 = sshll.u32 %s18705_s24, 4  ;;  %s282_s25 = int_to_ptr.vmem [resolvable:$true] %s281_s25 }
  0x13   : > { %s268_s15 = sshll.u32 %s22403_s0, 4  ;;  %s18707_s27 = smov 16   ;;  %s269_s15 = int_to_ptr.hbm [resolvable:$true] %s268_s15 }
  0x14   : > { %p18807_p5 = pnand %p17966_p4, %p22393_p1  ;;  %s22407_s3 = sld [smem:[#allocation28_spill]] }
  0x15   : > { %s279_s22 = sshll.u32 %s22405_s1, 4  ;;  %s18708_s14 = smov [#allocation8]   ;;  %s280_s22 = int_to_ptr.hbm [resolvable:$true] %s279_s22 }
  0x16   : > { %17969 = dma.hbm_to_vmem [thread:$0]  (!%p18807_p5), %s269_s15, 32, %s271_s19, [#allocation3]  }
  0x17   : > { %17972 = dma.hbm_to_vmem [thread:$0]  (!%p18807_p5), %s280_s22, 1024, %s282_s25, [#allocation6], %s18706_s26, %s18706_s26, %s18707_s27  }
  0x18   : > { %s307_s18 = sshll.u32 %s18708_s14, 4  ;;  %s18709_s15 = smov 512   ;;  %s308_s18 = int_to_ptr.vmem [resolvable:$true] %s307_s18 }
  0x19   : > { %s18710_s19 = smov 32   ;;  %s12075_s20 = sadd.s32 4294967294, %s18702_s12  }
  0x1a   : > { %s305_s13 = sshll.u32 %s22407_s3, 4  ;;  %s18822_s21 = sadd.s32 1, %s18702_s12   ;;  %s306_s13 = int_to_ptr.hbm [resolvable:$true] %s305_s13 }
  0x1b   : > { %17978 = dma.hbm_to_vmem [thread:$0]  (!%p18807_p5), %s306_s13, 16384, %s308_s18, [#allocation9], %s18709_s15, %s18709_s15, %s18710_s19  }
  0x1c   : > { %22408 = sst [smem:[#allocation23_spill]] %s18822_s21  ;;  %s180_s22 = sadd.s32 1, %s18698_s11 }
  0x1d   : > { %s177_s24 = ssub.s32 %s18702_s12, %s18822_s21  ;;  %p187_p6 = scmp.ne.s32.totalorder %s18698_s11, %s18694_s10 }
  0x1e   : > { %p178_p7 = scmp.eq.s32.totalorder %s177_s24, 0  ;;  %p188_p8 = scmp.eq.s32.totalorder %s18702_s12, 0 }
  0x1f   : > { %p193_p9 = scmp.ne.s32.totalorder %s18694_s10, %s18690_s30  ;;  %p243_p10 = scmp.eq.s32.totalorder %s18791_s16, 3 }
  0x20   : > { %s18834_s25 = scalar_select %p178_p7, %s18698_s11, %s180_s22  }
  0x21   : > { %p189_p11 = por %p188_p8, %p187_p6  ;;  %p18838_p12 = por %p22393_p1, %p193_p9 }
  0x22   : > { %22409 = sst [smem:[#allocation24_spill]] %s18834_s25  ;;  %p18842_p13 = por %p243_p10, %p187_p6 }
  0x23   : > { %p249_p0 = scmp.eq.s32.totalorder %s12075_s20, 3  ;;  %p18002_p2 = scmp.lt.s32.totalorder %s18702_s12, 4 }
  0x24   : > { %s348_s28 = sand.u32 1, %s18702_s12   ;;  %s22392_s13 = sand.u32 1, %s18698_s11  }
  0x25   : > { %p18848_p4 = por %p249_p0, %p193_p9  ;;  %s16795_s14 = smul.u32 648, %s18702_s12 }
  0x26   : > { %s17931_s18 = smul.u32 9720, %s22392_s13  ;;  %p18856_p7 = pnand %p18002_p2, %p189_p11 }
  0x27   : > { %s22412_s29 = scalar_select %p18848_p4, 1, 0 }
  0x28   : > { %s22415_s7 = sld [smem:[#allocation29_spill]]  ;;  %s352_s0 = scalar_lea.vmem [#allocation13], %s17931_s18 }
  0x29   : > { %22413 = sst [smem:[#allocation25_spill]] %s22412_s29  ;;  %s360_s1 = sshll.u32 %s352_s0, 4  ;;  %s361_s1 = int_to_ptr.vmem [resolvable:$true] %s360_s1 }
  0x2a   : > { %s18863_s3 = scalar_lea.sflag [#allocation3], %s348_s28  ;;  %p18474_p8 = pneg %p18856_p7 }
  0x2e   : > { %s357_s20 = scalar_lea.hbm %s22415_s7, %s16795_s14  ;;  %s18477_s14 = scalar_lea.hbm %s22415_s7, 38880 }
  0x2f   : > { %s358_s24 = sshll.u32 %s357_s20, 4  ;;  %s359_s24 = int_to_ptr.hbm [resolvable:$true] %s358_s24 }
  0x30   : > { %s18470_s25 = sshra.s32 %s359_s24, 4  ;;  %s18471_s25 = int_to_ptr.hbm [resolvable:$true] %s18470_s25 }
  0x31   : > { %s18472_s13 = scalar_lea.hbm %s18471_s25, 9720  ;;  %p18478_p11 = scmp.lt.s32.totalorder %s18471_s25, %s22415_s7 }
  0x32   : > { %p18473_p6 = scmp.ne.s32.totalorder %s18471_s25, %s18472_s13  ;;  %p18479_p0 = scmp.lt.s32.totalorder %s18477_s14, %s18472_s13 }
  0x34   : > { %p18475_p9 = pnand %p18474_p8, %p18473_p6  ;;  %p18480_p2 = por %p18479_p0, %p18478_p11 }
  0x36   : > { %p18476_p10 = pneg %p18475_p9 }
  0x38   : > { %p18481_p1 = pnand %p18480_p2, %p18476_p10 }
  0x3a   : > { %18484 = shalt.err (!%p18481_p1)
}
  0x3b   : > { %s18711_s0 = smov 41472   ;;  %s18712_s28 = smov 10368  }
  0x3c   : > { %s18713_s21 = smov 648   ;;  %s294_s29 = sshll.u32 %s22384_s2, 4  ;;  %s295_s29 = int_to_ptr.hbm [resolvable:$true] %s294_s29 }
  0x3d   : > { %17988 = dma.hbm_to_vmem [thread:$0]  (!%p18856_p7), %s359_s24, 155520, %s361_s1, %s18863_s3, %s18711_s0, %s18712_s28, %s18713_s21  }
  0x3e   : > { %s18714_s25 = smov [#allocation7]   ;;  %s320_s18 = sshll.u32 %s22386_s4, 4  ;;  %s321_s18 = int_to_ptr.hbm [resolvable:$true] %s320_s18 }
  0x3f   : > { %s296_s13 = sshll.u32 %s18714_s25, 4  ;;  %s18715_s7 = smov [#allocation10]   ;;  %s297_s13 = int_to_ptr.vmem [resolvable:$true] %s296_s13 }
  0x40   : > { %17975 = dma.hbm_to_vmem [thread:$0]  (!%p18807_p5), %s295_s29, 32, %s297_s13, [#allocation6]  }
  0x41   : > { %s322_s30 = sshll.u32 %s18715_s7, 4  ;;  %s335_s24 = sshll.u32 %s22388_s6, 4  ;;  %s323_s30 = int_to_ptr.vmem [resolvable:$true] %s322_s30  ;;  %s336_s24 = int_to_ptr.hbm [resolvable:$true] %s335_s24 }
  0x42   : > { %17981 = dma.hbm_to_vmem [thread:$0]  (!%p18807_p5), %s321_s18, 64, %s323_s30, [#allocation9]  }
  0x43   : > { %s22416_s0 = sand.u32 1, %s18698_s11   ;;  %s18716_s19 = smov [#allocation11]  }
  0x44   : > { %s17932_s28 = smul.u32 162, %s22416_s0  ;;  %s337_s22 = sshll.u32 %s18716_s19, 4  ;;  %s338_s22 = int_to_ptr.vmem [resolvable:$true] %s337_s22 }
  0x45   : > { %s375_s25 = smul.u32 162, %s18702_s12 }
  0x46   : > { %17984 = dma.hbm_to_vmem [thread:$0]  (!%p18807_p5), %s336_s24, 16, %s338_s22, [#allocation12]  }
  0x47   : > { %s378_s7 = scalar_lea.hbm %s22390_s8, %s375_s25  ;;  %s374_s14 = scalar_lea.vmem [#allocation14], %s17932_s28 }
  0x48   : > { %s382_s20 = sshll.u32 %s374_s14, 4  ;;  %s380_s1 = sshll.u32 %s378_s7, 4  ;;  %s383_s20 = int_to_ptr.vmem [resolvable:$true] %s382_s20  ;;  %s381_s1 = int_to_ptr.hbm [resolvable:$true] %s380_s1 }
  0x49   : > { %s18590_s21 = sshra.s32 %s381_s1, 4  ;;  %s18597_s24 = scalar_lea.hbm %s22390_s8, 648  ;;  %s18591_s21 = int_to_ptr.hbm [resolvable:$true] %s18590_s21 }
  0x4a   : > { %s18592_s30 = scalar_lea.hbm %s18591_s21, 162  ;;  %p18598_p5 = scmp.lt.s32.totalorder %s18591_s21, %s22390_s8 }
  0x4b   : > { %p18593_p1 = scmp.ne.s32.totalorder %s18591_s21, %s18592_s30  ;;  %p18599_p10 = scmp.lt.s32.totalorder %s18597_s24, %s18592_s30 }
  0x4d   : > { %p18595_p6 = pnand %p18593_p1, %p18474_p8  ;;  %p18600_p11 = por %p18599_p10, %p18598_p5 }
  0x4f   : > { %p18596_p9 = pneg %p18595_p6 }
  0x51   : > { %p18601_p0 = pnand %p18600_p11, %p18596_p9 }
  0x53   : > { %18604 = shalt.err (!%p18601_p0)
}
  0x54   : > { %17991 = dma.hbm_to_vmem [thread:$0]  (!%p18856_p7), %s381_s1, 2592, %s383_s20, %s18863_s3  }
  0x55   : > { %391 = sbr.rel (%p18796_p3) target bundleno = 1925 (0x785), region = 56  ;;  %p22417_p8 = scmp.eq.s32.totalorder (!%p18796_p3), %s18791_s16, 0 }
  0x5a   : > { %18665 = dma.done.wait (%p22417_p8), [#allocation3], 32   ;;  %p22418_p2 = pmov %p22417_p8 }
  0x5c   : > { %18667 = vsyncadd (%p22418_p2), [#allocation3], 4294967264  ;;  %p22419_p1 = pmov %p22418_p2 }
  0x5e   : > { %18669 = dma.done.wait (%p22419_p1), [#allocation6], 1056   ;;  %p22420_p6 = pmov %p22419_p1 }
  0x5f   : > { %p22421_p9 = pmov %p22419_p1 }
  0x60   : > { %18671 = vsyncadd (%p22420_p6), [#allocation6], 4294966240 }
  0x61   : > { %18673 = dma.done.wait (%p22421_p9), [#allocation9], 16448   ;;  %p22422_p7 = pmov %p22419_p1 }
  0x62   : > { %p22423_p3 = pmov %p22419_p1 }
  0x63   : > { %18675 = vsyncadd (%p22422_p7), [#allocation9], 4294950848 }
  0x64   : > { %18677 = dma.done.wait (%p22423_p3), [#allocation12], 16   ;;  %p22424_p5 = pmov %p22419_p1 }
  0x65   : > { %s423_s3 = sand.u32 1, %s18791_s16   ;;  %s18932_s17 = sand.u32 1, %s18694_s10  }
  0x66   : > { %18679 = vsyncadd (%p22424_p5), [#allocation12], 4294967280  ;;  %s17933_s15 = smul.u32 9720, %s18932_s17  ;;  %s424_s28 = scalar_lea.sflag [#allocation3], %s423_s3 }
  0x68   : > { %s18935_s22 = scalar_lea.vmem [#allocation13], %s17933_s15 }
  0x69   : > { %18681 = dma.done.wait (%p18838_p12), %s424_s28, 158112  }
  0x6a   : > { %18683 = vsyncadd (%p18838_p12), %s424_s28, 4294809184  ;;  %v488_v0 = vld [vmem:[#allocation5 + $0x30] sm:$0xff]  ;;  %v489_v1 = vld [vmem:[#allocation5 + $0x38] sm:$0xff]  ;;  %vm496_vm0 = vcmask 261120   ;;  %vm8668_vm3 = vcmask 1043456   ;;  %vm8664_vm9 = vcmask 982016  }
  0x6b   : > { %v486_v2 = vld [vmem:[#allocation5 + $0x20] sm:$0xff]  ;;  %512 = vmatpush.msra.mxu0 %v488_v0  ;;  %532 = vmatpush.msra.mxu1 %v489_v1  ;;  %v487_v3 = vld [vmem:[#allocation5 + $0x28] sm:$0xff]  ;;  %v484_v4 = vld [vmem:[#allocation5 + $0x10] sm:$0xff]  ;;  %s17934_s29 = smul.u32 162, %s18932_s17  ;;  %vm11708_vm10 = vcmask 1045508   ;;  %vm11706_vm11 = vcmask 1041408  }
  0x6c   : > { %v485_v5 = vld [vmem:[#allocation5 + $0x18] sm:$0xff]  ;;  %v482_v6 = vld [vmem:[#allocation5] sm:$0xff]  ;;  %v483_v9 = vld [vmem:[#allocation5 + $0x8] sm:$0xff]  ;;  %s17935_s7 = smul.u32 324, %s18932_s17  ;;  %s18640_s3 = scalar_lea.hbm %s22391_s9, 1296 }
  0x6d   : > { %513 = vmatpush.msra.mxu0 %v486_v2  ;;  %533 = vmatpush.msra.mxu1 %v487_v3  ;;  %v606_v7 = vld [vmem:[#allocation8 + $0x1e0] sm:$0xff]  ;;  %v481_v12 = vld [vmem:[#allocation2] sm:$0x3]  ;;  %v607_v13 = vld [vmem:[#allocation8 + $0x1e8] sm:$0xff]  ;;  %s19570_s13 = scalar_lea.vmem [#allocation14], %s17934_s29 }
  0x6e   : > { %v670_v8 = vld [vmem:[#allocation8 + $0x3e0] sm:$0xff]  ;;  %684 = vmatpush.msra.mxu2 %v606_v7  ;;  %v671_v14 = vld [vmem:[#allocation8 + $0x3e8] sm:$0xff]  ;;  %v608_v7 = vld [vmem:[#allocation8 + $0x1f0] sm:$0xff]  ;;  %s19647_s14 = scalar_lea.vmem [#allocation15], %s17935_s7 }
  0x6f   : > { %704 = vmatpush.msra.mxu3 %v670_v8  ;;  %v602_v10 = vld [vmem:[#allocation8 + $0x1c0] sm:$0xff]  ;;  %514 = vmatpush.msra.mxu0 %v484_v4  ;;  %v603_v17 = vld [vmem:[#allocation8 + $0x1c8] sm:$0xff]  ;;  %v672_v8 = vld [vmem:[#allocation8 + $0x3f0] sm:$0xff]  ;;  %s11925_s30 = sshll.u32 %s19647_s14, 4  ;;  %s11926_s30 = int_to_ptr.vmem [resolvable:$true] %s11925_s30 }
  0x70   : > { %v666_v11 = vld [vmem:[#allocation8 + $0x3c0] sm:$0xff]  ;;  %534 = vmatpush.msra.mxu1 %v485_v5  ;;  %685 = vmatpush.msra.mxu2 %v602_v10  ;;  %v667_v18 = vld [vmem:[#allocation8 + $0x3c8] sm:$0xff] }
  0x71   : > { %705 = vmatpush.msra.mxu3 %v666_v11  ;;  %515 = vmatpush.msra.mxu0 %v482_v6  ;;  %v598_v15 = vld [vmem:[#allocation8 + $0x1a0] sm:$0xff]  ;;  %v599_v21 = vld [vmem:[#allocation8 + $0x1a8] sm:$0xff]  ;;  %v609_v11 = vld [vmem:[#allocation8 + $0x1f8] sm:$0xff] }
  0x72   : > { %535 = vmatpush.msra.mxu1 %v483_v9  ;;  %v662_v16 = vld [vmem:[#allocation8 + $0x3a0] sm:$0xff]  ;;  %12092 = vmatmul.msk.f32.vlgmr.msra.gmra.mxu0 %vm496_vm0, %v481_v12  ;;  %v663_v22 = vld [vmem:[#allocation8 + $0x3a8] sm:$0xff] }
  0x73   : > { %12093 = vmatmul.msk.f32.vlgmr.msra.gmra.mxu1 %vm496_vm0, %v481_v12  ;;  %724 = vmatpush.msrb.mxu0 %v607_v13  ;;  %v594_v19 = vld [vmem:[#allocation8 + $0x180] sm:$0xff]  ;;  %v595_v25 = vld [vmem:[#allocation8 + $0x188] sm:$0xff]  ;;  %v673_v12 = vld [vmem:[#allocation8 + $0x3f8] sm:$0xff] }
  0x74   : > { %744 = vmatpush.msrb.mxu1 %v671_v14  ;;  %v658_v20 = vld [vmem:[#allocation8 + $0x380] sm:$0xff]  ;;  %686 = vmatpush.msra.mxu2 %v598_v15  ;;  %v659_v26 = vld [vmem:[#allocation8 + $0x388] sm:$0xff]  ;;  %v604_v13 = vld [vmem:[#allocation8 + $0x1d0] sm:$0xff] }
  0x75   : > { %706 = vmatpush.msra.mxu3 %v662_v16  ;;  %725 = vmatpush.msrb.mxu0 %v603_v17  ;;  %v590_v23 = vld [vmem:[#allocation8 + $0x160] sm:$0xff]  ;;  %v591_v29 = vld [vmem:[#allocation8 + $0x168] sm:$0xff]  ;;  %v668_v14 = vld [vmem:[#allocation8 + $0x3d0] sm:$0xff] }
  0x76   : > { %745 = vmatpush.msrb.mxu1 %v667_v18  ;;  %v654_v24 = vld [vmem:[#allocation8 + $0x360] sm:$0xff]  ;;  %687 = vmatpush.msra.mxu2 %v594_v19  ;;  %v655_v30 = vld [vmem:[#allocation8 + $0x368] sm:$0xff]  ;;  %v605_v15 = vld [vmem:[#allocation8 + $0x1d8] sm:$0xff] }
  0x77   : > { %707 = vmatpush.msra.mxu3 %v658_v20  ;;  %726 = vmatpush.msrb.mxu0 %v599_v21  ;;  %v586_v27 = vld [vmem:[#allocation8 + $0x140] sm:$0xff]  ;;  %v587_v33 = vld [vmem:[#allocation8 + $0x148] sm:$0xff]  ;;  %v669_v16 = vld [vmem:[#allocation8 + $0x3d8] sm:$0xff] }
  0x78   : > { %746 = vmatpush.msrb.mxu1 %v663_v22  ;;  %v650_v28 = vld [vmem:[#allocation8 + $0x340] sm:$0xff]  ;;  %688 = vmatpush.msra.mxu2 %v590_v23  ;;  %v651_v34 = vld [vmem:[#allocation8 + $0x348] sm:$0xff]  ;;  %v600_v17 = vld [vmem:[#allocation8 + $0x1b0] sm:$0xff] }
  0x79   : > { %708 = vmatpush.msra.mxu3 %v654_v24  ;;  %727 = vmatpush.msrb.mxu0 %v595_v25  ;;  %v582_v31 = vld [vmem:[#allocation8 + $0x120] sm:$0xff]  ;;  %v583_v37 = vld [vmem:[#allocation8 + $0x128] sm:$0xff]  ;;  %v664_v18 = vld [vmem:[#allocation8 + $0x3b0] sm:$0xff] }
  0x7a   : > { %747 = vmatpush.msrb.mxu1 %v659_v26  ;;  %v646_v32 = vld [vmem:[#allocation8 + $0x320] sm:$0xff]  ;;  %689 = vmatpush.msra.mxu2 %v586_v27  ;;  %v647_v38 = vld [vmem:[#allocation8 + $0x328] sm:$0xff]  ;;  %v601_v19 = vld [vmem:[#allocation8 + $0x1b8] sm:$0xff] }
  0x7b   : > { %709 = vmatpush.msra.mxu3 %v650_v28  ;;  %728 = vmatpush.msrb.mxu0 %v591_v29  ;;  %v578_v35 = vld [vmem:[#allocation8 + $0x100] sm:$0xff]  ;;  %v579_v41 = vld [vmem:[#allocation8 + $0x108] sm:$0xff]  ;;  %v665_v20 = vld [vmem:[#allocation8 + $0x3b8] sm:$0xff] }
  0x7c   : > { %748 = vmatpush.msrb.mxu1 %v655_v30  ;;  %v642_v36 = vld [vmem:[#allocation8 + $0x300] sm:$0xff]  ;;  %690 = vmatpush.msra.mxu2 %v582_v31  ;;  %v643_v42 = vld [vmem:[#allocation8 + $0x308] sm:$0xff]  ;;  %v596_v21 = vld [vmem:[#allocation8 + $0x190] sm:$0xff] }
  0x7d   : > { %710 = vmatpush.msra.mxu3 %v646_v32  ;;  %729 = vmatpush.msrb.mxu0 %v587_v33  ;;  %v574_v39 = vld [vmem:[#allocation8 + $0xe0] sm:$0xff]  ;;  %v575_v45 = vld [vmem:[#allocation8 + $0xe8] sm:$0xff]  ;;  %v660_v22 = vld [vmem:[#allocation8 + $0x390] sm:$0xff] }
  0x7e   : > { %749 = vmatpush.msrb.mxu1 %v651_v34  ;;  %v638_v40 = vld [vmem:[#allocation8 + $0x2e0] sm:$0xff]  ;;  %691 = vmatpush.msra.mxu2 %v578_v35  ;;  %v639_v46 = vld [vmem:[#allocation8 + $0x2e8] sm:$0xff]  ;;  %v597_v23 = vld [vmem:[#allocation8 + $0x198] sm:$0xff] }
  0x7f   : > { %711 = vmatpush.msra.mxu3 %v642_v36  ;;  %730 = vmatpush.msrb.mxu0 %v583_v37  ;;  %v570_v43 = vld [vmem:[#allocation8 + $0xc0] sm:$0xff]  ;;  %v571_v49 = vld [vmem:[#allocation8 + $0xc8] sm:$0xff]  ;;  %v661_v24 = vld [vmem:[#allocation8 + $0x398] sm:$0xff] }
  0x80   : > { %750 = vmatpush.msrb.mxu1 %v647_v38  ;;  %v634_v44 = vld [vmem:[#allocation8 + $0x2c0] sm:$0xff]  ;;  %692 = vmatpush.msra.mxu2 %v574_v39  ;;  %v635_v50 = vld [vmem:[#allocation8 + $0x2c8] sm:$0xff]  ;;  %v592_v25 = vld [vmem:[#allocation8 + $0x170] sm:$0xff] }
  0x81   : > { %712 = vmatpush.msra.mxu3 %v638_v40  ;;  %731 = vmatpush.msrb.mxu0 %v579_v41  ;;  %v566_v47 = vld [vmem:[#allocation8 + $0xa0] sm:$0xff]  ;;  %v567_v53 = vld [vmem:[#allocation8 + $0xa8] sm:$0xff]  ;;  %v656_v26 = vld [vmem:[#allocation8 + $0x370] sm:$0xff] }
  0x82   : > { %751 = vmatpush.msrb.mxu1 %v643_v42  ;;  %v630_v48 = vld [vmem:[#allocation8 + $0x2a0] sm:$0xff]  ;;  %693 = vmatpush.msra.mxu2 %v570_v43  ;;  %v631_v54 = vld [vmem:[#allocation8 + $0x2a8] sm:$0xff]  ;;  %v593_v27 = vld [vmem:[#allocation8 + $0x178] sm:$0xff] }
  0x83   : > { %713 = vmatpush.msra.mxu3 %v634_v44  ;;  %732 = vmatpush.msrb.mxu0 %v575_v45  ;;  %v562_v51 = vld [vmem:[#allocation8 + $0x80] sm:$0xff]  ;;  %v563_v57 = vld [vmem:[#allocation8 + $0x88] sm:$0xff]  ;;  %v657_v28 = vld [vmem:[#allocation8 + $0x378] sm:$0xff] }
  0x84   : > { %752 = vmatpush.msrb.mxu1 %v639_v46  ;;  %v626_v52 = vld [vmem:[#allocation8 + $0x280] sm:$0xff]  ;;  %694 = vmatpush.msra.mxu2 %v566_v47  ;;  %v627_v58 = vld [vmem:[#allocation8 + $0x288] sm:$0xff]  ;;  %v588_v29 = vld [vmem:[#allocation8 + $0x150] sm:$0xff] }
  0x85   : > { %714 = vmatpush.msra.mxu3 %v630_v48  ;;  %733 = vmatpush.msrb.mxu0 %v571_v49  ;;  %v558_v55 = vld [vmem:[#allocation8 + $0x60] sm:$0xff]  ;;  %v559_v61 = vld [vmem:[#allocation8 + $0x68] sm:$0xff]  ;;  %v652_v30 = vld [vmem:[#allocation8 + $0x350] sm:$0xff] }
  0x86   : > { %753 = vmatpush.msrb.mxu1 %v635_v50  ;;  %v622_v56 = vld [vmem:[#allocation8 + $0x260] sm:$0xff]  ;;  %695 = vmatpush.msra.mxu2 %v562_v51  ;;  %v623_v62 = vld [vmem:[#allocation8 + $0x268] sm:$0xff]  ;;  %v589_v31 = vld [vmem:[#allocation8 + $0x158] sm:$0xff] }
  0x87   : > { %715 = vmatpush.msra.mxu3 %v626_v52  ;;  %734 = vmatpush.msrb.mxu0 %v567_v53  ;;  %v554_v59 = vld [vmem:[#allocation8 + $0x40] sm:$0xff]  ;;  %v555_v1 = vld [vmem:[#allocation8 + $0x48] sm:$0xff]  ;;  %v653_v32 = vld [vmem:[#allocation8 + $0x358] sm:$0xff] }
  0x88   : > { %754 = vmatpush.msrb.mxu1 %v631_v54  ;;  %v618_v60 = vld [vmem:[#allocation8 + $0x240] sm:$0xff]  ;;  %696 = vmatpush.msra.mxu2 %v558_v55  ;;  %v619_v2 = vld [vmem:[#allocation8 + $0x248] sm:$0xff]  ;;  %v584_v33 = vld [vmem:[#allocation8 + $0x130] sm:$0xff] }
  0x89   : > { %716 = vmatpush.msra.mxu3 %v622_v56  ;;  %735 = vmatpush.msrb.mxu0 %v563_v57  ;;  %v550_v63 = vld [vmem:[#allocation8 + $0x20] sm:$0xff]  ;;  %v551_v5 = vld [vmem:[#allocation8 + $0x28] sm:$0xff]  ;;  %v648_v34 = vld [vmem:[#allocation8 + $0x330] sm:$0xff] }
  0x8a   : > { %755 = vmatpush.msrb.mxu1 %v627_v58  ;;  %v614_v0 = vld [vmem:[#allocation8 + $0x220] sm:$0xff]  ;;  %697 = vmatpush.msra.mxu2 %v554_v59  ;;  %v615_v6 = vld [vmem:[#allocation8 + $0x228] sm:$0xff]  ;;  %v585_v35 = vld [vmem:[#allocation8 + $0x138] sm:$0xff] }
  0x8b   : > { %717 = vmatpush.msra.mxu3 %v618_v60  ;;  %736 = vmatpush.msrb.mxu0 %v559_v61  ;;  %v546_v3 = vld [vmem:[#allocation8] sm:$0xff]  ;;  %v547_v9 = vld [vmem:[#allocation8 + $0x8] sm:$0xff]  ;;  %v649_v36 = vld [vmem:[#allocation8 + $0x338] sm:$0xff] }
  0x8c   : > { %756 = vmatpush.msrb.mxu1 %v623_v62  ;;  %v610_v4 = vld [vmem:[#allocation8 + $0x200] sm:$0xff]  ;;  %698 = vmatpush.msra.mxu2 %v550_v63  ;;  %v611_v10 = vld [vmem:[#allocation8 + $0x208] sm:$0xff]  ;;  %v580_v37 = vld [vmem:[#allocation8 + $0x110] sm:$0xff] }
  0x8d   : > { %718 = vmatpush.msra.mxu3 %v614_v0  ;;  %737 = vmatpush.msrb.mxu0 %v555_v1  ;;  %v644_v38 = vld [vmem:[#allocation8 + $0x310] sm:$0xff]  ;;  %v581_v39 = vld [vmem:[#allocation8 + $0x118] sm:$0xff] }
  0x8e   : > { %757 = vmatpush.msrb.mxu1 %v619_v2  ;;  %699 = vmatpush.msra.mxu2 %v546_v3  ;;  %v645_v40 = vld [vmem:[#allocation8 + $0x318] sm:$0xff]  ;;  %v576_v41 = vld [vmem:[#allocation8 + $0xf0] sm:$0xff] }
  0x8f   : > { %719 = vmatpush.msra.mxu3 %v610_v4  ;;  %738 = vmatpush.msrb.mxu0 %v551_v5  ;;  %v640_v42 = vld [vmem:[#allocation8 + $0x2f0] sm:$0xff]  ;;  %v577_v43 = vld [vmem:[#allocation8 + $0xf8] sm:$0xff] }
  0x90   : > { %758 = vmatpush.msrb.mxu1 %v615_v6  ;;  %764 = vmatpush.msrb.mxu2 %v608_v7  ;;  %v641_v44 = vld [vmem:[#allocation8 + $0x2f8] sm:$0xff]  ;;  %v572_v45 = vld [vmem:[#allocation8 + $0xd0] sm:$0xff] }
  0x91   : > { %784 = vmatpush.msrb.mxu3 %v672_v8  ;;  %739 = vmatpush.msrb.mxu0 %v547_v9  ;;  %v636_v46 = vld [vmem:[#allocation8 + $0x2d0] sm:$0xff]  ;;  %v573_v47 = vld [vmem:[#allocation8 + $0xd8] sm:$0xff] }
  0x92   : > { %759 = vmatpush.msrb.mxu1 %v611_v10  ;;  %765 = vmatpush.msrb.mxu2 %v604_v13  ;;  %v637_v48 = vld [vmem:[#allocation8 + $0x2d8] sm:$0xff]  ;;  %v568_v49 = vld [vmem:[#allocation8 + $0xb0] sm:$0xff] }
  0x93   : > { %804 = vmatpush.msra.mxu0 %v609_v11  ;;  %785 = vmatpush.msrb.mxu3 %v668_v14  ;;  %v632_v50 = vld [vmem:[#allocation8 + $0x2b0] sm:$0xff]  ;;  %v569_v51 = vld [vmem:[#allocation8 + $0xb8] sm:$0xff] }
  0x94   : > { %824 = vmatpush.msra.mxu1 %v673_v12  ;;  %766 = vmatpush.msrb.mxu2 %v600_v17  ;;  %v633_v52 = vld [vmem:[#allocation8 + $0x2b8] sm:$0xff]  ;;  %v564_v53 = vld [vmem:[#allocation8 + $0x90] sm:$0xff] }
  0x95   : > { %805 = vmatpush.msra.mxu0 %v605_v15  ;;  %786 = vmatpush.msrb.mxu3 %v664_v18  ;;  %v628_v54 = vld [vmem:[#allocation8 + $0x290] sm:$0xff]  ;;  %v565_v55 = vld [vmem:[#allocation8 + $0x98] sm:$0xff] }
  0x96   : > { %825 = vmatpush.msra.mxu1 %v669_v16  ;;  %767 = vmatpush.msrb.mxu2 %v596_v21  ;;  %v629_v56 = vld [vmem:[#allocation8 + $0x298] sm:$0xff]  ;;  %v560_v57 = vld [vmem:[#allocation8 + $0x70] sm:$0xff] }
  0x97   : > { %806 = vmatpush.msra.mxu0 %v601_v19  ;;  %787 = vmatpush.msrb.mxu3 %v660_v22  ;;  %v624_v58 = vld [vmem:[#allocation8 + $0x270] sm:$0xff]  ;;  %v561_v59 = vld [vmem:[#allocation8 + $0x78] sm:$0xff] }
  0x98   : > { %826 = vmatpush.msra.mxu1 %v665_v20  ;;  %768 = vmatpush.msrb.mxu2 %v592_v25  ;;  %v625_v60 = vld [vmem:[#allocation8 + $0x278] sm:$0xff]  ;;  %v556_v61 = vld [vmem:[#allocation8 + $0x50] sm:$0xff] }
  0x99   : > { %807 = vmatpush.msra.mxu0 %v597_v23  ;;  %788 = vmatpush.msrb.mxu3 %v656_v26  ;;  %v620_v62 = vld [vmem:[#allocation8 + $0x250] sm:$0xff]  ;;  %v557_v63 = vld [vmem:[#allocation8 + $0x58] sm:$0xff] }
  0x9a   : > { %827 = vmatpush.msra.mxu1 %v661_v24  ;;  %769 = vmatpush.msrb.mxu2 %v588_v29  ;;  %v621_v0 = vld [vmem:[#allocation8 + $0x258] sm:$0xff]  ;;  %v552_v1 = vld [vmem:[#allocation8 + $0x30] sm:$0xff]  ;;  %v869_v29 = vld [vmem:[%s22387_s5 + $0x68] sm:$0xff] }
  0x9b   : > { %808 = vmatpush.msra.mxu0 %v593_v27  ;;  %789 = vmatpush.msrb.mxu3 %v652_v30  ;;  %v616_v2 = vld [vmem:[#allocation8 + $0x230] sm:$0xff]  ;;  %v553_v3 = vld [vmem:[#allocation8 + $0x38] sm:$0xff]  ;;  %v917_v30 = vld [vmem:[%s22387_s5 + $0x1e8] sm:$0xff] }
  0x9c   : > { %828 = vmatpush.msra.mxu1 %v657_v28  ;;  %770 = vmatpush.msrb.mxu2 %v584_v33  ;;  %v617_v4 = vld [vmem:[#allocation8 + $0x238] sm:$0xff]  ;;  %v548_v5 = vld [vmem:[#allocation8 + $0x10] sm:$0xff]  ;;  %v885_v28 = vld [vmem:[%s22387_s5 + $0xe8] sm:$0xff] }
  0x9d   : > { %809 = vmatpush.msra.mxu0 %v589_v31  ;;  %790 = vmatpush.msrb.mxu3 %v648_v34  ;;  %v612_v6 = vld [vmem:[#allocation8 + $0x210] sm:$0xff]  ;;  %v549_v7 = vld [vmem:[#allocation8 + $0x18] sm:$0xff]  ;;  %v901_v31 = vld [vmem:[%s22387_s5 + $0x168] sm:$0xff] }
  0x9e   : > { %829 = vmatpush.msra.mxu1 %v653_v32  ;;  %771 = vmatpush.msrb.mxu2 %v580_v37  ;;  %v613_v8 = vld [vmem:[#allocation8 + $0x218] sm:$0xff]  ;;  %v886_v24 = vld [vmem:[%s22387_s5 + $0xf0] sm:$0xff] }
  0x9f   : > { %810 = vmatpush.msra.mxu0 %v585_v35  ;;  %791 = vmatpush.msrb.mxu3 %v644_v38  ;;  %v490_v9 = vld [vmem:[#allocation7] sm:$0x3]  ;;  %v887_v20 = vld [vmem:[%s22387_s5 + $0xf8] sm:$0xff]  ;;  %v870_v25 = vld [vmem:[%s22387_s5 + $0x70] sm:$0xff] }
  0xa0   : > { %830 = vmatpush.msra.mxu1 %v649_v36  ;;  %772 = vmatpush.msrb.mxu2 %v576_v41  ;;  %v492_v10 = vperm.slane %v490_v9, 0  ;;  %v493_v11 = vperm.slane %v490_v9, 1  ;;  %v871_v21 = vld [vmem:[%s22387_s5 + $0x78] sm:$0xff]  ;;  %v918_v26 = vld [vmem:[%s22387_s5 + $0x1f0] sm:$0xff]  ;;  %v884_v32 = vld [vmem:[%s22387_s5 + $0xe0] sm:$0xff] }
  0xa1   : > { %811 = vmatpush.msra.mxu0 %v581_v39  ;;  %792 = vmatpush.msrb.mxu3 %v640_v42  ;;  %v919_v22 = vld [vmem:[%s22387_s5 + $0x1f8] sm:$0xff]  ;;  %v902_v27 = vld [vmem:[%s22387_s5 + $0x170] sm:$0xff]  ;;  %v868_v33 = vld [vmem:[%s22387_s5 + $0x60] sm:$0xff] }
  0xa2   : > { %831 = vmatpush.msra.mxu1 %v645_v40  ;;  %773 = vmatpush.msrb.mxu2 %v572_v45  ;;  %v903_v23 = vld [vmem:[%s22387_s5 + $0x178] sm:$0xff]  ;;  %v916_v34 = vld [vmem:[%s22387_s5 + $0x1e0] sm:$0xff]  ;;  %v882_v40 = vld [vmem:[%s22387_s5 + $0xd0] sm:$0xff] }
  0xa3   : > { %812 = vmatpush.msra.mxu0 %v577_v43  ;;  %793 = vmatpush.msrb.mxu3 %v636_v46  ;;  %v900_v35 = vld [vmem:[%s22387_s5 + $0x160] sm:$0xff]  ;;  %v883_v36 = vld [vmem:[%s22387_s5 + $0xd8] sm:$0xff]  ;;  %v866_v41 = vld [vmem:[%s22387_s5 + $0x50] sm:$0xff] }
  0xa4   : > { %832 = vmatpush.msra.mxu1 %v641_v44  ;;  %774 = vmatpush.msrb.mxu2 %v568_v49  ;;  %v867_v37 = vld [vmem:[%s22387_s5 + $0x58] sm:$0xff]  ;;  %v914_v42 = vld [vmem:[%s22387_s5 + $0x1d0] sm:$0xff]  ;;  %v881_v43 = vld [vmem:[%s22387_s5 + $0xc8] sm:$0xff] }
  0xa5   : > { %813 = vmatpush.msra.mxu0 %v573_v47  ;;  %794 = vmatpush.msrb.mxu3 %v632_v50  ;;  %v915_v38 = vld [vmem:[%s22387_s5 + $0x1d8] sm:$0xff]  ;;  %v865_v44 = vld [vmem:[%s22387_s5 + $0x48] sm:$0xff]  ;;  %v880_v46 = vld [vmem:[%s22387_s5 + $0xc0] sm:$0xff] }
  0xa6   : > { %833 = vmatpush.msra.mxu1 %v637_v48  ;;  %775 = vmatpush.msrb.mxu2 %v564_v53  ;;  %v899_v39 = vld [vmem:[%s22387_s5 + $0x158] sm:$0xff]  ;;  %v913_v45 = vld [vmem:[%s22387_s5 + $0x1c8] sm:$0xff]  ;;  %v864_v47 = vld [vmem:[%s22387_s5 + $0x40] sm:$0xff] }
  0xa7   : > { %814 = vmatpush.msra.mxu0 %v569_v51  ;;  %795 = vmatpush.msrb.mxu3 %v628_v54  ;;  %v912_v48 = vld [vmem:[%s22387_s5 + $0x1c0] sm:$0xff]  ;;  %v879_v49 = vld [vmem:[%s22387_s5 + $0xb8] sm:$0xff]  ;;  %v878_v51 = vld [vmem:[%s22387_s5 + $0xb0] sm:$0xff] }
  0xa8   : > { %834 = vmatpush.msra.mxu1 %v633_v52  ;;  %776 = vmatpush.msrb.mxu2 %v560_v57  ;;  %v863_v50 = vld [vmem:[%s22387_s5 + $0x38] sm:$0xff]  ;;  %v877_v52 = vld [vmem:[%s22387_s5 + $0xa8] sm:$0xff]  ;;  %v876_v53 = vld [vmem:[%s22387_s5 + $0xa0] sm:$0xff] }
  0xa9   : > { %815 = vmatpush.msra.mxu0 %v565_v55  ;;  %796 = vmatpush.msrb.mxu3 %v624_v58  ;;  %v862_v54 = vld [vmem:[%s22387_s5 + $0x30] sm:$0xff]  ;;  %v875_v55 = vld [vmem:[%s22387_s5 + $0x98] sm:$0xff]  ;;  %v861_v58 = vld [vmem:[%s22387_s5 + $0x28] sm:$0xff] }
  0xaa   : > { %835 = vmatpush.msra.mxu1 %v629_v56  ;;  %777 = vmatpush.msrb.mxu2 %v556_v61  ;;  %v898_v56 = vld [vmem:[%s22387_s5 + $0x150] sm:$0xff]  ;;  %v911_v57 = vld [vmem:[%s22387_s5 + $0x1b8] sm:$0xff]  ;;  %v857_v9 = vld [vmem:[%s22387_s5 + $0x8] sm:$0xff] }
  0xab   : > { %816 = vmatpush.msra.mxu0 %v561_v59  ;;  %797 = vmatpush.msrb.mxu3 %v620_v62  ;;  %v874_v59 = vld [vmem:[%s22387_s5 + $0x90] sm:$0xff]  ;;  %v860_v62 = vld [vmem:[%s22387_s5 + $0x20] sm:$0xff] }
  0xac   : > { %836 = vmatpush.msra.mxu1 %v625_v60  ;;  %778 = vmatpush.msrb.mxu2 %v552_v1  ;;  %v897_v60 = vld [vmem:[%s22387_s5 + $0x148] sm:$0xff]  ;;  %v910_v61 = vld [vmem:[%s22387_s5 + $0x1b0] sm:$0xff] }
  0xad   : > { %817 = vmatpush.msra.mxu0 %v557_v63  ;;  %798 = vmatpush.msrb.mxu3 %v616_v2  ;;  %v873_v63 = vld [vmem:[%s22387_s5 + $0x88] sm:$0xff]  ;;  %v859_v2 = vld [vmem:[%s22387_s5 + $0x18] sm:$0xff] }
  0xae   : > { %837 = vmatpush.msra.mxu1 %v621_v0  ;;  %779 = vmatpush.msrb.mxu2 %v548_v5  ;;  %v896_v0 = vld [vmem:[%s22387_s5 + $0x140] sm:$0xff]  ;;  %v909_v1 = vld [vmem:[%s22387_s5 + $0x1a8] sm:$0xff] }
  0xaf   : > { %818 = vmatpush.msra.mxu0 %v553_v3  ;;  %799 = vmatpush.msrb.mxu3 %v612_v6  ;;  %v872_v3 = vld [vmem:[%s22387_s5 + $0x80] sm:$0xff]  ;;  %v858_v6 = vld [vmem:[%s22387_s5 + $0x10] sm:$0xff] }
  0xb0   : > { %838 = vmatpush.msra.mxu1 %v617_v4  ;;  %v895_v4 = vld [vmem:[%s22387_s5 + $0x138] sm:$0xff]  ;;  %v908_v5 = vld [vmem:[%s22387_s5 + $0x1a0] sm:$0xff] }
  0xb1   : > { %819 = vmatpush.msra.mxu0 %v549_v7  ;;  %v894_v7 = vld [vmem:[%s22387_s5 + $0x130] sm:$0xff] }
  0xb2   : > { %839 = vmatpush.msra.mxu1 %v613_v8  ;;  %v907_v8 = vld [vmem:[%s22387_s5 + $0x198] sm:$0xff] }
  0xef   : > { %v517_v12 = vpop.f32.mrf.mxu0 }
  0xf0   : > { %v537_v13 = vpop.f32.mrf.mxu1  ;;  %v518_v14 = vadd.f32 %v517_v12, %v492_v10  ;;  %v893_v10 = vld [vmem:[%s22387_s5 + $0x128] sm:$0xff]  ;;  %v856_v12 = vld [vmem:[%s22387_s5] sm:$0xff] }
  0xf1   : > { %v538_v15 = vadd.f32 %v537_v13, %v493_v11  ;;  %v906_v11 = vld [vmem:[%s22387_s5 + $0x190] sm:$0xff]  ;;  %v892_v13 = vld [vmem:[%s22387_s5 + $0x120] sm:$0xff] }
  0xf2   : > { %vm540_vm1 = vcmp.gt.f32.partialorder %v518_v14, 0.0  ;;  %v542_v16 = vmul.f32 0.01, %v518_v14 }
  0xf3   : > { %vm541_vm2 = vcmp.gt.f32.partialorder %v538_v15, 0.0  ;;  %v543_v17 = vmul.f32 0.01, %v538_v15 }
  0xf4   : > { %v544_v18 = vsel %vm540_vm1, %v518_v14, %v542_v16  ;;  %v905_v14 = vld [vmem:[%s22387_s5 + $0x188] sm:$0xff]  ;;  %v904_v16 = vld [vmem:[%s22387_s5 + $0x180] sm:$0xff] }
  0xf5   : > { %v545_v19 = vsel %vm541_vm2, %v538_v15, %v543_v17  ;;  %700 = vmatmul.f32.vlgmr.msra.gmra.mxu2 %v544_v18  ;;  %740 = vmatmul.f32.vlgmr.msrb.gmra.mxu0 %v544_v18  ;;  %v891_v15 = vld [vmem:[%s22387_s5 + $0x118] sm:$0xff]  ;;  %v890_v17 = vld [vmem:[%s22387_s5 + $0x110] sm:$0xff] }
  0xf6   : > { %720 = vmatmul.f32.vlgmr.msra.gmra.mxu3 %v545_v19  ;;  %760 = vmatmul.f32.vlgmr.msrb.gmra.mxu1 %v545_v19 }
  0xf7   : > { %944 = vmatpush.msra.mxu3 %v887_v20  ;;  %924 = vmatpush.msra.mxu2 %v871_v21  ;;  %v2142_v20 = vld [vmem:[%s18935_s22 + $0x2370] sm:$0xff]  ;;  %v2143_v21 = vld [vmem:[%s18935_s22 + $0x2378] sm:$0xff] }
  0xf8   : > { %984 = vmatpush.msrb.mxu1 %v919_v22  ;;  %964 = vmatpush.msrb.mxu0 %v903_v23  ;;  %v19135_v22 = vld [vmem:[#allocation10] sm:$0xf]  ;;  %v6072_v23 = vunpack.c.l.b16 %v2142_v20 }
  0xf9   : > { %945 = vmatpush.msra.mxu3 %v886_v24  ;;  %925 = vmatpush.msra.mxu2 %v870_v25  ;;  %v6073_v24 = vunpack.c.h.b16 %v2142_v20  ;;  %v6074_v25 = vunpack.c.l.b16 %v2143_v21  ;;  %v679_v20 = vperm.slane %v19135_v22, 3 }
  0xfa   : > { %985 = vmatpush.msrb.mxu1 %v918_v26  ;;  %965 = vmatpush.msrb.mxu0 %v902_v27  ;;  %v6075_v26 = vunpack.c.h.b16 %v2143_v21  ;;  %v15984_v27 = vld [vmem:[%s18935_s22 + $0x1e60] sm:$0xf] }
  0xfb   : > { %946 = vmatpush.msra.mxu3 %v885_v28  ;;  %926 = vmatpush.msra.mxu2 %v869_v29  ;;  %v17849_v28 = vld [vmem:[%s18935_s22 + $0x20e4] sm:$0xf0]  ;;  %v7368_v29 = vpack.c.b16 %v6072_v23, %v6072_v23  ;;  %v17364_v23 = vld [vmem:[%s18935_s22 + $0x11bc] sm:$0xf0] }
  0xfc   : > { %986 = vmatpush.msrb.mxu1 %v917_v30  ;;  %966 = vmatpush.msrb.mxu0 %v901_v31  ;;  %v7369_v30 = vpack.c.b16 %v6073_v24, %v6073_v24  ;;  %v7370_v31 = vpack.c.b16 %v6074_v25, %v6074_v25  ;;  %v17283_v25 = vld [vmem:[%s18935_s22 + $0xf3c] sm:$0xf] }
  0xfd   : > { %780 = vmatmul.f32.vlgmr.msrb.gmra.mxu2 %v544_v18  ;;  %820 = vmatmul.f32.vlgmr.msra.gmra.mxu0 %v544_v18  ;;  %v889_v18 = vld [vmem:[%s22387_s5 + $0x108] sm:$0xff] }
  0xfe   : > { %800 = vmatmul.f32.vlgmr.msrb.gmra.mxu3 %v545_v19  ;;  %840 = vmatmul.f32.vlgmr.msra.gmra.mxu1 %v545_v19  ;;  %v888_v19 = vld [vmem:[%s22387_s5 + $0x100] sm:$0xff] }
  0xff   : > { %947 = vmatpush.msra.mxu3 %v884_v32  ;;  %927 = vmatpush.msra.mxu2 %v868_v33  ;;  %v7371_v32 = vpack.c.b16 %v6075_v26, %v6075_v26  ;;  %v17768_v33 = vld [vmem:[%s18935_s22 + $0x1e64] sm:$0xf] }
 0x100   : > { %987 = vmatpush.msrb.mxu1 %v916_v34  ;;  %967 = vmatpush.msrb.mxu0 %v900_v35  ;;  %v15986_v34 = vld [vmem:[%s18935_s22 + $0x20e8] sm:$0xf0]  ;;  %v15992_v35 = vld [vmem:[%s18935_s22 + $0x1e68] sm:$0xf]  ;;  %v14050_v26 = vld [vmem:[%s18935_s22 + $0x11c0] sm:$0xf0] }
 0x101   : > { %948 = vmatpush.msra.mxu3 %v883_v36  ;;  %928 = vmatpush.msra.mxu2 %v867_v37  ;;  %v17850_v36 = vld [vmem:[%s18935_s22 + $0x20ec] sm:$0xf0]  ;;  %v17769_v37 = vld [vmem:[%s18935_s22 + $0x1e6c] sm:$0xf] }
 0x102   : > { %988 = vmatpush.msrb.mxu1 %v915_v38  ;;  %968 = vmatpush.msrb.mxu0 %v899_v39  ;;  %v15994_v38 = vld [vmem:[%s18935_s22 + $0x20f0] sm:$0xf0]  ;;  %v8670_v39 = vsel %vm8668_vm3, %v7368_v29, 0 }
 0x103   : > { %949 = vmatpush.msra.mxu3 %v882_v40  ;;  %929 = vmatpush.msra.mxu2 %v866_v41  ;;  %v8673_v40 = vsel %vm8668_vm3, %v7369_v30, 0  ;;  %v8676_v41 = vsel %vm8668_vm3, %v7370_v31, 0  ;;  %v13392_v30 = vld [vmem:[%s18935_s22 + $0xa20] sm:$0xf]  ;;  %v17201_v31 = vld [vmem:[%s18935_s22 + $0xca4] sm:$0xf0] }
 0x104   : > { %989 = vmatpush.msrb.mxu1 %v914_v42  ;;  %969 = vmatpush.msrb.mxu0 %v898_v56  ;;  %v8679_v42 = vsel %vm8668_vm3, %v7371_v32, 0 }
 0x105   : > { %950 = vmatpush.msra.mxu3 %v881_v43  ;;  %930 = vmatpush.msra.mxu2 %v865_v44  ;;  %v677_v43 = vperm.slane %v19135_v22, 1  ;;  %v15985_v44 = vor.u32 %v17849_v28, %v15984_v27 }
 0x106   : > { %990 = vmatpush.msrb.mxu1 %v913_v45  ;;  %970 = vmatpush.msrb.mxu0 %v897_v60  ;;  %v15989_v45 = vor.u32 %v17768_v33, %v15986_v34 }
 0x107   : > { %951 = vmatpush.msra.mxu3 %v880_v46  ;;  %931 = vmatpush.msra.mxu2 %v864_v47  ;;  %v15336_v46 = vld [vmem:[%s18935_s22 + $0x1950] sm:$0xf]  ;;  %v17687_v47 = vld [vmem:[%s18935_s22 + $0x1bd4] sm:$0xf0] }
 0x108   : > { %991 = vmatpush.msrb.mxu1 %v912_v48  ;;  %971 = vmatpush.msrb.mxu0 %v896_v0  ;;  %v15993_v48 = vor.u32 %v17850_v36, %v15992_v35  ;;  %v15337_v56 = vor.u32 %v17687_v47, %v15336_v46  ;;  %v17444_v0 = vld [vmem:[%s18935_s22 + $0x1444] sm:$0xf]  ;;  %v13394_v36 = vld [vmem:[%s18935_s22 + $0xca8] sm:$0xf0] }
 0x109   : > { %952 = vmatpush.msra.mxu3 %v879_v49  ;;  %932 = vmatpush.msra.mxu2 %v863_v50  ;;  %v15997_v49 = vor.u32 %v17769_v37, %v15994_v38  ;;  %v17606_v50 = vld [vmem:[%s18935_s22 + $0x1954] sm:$0xf]  ;;  %v17120_v35 = vld [vmem:[%s18935_s22 + $0xa24] sm:$0xf]  ;;  %v13400_v37 = vld [vmem:[%s18935_s22 + $0xa28] sm:$0xf] }
 0x10a   : > { %992 = vmatpush.msrb.mxu1 %v911_v57  ;;  %972 = vmatpush.msrb.mxu0 %v895_v4  ;;  %v17526_v4 = vld [vmem:[%s18935_s22 + $0x16cc] sm:$0xf0]  ;;  %v2144_v46 = vld [vmem:[%s18935_s22 + $0x2380] sm:$0xff] }
 0x10b   : > { %953 = vmatpush.msra.mxu3 %v878_v51  ;;  %933 = vmatpush.msra.mxu2 %v862_v54  ;;  %v15338_v51 = vld [vmem:[%s18935_s22 + $0x1bd8] sm:$0xf0] }
 0x10c   : > { %993 = vmatpush.msrb.mxu1 %v910_v61  ;;  %973 = vmatpush.msrb.mxu0 %v894_v7  ;;  %v17607_v54 = vld [vmem:[%s18935_s22 + $0x195c] sm:$0xf]  ;;  %v15341_v57 = vor.u32 %v17606_v50, %v15338_v51  ;;  %v14698_v7 = vld [vmem:[%s18935_s22 + $0x16d0] sm:$0xf0]  ;;  %v12744_v50 = vld [vmem:[%s18935_s22 + $0x510] sm:$0xf] }
 0x10d   : > { %954 = vmatpush.msra.mxu3 %v877_v52  ;;  %934 = vmatpush.msra.mxu2 %v861_v58  ;;  %v15344_v52 = vld [vmem:[%s18935_s22 + $0x1958] sm:$0xf]  ;;  %v14688_v58 = vld [vmem:[%s18935_s22 + $0x1440] sm:$0xf] }
 0x10e   : > { %994 = vmatpush.msrb.mxu1 %v909_v1  ;;  %974 = vmatpush.msrb.mxu0 %v893_v10  ;;  %v14690_v1 = vld [vmem:[%s18935_s22 + $0x16c8] sm:$0xf0]  ;;  %v17039_v51 = vld [vmem:[%s18935_s22 + $0x794] sm:$0xf0] }
 0x10f   : > { %955 = vmatpush.msra.mxu3 %v876_v53  ;;  %935 = vmatpush.msra.mxu2 %v860_v62  ;;  %v17688_v53 = vld [vmem:[%s18935_s22 + $0x1bdc] sm:$0xf0]  ;;  %v14693_v10 = vor.u32 %v17444_v0, %v14690_v1  ;;  %v12745_v0 = vor.u32 %v17039_v51, %v12744_v50  ;;  %v16959_v1 = vld [vmem:[%s18935_s22 + $0x51c] sm:$0xf]  ;;  %v15360_v50 = vld [vmem:[%s18935_s22 + $0x1968] sm:$0xf] }
 0x110   : > { %995 = vmatpush.msrb.mxu1 %v908_v5  ;;  %975 = vmatpush.msrb.mxu0 %v892_v13  ;;  %v15345_v61 = vor.u32 %v17688_v53, %v15344_v52  ;;  %v676_v5 = vperm.slane %v19135_v22, 0  ;;  %v16958_v52 = vld [vmem:[%s18935_s22 + $0x514] sm:$0xf]  ;;  %v17690_v51 = vld [vmem:[%s18935_s22 + $0x1bec] sm:$0xf0] }
 0x111   : > { %956 = vmatpush.msra.mxu3 %v875_v55  ;;  %936 = vmatpush.msra.mxu2 %v859_v2  ;;  %v15346_v55 = vld [vmem:[%s18935_s22 + $0x1be0] sm:$0xf0] }
 0x112   : > { %996 = vmatpush.msrb.mxu1 %v907_v8  ;;  %976 = vmatpush.msrb.mxu0 %v891_v15  ;;  %v15349_v62 = vor.u32 %v17607_v54, %v15346_v55  ;;  %v14042_v15 = vld [vmem:[%s18935_s22 + $0x11b8] sm:$0xf0] }
 0x113   : > { %957 = vmatpush.msra.mxu3 %v874_v59  ;;  %937 = vmatpush.msra.mxu2 %v858_v6  ;;  %v17445_v6 = vld [vmem:[%s18935_s22 + $0x144c] sm:$0xf] }
 0x114   : > { %997 = vmatpush.msrb.mxu1 %v906_v11  ;;  %977 = vmatpush.msrb.mxu0 %v890_v17  ;;  %v14040_v11 = vld [vmem:[%s18935_s22 + $0xf30] sm:$0xf]  ;;  %v14701_v21 = vor.u32 %v17445_v6, %v14698_v7  ;;  %v12096_v6 = vld [vmem:[%s18935_s22] sm:$0xf]  ;;  %v16877_v7 = vld [vmem:[%s18935_s22 + $0x284] sm:$0xf0] }
 0x115   : > { %958 = vmatpush.msra.mxu3 %v873_v63  ;;  %938 = vmatpush.msra.mxu2 %v857_v9  ;;  %v17525_v63 = vld [vmem:[%s18935_s22 + $0x16c4] sm:$0xf0] }
 0x116   : > { %998 = vmatpush.msrb.mxu1 %v905_v14  ;;  %978 = vmatpush.msrb.mxu0 %v889_v18  ;;  %v14689_v9 = vor.u32 %v17525_v63, %v14688_v58  ;;  %v17282_v14 = vld [vmem:[%s18935_s22 + $0xf34] sm:$0xf] }
 0x117   : > { %959 = vmatpush.msra.mxu3 %v872_v3  ;;  %939 = vmatpush.msra.mxu2 %v856_v12  ;;  %v14696_v3 = vld [vmem:[%s18935_s22 + $0x1448] sm:$0xf]  ;;  %v17363_v12 = vld [vmem:[%s18935_s22 + $0x11b4] sm:$0xf0]  ;;  %v14045_v29 = vor.u32 %v17282_v14, %v14042_v15 }
 0x118   : > { %999 = vmatpush.msrb.mxu1 %v904_v16  ;;  %979 = vmatpush.msrb.mxu0 %v888_v19  ;;  %v14697_v13 = vor.u32 %v17526_v4, %v14696_v3  ;;  %v14048_v16 = vld [vmem:[%s18935_s22 + $0xf38] sm:$0xf]  ;;  %v14041_v28 = vor.u32 %v17363_v12, %v14040_v11  ;;  %v16796_v12 = vld [vmem:[%s18935_s22 + $0x4] sm:$0xf]  ;;  %v12104_v15 = vld [vmem:[%s18935_s22 + $0x8] sm:$0xf] }
 0x119   : > { %9155 = vmatpush.bf16.msrb.mxu2 %v8670_v39  ;;  %9168 = vmatpush.bf16.msrb.mxu3 %v8673_v40  ;;  %v14049_v34 = vor.u32 %v17364_v23, %v14048_v16  ;;  %v14053_v39 = vor.u32 %v17283_v25, %v14050_v26  ;;  %v17202_v40 = vld [vmem:[%s18935_s22 + $0xcac] sm:$0xf0]  ;;  %v12106_v23 = vld [vmem:[%s18935_s22 + $0x290] sm:$0xf0] }
 0x11a   : > { %9181 = vmatpush.bf16.msra.mxu0 %v8676_v41  ;;  %9194 = vmatpush.bf16.msra.mxu1 %v8679_v42  ;;  %v17121_v41 = vld [vmem:[%s18935_s22 + $0xa2c] sm:$0xf]  ;;  %v13402_v42 = vld [vmem:[%s18935_s22 + $0xcb0] sm:$0xf0]  ;;  %v13401_v54 = vor.u32 %v17202_v40, %v13400_v37  ;;  %v16878_v16 = vld [vmem:[%s18935_s22 + $0x28c] sm:$0xf0] }
 0x11b   : > { %v13405_v55 = vor.u32 %v17121_v41, %v13402_v42  ;;  %v17852_v37 = vld [vmem:[%s18935_s22 + $0x20fc] sm:$0xf0]  ;;  %v17771_v40 = vld [vmem:[%s18935_s22 + $0x1e7c] sm:$0xf]  ;;  %v16010_v41 = vld [vmem:[%s18935_s22 + $0x2100] sm:$0xf0] }
 0x11d   : > { %9156 = vmatpush.bf16.msrb.mxu2 %v15985_v44  ;;  %9169 = vmatpush.bf16.msrb.mxu3 %v15989_v45  ;;  %v678_v45 = vperm.slane %v19135_v22, 2  ;;  %v12746_v22 = vld [vmem:[%s18935_s22 + $0x798] sm:$0xf0] }
 0x11e   : > { %9182 = vmatpush.bf16.msra.mxu0 %v15993_v48  ;;  %9195 = vmatpush.bf16.msra.mxu1 %v15997_v49  ;;  %v13393_v48 = vor.u32 %v17201_v31, %v13392_v30  ;;  %v13397_v49 = vor.u32 %v17120_v35, %v13394_v36  ;;  %v16002_v35 = vld [vmem:[%s18935_s22 + $0x20f8] sm:$0xf0]  ;;  %v16008_v36 = vld [vmem:[%s18935_s22 + $0x1e78] sm:$0xf] }
 0x121   : > { %9157 = vmatpush.bf16.msrb.mxu2 %v15337_v56  ;;  %9170 = vmatpush.bf16.msrb.mxu3 %v15341_v57  ;;  %v12752_v56 = vld [vmem:[%s18935_s22 + $0x518] sm:$0xf]  ;;  %v2145_v57 = vld [vmem:[%s18935_s22 + $0x2388] sm:$0xff] }
 0x122   : > { %9183 = vmatpush.bf16.msra.mxu0 %v15345_v61  ;;  %9196 = vmatpush.bf16.msra.mxu1 %v15349_v62  ;;  %v6076_v61 = vunpack.c.l.b16 %v2144_v46  ;;  %v6077_v62 = vunpack.c.h.b16 %v2144_v46  ;;  %v16009_v46 = vor.u32 %v17852_v37, %v16008_v36  ;;  %v17042_v36 = vld [vmem:[%s18935_s22 + $0x7ac] sm:$0xf0] }
 0x125   : > { %9158 = vmatpush.bf16.msrb.mxu2 %v14689_v9  ;;  %9171 = vmatpush.bf16.msrb.mxu3 %v14693_v10  ;;  %v6079_v9 = vunpack.c.h.b16 %v2145_v57 }
 0x126   : > { %9184 = vmatpush.bf16.msra.mxu0 %v14697_v13  ;;  %9197 = vmatpush.bf16.msra.mxu1 %v14701_v21  ;;  %v12098_v13 = vld [vmem:[%s18935_s22 + $0x288] sm:$0xf0]  ;;  %v12097_v21 = vor.u32 %v16877_v7, %v12096_v6  ;;  %v17365_v6 = vld [vmem:[%s18935_s22 + $0x11c4] sm:$0xf0]  ;;  %v17284_v7 = vld [vmem:[%s18935_s22 + $0xf44] sm:$0xf] }
 0x127   : > { %v7375_v26 = vpack.c.b16 %v6079_v9, %v6079_v9  ;;  %v14058_v9 = vld [vmem:[%s18935_s22 + $0x11c8] sm:$0xf0] }
 0x129   : > { %9159 = vmatpush.bf16.msrb.mxu2 %v14041_v28  ;;  %9172 = vmatpush.bf16.msrb.mxu3 %v14045_v29  ;;  %v12105_v28 = vor.u32 %v16878_v16, %v12104_v15  ;;  %v16000_v29 = vld [vmem:[%s18935_s22 + $0x1e70] sm:$0xf]  ;;  %v14066_v15 = vld [vmem:[%s18935_s22 + $0x11d0] sm:$0xf0] }
 0x12a   : > { %9185 = vmatpush.bf16.msra.mxu0 %v14049_v34  ;;  %9198 = vmatpush.bf16.msra.mxu1 %v14053_v39  ;;  %v17770_v34 = vld [vmem:[%s18935_s22 + $0x1e74] sm:$0xf]  ;;  %v8691_v39 = vsel %vm8668_vm3, %v7375_v26, 0 }
 0x12d   : > { %9160 = vmatpush.bf16.msrb.mxu2 %v13393_v48  ;;  %9173 = vmatpush.bf16.msrb.mxu3 %v13397_v49  ;;  %v17608_v48 = vld [vmem:[%s18935_s22 + $0x1964] sm:$0xf]  ;;  %v15354_v49 = vld [vmem:[%s18935_s22 + $0x1be8] sm:$0xf0] }
 0x12e   : > { %9186 = vmatpush.bf16.msra.mxu0 %v13401_v54  ;;  %9199 = vmatpush.bf16.msra.mxu1 %v13405_v55  ;;  %v15357_v55 = vor.u32 %v17608_v48, %v15354_v49  ;;  %v16880_v48 = vld [vmem:[%s18935_s22 + $0x29c] sm:$0xf0] }
 0x131   : > { %9161 = vmatpush.bf16.msrb.mxu2 %v12745_v0 }
 0x135   : > { %9162 = vmatpush.bf16.msrb.mxu2 %v12097_v21  ;;  %v13410_v21 = vld [vmem:[%s18935_s22 + $0xcb8] sm:$0xf0] }
 0x172   : > { %v741_v59 = vpop.f32.mrf.mxu0 }
 0x173   : > { %v761_v60 = vpop.f32.mrf.mxu1  ;;  %v742_v2 = vadd.f32 %v741_v59, %v677_v43 }
 0x175   : > { %v762_v8 = vadd.f32 %v761_v60, %v742_v2  ;;  %v17040_v60 = vld [vmem:[%s18935_s22 + $0x79c] sm:$0xf0]  ;;  %v12754_v2 = vld [vmem:[%s18935_s22 + $0x7a0] sm:$0xf0] }
 0x176   : > { %v12753_v11 = vor.u32 %v17040_v60, %v12752_v56  ;;  %v12757_v14 = vor.u32 %v16959_v1, %v12754_v2  ;;  %v17447_v2 = vld [vmem:[%s18935_s22 + $0x145c] sm:$0xf] }
 0x177   : > { %v849_v17 = vmul.f32 0.01, %v762_v8  ;;  %vm845_vm4 = vcmp.gt.f32.partialorder %v762_v8, 0.0 }
 0x178   : > { %v701_v18 = vpop.f32.mrf.mxu2  ;;  %9187 = vmatpush.bf16.msra.mxu0 %v12753_v11  ;;  %9200 = vmatpush.bf16.msra.mxu1 %v12757_v14  ;;  %v17366_v11 = vld [vmem:[%s18935_s22 + $0x11cc] sm:$0xf0]  ;;  %v17285_v14 = vld [vmem:[%s18935_s22 + $0xf4c] sm:$0xf] }
 0x179   : > { %v721_v19 = vpop.f32.mrf.mxu3  ;;  %v702_v24 = vadd.f32 %v701_v18, %v676_v5  ;;  %v853_v27 = vsel %vm845_vm4, %v762_v8, %v849_v17  ;;  %v12749_v5 = vor.u32 %v16958_v52, %v12746_v22  ;;  %v6078_v8 = vunpack.c.l.b16 %v2145_v57  ;;  %v16797_v17 = vld [vmem:[%s18935_s22 + $0xc] sm:$0xf]  ;;  %v14704_v57 = vld [vmem:[%s18935_s22 + $0x1450] sm:$0xf] }
 0x17a   : > { %v821_v33 = vpop.f32.mrf.mxu0  ;;  %960 = vmatmul.f32.vlgmr.msra.gmra.mxu3 %v853_v27  ;;  %v7372_v18 = vpack.c.b16 %v6076_v61, %v6076_v61  ;;  %v12109_v30 = vor.u32 %v16797_v17, %v12106_v23  ;;  %v17609_v52 = vld [vmem:[%s18935_s22 + $0x196c] sm:$0xf]  ;;  %v15361_v22 = vor.u32 %v17690_v51, %v15360_v50  ;;  %v14706_v61 = vld [vmem:[%s18935_s22 + $0x16d8] sm:$0xf0]  ;;  %v14069_v16 = vor.u32 %v17285_v14, %v14066_v15  ;;  %v13408_v17 = vld [vmem:[%s18935_s22 + $0xa30] sm:$0xf] }
 0x17b   : > { %v722_v32 = vadd.f32 %v721_v19, %v702_v24  ;;  %v822_v38 = vadd.f32 %v821_v33, %v679_v20  ;;  %v841_v44 = vpop.f32.mrf.mxu1  ;;  %v7373_v19 = vpack.c.b16 %v6077_v62, %v6077_v62  ;;  %9174 = vmatpush.bf16.msrb.mxu3 %v12749_v5  ;;  %v12101_v24 = vor.u32 %v16796_v12, %v12098_v13  ;;  %v17851_v33 = vld [vmem:[%s18935_s22 + $0x20f4] sm:$0xf0]  ;;  %v14056_v5 = vld [vmem:[%s18935_s22 + $0xf40] sm:$0xf]  ;;  %v16799_v51 = vld [vmem:[%s18935_s22 + $0x1c] sm:$0xf] }
 0x17c   : > { %v7374_v25 = vpack.c.b16 %v6078_v8, %v6078_v8  ;;  %v8682_v31 = vsel %vm8668_vm3, %v7372_v18, 0  ;;  %9188 = vmatpush.bf16.msra.mxu0 %v12105_v28  ;;  %v16001_v42 = vor.u32 %v17851_v33, %v16000_v29  ;;  %9201 = vmatpush.bf16.msra.mxu1 %v12109_v30  ;;  %v14712_v62 = vld [vmem:[%s18935_s22 + $0x1458] sm:$0xf]  ;;  %v14057_v8 = vor.u32 %v17365_v6, %v14056_v5  ;;  %v13418_v28 = vld [vmem:[%s18935_s22 + $0xcc0] sm:$0xf0] }
 0x17d   : > { %v848_v43 = vmul.f32 0.01, %v722_v32  ;;  %vm844_vm5 = vcmp.gt.f32.partialorder %v722_v32, 0.0  ;;  %v842_v47 = vadd.f32 %v841_v44, %v822_v38  ;;  %v15352_v44 = vld [vmem:[%s18935_s22 + $0x1960] sm:$0xf]  ;;  %v14061_v12 = vor.u32 %v17284_v7, %v14058_v9 }
 0x17e   : > { %v8688_v38 = vsel %vm8668_vm3, %v7374_v25, 0  ;;  %v17203_v18 = vld [vmem:[%s18935_s22 + $0xcb4] sm:$0xf0]  ;;  %v12760_v30 = vld [vmem:[%s18935_s22 + $0x520] sm:$0xf] }
 0x17f   : > { %v852_v53 = vsel %vm844_vm5, %v722_v32, %v848_v43  ;;  %vm847_vm6 = vcmp.gt.f32.partialorder %v842_v47, 0.0  ;;  %v851_v58 = vmul.f32 0.01, %v842_v47  ;;  %v8685_v32 = vsel %vm8668_vm3, %v7373_v19, 0  ;;  %9175 = vmatpush.bf16.msrb.mxu3 %v12101_v24  ;;  %v17122_v19 = vld [vmem:[%s18935_s22 + $0xa34] sm:$0xf] }
 0x180   : > { %v781_v59 = vpop.f32.mrf.mxu2  ;;  %940 = vmatmul.f32.vlgmr.msra.gmra.mxu2 %v852_v53  ;;  %v16005_v43 = vor.u32 %v17770_v34, %v16002_v35  ;;  %v15362_v53 = vld [vmem:[%s18935_s22 + $0x1bf0] sm:$0xf0]  ;;  %v13416_v23 = vld [vmem:[%s18935_s22 + $0xa38] sm:$0xf]  ;;  %v17204_v24 = vld [vmem:[%s18935_s22 + $0xcbc] sm:$0xf0]  ;;  %v13413_v25 = vor.u32 %v17122_v19, %v13410_v21 }
 0x181   : > { %v782_v63 = vadd.f32 %v781_v59, %v678_v45  ;;  %v801_v3 = vpop.f32.mrf.mxu3  ;;  %v855_v4 = vsel %vm847_vm6, %v842_v47, %v851_v58  ;;  %9207 = vmatpush.bf16.msra.mxu2 %v8682_v31  ;;  %v17689_v45 = vld [vmem:[%s18935_s22 + $0x1be4] sm:$0xf0]  ;;  %v16013_v47 = vor.u32 %v17771_v40, %v16010_v41  ;;  %v15365_v56 = vor.u32 %v17609_v52, %v15362_v53  ;;  %v17527_v58 = vld [vmem:[%s18935_s22 + $0x16d4] sm:$0xf0]  ;;  %v17446_v59 = vld [vmem:[%s18935_s22 + $0x1454] sm:$0xf] }
 0x182   : > { %1000 = vmatmul.f32.vlgmr.msrb.gmra.mxu1 %v855_v4  ;;  %v15353_v54 = vor.u32 %v17689_v45, %v15352_v44  ;;  %v14705_v60 = vor.u32 %v17527_v58, %v14704_v57  ;;  %v14709_v0 = vor.u32 %v17446_v59, %v14706_v61  ;;  %v13417_v26 = vor.u32 %v17204_v24, %v13416_v23  ;;  %v17041_v31 = vld [vmem:[%s18935_s22 + $0x7a4] sm:$0xf0]  ;;  %v12762_v34 = vld [vmem:[%s18935_s22 + $0x7a8] sm:$0xf0]  ;;  %v12770_v40 = vld [vmem:[%s18935_s22 + $0x7b0] sm:$0xf0] }
 0x183   : > { %v802_v10 = vadd.f32 %v801_v3, %v782_v63  ;;  %9220 = vmatpush.bf16.msra.mxu3 %v8685_v32  ;;  %9246 = vmatpush.bf16.msrb.mxu1 %v8691_v39  ;;  %v17528_v63 = vld [vmem:[%s18935_s22 + $0x16dc] sm:$0xf0]  ;;  %v14714_v3 = vld [vmem:[%s18935_s22 + $0x16e0] sm:$0xf0]  ;;  %v12761_v33 = vor.u32 %v17041_v31, %v12760_v30  ;;  %v12768_v35 = vld [vmem:[%s18935_s22 + $0x528] sm:$0xf] }
 0x184   : > { %v14713_v1 = vor.u32 %v17528_v63, %v14712_v62  ;;  %v14717_v4 = vor.u32 %v17447_v2, %v14714_v3  ;;  %v16960_v32 = vld [vmem:[%s18935_s22 + $0x524] sm:$0xf]  ;;  %v16961_v39 = vld [vmem:[%s18935_s22 + $0x52c] sm:$0xf]  ;;  %v16798_v44 = vld [vmem:[%s18935_s22 + $0x14] sm:$0xf] }
 0x185   : > { %vm846_vm7 = vcmp.gt.f32.partialorder %v802_v10, 0.0  ;;  %v850_v20 = vmul.f32 0.01, %v802_v10  ;;  %9208 = vmatpush.bf16.msra.mxu2 %v16001_v42  ;;  %v12765_v37 = vor.u32 %v16960_v32, %v12762_v34  ;;  %v12773_v41 = vor.u32 %v16961_v39, %v12770_v40  ;;  %v12112_v42 = vld [vmem:[%s18935_s22 + $0x10] sm:$0xf]  ;;  %v2147_v57 = vld [vmem:[%s18935_s22 + $0x2398] sm:$0xff] }
 0x186   : > { %v12122_v52 = vld [vmem:[%s18935_s22 + $0x2a0] sm:$0xf0]  ;;  %v6082_v63 = vunpack.c.l.b16 %v2147_v57  ;;  %v16016_v15 = vld [vmem:[%s18935_s22 + $0x1e80] sm:$0xf]  ;;  %v16024_v19 = vld [vmem:[%s18935_s22 + $0x1e88] sm:$0xf] }
 0x187   : > { %v854_v27 = vsel %vm846_vm7, %v802_v10, %v850_v20  ;;  %9221 = vmatpush.bf16.msra.mxu3 %v16005_v43  ;;  %9247 = vmatpush.bf16.msrb.mxu1 %v16013_v47  ;;  %v14064_v10 = vld [vmem:[%s18935_s22 + $0xf48] sm:$0xf]  ;;  %v13409_v20 = vor.u32 %v17203_v18, %v13408_v17  ;;  %v16879_v43 = vld [vmem:[%s18935_s22 + $0x294] sm:$0xf0]  ;;  %v12125_v53 = vor.u32 %v16799_v51, %v12122_v52  ;;  %v17772_v17 = vld [vmem:[%s18935_s22 + $0x1e84] sm:$0xf] }
 0x188   : > { %980 = vmatmul.f32.vlgmr.msrb.gmra.mxu0 %v854_v27  ;;  %v14065_v13 = vor.u32 %v17366_v11, %v14064_v10  ;;  %v17123_v27 = vld [vmem:[%s18935_s22 + $0xa3c] sm:$0xf]  ;;  %v12113_v45 = vor.u32 %v16879_v43, %v12112_v42  ;;  %v12120_v47 = vld [vmem:[%s18935_s22 + $0x18] sm:$0xf]  ;;  %v7378_v6 = vpack.c.b16 %v6082_v63, %v6082_v63  ;;  %v16018_v18 = vld [vmem:[%s18935_s22 + $0x2108] sm:$0xf0] }
 0x189   : > { %9233 = vmatpush.bf16.msrb.mxu0 %v8688_v38  ;;  %9209 = vmatpush.bf16.msra.mxu2 %v15353_v54  ;;  %v13421_v29 = vor.u32 %v17123_v27, %v13418_v28  ;;  %v12769_v38 = vor.u32 %v17042_v36, %v12768_v35  ;;  %v12121_v50 = vor.u32 %v16880_v48, %v12120_v47  ;;  %v18055_v54 = vld [vmem:[#allocation11] ss:$0 sm:$0xff]  ;;  %v17773_v21 = vld [vmem:[%s18935_s22 + $0x1e8c] sm:$0xf]  ;;  %v16026_v23 = vld [vmem:[%s18935_s22 + $0x2110] sm:$0xf0] }
 0x18a   : > { %v17691_v27 = vld [vmem:[%s18935_s22 + $0x1bf4] sm:$0xf0]  ;;  %v17610_v30 = vld [vmem:[%s18935_s22 + $0x1974] sm:$0xf]  ;;  %v15370_v31 = vld [vmem:[%s18935_s22 + $0x1bf8] sm:$0xf0] }
 0x18b   : > { %9222 = vmatpush.bf16.msra.mxu3 %v15357_v55  ;;  %9248 = vmatpush.bf16.msrb.mxu1 %v15365_v56  ;;  %v15376_v32 = vld [vmem:[%s18935_s22 + $0x1978] sm:$0xf]  ;;  %v17611_v34 = vld [vmem:[%s18935_s22 + $0x197c] sm:$0xf]  ;;  %v15378_v35 = vld [vmem:[%s18935_s22 + $0x1c00] sm:$0xf0] }
 0x18c   : > { %v17529_v39 = vld [vmem:[%s18935_s22 + $0x16e4] sm:$0xf0]  ;;  %v17448_v42 = vld [vmem:[%s18935_s22 + $0x1464] sm:$0xf]  ;;  %v14722_v43 = vld [vmem:[%s18935_s22 + $0x16e8] sm:$0xf0] }
 0x18d   : > { %9234 = vmatpush.bf16.msrb.mxu0 %v16009_v46  ;;  %9210 = vmatpush.bf16.msra.mxu2 %v14705_v60  ;;  %v12114_v46 = vld [vmem:[%s18935_s22 + $0x298] sm:$0xf0]  ;;  %v14730_v47 = vld [vmem:[%s18935_s22 + $0x16f0] sm:$0xf0]  ;;  %v17367_v51 = vld [vmem:[%s18935_s22 + $0x11d4] sm:$0xf0] }
 0x18e   : > { %v12117_v49 = vor.u32 %v16798_v44, %v12114_v46  ;;  %v14728_v44 = vld [vmem:[%s18935_s22 + $0x1468] sm:$0xf]  ;;  %v17449_v46 = vld [vmem:[%s18935_s22 + $0x146c] sm:$0xf]  ;;  %v17124_v63 = vld [vmem:[%s18935_s22 + $0xa44] sm:$0xf] }
 0x18f   : > { %9223 = vmatpush.bf16.msra.mxu3 %v14709_v0  ;;  %9249 = vmatpush.bf16.msrb.mxu1 %v14717_v4  ;;  %v6083_v0 = vunpack.c.h.b16 %v2147_v57  ;;  %v17287_v57 = vld [vmem:[%s18935_s22 + $0xf5c] sm:$0xf] }
 0x191   : > { %9235 = vmatpush.bf16.msrb.mxu0 %v15361_v22  ;;  %9211 = vmatpush.bf16.msra.mxu2 %v14057_v8  ;;  %v2146_v22 = vld [vmem:[%s18935_s22 + $0x2390] sm:$0xff]  ;;  %v7379_v7 = vpack.c.b16 %v6083_v0, %v6083_v0 }
 0x192   : > { %v6080_v60 = vunpack.c.l.b16 %v2146_v22  ;;  %v6081_v61 = vunpack.c.h.b16 %v2146_v22  ;;  %v14080_v22 = vld [vmem:[%s18935_s22 + $0xf58] sm:$0xf] }
 0x193   : > { %9224 = vmatpush.bf16.msra.mxu3 %v14061_v12  ;;  %9250 = vmatpush.bf16.msrb.mxu1 %v14069_v16  ;;  %v8703_v14 = vsel %vm8668_vm3, %v7379_v7, 0  ;;  %v17853_v16 = vld [vmem:[%s18935_s22 + $0x2104] sm:$0xf0]  ;;  %v2148_v7 = vld [vmem:[%s18935_s22 + $0x23a0] sm:$0xff] }
 0x194   : > { %v7376_v4 = vpack.c.b16 %v6080_v60, %v6080_v60  ;;  %v7377_v5 = vpack.c.b16 %v6081_v61, %v6081_v61  ;;  %v16017_v24 = vor.u32 %v17853_v16, %v16016_v15  ;;  %v13424_v61 = vld [vmem:[%s18935_s22 + $0xa40] sm:$0xf] }
 0x195   : > { %9236 = vmatpush.bf16.msrb.mxu0 %v14713_v1  ;;  %9212 = vmatpush.bf16.msra.mxu2 %v13409_v20  ;;  %v17854_v20 = vld [vmem:[%s18935_s22 + $0x210c] sm:$0xf0] }
 0x196   : > { %v8694_v10 = vsel %vm8668_vm3, %v7376_v4, 0  ;;  %v8697_v11 = vsel %vm8668_vm3, %v7377_v5, 0  ;;  %v16025_v28 = vor.u32 %v17854_v20, %v16024_v19  ;;  %v17206_v4 = vld [vmem:[%s18935_s22 + $0xccc] sm:$0xf0]  ;;  %v17125_v5 = vld [vmem:[%s18935_s22 + $0xa4c] sm:$0xf]  ;;  %v6084_v20 = vunpack.c.l.b16 %v2148_v7 }
 0x197   : > { %9225 = vmatpush.bf16.msra.mxu3 %v13413_v25  ;;  %9251 = vmatpush.bf16.msrb.mxu1 %v13421_v29  ;;  %v16021_v25 = vor.u32 %v17772_v17, %v16018_v18  ;;  %v16029_v29 = vor.u32 %v17773_v21, %v16026_v23  ;;  %v12778_v17 = vld [vmem:[%s18935_s22 + $0x7b8] sm:$0xf0]  ;;  %v12784_v18 = vld [vmem:[%s18935_s22 + $0x538] sm:$0xf]  ;;  %v17044_v19 = vld [vmem:[%s18935_s22 + $0x7bc] sm:$0xf0]  ;;  %v6085_v21 = vunpack.c.h.b16 %v2148_v7 }
 0x198   : > { %v16963_v23 = vld [vmem:[%s18935_s22 + $0x53c] sm:$0xf] }
 0x199   : > { %9237 = vmatpush.bf16.msrb.mxu0 %v14065_v13  ;;  %9213 = vmatpush.bf16.msra.mxu2 %v12761_v33  ;;  %v8700_v13 = vsel %vm8668_vm3, %v7378_v6, 0  ;;  %v17692_v33 = vld [vmem:[%s18935_s22 + $0x1bfc] sm:$0xf0]  ;;  %v13434_v6 = vld [vmem:[%s18935_s22 + $0xcd0] sm:$0xf0] }
 0x19a   : > { %v15377_v40 = vor.u32 %v17692_v33, %v15376_v32  ;;  %v13437_v16 = vor.u32 %v17125_v5, %v13434_v6  ;;  %v16800_v33 = vld [vmem:[%s18935_s22 + $0x24] sm:$0xf]  ;;  %v15394_v5 = vld [vmem:[%s18935_s22 + $0x1c10] sm:$0xf0] }
 0x19b   : > { %9226 = vmatpush.bf16.msra.mxu3 %v12765_v37  ;;  %9252 = vmatpush.bf16.msrb.mxu1 %v12773_v41  ;;  %v15373_v37 = vor.u32 %v17610_v30, %v15370_v31  ;;  %v15381_v41 = vor.u32 %v17611_v34, %v15378_v35  ;;  %v12128_v30 = vld [vmem:[%s18935_s22 + $0x20] sm:$0xf]  ;;  %v16881_v31 = vld [vmem:[%s18935_s22 + $0x2a4] sm:$0xf0]  ;;  %v12130_v34 = vld [vmem:[%s18935_s22 + $0x2a8] sm:$0xf0] }
 0x19c   : > { %v12136_v35 = vld [vmem:[%s18935_s22 + $0x28] sm:$0xf] }
 0x19d   : > { %9238 = vmatpush.bf16.msrb.mxu0 %v13417_v26  ;;  %9214 = vmatpush.bf16.msra.mxu2 %v12113_v45  ;;  %v15368_v26 = vld [vmem:[%s18935_s22 + $0x1970] sm:$0xf] }
 0x19e   : > { %v15369_v36 = vor.u32 %v17691_v27, %v15368_v26  ;;  %v17530_v45 = vld [vmem:[%s18935_s22 + $0x16ec] sm:$0xf0] }
 0x19f   : > { %9227 = vmatpush.bf16.msra.mxu3 %v12117_v49  ;;  %9253 = vmatpush.bf16.msrb.mxu1 %v12125_v53  ;;  %v14725_v49 = vor.u32 %v17448_v42, %v14722_v43  ;;  %v14729_v52 = vor.u32 %v17530_v45, %v14728_v44  ;;  %v14733_v53 = vor.u32 %v17449_v46, %v14730_v47 }
 0x1a0   : > { %v12129_v43 = vor.u32 %v16881_v31, %v12128_v30  ;;  %v12133_v44 = vor.u32 %v16800_v33, %v12130_v34  ;;  %v17289_v30 = vld [vmem:[%s18935_s22 + $0xf6c] sm:$0xf]  ;;  %v14098_v31 = vld [vmem:[%s18935_s22 + $0x11f0] sm:$0xf0]  ;;  %v13440_v34 = vld [vmem:[%s18935_s22 + $0xa50] sm:$0xf] }
 0x1a1   : > { %9239 = vmatpush.bf16.msrb.mxu0 %v12769_v38  ;;  %v14720_v38 = vld [vmem:[%s18935_s22 + $0x1460] sm:$0xf] }
 0x1a2   : > { %v14721_v48 = vor.u32 %v17529_v39, %v14720_v38  ;;  %v16882_v38 = vld [vmem:[%s18935_s22 + $0x2ac] sm:$0xf0]  ;;  %v16801_v39 = vld [vmem:[%s18935_s22 + $0x2c] sm:$0xf] }
 0x1a3   : > { %v12137_v45 = vor.u32 %v16882_v38, %v12136_v35  ;;  %v17207_v35 = vld [vmem:[%s18935_s22 + $0xcd4] sm:$0xf0]  ;;  %v14101_v38 = vor.u32 %v17289_v30, %v14098_v31  ;;  %v16058_v30 = vld [vmem:[%s18935_s22 + $0x2130] sm:$0xf0] }
 0x1a5   : > { %9240 = vmatpush.bf16.msrb.mxu0 %v12121_v50  ;;  %v14072_v50 = vld [vmem:[%s18935_s22 + $0xf50] sm:$0xf] }
 0x1fd   : > { %v961_v58 = vpop.f32.mrf.mxu3 }
 0x1ff   : > { %v1001_v2 = vpop.f32.mrf.mxu1 }
 0x203   : > { %v941_v55 = vpop.f32.mrf.mxu2 }
 0x204   : > { %v942_v56 = vadd.f32 %v18055_v54, %v941_v55  ;;  %v17286_v54 = vld [vmem:[%s18935_s22 + $0xf54] sm:$0xf]  ;;  %v14074_v55 = vld [vmem:[%s18935_s22 + $0x11d8] sm:$0xf0] }
 0x205   : > { %v981_v62 = vpop.f32.mrf.mxu0  ;;  %v14077_v60 = vor.u32 %v17286_v54, %v14074_v55  ;;  %v16034_v54 = vld [vmem:[%s18935_s22 + $0x2118] sm:$0xf0]  ;;  %v16040_v55 = vld [vmem:[%s18935_s22 + $0x1e98] sm:$0xf] }
 0x206   : > { %v962_v59 = vadd.f32 %v961_v58, %v942_v56  ;;  %v17368_v56 = vld [vmem:[%s18935_s22 + $0x11dc] sm:$0xf0]  ;;  %v14082_v58 = vld [vmem:[%s18935_s22 + $0x11e0] sm:$0xf0] }
 0x207   : > { %v14081_v0 = vor.u32 %v17368_v56, %v14080_v22  ;;  %v17856_v22 = vld [vmem:[%s18935_s22 + $0x211c] sm:$0xf0]  ;;  %v17775_v56 = vld [vmem:[%s18935_s22 + $0x1e9c] sm:$0xf] }
 0x208   : > { %v982_v1 = vadd.f32 %v981_v62, %v962_v59  ;;  %v14073_v59 = vor.u32 %v17367_v51, %v14072_v50  ;;  %v17205_v62 = vld [vmem:[%s18935_s22 + $0xcc4] sm:$0xf0]  ;;  %v16032_v51 = vld [vmem:[%s18935_s22 + $0x1e90] sm:$0xf] }
 0x20a   : > { %v1002_v3 = vadd.f32 %v1001_v2, %v982_v1  ;;  %v14085_v1 = vor.u32 %v17287_v57, %v14082_v58  ;;  %v13426_v2 = vld [vmem:[%s18935_s22 + $0xcc8] sm:$0xf0]  ;;  %v16042_v57 = vld [vmem:[%s18935_s22 + $0x2120] sm:$0xf0] }
 0x20c   : > { %vm1004_vm8 = vcmp.gt.f32.partialorder %v1002_v3, 0.0  ;;  %v1005_v8 = vmul.f32 0.01, %v1002_v3 }
 0x20e   : > { %v1006_v9 = vsel %vm1004_vm8, %v1002_v3, %v1005_v8  ;;  %v13432_v3 = vld [vmem:[%s18935_s22 + $0xa48] sm:$0xf] }
 0x20f   : > { %v19267_v12 = vpack.c.bf16 %v1006_v9, %v1006_v9  ;;  %v2149_v8 = vld [vmem:[%s18935_s22 + $0x23a8] sm:$0xff]  ;;  %v13425_v9 = vor.u32 %v17205_v62, %v13424_v61  ;;  %v13433_v15 = vor.u32 %v17206_v4, %v13432_v3  ;;  %v16041_v62 = vor.u32 %v17856_v22, %v16040_v55  ;;  %v17694_v3 = vld [vmem:[%s18935_s22 + $0x1c0c] sm:$0xf0] }
 0x210   : > { %v6087_v26 = vunpack.c.h.b16 %v2149_v8  ;;  %v17693_v61 = vld [vmem:[%s18935_s22 + $0x1c04] sm:$0xf0]  ;;  %v17613_v4 = vld [vmem:[%s18935_s22 + $0x198c] sm:$0xf]  ;;  %v17046_v55 = vld [vmem:[%s18935_s22 + $0x7cc] sm:$0xf0] }
 0x211   : > { %16630 = vmatmul.msk.bf16.vlgmr.msrb.gmra.mxu2 %vm8664_vm9, %v19267_v12  ;;  %16631 = vmatmul.msk.bf16.vlgmr.msrb.gmra.mxu3 %vm8664_vm9, %v19267_v12 }
 0x212   : > { %16632 = vmatmul.msk.bf16.vlgmr.msra.gmra.mxu0 %vm8664_vm9, %v19267_v12  ;;  %16633 = vmatmul.msk.bf16.vlgmr.msra.gmra.mxu1 %vm8664_vm9, %v19267_v12  ;;  %v7383_v42 = vpack.c.b16 %v6087_v26, %v6087_v26  ;;  %v17288_v26 = vld [vmem:[%s18935_s22 + $0xf64] sm:$0xf] }
 0x213   : > { %9259 = vmatpush.bf16.msrb.mxu2 %v8694_v10  ;;  %9272 = vmatpush.bf16.msrb.mxu3 %v8697_v11  ;;  %v13429_v10 = vor.u32 %v17124_v63, %v13426_v2  ;;  %v12776_v11 = vld [vmem:[%s18935_s22 + $0x530] sm:$0xf]  ;;  %v16045_v63 = vor.u32 %v17775_v56, %v16042_v57  ;;  %v15392_v2 = vld [vmem:[%s18935_s22 + $0x1988] sm:$0xf]  ;;  %v16965_v57 = vld [vmem:[%s18935_s22 + $0x54c] sm:$0xf] }
 0x214   : > { %9285 = vmatpush.bf16.msra.mxu0 %v8700_v13  ;;  %9298 = vmatpush.bf16.msra.mxu1 %v8703_v14  ;;  %v17043_v13 = vld [vmem:[%s18935_s22 + $0x7b4] sm:$0xf0]  ;;  %v16962_v14 = vld [vmem:[%s18935_s22 + $0x534] sm:$0xf]  ;;  %v8715_v50 = vsel %vm8668_vm3, %v7383_v42, 0 }
 0x215   : > { %v12777_v27 = vor.u32 %v17043_v13, %v12776_v11  ;;  %v15397_v11 = vor.u32 %v17613_v4, %v15394_v5  ;;  %v17450_v13 = vld [vmem:[%s18935_s22 + $0x1474] sm:$0xf]  ;;  %v17127_v42 = vld [vmem:[%s18935_s22 + $0xa5c] sm:$0xf]  ;;  %v12152_v5 = vld [vmem:[%s18935_s22 + $0x38] sm:$0xf] }
 0x216   : > { %v12146_v4 = vld [vmem:[%s18935_s22 + $0x2b8] sm:$0xf0] }
 0x217   : > { %9260 = vmatpush.bf16.msrb.mxu2 %v16017_v24  ;;  %9273 = vmatpush.bf16.msrb.mxu3 %v16021_v25  ;;  %v12786_v24 = vld [vmem:[%s18935_s22 + $0x7c0] sm:$0xf0]  ;;  %v6086_v25 = vunpack.c.l.b16 %v2149_v8  ;;  %v14736_v8 = vld [vmem:[%s18935_s22 + $0x1470] sm:$0xf] }
 0x218   : > { %9286 = vmatpush.bf16.msra.mxu0 %v16025_v28  ;;  %9299 = vmatpush.bf16.msra.mxu1 %v16029_v29  ;;  %v12781_v28 = vor.u32 %v16962_v14, %v12778_v17  ;;  %v12785_v29 = vor.u32 %v17044_v19, %v12784_v18  ;;  %v12789_v32 = vor.u32 %v16963_v23, %v12786_v24  ;;  %v14738_v14 = vld [vmem:[%s18935_s22 + $0x16f8] sm:$0xf0]  ;;  %v14746_v18 = vld [vmem:[%s18935_s22 + $0x1700] sm:$0xf0]  ;;  %v17369_v23 = vld [vmem:[%s18935_s22 + $0x11e4] sm:$0xf0] }
 0x219   : > { %v17451_v17 = vld [vmem:[%s18935_s22 + $0x147c] sm:$0xf] }
 0x21b   : > { %9261 = vmatpush.bf16.msrb.mxu2 %v15369_v36  ;;  %9274 = vmatpush.bf16.msrb.mxu3 %v15373_v37  ;;  %v7380_v36 = vpack.c.b16 %v6084_v20, %v6084_v20  ;;  %v7381_v37 = vpack.c.b16 %v6085_v21, %v6085_v21  ;;  %v14741_v20 = vor.u32 %v17450_v13, %v14738_v14  ;;  %v14088_v21 = vld [vmem:[%s18935_s22 + $0xf60] sm:$0xf] }
 0x21c   : > { %9287 = vmatpush.bf16.msra.mxu0 %v15377_v40  ;;  %9300 = vmatpush.bf16.msra.mxu1 %v15381_v41  ;;  %v12138_v40 = vld [vmem:[%s18935_s22 + $0x2b0] sm:$0xf0]  ;;  %v7382_v41 = vpack.c.b16 %v6086_v25, %v6086_v25  ;;  %v14749_v25 = vor.u32 %v17451_v17, %v14746_v18 }
 0x21d   : > { %v12141_v46 = vor.u32 %v16801_v39, %v12138_v40  ;;  %v8706_v47 = vsel %vm8668_vm3, %v7380_v36, 0  ;;  %v17126_v36 = vld [vmem:[%s18935_s22 + $0xa54] sm:$0xf]  ;;  %v13442_v39 = vld [vmem:[%s18935_s22 + $0xcd8] sm:$0xf0] }
 0x21e   : > { %v13448_v40 = vld [vmem:[%s18935_s22 + $0xa58] sm:$0xf] }
 0x21f   : > { %9262 = vmatpush.bf16.msrb.mxu2 %v14721_v48  ;;  %9275 = vmatpush.bf16.msrb.mxu3 %v14725_v49  ;;  %v8709_v48 = vsel %vm8668_vm3, %v7381_v37, 0  ;;  %v8712_v49 = vsel %vm8668_vm3, %v7382_v41, 0  ;;  %v17208_v41 = vld [vmem:[%s18935_s22 + $0xcdc] sm:$0xf0] }
 0x220   : > { %9288 = vmatpush.bf16.msra.mxu0 %v14729_v52  ;;  %9301 = vmatpush.bf16.msra.mxu1 %v14733_v53  ;;  %v17855_v52 = vld [vmem:[%s18935_s22 + $0x2114] sm:$0xf0]  ;;  %v17774_v53 = vld [vmem:[%s18935_s22 + $0x1e94] sm:$0xf] }
 0x221   : > { %16634 = vmatmul.msk.bf16.vlgmr.msra.gmra.mxu2 %vm8664_vm9, %v19267_v12  ;;  %16635 = vmatmul.msk.bf16.vlgmr.msra.gmra.mxu3 %vm8664_vm9, %v19267_v12  ;;  %v16033_v58 = vor.u32 %v17855_v52, %v16032_v51  ;;  %v13449_v51 = vor.u32 %v17208_v41, %v13448_v40  ;;  %v17696_v40 = vld [vmem:[%s18935_s22 + $0x1c1c] sm:$0xf0]  ;;  %v17615_v41 = vld [vmem:[%s18935_s22 + $0x199c] sm:$0xf] }
 0x222   : > { %16636 = vmatmul.msk.bf16.vlgmr.msrb.gmra.mxu0 %vm8664_vm9, %v19267_v12  ;;  %16637 = vmatmul.msk.bf16.vlgmr.msrb.gmra.mxu1 %vm8664_vm9, %v19267_v12 }
 0x223   : > { %9263 = vmatpush.bf16.msrb.mxu2 %v14073_v59  ;;  %9276 = vmatpush.bf16.msrb.mxu3 %v14077_v60  ;;  %v16037_v59 = vor.u32 %v17774_v53, %v16034_v54  ;;  %v15384_v60 = vld [vmem:[%s18935_s22 + $0x1980] sm:$0xf]  ;;  %v12794_v53 = vld [vmem:[%s18935_s22 + $0x7c8] sm:$0xf0]  ;;  %v12800_v54 = vld [vmem:[%s18935_s22 + $0x548] sm:$0xf] }
 0x224   : > { %9289 = vmatpush.bf16.msra.mxu0 %v14081_v0  ;;  %9302 = vmatpush.bf16.msra.mxu1 %v14085_v1  ;;  %v17612_v0 = vld [vmem:[%s18935_s22 + $0x1984] sm:$0xf]  ;;  %v15386_v1 = vld [vmem:[%s18935_s22 + $0x1c08] sm:$0xf0]  ;;  %v15385_v6 = vor.u32 %v17693_v61, %v15384_v60 }
 0x225   : > { %v15389_v7 = vor.u32 %v17612_v0, %v15386_v1  ;;  %v12144_v0 = vld [vmem:[%s18935_s22 + $0x30] sm:$0xf]  ;;  %v16883_v1 = vld [vmem:[%s18935_s22 + $0x2b4] sm:$0xf0] }
 0x226   : > { %v12145_v14 = vor.u32 %v16883_v1, %v12144_v0  ;;  %v17291_v0 = vld [vmem:[%s18935_s22 + $0xf7c] sm:$0xf]  ;;  %v14114_v1 = vld [vmem:[%s18935_s22 + $0x1200] sm:$0xf0] }
 0x227   : > { %9264 = vmatpush.bf16.msrb.mxu2 %v13425_v9  ;;  %9277 = vmatpush.bf16.msrb.mxu3 %v13429_v10  ;;  %v17531_v9 = vld [vmem:[%s18935_s22 + $0x16f4] sm:$0xf0]  ;;  %v15393_v10 = vor.u32 %v17694_v3, %v15392_v2  ;;  %v16802_v3 = vld [vmem:[%s18935_s22 + $0x34] sm:$0xf] }
 0x228   : > { %9290 = vmatpush.bf16.msra.mxu0 %v13433_v15  ;;  %9303 = vmatpush.bf16.msra.mxu1 %v13437_v16  ;;  %v14744_v15 = vld [vmem:[%s18935_s22 + $0x1478] sm:$0xf]  ;;  %v17532_v16 = vld [vmem:[%s18935_s22 + $0x16fc] sm:$0xf0]  ;;  %v14737_v19 = vor.u32 %v17531_v9, %v14736_v8  ;;  %v16803_v9 = vld [vmem:[%s18935_s22 + $0x3c] sm:$0xf] }
 0x229   : > { %v14745_v24 = vor.u32 %v17532_v16, %v14744_v15  ;;  %v16884_v8 = vld [vmem:[%s18935_s22 + $0x2bc] sm:$0xf0]  ;;  %v12149_v15 = vor.u32 %v16802_v3, %v12146_v4 }
 0x22a   : > { %v12153_v16 = vor.u32 %v16884_v8, %v12152_v5  ;;  %v13456_v4 = vld [vmem:[%s18935_s22 + $0xa60] sm:$0xf]  ;;  %v17209_v5 = vld [vmem:[%s18935_s22 + $0xce4] sm:$0xf0]  ;;  %v14117_v8 = vor.u32 %v17291_v0, %v14114_v1  ;;  %v16074_v0 = vld [vmem:[%s18935_s22 + $0x2140] sm:$0xf0] }
 0x22b   : > { %9265 = vmatpush.bf16.msrb.mxu2 %v12777_v27  ;;  %9278 = vmatpush.bf16.msrb.mxu3 %v12781_v28  ;;  %v14090_v27 = vld [vmem:[%s18935_s22 + $0x11e8] sm:$0xf0]  ;;  %v14096_v28 = vld [vmem:[%s18935_s22 + $0xf68] sm:$0xf] }
 0x22c   : > { %9291 = vmatpush.bf16.msra.mxu0 %v12785_v29  ;;  %9304 = vmatpush.bf16.msra.mxu1 %v12789_v32  ;;  %v17370_v29 = vld [vmem:[%s18935_s22 + $0x11ec] sm:$0xf0]  ;;  %v14089_v32 = vor.u32 %v17369_v23, %v14088_v21  ;;  %v14093_v33 = vor.u32 %v17288_v26, %v14090_v27  ;;  %v16048_v23 = vld [vmem:[%s18935_s22 + $0x1ea0] sm:$0xf]  ;;  %v16050_v26 = vld [vmem:[%s18935_s22 + $0x2128] sm:$0xf0] }
 0x22d   : > { %v14097_v37 = vor.u32 %v17370_v29, %v14096_v28  ;;  %v16056_v27 = vld [vmem:[%s18935_s22 + $0x1ea8] sm:$0xf]  ;;  %v17858_v28 = vld [vmem:[%s18935_s22 + $0x212c] sm:$0xf0]  ;;  %v17777_v29 = vld [vmem:[%s18935_s22 + $0x1eac] sm:$0xf] }
 0x22f   : > { %9266 = vmatpush.bf16.msrb.mxu2 %v12129_v43  ;;  %9279 = vmatpush.bf16.msrb.mxu3 %v12133_v44  ;;  %v13450_v43 = vld [vmem:[%s18935_s22 + $0xce0] sm:$0xf0]  ;;  %v2150_v44 = vld [vmem:[%s18935_s22 + $0x23b0] sm:$0xff] }
 0x230   : > { %9292 = vmatpush.bf16.msra.mxu0 %v12137_v45  ;;  %9305 = vmatpush.bf16.msra.mxu1 %v12141_v46  ;;  %v2151_v45 = vld [vmem:[%s18935_s22 + $0x23b8] sm:$0xff]  ;;  %v13441_v46 = vor.u32 %v17207_v35, %v13440_v34  ;;  %v13453_v52 = vor.u32 %v17127_v42, %v13450_v43  ;;  %v6088_v22 = vunpack.c.l.b16 %v2150_v44  ;;  %v6089_v56 = vunpack.c.h.b16 %v2150_v44  ;;  %v15410_v42 = vld [vmem:[%s18935_s22 + $0x1c20] sm:$0xf0] }
 0x231   : > { %v6091_v60 = vunpack.c.h.b16 %v2151_v45  ;;  %v17695_v34 = vld [vmem:[%s18935_s22 + $0x1c14] sm:$0xf0]  ;;  %v16057_v35 = vor.u32 %v17858_v28, %v16056_v27  ;;  %v17048_v27 = vld [vmem:[%s18935_s22 + $0x7dc] sm:$0xf0] }
 0x232   : > { %16638 = vmatmul.msk.bf16.vlgmr.msrb.gmra.mxu2 %vm8664_vm9, %v19267_v12  ;;  %16639 = vmatmul.msk.bf16.vlgmr.msrb.gmra.mxu3 %vm8664_vm9, %v19267_v12 }
 0x233   : > { %9311 = vmatpush.bf16.msra.mxu2 %v8706_v47  ;;  %9324 = vmatpush.bf16.msra.mxu3 %v8709_v48  ;;  %v13445_v47 = vor.u32 %v17126_v36, %v13442_v39  ;;  %v12792_v48 = vld [vmem:[%s18935_s22 + $0x540] sm:$0xf]  ;;  %v7387_v13 = vpack.c.b16 %v6091_v60, %v6091_v60  ;;  %v16061_v36 = vor.u32 %v17777_v29, %v16058_v30  ;;  %v15408_v39 = vld [vmem:[%s18935_s22 + $0x1998] sm:$0xf]  ;;  %v17290_v60 = vld [vmem:[%s18935_s22 + $0xf74] sm:$0xf] }
 0x234   : > { %9337 = vmatpush.bf16.msrb.mxu0 %v8712_v49  ;;  %9350 = vmatpush.bf16.msrb.mxu1 %v8715_v50  ;;  %v17045_v49 = vld [vmem:[%s18935_s22 + $0x7c4] sm:$0xf0]  ;;  %v16964_v50 = vld [vmem:[%s18935_s22 + $0x544] sm:$0xf]  ;;  %v16967_v30 = vld [vmem:[%s18935_s22 + $0x55c] sm:$0xf] }
 0x235   : > { %16640 = vmatmul.msk.bf16.vlgmr.msra.gmra.mxu0 %vm8664_vm9, %v19267_v12  ;;  %16641 = vmatmul.msk.bf16.vlgmr.msra.gmra.mxu1 %vm8664_vm9, %v19267_v12  ;;  %v12793_v61 = vor.u32 %v17045_v49, %v12792_v48  ;;  %v8727_v21 = vsel %vm8668_vm3, %v7387_v13, 0  ;;  %v15413_v48 = vor.u32 %v17615_v41, %v15410_v42  ;;  %v17452_v49 = vld [vmem:[%s18935_s22 + $0x1484] sm:$0xf]  ;;  %v17129_v13 = vld [vmem:[%s18935_s22 + $0xa6c] sm:$0xf] }
 0x236   : > { %v12162_v41 = vld [vmem:[%s18935_s22 + $0x2c8] sm:$0xf0]  ;;  %v12168_v42 = vld [vmem:[%s18935_s22 + $0x48] sm:$0xf] }
 0x237   : > { %9312 = vmatpush.bf16.msra.mxu2 %v16033_v58  ;;  %9325 = vmatpush.bf16.msra.mxu3 %v16037_v59  ;;  %v12802_v58 = vld [vmem:[%s18935_s22 + $0x7d0] sm:$0xf0]  ;;  %v6090_v59 = vunpack.c.l.b16 %v2151_v45  ;;  %v14752_v45 = vld [vmem:[%s18935_s22 + $0x1480] sm:$0xf] }
 0x238   : > { %9338 = vmatpush.bf16.msrb.mxu0 %v16041_v62  ;;  %9351 = vmatpush.bf16.msrb.mxu1 %v16045_v63  ;;  %v12797_v62 = vor.u32 %v16964_v50, %v12794_v53  ;;  %v12801_v63 = vor.u32 %v17046_v55, %v12800_v54  ;;  %v12805_v2 = vor.u32 %v16965_v57, %v12802_v58  ;;  %v14754_v50 = vld [vmem:[%s18935_s22 + $0x1708] sm:$0xf0]  ;;  %v14762_v54 = vld [vmem:[%s18935_s22 + $0x1710] sm:$0xf0]  ;;  %v17371_v57 = vld [vmem:[%s18935_s22 + $0x11f4] sm:$0xf0] }
 0x239   : > { %v17453_v53 = vld [vmem:[%s18935_s22 + $0x148c] sm:$0xf] }
 0x23b   : > { %9313 = vmatpush.bf16.msra.mxu2 %v15385_v6  ;;  %9326 = vmatpush.bf16.msra.mxu3 %v15389_v7  ;;  %v7384_v6 = vpack.c.b16 %v6088_v22, %v6088_v22  ;;  %v7385_v7 = vpack.c.b16 %v6089_v56, %v6089_v56  ;;  %v14757_v22 = vor.u32 %v17452_v49, %v14754_v50  ;;  %v14104_v56 = vld [vmem:[%s18935_s22 + $0xf70] sm:$0xf] }
 0x23c   : > { %9339 = vmatpush.bf16.msrb.mxu0 %v15393_v10  ;;  %9352 = vmatpush.bf16.msrb.mxu1 %v15397_v11  ;;  %v12154_v10 = vld [vmem:[%s18935_s22 + $0x2c0] sm:$0xf0]  ;;  %v7386_v11 = vpack.c.b16 %v6090_v59, %v6090_v59  ;;  %v14765_v59 = vor.u32 %v17453_v53, %v14762_v54 }
 0x23d   : > { %v12157_v17 = vor.u32 %v16803_v9, %v12154_v10  ;;  %v8718_v18 = vsel %vm8668_vm3, %v7384_v6, 0  ;;  %v17128_v6 = vld [vmem:[%s18935_s22 + $0xa64] sm:$0xf]  ;;  %v13458_v9 = vld [vmem:[%s18935_s22 + $0xce8] sm:$0xf0] }
 0x23e   : > { %v13464_v10 = vld [vmem:[%s18935_s22 + $0xa68] sm:$0xf] }
 0x23f   : > { %9314 = vmatpush.bf16.msra.mxu2 %v14737_v19  ;;  %9327 = vmatpush.bf16.msra.mxu3 %v14741_v20  ;;  %v8721_v19 = vsel %vm8668_vm3, %v7385_v7, 0  ;;  %v8724_v20 = vsel %vm8668_vm3, %v7386_v11, 0  ;;  %v17210_v11 = vld [vmem:[%s18935_s22 + $0xcec] sm:$0xf0] }
 0x240   : > { %9340 = vmatpush.bf16.msrb.mxu0 %v14745_v24  ;;  %9353 = vmatpush.bf16.msrb.mxu1 %v14749_v25  ;;  %v17857_v24 = vld [vmem:[%s18935_s22 + $0x2124] sm:$0xf0]  ;;  %v17776_v25 = vld [vmem:[%s18935_s22 + $0x1ea4] sm:$0xf] }
 0x241   : > { %v16049_v31 = vor.u32 %v17857_v24, %v16048_v23  ;;  %v13465_v23 = vor.u32 %v17210_v11, %v13464_v10  ;;  %v17698_v10 = vld [vmem:[%s18935_s22 + $0x1c2c] sm:$0xf0]  ;;  %v17617_v11 = vld [vmem:[%s18935_s22 + $0x19ac] sm:$0xf] }
 0x243   : > { %9315 = vmatpush.bf16.msra.mxu2 %v14089_v32  ;;  %9328 = vmatpush.bf16.msra.mxu3 %v14093_v33  ;;  %v16053_v32 = vor.u32 %v17776_v25, %v16050_v26  ;;  %v15400_v33 = vld [vmem:[%s18935_s22 + $0x1990] sm:$0xf]  ;;  %v12810_v25 = vld [vmem:[%s18935_s22 + $0x7d8] sm:$0xf0]  ;;  %v12816_v26 = vld [vmem:[%s18935_s22 + $0x558] sm:$0xf] }
 0x244   : > { %9341 = vmatpush.bf16.msrb.mxu0 %v14097_v37  ;;  %9354 = vmatpush.bf16.msrb.mxu1 %v14101_v38  ;;  %v17614_v37 = vld [vmem:[%s18935_s22 + $0x1994] sm:$0xf]  ;;  %v15402_v38 = vld [vmem:[%s18935_s22 + $0x1c18] sm:$0xf0]  ;;  %v15401_v43 = vor.u32 %v17695_v34, %v15400_v33 }
 0x245   : > { %v15405_v44 = vor.u32 %v17614_v37, %v15402_v38  ;;  %v12160_v37 = vld [vmem:[%s18935_s22 + $0x40] sm:$0xf]  ;;  %v16885_v38 = vld [vmem:[%s18935_s22 + $0x2c4] sm:$0xf0] }
 0x246   : > { %v12161_v50 = vor.u32 %v16885_v38, %v12160_v37  ;;  %v17293_v37 = vld [vmem:[%s18935_s22 + $0xf8c] sm:$0xf]  ;;  %v14130_v38 = vld [vmem:[%s18935_s22 + $0x1210] sm:$0xf0] }
 0x247   : > { %9316 = vmatpush.bf16.msra.mxu2 %v13441_v46  ;;  %9329 = vmatpush.bf16.msra.mxu3 %v13445_v47  ;;  %v17533_v46 = vld [vmem:[%s18935_s22 + $0x1704] sm:$0xf0]  ;;  %v15409_v47 = vor.u32 %v17696_v40, %v15408_v39  ;;  %v16804_v40 = vld [vmem:[%s18935_s22 + $0x44] sm:$0xf] }
 0x248   : > { %9342 = vmatpush.bf16.msrb.mxu0 %v13449_v51  ;;  %9355 = vmatpush.bf16.msrb.mxu1 %v13453_v52  ;;  %v14760_v51 = vld [vmem:[%s18935_s22 + $0x1488] sm:$0xf]  ;;  %v17534_v52 = vld [vmem:[%s18935_s22 + $0x170c] sm:$0xf0]  ;;  %v14753_v55 = vor.u32 %v17533_v46, %v14752_v45  ;;  %v16805_v46 = vld [vmem:[%s18935_s22 + $0x4c] sm:$0xf] }
 0x249   : > { %v14761_v58 = vor.u32 %v17534_v52, %v14760_v51  ;;  %v16886_v45 = vld [vmem:[%s18935_s22 + $0x2cc] sm:$0xf0]  ;;  %v12165_v51 = vor.u32 %v16804_v40, %v12162_v41 }
 0x24a   : > { %v12169_v52 = vor.u32 %v16886_v45, %v12168_v42  ;;  %v17211_v42 = vld [vmem:[%s18935_s22 + $0xcf4] sm:$0xf0] }
 0x24b   : > { %9317 = vmatpush.bf16.msra.mxu2 %v12793_v61  ;;  %9330 = vmatpush.bf16.msra.mxu3 %v12797_v62  ;;  %v14106_v61 = vld [vmem:[%s18935_s22 + $0x11f8] sm:$0xf0]  ;;  %v14112_v62 = vld [vmem:[%s18935_s22 + $0xf78] sm:$0xf] }
 0x24c   : > { %9343 = vmatpush.bf16.msrb.mxu0 %v12801_v63  ;;  %9356 = vmatpush.bf16.msrb.mxu1 %v12805_v2  ;;  %v17372_v63 = vld [vmem:[%s18935_s22 + $0x11fc] sm:$0xf0]  ;;  %v14105_v2 = vor.u32 %v17371_v57, %v14104_v56  ;;  %v14109_v3 = vor.u32 %v17290_v60, %v14106_v61  ;;  %v16064_v57 = vld [vmem:[%s18935_s22 + $0x1eb0] sm:$0xf]  ;;  %v16066_v60 = vld [vmem:[%s18935_s22 + $0x2138] sm:$0xf0] }
 0x24d   : > { %v14113_v7 = vor.u32 %v17372_v63, %v14112_v62  ;;  %v16072_v61 = vld [vmem:[%s18935_s22 + $0x1eb8] sm:$0xf]  ;;  %v17860_v62 = vld [vmem:[%s18935_s22 + $0x213c] sm:$0xf0]  ;;  %v17779_v63 = vld [vmem:[%s18935_s22 + $0x1ebc] sm:$0xf] }
 0x24f   : > { %9318 = vmatpush.bf16.msra.mxu2 %v12145_v14  ;;  %9331 = vmatpush.bf16.msra.mxu3 %v12149_v15  ;;  %v13466_v14 = vld [vmem:[%s18935_s22 + $0xcf0] sm:$0xf0]  ;;  %v2152_v15 = vld [vmem:[%s18935_s22 + $0x23c0] sm:$0xff] }
 0x250   : > { %9344 = vmatpush.bf16.msrb.mxu0 %v12153_v16  ;;  %9357 = vmatpush.bf16.msrb.mxu1 %v12157_v17  ;;  %v2153_v16 = vld [vmem:[%s18935_s22 + $0x23c8] sm:$0xff]  ;;  %v13457_v17 = vor.u32 %v17209_v5, %v13456_v4  ;;  %v13469_v24 = vor.u32 %v17129_v13, %v13466_v14  ;;  %v6092_v28 = vunpack.c.l.b16 %v2152_v15  ;;  %v6093_v29 = vunpack.c.h.b16 %v2152_v15  ;;  %v15426_v13 = vld [vmem:[%s18935_s22 + $0x1c30] sm:$0xf0] }
 0x251   : > { %v6095_v33 = vunpack.c.h.b16 %v2153_v16  ;;  %v17697_v4 = vld [vmem:[%s18935_s22 + $0x1c24] sm:$0xf0]  ;;  %v16073_v5 = vor.u32 %v17860_v62, %v16072_v61  ;;  %v17050_v61 = vld [vmem:[%s18935_s22 + $0x7ec] sm:$0xf0]  ;;  %v16969_v62 = vld [vmem:[%s18935_s22 + $0x56c] sm:$0xf] }
 0x252   : > { %16642 = vmatmul.msk.bf16.vlgmr.msra.gmra.mxu2 %vm8664_vm9, %v19267_v12  ;;  %16643 = vmatmul.msk.bf16.vlgmr.msra.gmra.mxu3 %vm8664_vm9, %v19267_v12 }
 0x253   : > { %9363 = vmatpush.bf16.msrb.mxu2 %v8718_v18  ;;  %9376 = vmatpush.bf16.msrb.mxu3 %v8721_v19  ;;  %v13461_v18 = vor.u32 %v17128_v6, %v13458_v9  ;;  %v12808_v19 = vld [vmem:[%s18935_s22 + $0x550] sm:$0xf]  ;;  %v7391_v49 = vpack.c.b16 %v6095_v33, %v6095_v33  ;;  %v16077_v6 = vor.u32 %v17779_v63, %v16074_v0  ;;  %v15424_v9 = vld [vmem:[%s18935_s22 + $0x19a8] sm:$0xf]  ;;  %v17292_v33 = vld [vmem:[%s18935_s22 + $0xf84] sm:$0xf] }
 0x254   : > { %9389 = vmatpush.bf16.msra.mxu0 %v8724_v20  ;;  %9402 = vmatpush.bf16.msra.mxu1 %v8727_v21  ;;  %v17047_v20 = vld [vmem:[%s18935_s22 + $0x7d4] sm:$0xf0]  ;;  %v16966_v21 = vld [vmem:[%s18935_s22 + $0x554] sm:$0xf] }
 0x255   : > { %16644 = vmatmul.msk.bf16.vlgmr.msrb.gmra.mxu0 %vm8664_vm9, %v19267_v12  ;;  %16645 = vmatmul.msk.bf16.vlgmr.msrb.gmra.mxu1 %vm8664_vm9, %v19267_v12  ;;  %v12809_v34 = vor.u32 %v17047_v20, %v12808_v19  ;;  %v8739_v56 = vsel %vm8668_vm3, %v7391_v49, 0  ;;  %v15429_v19 = vor.u32 %v17617_v11, %v15426_v13  ;;  %v17454_v20 = vld [vmem:[%s18935_s22 + $0x1494] sm:$0xf]  ;;  %v17131_v49 = vld [vmem:[%s18935_s22 + $0xa7c] sm:$0xf] }
 0x256   : > { %v12834_v63 = vld [vmem:[%s18935_s22 + $0x7f0] sm:$0xf0]  ;;  %v12178_v11 = vld [vmem:[%s18935_s22 + $0x2d8] sm:$0xf0]  ;;  %v12184_v13 = vld [vmem:[%s18935_s22 + $0x58] sm:$0xf] }
 0x257   : > { %9364 = vmatpush.bf16.msrb.mxu2 %v16049_v31  ;;  %9377 = vmatpush.bf16.msrb.mxu3 %v16053_v32  ;;  %v12818_v31 = vld [vmem:[%s18935_s22 + $0x7e0] sm:$0xf0]  ;;  %v6094_v32 = vunpack.c.l.b16 %v2153_v16  ;;  %v14768_v16 = vld [vmem:[%s18935_s22 + $0x1490] sm:$0xf] }
 0x258   : > { %9390 = vmatpush.bf16.msra.mxu0 %v16057_v35  ;;  %9403 = vmatpush.bf16.msra.mxu1 %v16061_v36  ;;  %v12813_v35 = vor.u32 %v16966_v21, %v12810_v25  ;;  %v12817_v36 = vor.u32 %v17048_v27, %v12816_v26  ;;  %v12821_v39 = vor.u32 %v16967_v30, %v12818_v31  ;;  %v14770_v21 = vld [vmem:[%s18935_s22 + $0x1718] sm:$0xf0]  ;;  %v14778_v26 = vld [vmem:[%s18935_s22 + $0x1720] sm:$0xf0]  ;;  %v17373_v30 = vld [vmem:[%s18935_s22 + $0x1204] sm:$0xf0] }
 0x259   : > { %v17455_v25 = vld [vmem:[%s18935_s22 + $0x149c] sm:$0xf] }
 0x25b   : > { %9365 = vmatpush.bf16.msrb.mxu2 %v15401_v43  ;;  %9378 = vmatpush.bf16.msrb.mxu3 %v15405_v44  ;;  %v7388_v43 = vpack.c.b16 %v6092_v28, %v6092_v28  ;;  %v7389_v44 = vpack.c.b16 %v6093_v29, %v6093_v29  ;;  %v14773_v28 = vor.u32 %v17454_v20, %v14770_v21  ;;  %v14120_v29 = vld [vmem:[%s18935_s22 + $0xf80] sm:$0xf] }
 0x25c   : > { %9391 = vmatpush.bf16.msra.mxu0 %v15409_v47  ;;  %9404 = vmatpush.bf16.msra.mxu1 %v15413_v48  ;;  %v12170_v47 = vld [vmem:[%s18935_s22 + $0x2d0] sm:$0xf0]  ;;  %v7390_v48 = vpack.c.b16 %v6094_v32, %v6094_v32  ;;  %v14781_v32 = vor.u32 %v17455_v25, %v14778_v26  ;;  %v14121_v40 = vor.u32 %v17373_v30, %v14120_v29  ;;  %v16080_v29 = vld [vmem:[%s18935_s22 + $0x1ec0] sm:$0xf]  ;;  %v17861_v30 = vld [vmem:[%s18935_s22 + $0x2144] sm:$0xf0] }
 0x25d   : > { %v12173_v53 = vor.u32 %v16805_v46, %v12170_v47  ;;  %v8730_v54 = vsel %vm8668_vm3, %v7388_v43, 0  ;;  %v17130_v43 = vld [vmem:[%s18935_s22 + $0xa74] sm:$0xf]  ;;  %v14133_v46 = vor.u32 %v17293_v37, %v14130_v38  ;;  %v13480_v47 = vld [vmem:[%s18935_s22 + $0xa78] sm:$0xf] }
 0x25e   : > { %v16090_v37 = vld [vmem:[%s18935_s22 + $0x2150] sm:$0xf0] }
 0x25f   : > { %9366 = vmatpush.bf16.msrb.mxu2 %v14753_v55  ;;  %9379 = vmatpush.bf16.msrb.mxu3 %v14757_v22  ;;  %v8733_v55 = vsel %vm8668_vm3, %v7389_v44, 0  ;;  %v8736_v22 = vsel %vm8668_vm3, %v7390_v48, 0  ;;  %v13474_v44 = vld [vmem:[%s18935_s22 + $0xcf8] sm:$0xf0]  ;;  %v17212_v48 = vld [vmem:[%s18935_s22 + $0xcfc] sm:$0xf0] }
 0x260   : > { %9392 = vmatpush.bf16.msra.mxu0 %v14761_v58  ;;  %9405 = vmatpush.bf16.msra.mxu1 %v14765_v59  ;;  %v17859_v58 = vld [vmem:[%s18935_s22 + $0x2134] sm:$0xf0]  ;;  %v17778_v59 = vld [vmem:[%s18935_s22 + $0x1eb4] sm:$0xf] }
 0x261   : > { %v16065_v1 = vor.u32 %v17859_v58, %v16064_v57  ;;  %v16968_v57 = vld [vmem:[%s18935_s22 + $0x564] sm:$0xf]  ;;  %v12826_v58 = vld [vmem:[%s18935_s22 + $0x7e8] sm:$0xf0]  ;;  %v19573_v38 = vld [vmem:[%s19570_s13] sm:$0xff] }
 0x263   : > { %9367 = vmatpush.bf16.msrb.mxu2 %v14105_v2  ;;  %9380 = vmatpush.bf16.msrb.mxu3 %v14109_v3  ;;  %v16069_v2 = vor.u32 %v17778_v59, %v16066_v60  ;;  %v15416_v3 = vld [vmem:[%s18935_s22 + $0x19a0] sm:$0xf]  ;;  %v12832_v59 = vld [vmem:[%s18935_s22 + $0x568] sm:$0xf] }
 0x264   : > { %9393 = vmatpush.bf16.msra.mxu0 %v14113_v7  ;;  %9406 = vmatpush.bf16.msra.mxu1 %v14117_v8  ;;  %v17616_v7 = vld [vmem:[%s18935_s22 + $0x19a4] sm:$0xf]  ;;  %v15418_v8 = vld [vmem:[%s18935_s22 + $0x1c28] sm:$0xf0]  ;;  %v15417_v14 = vor.u32 %v17697_v4, %v15416_v3  ;;  %v12829_v4 = vor.u32 %v16968_v57, %v12826_v58  ;;  %v14784_v57 = vld [vmem:[%s18935_s22 + $0x14a0] sm:$0xf] }
 0x265   : > { %v15421_v15 = vor.u32 %v17616_v7, %v15418_v8  ;;  %v12176_v7 = vld [vmem:[%s18935_s22 + $0x50] sm:$0xf]  ;;  %v16887_v8 = vld [vmem:[%s18935_s22 + $0x2d4] sm:$0xf0]  ;;  %v17537_v58 = vld [vmem:[%s18935_s22 + $0x1724] sm:$0xf0] }
 0x266   : > { %v12177_v20 = vor.u32 %v16887_v8, %v12176_v7  ;;  %v14136_v8 = vld [vmem:[%s18935_s22 + $0xf90] sm:$0xf] }
 0x267   : > { %9368 = vmatpush.bf16.msrb.mxu2 %v13457_v17  ;;  %9381 = vmatpush.bf16.msrb.mxu3 %v13461_v18  ;;  %v17535_v17 = vld [vmem:[%s18935_s22 + $0x1714] sm:$0xf0]  ;;  %v15425_v18 = vor.u32 %v17698_v10, %v15424_v9  ;;  %v16806_v9 = vld [vmem:[%s18935_s22 + $0x54] sm:$0xf] }
 0x268   : > { %9394 = vmatpush.bf16.msra.mxu0 %v13465_v23  ;;  %9407 = vmatpush.bf16.msra.mxu1 %v13469_v24  ;;  %v14776_v23 = vld [vmem:[%s18935_s22 + $0x1498] sm:$0xf]  ;;  %v17536_v24 = vld [vmem:[%s18935_s22 + $0x171c] sm:$0xf0]  ;;  %v14769_v27 = vor.u32 %v17535_v17, %v14768_v16  ;;  %v12181_v21 = vor.u32 %v16806_v9, %v12178_v11 }
 0x269   : > { %v14777_v31 = vor.u32 %v17536_v24, %v14776_v23  ;;  %v17375_v9 = vld [vmem:[%s18935_s22 + $0x1214] sm:$0xf0] }
 0x26b   : > { %9369 = vmatpush.bf16.msrb.mxu2 %v12809_v34  ;;  %9382 = vmatpush.bf16.msrb.mxu3 %v12813_v35  ;;  %v14122_v34 = vld [vmem:[%s18935_s22 + $0x1208] sm:$0xf0]  ;;  %v14128_v35 = vld [vmem:[%s18935_s22 + $0xf88] sm:$0xf] }
 0x26c   : > { %9395 = vmatpush.bf16.msra.mxu0 %v12817_v36  ;;  %9408 = vmatpush.bf16.msra.mxu1 %v12821_v39  ;;  %v17374_v36 = vld [vmem:[%s18935_s22 + $0x120c] sm:$0xf0]  ;;  %v14125_v41 = vor.u32 %v17292_v33, %v14122_v34  ;;  %v16088_v33 = vld [vmem:[%s18935_s22 + $0x1ec8] sm:$0xf] }
 0x26d   : > { %v13472_v39 = vld [vmem:[%s18935_s22 + $0xa70] sm:$0xf]  ;;  %v14129_v45 = vor.u32 %v17374_v36, %v14128_v35  ;;  %v17781_v36 = vld [vmem:[%s18935_s22 + $0x1ecc] sm:$0xf] }
 0x26e   : > { %v17862_v34 = vld [vmem:[%s18935_s22 + $0x214c] sm:$0xf0] }
 0x26f   : > { %9370 = vmatpush.bf16.msrb.mxu2 %v12161_v50  ;;  %9383 = vmatpush.bf16.msrb.mxu3 %v12165_v51  ;;  %v13482_v50 = vld [vmem:[%s18935_s22 + $0xd00] sm:$0xf0]  ;;  %v2154_v51 = vld [vmem:[%s18935_s22 + $0x23d0] sm:$0xff] }
 0x270   : > { %9396 = vmatpush.bf16.msra.mxu0 %v12169_v52  ;;  %9409 = vmatpush.bf16.msra.mxu1 %v12173_v53  ;;  %v2155_v52 = vld [vmem:[%s18935_s22 + $0x23d8] sm:$0xff]  ;;  %v12824_v53 = vld [vmem:[%s18935_s22 + $0x560] sm:$0xf]  ;;  %v13485_v60 = vor.u32 %v17131_v49, %v13482_v50  ;;  %v6096_v0 = vunpack.c.l.b16 %v2154_v51  ;;  %v2267_v49 = vperm.slane %v19573_v38, 2  ;;  %v2268_v50 = vperm.slane %v19573_v38, 3 }
 0x271   : > { %v6099_v10 = vunpack.c.h.b16 %v2155_v52 }
 0x272   : > { %16646 = vmatmul.msk.bf16.vlgmr.msrb.gmra.mxu2 %vm8664_vm9, %v19267_v12  ;;  %16647 = vmatmul.msk.bf16.vlgmr.msrb.gmra.mxu3 %vm8664_vm9, %v19267_v12 }
 0x273   : > { %9415 = vmatpush.bf16.msra.mxu2 %v8730_v54  ;;  %9428 = vmatpush.bf16.msra.mxu3 %v8733_v55  ;;  %v17049_v54 = vld [vmem:[%s18935_s22 + $0x7e4] sm:$0xf0]  ;;  %v13473_v55 = vor.u32 %v17211_v42, %v13472_v39  ;;  %v7395_v24 = vpack.c.b16 %v6099_v10, %v6099_v10  ;;  %v15432_v39 = vld [vmem:[%s18935_s22 + $0x19b0] sm:$0xf]  ;;  %v17699_v42 = vld [vmem:[%s18935_s22 + $0x1c34] sm:$0xf0] }
 0x274   : > { %9441 = vmatpush.bf16.msrb.mxu0 %v8736_v22  ;;  %9454 = vmatpush.bf16.msrb.mxu1 %v8739_v56  ;;  %v13477_v22 = vor.u32 %v17130_v43, %v13474_v44  ;;  %v13481_v56 = vor.u32 %v17212_v48, %v13480_v47  ;;  %v12825_v3 = vor.u32 %v17049_v54, %v12824_v53  ;;  %v17618_v43 = vld [vmem:[%s18935_s22 + $0x19b4] sm:$0xf]  ;;  %v15434_v44 = vld [vmem:[%s18935_s22 + $0x1c38] sm:$0xf0]  ;;  %v15440_v47 = vld [vmem:[%s18935_s22 + $0x19b8] sm:$0xf] }
 0x275   : > { %16648 = vmatmul.msk.bf16.vlgmr.msra.gmra.mxu0 %vm8664_vm9, %v19267_v12  ;;  %16649 = vmatmul.msk.bf16.vlgmr.msra.gmra.mxu1 %vm8664_vm9, %v19267_v12  ;;  %v8751_v35 = vsel %vm8668_vm3, %v7395_v24, 0  ;;  %v17700_v48 = vld [vmem:[%s18935_s22 + $0x1c3c] sm:$0xf0]  ;;  %v15433_v53 = vor.u32 %v17699_v42, %v15432_v39  ;;  %v15437_v54 = vor.u32 %v17618_v43, %v15434_v44  ;;  %v17133_v39 = vld [vmem:[%s18935_s22 + $0xa8c] sm:$0xf] }
 0x276   : > { %v13488_v24 = vld [vmem:[%s18935_s22 + $0xa80] sm:$0xf]  ;;  %v12840_v44 = vld [vmem:[%s18935_s22 + $0x570] sm:$0xf] }
 0x277   : > { %9416 = vmatpush.bf16.msra.mxu2 %v16065_v1  ;;  %9429 = vmatpush.bf16.msra.mxu3 %v16069_v2  ;;  %v6097_v1 = vunpack.c.h.b16 %v2154_v51  ;;  %v6098_v2 = vunpack.c.l.b16 %v2155_v52  ;;  %v17619_v51 = vld [vmem:[%s18935_s22 + $0x19bc] sm:$0xf]  ;;  %v15442_v52 = vld [vmem:[%s18935_s22 + $0x1c40] sm:$0xf0] }
 0x278   : > { %9442 = vmatpush.bf16.msrb.mxu0 %v16073_v5  ;;  %9455 = vmatpush.bf16.msrb.mxu1 %v16077_v6  ;;  %v12833_v5 = vor.u32 %v17050_v61, %v12832_v59  ;;  %v12837_v6 = vor.u32 %v16969_v62, %v12834_v63  ;;  %v17456_v59 = vld [vmem:[%s18935_s22 + $0x14a4] sm:$0xf]  ;;  %v14786_v63 = vld [vmem:[%s18935_s22 + $0x1728] sm:$0xf0] }
 0x279   : > { %v7393_v16 = vpack.c.b16 %v6097_v1, %v6097_v1  ;;  %v7394_v17 = vpack.c.b16 %v6098_v2, %v6098_v2  ;;  %v17538_v1 = vld [vmem:[%s18935_s22 + $0x172c] sm:$0xf0]  ;;  %v17457_v2 = vld [vmem:[%s18935_s22 + $0x14ac] sm:$0xf]  ;;  %v14789_v7 = vor.u32 %v17456_v59, %v14786_v63  ;;  %v2272_v59 = vperm.slane %v19573_v38, 7 }
 0x27b   : > { %9417 = vmatpush.bf16.msra.mxu2 %v15417_v14  ;;  %9430 = vmatpush.bf16.msra.mxu3 %v15421_v15  ;;  %v16888_v14 = vld [vmem:[%s18935_s22 + $0x2dc] sm:$0xf0]  ;;  %v7392_v15 = vpack.c.b16 %v6096_v0, %v6096_v0  ;;  %v14792_v0 = vld [vmem:[%s18935_s22 + $0x14a8] sm:$0xf] }
 0x27c   : > { %9443 = vmatpush.bf16.msrb.mxu0 %v15425_v18  ;;  %9456 = vmatpush.bf16.msrb.mxu1 %v15429_v19  ;;  %v16807_v18 = vld [vmem:[%s18935_s22 + $0x5c] sm:$0xf]  ;;  %v12186_v19 = vld [vmem:[%s18935_s22 + $0x2e0] sm:$0xf0]  ;;  %v12185_v23 = vor.u32 %v16888_v14, %v12184_v13  ;;  %v14793_v10 = vor.u32 %v17538_v1, %v14792_v0 }
 0x27d   : > { %v12189_v25 = vor.u32 %v16807_v18, %v12186_v19  ;;  %v8742_v26 = vsel %vm8668_vm3, %v7392_v15, 0  ;;  %v17294_v15 = vld [vmem:[%s18935_s22 + $0xf94] sm:$0xf]  ;;  %v17376_v19 = vld [vmem:[%s18935_s22 + $0x121c] sm:$0xf0] }
 0x27f   : > { %9418 = vmatpush.bf16.msra.mxu2 %v14769_v27  ;;  %9431 = vmatpush.bf16.msra.mxu3 %v14773_v28  ;;  %v8745_v27 = vsel %vm8668_vm3, %v7393_v16, 0  ;;  %v8748_v28 = vsel %vm8668_vm3, %v7394_v17, 0  ;;  %v14138_v16 = vld [vmem:[%s18935_s22 + $0x1218] sm:$0xf0]  ;;  %v14144_v17 = vld [vmem:[%s18935_s22 + $0xf98] sm:$0xf] }
 0x280   : > { %9444 = vmatpush.bf16.msrb.mxu0 %v14777_v31  ;;  %9457 = vmatpush.bf16.msrb.mxu1 %v14781_v32  ;;  %v17780_v31 = vld [vmem:[%s18935_s22 + $0x1ec4] sm:$0xf]  ;;  %v16082_v32 = vld [vmem:[%s18935_s22 + $0x2148] sm:$0xf0] }
 0x283   : > { %9419 = vmatpush.bf16.msra.mxu2 %v14121_v40  ;;  %9432 = vmatpush.bf16.msra.mxu3 %v14125_v41  ;;  %v16081_v40 = vor.u32 %v17861_v30, %v16080_v29  ;;  %v16085_v41 = vor.u32 %v17780_v31, %v16082_v32  ;;  %v17213_v29 = vld [vmem:[%s18935_s22 + $0xd04] sm:$0xf0]  ;;  %v17132_v30 = vld [vmem:[%s18935_s22 + $0xa84] sm:$0xf]  ;;  %v13490_v31 = vld [vmem:[%s18935_s22 + $0xd08] sm:$0xf0]  ;;  %v14145_v32 = vor.u32 %v17376_v19, %v14144_v17 }
 0x284   : > { %9445 = vmatpush.bf16.msrb.mxu0 %v14129_v45  ;;  %9458 = vmatpush.bf16.msrb.mxu1 %v14133_v46  ;;  %v16089_v45 = vor.u32 %v17862_v34, %v16088_v33  ;;  %v16093_v46 = vor.u32 %v17781_v36, %v16090_v37  ;;  %v13496_v34 = vld [vmem:[%s18935_s22 + $0xa88] sm:$0xf]  ;;  %v2156_v36 = vld [vmem:[%s18935_s22 + $0x23e0] sm:$0xff]  ;;  %v13489_v43 = vor.u32 %v17213_v29, %v13488_v24  ;;  %v12194_v17 = vld [vmem:[%s18935_s22 + $0x2e8] sm:$0xf0] }
 0x285   : > { %v16890_v19 = vld [vmem:[%s18935_s22 + $0x2ec] sm:$0xf0]  ;;  %v16809_v24 = vld [vmem:[%s18935_s22 + $0x6c] sm:$0xf] }
 0x287   : > { %9420 = vmatpush.bf16.msra.mxu2 %v13473_v55  ;;  %9433 = vmatpush.bf16.msra.mxu3 %v13477_v22  ;;  %v15441_v55 = vor.u32 %v17700_v48, %v15440_v47  ;;  %v13493_v47 = vor.u32 %v17132_v30, %v13490_v31  ;;  %v2269_v30 = vperm.slane %v19573_v38, 4 }
 0x288   : > { %9446 = vmatpush.bf16.msrb.mxu0 %v13481_v56  ;;  %9459 = vmatpush.bf16.msrb.mxu1 %v13485_v60  ;;  %v15445_v60 = vor.u32 %v17619_v51, %v15442_v52  ;;  %v17052_v51 = vld [vmem:[%s18935_s22 + $0x7fc] sm:$0xf0]  ;;  %v6100_v52 = vunpack.c.l.b16 %v2156_v36 }
 0x28b   : > { %9421 = vmatpush.bf16.msra.mxu2 %v12825_v3  ;;  %9434 = vmatpush.bf16.msra.mxu3 %v12829_v4  ;;  %v14794_v3 = vld [vmem:[%s18935_s22 + $0x1730] sm:$0xf0]  ;;  %v2266_v4 = vperm.slane %v19573_v38, 1 }
 0x28c   : > { %9447 = vmatpush.bf16.msrb.mxu0 %v12833_v5  ;;  %9460 = vmatpush.bf16.msrb.mxu1 %v12837_v6  ;;  %v2265_v5 = vperm.slane %v19573_v38, 0  ;;  %v14785_v6 = vor.u32 %v17537_v58, %v14784_v57  ;;  %v14797_v11 = vor.u32 %v17457_v2, %v14794_v3  ;;  %v12850_v57 = vld [vmem:[%s18935_s22 + $0x800] sm:$0xf0]  ;;  %v2271_v58 = vperm.slane %v19573_v38, 6 }
 0x28f   : > { %9422 = vmatpush.bf16.msra.mxu2 %v12177_v20  ;;  %9435 = vmatpush.bf16.msra.mxu3 %v12181_v21  ;;  %v9190_v22 = vpop.f32.mrf.mxu0  ;;  %v9203_v56 = vpop.f32.mrf.mxu1  ;;  %v17295_v20 = vld [vmem:[%s18935_s22 + $0xf9c] sm:$0xf]  ;;  %v14146_v21 = vld [vmem:[%s18935_s22 + $0x1220] sm:$0xf0] }
 0x290   : > { %9448 = vmatpush.bf16.msrb.mxu0 %v12185_v23  ;;  %9461 = vmatpush.bf16.msrb.mxu1 %v12189_v25  ;;  %v9191_v61 = vadd.f32 %v9190_v22, %v2267_v49  ;;  %v9204_v62 = vadd.f32 %v9203_v56, %v2268_v50  ;;  %v14137_v25 = vor.u32 %v17375_v9, %v14136_v8  ;;  %v12842_v49 = vld [vmem:[%s18935_s22 + $0x7f8] sm:$0xf0]  ;;  %v12848_v50 = vld [vmem:[%s18935_s22 + $0x578] sm:$0xf]  ;;  %v16889_v9 = vld [vmem:[%s18935_s22 + $0x2e4] sm:$0xf0] }
 0x291   : > { %v14149_v33 = vor.u32 %v17295_v20, %v14146_v21  ;;  %v16971_v56 = vld [vmem:[%s18935_s22 + $0x57c] sm:$0xf]  ;;  %v12849_v3 = vor.u32 %v17052_v51, %v12848_v50  ;;  %v16106_v51 = vld [vmem:[%s18935_s22 + $0x2160] sm:$0xf0] }
 0x292   : > { %16650 = vmatmul.msk.bf16.vlgmr.msra.gmra.mxu2 %vm8664_vm9, %v19267_v12  ;;  %16651 = vmatmul.msk.bf16.vlgmr.msra.gmra.mxu3 %vm8664_vm9, %v19267_v12  ;;  %18056 = vtanh.f32 %v9191_v61  ;;  %v17783_v50 = vld [vmem:[%s18935_s22 + $0x1edc] sm:$0xf] }
 0x293   : > { %9467 = vmatpush.bf16.msrb.mxu2 %v8742_v26  ;;  %9480 = vmatpush.bf16.msrb.mxu3 %v8745_v27  ;;  %18058 = vtanh.f32 %v9204_v62  ;;  %v14141_v26 = vor.u32 %v17294_v15, %v14138_v16 }
 0x294   : > { %9493 = vmatpush.bf16.msra.mxu0 %v8748_v28  ;;  %9506 = vmatpush.bf16.msra.mxu1 %v8751_v35  ;;  %v9164_v13 = vpop.f32.mrf.mxu2  ;;  %v9177_v14 = vpop.f32.mrf.mxu3  ;;  %v17214_v35 = vld [vmem:[%s18935_s22 + $0xd0c] sm:$0xf0] }
 0x295   : > { %16652 = vmatmul.msk.bf16.vlgmr.msrb.gmra.mxu0 %vm8664_vm9, %v19267_v12  ;;  %16653 = vmatmul.msk.bf16.vlgmr.msrb.gmra.mxu1 %vm8664_vm9, %v19267_v12  ;;  %v9178_v18 = vadd.f32 %v9177_v14, %v2266_v4  ;;  %v9165_v23 = vadd.f32 %v9164_v13, %v2265_v5  ;;  %v13497_v48 = vor.u32 %v17214_v35, %v13496_v34  ;;  %v12192_v4 = vld [vmem:[%s18935_s22 + $0x60] sm:$0xf] }
 0x296   : > { %v12193_v29 = vor.u32 %v16889_v9, %v12192_v4 }
 0x297   : > { %9468 = vmatpush.bf16.msrb.mxu2 %v16081_v40  ;;  %9481 = vmatpush.bf16.msrb.mxu3 %v16085_v41  ;;  %v9192_v27 = vpop.f32.mrf.mxu0  ;;  %v9205_v28 = vpop.f32.mrf.mxu1  ;;  %18060 = vtanh.f32 %v9178_v18  ;;  %v13498_v40 = vld [vmem:[%s18935_s22 + $0xd10] sm:$0xf0]  ;;  %v2157_v41 = vld [vmem:[%s18935_s22 + $0x23e8] sm:$0xff] }
 0x298   : > { %9494 = vmatpush.bf16.msra.mxu0 %v16089_v45  ;;  %9507 = vmatpush.bf16.msra.mxu1 %v16093_v46  ;;  %v18057_v37 = vpop.eup %18056  ;;  %18062 = vtanh.f32 %v9165_v23  ;;  %v17051_v45 = vld [vmem:[%s18935_s22 + $0x7f4] sm:$0xf0]  ;;  %v16970_v46 = vld [vmem:[%s18935_s22 + $0x574] sm:$0xf]  ;;  %v6103_v63 = vunpack.c.h.b16 %v2157_v41  ;;  %v12200_v18 = vld [vmem:[%s18935_s22 + $0x68] sm:$0xf] }
 0x299   : > { %v18059_v42 = vpop.eup %18058  ;;  %v11586_v61 = vrot.slane %v18057_v37, 4  ;;  %v12841_v1 = vor.u32 %v17051_v45, %v12840_v44  ;;  %v12845_v2 = vor.u32 %v16970_v46, %v12842_v49  ;;  %v2270_v27 = vperm.slane %v19573_v38, 5  ;;  %v17782_v44 = vld [vmem:[%s18935_s22 + $0x1ed4] sm:$0xf]  ;;  %v16098_v45 = vld [vmem:[%s18935_s22 + $0x2158] sm:$0xf0] }
 0x29a   : > { %v11587_v62 = vrot.slane %v18059_v42, 2  ;;  %v17863_v42 = vld [vmem:[%s18935_s22 + $0x2154] sm:$0xf0]  ;;  %v17864_v49 = vld [vmem:[%s18935_s22 + $0x215c] sm:$0xf0] }
 0x29b   : > { %9469 = vmatpush.bf16.msrb.mxu2 %v15433_v53  ;;  %9482 = vmatpush.bf16.msrb.mxu3 %v15437_v54  ;;  %v6101_v53 = vunpack.c.h.b16 %v2156_v36  ;;  %v13501_v54 = vor.u32 %v17133_v39, %v13498_v40  ;;  %v16104_v46 = vld [vmem:[%s18935_s22 + $0x1ed8] sm:$0xf] }
 0x29c   : > { %9495 = vmatpush.bf16.msra.mxu0 %v15441_v55  ;;  %9508 = vmatpush.bf16.msra.mxu1 %v15445_v60  ;;  %v9166_v55 = vpop.f32.mrf.mxu2  ;;  %v9179_v22 = vpop.f32.mrf.mxu3  ;;  %v6102_v60 = vunpack.c.l.b16 %v2157_v41  ;;  %v11709_v21 = vsel %vm11708_vm10, %v11586_v61, %v11587_v62  ;;  %v16096_v41 = vld [vmem:[%s18935_s22 + $0x1ed0] sm:$0xf]  ;;  %v15456_v61 = vld [vmem:[%s18935_s22 + $0x19c8] sm:$0xf] }
 0x29d   : > { %v18061_v0 = vpop.eup %18060  ;;  %v7397_v13 = vpack.c.b16 %v6101_v53, %v6101_v53  ;;  %v16101_v55 = vor.u32 %v17782_v44, %v16098_v45  ;;  %v17701_v22 = vld [vmem:[%s18935_s22 + $0x1c44] sm:$0xf0]  ;;  %v17702_v62 = vld [vmem:[%s18935_s22 + $0x1c4c] sm:$0xf0] }
 0x29e   : > { %v11585_v5 = vrot.slane %v18061_v0, 6  ;;  %v18063_v14 = vpop.eup %18062  ;;  %v7398_v20 = vpack.c.b16 %v6102_v60, %v6102_v60  ;;  %v16109_v60 = vor.u32 %v17783_v50, %v16106_v51  ;;  %v15458_v0 = vld [vmem:[%s18935_s22 + $0x1c50] sm:$0xf0]  ;;  %v13506_v51 = vld [vmem:[%s18935_s22 + $0xd18] sm:$0xf0] }
 0x29f   : > { %9470 = vmatpush.bf16.msrb.mxu2 %v14785_v6  ;;  %9483 = vmatpush.bf16.msrb.mxu3 %v14789_v7  ;;  %v12853_v6 = vor.u32 %v16971_v56, %v12850_v57  ;;  %v9242_v7 = vpop.f32.mrf.mxu0  ;;  %v9255_v8 = vpop.f32.mrf.mxu1  ;;  %v8757_v34 = vsel %vm8668_vm3, %v7397_v13, 0  ;;  %v17620_v56 = vld [vmem:[%s18935_s22 + $0x19c4] sm:$0xf]  ;;  %v15450_v57 = vld [vmem:[%s18935_s22 + $0x1c48] sm:$0xf0] }
 0x2a0   : > { %9496 = vmatpush.bf16.msra.mxu0 %v14793_v10  ;;  %9509 = vmatpush.bf16.msra.mxu1 %v14797_v11  ;;  %v16808_v10 = vld [vmem:[%s18935_s22 + $0x64] sm:$0xf]  ;;  %v7396_v11 = vpack.c.b16 %v6100_v52, %v6100_v52  ;;  %v9243_v15 = vadd.f32 %v9242_v7, %v2271_v58  ;;  %v9256_v16 = vadd.f32 %v9255_v8, %v2272_v59  ;;  %v8760_v37 = vsel %vm8668_vm3, %v7398_v20, 0  ;;  %v15448_v52 = vld [vmem:[%s18935_s22 + $0x19c0] sm:$0xf] }
 0x2a1   : > { %v11707_v23 = vsel %vm11706_vm11, %v18063_v14, %v11585_v5  ;;  %v12197_v31 = vor.u32 %v16808_v10, %v12194_v17  ;;  %v16105_v59 = vor.u32 %v17864_v49, %v16104_v46  ;;  %v17539_v5 = vld [vmem:[%s18935_s22 + $0x1734] sm:$0xf0]  ;;  %v14802_v7 = vld [vmem:[%s18935_s22 + $0x1738] sm:$0xf0]  ;;  %v15449_v10 = vor.u32 %v17701_v22, %v15448_v52  ;;  %v17540_v14 = vld [vmem:[%s18935_s22 + $0x173c] sm:$0xf0] }
 0x2a2   : > { %v11710_v28 = vsel %vm8668_vm3, %v11707_v23, %v11709_v21  ;;  %18064 = vtanh.f32 %v9243_v15  ;;  %v8754_v38 = vsel %vm8668_vm3, %v7396_v11, 0  ;;  %v15453_v11 = vor.u32 %v17620_v56, %v15450_v57  ;;  %v14808_v13 = vld [vmem:[%s18935_s22 + $0x14b8] sm:$0xf]  ;;  %v17459_v20 = vld [vmem:[%s18935_s22 + $0x14bc] sm:$0xf] }
 0x2a3   : > { %9471 = vmatpush.bf16.msrb.mxu2 %v14137_v25  ;;  %9484 = vmatpush.bf16.msrb.mxu3 %v14141_v26  ;;  %v12202_v25 = vld [vmem:[%s18935_s22 + $0x2f0] sm:$0xf0]  ;;  %v7399_v26 = vpack.c.b16 %v6103_v63, %v6103_v63  ;;  %11870 = vst [vmem:[%s19647_s14] sm:$0xff] %v11710_v28  ;;  %18066 = vtanh.f32 %v9256_v16  ;;  %v17621_v63 = vld [vmem:[%s18935_s22 + $0x19cc] sm:$0xf]  ;;  %v15457_v16 = vor.u32 %v17702_v62, %v15456_v61  ;;  %v14810_v21 = vld [vmem:[%s18935_s22 + $0x1740] sm:$0xf0] }
 0x2a4   : > { %9497 = vmatpush.bf16.msra.mxu0 %v14145_v32  ;;  %9510 = vmatpush.bf16.msra.mxu1 %v14149_v33  ;;  %v12201_v32 = vor.u32 %v16890_v19, %v12200_v18  ;;  %v12205_v33 = vor.u32 %v16809_v24, %v12202_v25  ;;  %v9216_v35 = vpop.f32.mrf.mxu2  ;;  %v9229_v36 = vpop.f32.mrf.mxu3  ;;  %v15461_v17 = vor.u32 %v17621_v63, %v15458_v0  ;;  %v13504_v46 = vld [vmem:[%s18935_s22 + $0xa90] sm:$0xf]  ;;  %v17134_v50 = vld [vmem:[%s18935_s22 + $0xa94] sm:$0xf]  ;;  %v13512_v52 = vld [vmem:[%s18935_s22 + $0xa98] sm:$0xf] }
 0x2a5   : > { %v8763_v39 = vsel %vm8668_vm3, %v7399_v26, 0  ;;  %v9230_v40 = vadd.f32 %v9229_v36, %v2270_v27  ;;  %v14809_v27 = vor.u32 %v17540_v14, %v14808_v13  ;;  %v17216_v56 = vld [vmem:[%s18935_s22 + $0xd1c] sm:$0xf0]  ;;  %v17135_v57 = vld [vmem:[%s18935_s22 + $0xa9c] sm:$0xf] }
 0x2a6   : > { %v2159_v61 = vld [vmem:[%s18935_s22 + $0x23f8] sm:$0xff]  ;;  %v12856_v0 = vld [vmem:[%s18935_s22 + $0x580] sm:$0xf]  ;;  %v16973_v13 = vld [vmem:[%s18935_s22 + $0x58c] sm:$0xf] }
 0x2a7   : > { %9472 = vmatpush.bf16.msrb.mxu2 %v13489_v43  ;;  %9485 = vmatpush.bf16.msrb.mxu3 %v13493_v47  ;;  %v9217_v43 = vadd.f32 %v9216_v35, %v2269_v30  ;;  %v9244_v47 = vpop.f32.mrf.mxu0  ;;  %18068 = vtanh.f32 %v9230_v40  ;;  %v14160_v40 = vld [vmem:[%s18935_s22 + $0xfa8] sm:$0xf]  ;;  %v12866_v14 = vld [vmem:[%s18935_s22 + $0x810] sm:$0xf0] }
 0x2a8   : > { %9498 = vmatpush.bf16.msra.mxu0 %v13497_v48  ;;  %9511 = vmatpush.bf16.msra.mxu1 %v13501_v54  ;;  %v9257_v48 = vpop.f32.mrf.mxu1  ;;  %v18065_v53 = vpop.eup %18064  ;;  %v16097_v54 = vor.u32 %v17863_v42, %v16096_v41  ;;  %v17378_v41 = vld [vmem:[%s18935_s22 + $0x122c] sm:$0xf0]  ;;  %v17297_v42 = vld [vmem:[%s18935_s22 + $0xfac] sm:$0xf]  ;;  %v17215_v47 = vld [vmem:[%s18935_s22 + $0xd14] sm:$0xf0] }
 0x2a9   : > { %v18067_v58 = vpop.eup %18066  ;;  %18070 = vtanh.f32 %v9217_v43  ;;  %v11589_v8 = vrot.slane %v18065_v53, 4  ;;  %v14162_v43 = vld [vmem:[%s18935_s22 + $0x1230] sm:$0xf0]  ;;  %v14161_v53 = vor.u32 %v17378_v41, %v14160_v40  ;;  %v13505_v63 = vor.u32 %v17215_v47, %v13504_v46  ;;  %v12218_v40 = vld [vmem:[%s18935_s22 + $0x300] sm:$0xf0] }
 0x2aa   : > { %v11590_v9 = vrot.slane %v18067_v58, 2  ;;  %v13514_v58 = vld [vmem:[%s18935_s22 + $0xd20] sm:$0xf0] }
 0x2ab   : > { %9473 = vmatpush.bf16.msrb.mxu2 %v12841_v1  ;;  %9486 = vmatpush.bf16.msrb.mxu3 %v12845_v2  ;;  %v19675_v1 = vld [vmem:[%s19570_s13 + $0x8] sm:$0xff]  ;;  %v14800_v2 = vld [vmem:[%s18935_s22 + $0x14b0] sm:$0xf] }
 0x2ac   : > { %9499 = vmatpush.bf16.msra.mxu0 %v12849_v3  ;;  %9512 = vmatpush.bf16.msra.mxu1 %v12853_v6  ;;  %v9218_v3 = vpop.f32.mrf.mxu2  ;;  %v9231_v4 = vpop.f32.mrf.mxu3  ;;  %v17458_v6 = vld [vmem:[%s18935_s22 + $0x14b4] sm:$0xf]  ;;  %v2275_v18 = vperm.slane %v19675_v1, 2  ;;  %v2276_v19 = vperm.slane %v19675_v1, 3  ;;  %v14801_v25 = vor.u32 %v17539_v5, %v14800_v2  ;;  %v11712_v28 = vsel %vm11708_vm10, %v11589_v8, %v11590_v9  ;;  %v17053_v2 = vld [vmem:[%s18935_s22 + $0x804] sm:$0xf0] }
 0x2ad   : > { %v18069_v15 = vpop.eup %18068  ;;  %v14805_v26 = vor.u32 %v17458_v6, %v14802_v7  ;;  %v2274_v44 = vperm.slane %v19675_v1, 1  ;;  %v2273_v45 = vperm.slane %v19675_v1, 0  ;;  %v13509_v5 = vor.u32 %v17134_v50, %v13506_v51  ;;  %v16972_v8 = vld [vmem:[%s18935_s22 + $0x584] sm:$0xf]  ;;  %v12858_v9 = vld [vmem:[%s18935_s22 + $0x808] sm:$0xf0] }
 0x2ae   : > { %v11588_v23 = vrot.slane %v18069_v15, 6  ;;  %v13513_v6 = vor.u32 %v17216_v56, %v13512_v52  ;;  %v13517_v7 = vor.u32 %v17135_v57, %v13514_v58  ;;  %v16114_v57 = vld [vmem:[%s18935_s22 + $0x2168] sm:$0xf0]  ;;  %v16120_v58 = vld [vmem:[%s18935_s22 + $0x1ee8] sm:$0xf] }
 0x2af   : > { %9474 = vmatpush.bf16.msrb.mxu2 %v12193_v29  ;;  %9487 = vmatpush.bf16.msrb.mxu3 %v12197_v31  ;;  %v18071_v24 = vpop.eup %18070 }
 0x2b0   : > { %9500 = vmatpush.bf16.msra.mxu0 %v12201_v32  ;;  %9513 = vmatpush.bf16.msra.mxu1 %v12205_v33  ;;  %v11711_v29 = vsel %vm11706_vm11, %v18071_v24, %v11588_v23  ;;  %v14813_v32 = vor.u32 %v17459_v20, %v14810_v21  ;;  %v14152_v33 = vld [vmem:[%s18935_s22 + $0xfa0] sm:$0xf]  ;;  %v12857_v20 = vor.u32 %v17053_v2, %v12856_v0  ;;  %v15464_v2 = vld [vmem:[%s18935_s22 + $0x19d0] sm:$0xf] }
 0x2b1   : > { %v11713_v35 = vsel %vm8668_vm3, %v11711_v29, %v11712_v28  ;;  %v12861_v21 = vor.u32 %v16972_v8, %v12858_v9  ;;  %v12869_v24 = vor.u32 %v16973_v13, %v12866_v14  ;;  %v6107_v28 = vunpack.c.h.b16 %v2159_v61  ;;  %v15472_v8 = vld [vmem:[%s18935_s22 + $0x19d8] sm:$0xf]  ;;  %v17704_v9 = vld [vmem:[%s18935_s22 + $0x1c5c] sm:$0xf0] }
 0x2b2   : > { %16654 = vmatmul.msk.bf16.vlgmr.msrb.gmra.mxu2 %vm8664_vm9, %v19267_v12  ;;  %16655 = vmatmul.msk.bf16.vlgmr.msrb.gmra.mxu3 %vm8664_vm9, %v19267_v12  ;;  %v9294_v30 = vpop.f32.mrf.mxu0  ;;  %v9307_v31 = vpop.f32.mrf.mxu1  ;;  %11871 = vst [vmem:[%s19647_s14 + $0x8] sm:$0xff] %v11713_v35  ;;  %v14816_v13 = vld [vmem:[%s18935_s22 + $0x14c0] sm:$0xf] }
 0x2b3   : > { %9519 = vmatpush.bf16.msra.mxu2 %v8754_v38  ;;  %9532 = vmatpush.bf16.msra.mxu3 %v8757_v34  ;;  %v17377_v38 = vld [vmem:[%s18935_s22 + $0x1224] sm:$0xf0]  ;;  %v17296_v34 = vld [vmem:[%s18935_s22 + $0xfa4] sm:$0xf]  ;;  %v9295_v36 = vadd.f32 %v9294_v30, %v2275_v18  ;;  %v7403_v46 = vpack.c.b16 %v6107_v28, %v6107_v28 }
 0x2b4   : > { %9545 = vmatpush.bf16.msrb.mxu0 %v8760_v37  ;;  %9558 = vmatpush.bf16.msrb.mxu1 %v8763_v39  ;;  %v9308_v37 = vadd.f32 %v9307_v31, %v2276_v19  ;;  %v14154_v39 = vld [vmem:[%s18935_s22 + $0x1228] sm:$0xf0]  ;;  %v14153_v48 = vor.u32 %v17377_v38, %v14152_v33  ;;  %v12210_v31 = vld [vmem:[%s18935_s22 + $0x2f8] sm:$0xf0]  ;;  %v16892_v33 = vld [vmem:[%s18935_s22 + $0x2fc] sm:$0xf0] }
 0x2b5   : > { %16656 = vmatmul.msk.bf16.vlgmr.msra.gmra.mxu0 %vm8664_vm9, %v19267_v12  ;;  %16657 = vmatmul.msk.bf16.vlgmr.msra.gmra.mxu1 %vm8664_vm9, %v19267_v12  ;;  %18072 = vtanh.f32 %v9295_v36  ;;  %v14157_v49 = vor.u32 %v17296_v34, %v14154_v39  ;;  %v9281_v22 = vpop.f32.mrf.mxu3  ;;  %v16811_v39 = vld [vmem:[%s18935_s22 + $0x7c] sm:$0xf] }
 0x2b6   : > { %18074 = vtanh.f32 %v9308_v37 }
 0x2b7   : > { %9520 = vmatpush.bf16.msra.mxu2 %v16097_v54  ;;  %9533 = vmatpush.bf16.msra.mxu3 %v16101_v55  ;;  %v14165_v54 = vor.u32 %v17297_v42, %v14162_v43  ;;  %v9268_v55 = vpop.f32.mrf.mxu2 }
 0x2b8   : > { %9546 = vmatpush.bf16.msrb.mxu0 %v16105_v59  ;;  %9559 = vmatpush.bf16.msrb.mxu1 %v16109_v60  ;;  %v9282_v59 = vadd.f32 %v9281_v22, %v2274_v44  ;;  %v2158_v60 = vld [vmem:[%s18935_s22 + $0x23f0] sm:$0xff]  ;;  %v9269_v62 = vadd.f32 %v9268_v55, %v2273_v45  ;;  %v17865_v55 = vld [vmem:[%s18935_s22 + $0x2164] sm:$0xf0]  ;;  %v17784_v22 = vld [vmem:[%s18935_s22 + $0x1ee4] sm:$0xf] }
 0x2b9   : > { %v6104_v15 = vunpack.c.l.b16 %v2158_v60  ;;  %v16117_v0 = vor.u32 %v17784_v22, %v16114_v57  ;;  %v17218_v22 = vld [vmem:[%s18935_s22 + $0xd2c] sm:$0xf0]  ;;  %v13530_v57 = vld [vmem:[%s18935_s22 + $0xd30] sm:$0xf0] }
 0x2ba   : > { %v9296_v3 = vpop.f32.mrf.mxu0  ;;  %v9309_v4 = vpop.f32.mrf.mxu1  ;;  %18076 = vtanh.f32 %v9282_v59  ;;  %v17866_v59 = vld [vmem:[%s18935_s22 + $0x216c] sm:$0xf0] }
 0x2bb   : > { %9521 = vmatpush.bf16.msra.mxu2 %v15449_v10  ;;  %9534 = vmatpush.bf16.msra.mxu3 %v15453_v11  ;;  %v12864_v10 = vld [vmem:[%s18935_s22 + $0x588] sm:$0xf]  ;;  %v17054_v11 = vld [vmem:[%s18935_s22 + $0x80c] sm:$0xf0]  ;;  %v18073_v18 = vpop.eup %18072  ;;  %18078 = vtanh.f32 %v9269_v62  ;;  %v7400_v38 = vpack.c.b16 %v6104_v15, %v6104_v15  ;;  %v16122_v62 = vld [vmem:[%s18935_s22 + $0x2170] sm:$0xf0]  ;;  %v16121_v4 = vor.u32 %v17866_v59, %v16120_v58 }
 0x2bc   : > { %9547 = vmatpush.bf16.msrb.mxu0 %v15457_v16  ;;  %9560 = vmatpush.bf16.msrb.mxu1 %v15461_v17  ;;  %v6105_v16 = vunpack.c.h.b16 %v2158_v60  ;;  %v6106_v17 = vunpack.c.l.b16 %v2159_v61  ;;  %v18075_v19 = vpop.eup %18074  ;;  %v12865_v23 = vor.u32 %v17054_v11, %v12864_v10  ;;  %v11592_v36 = vrot.slane %v18073_v18, 4  ;;  %v17785_v61 = vld [vmem:[%s18935_s22 + $0x1eec] sm:$0xf]  ;;  %v17703_v3 = vld [vmem:[%s18935_s22 + $0x1c54] sm:$0xf0]  ;;  %v2160_v59 = vld [vmem:[%s18935_s22 + $0x2400] sm:$0xff] }
 0x2bd   : > { %v9283_v30 = vpop.f32.mrf.mxu3  ;;  %v11593_v37 = vrot.slane %v18075_v19, 2  ;;  %v8775_v60 = vsel %vm8668_vm3, %v7403_v46, 0  ;;  %v17623_v10 = vld [vmem:[%s18935_s22 + $0x19dc] sm:$0xf]  ;;  %v15474_v11 = vld [vmem:[%s18935_s22 + $0x1c60] sm:$0xf0]  ;;  %v15465_v14 = vor.u32 %v17703_v3, %v15464_v2 }
 0x2be   : > { %v7401_v34 = vpack.c.b16 %v6105_v16, %v6105_v16  ;;  %v7402_v35 = vpack.c.b16 %v6106_v17, %v6106_v17  ;;  %v2279_v16 = vperm.slane %v19675_v1, 6  ;;  %v2280_v17 = vperm.slane %v19675_v1, 7  ;;  %v17541_v18 = vld [vmem:[%s18935_s22 + $0x1744] sm:$0xf0]  ;;  %v17460_v19 = vld [vmem:[%s18935_s22 + $0x14c4] sm:$0xf] }
 0x2bf   : > { %9522 = vmatpush.bf16.msra.mxu2 %v14801_v25  ;;  %9535 = vmatpush.bf16.msra.mxu3 %v14805_v26  ;;  %v12208_v25 = vld [vmem:[%s18935_s22 + $0x70] sm:$0xf]  ;;  %v16891_v26 = vld [vmem:[%s18935_s22 + $0x2f4] sm:$0xf0]  ;;  %v9270_v29 = vpop.f32.mrf.mxu2  ;;  %v11715_v52 = vsel %vm11708_vm10, %v11592_v36, %v11593_v37  ;;  %v14817_v30 = vor.u32 %v17541_v18, %v14816_v13  ;;  %v13520_v46 = vld [vmem:[%s18935_s22 + $0xaa0] sm:$0xf] }
 0x2c0   : > { %9548 = vmatpush.bf16.msrb.mxu0 %v14809_v27  ;;  %9561 = vmatpush.bf16.msrb.mxu1 %v14813_v32  ;;  %v16810_v27 = vld [vmem:[%s18935_s22 + $0x74] sm:$0xf]  ;;  %v12216_v32 = vld [vmem:[%s18935_s22 + $0x78] sm:$0xf]  ;;  %v18077_v41 = vpop.eup %18076  ;;  %v12209_v42 = vor.u32 %v16891_v26, %v12208_v25  ;;  %v8769_v50 = vsel %vm8668_vm3, %v7401_v34, 0  ;;  %v8772_v51 = vsel %vm8668_vm3, %v7402_v35, 0 }
 0x2c1   : > { %v11591_v43 = vrot.slane %v18077_v41, 6  ;;  %v12213_v44 = vor.u32 %v16810_v27, %v12210_v31  ;;  %v12217_v45 = vor.u32 %v16892_v33, %v12216_v32  ;;  %v18079_v47 = vpop.eup %18078  ;;  %v17542_v25 = vld [vmem:[%s18935_s22 + $0x174c] sm:$0xf0]  ;;  %v17461_v26 = vld [vmem:[%s18935_s22 + $0x14cc] sm:$0xf] }
 0x2c2   : > { %v14826_v27 = vld [vmem:[%s18935_s22 + $0x1750] sm:$0xf0]  ;;  %v14168_v33 = vld [vmem:[%s18935_s22 + $0xfb0] sm:$0xf]  ;;  %v17380_v41 = vld [vmem:[%s18935_s22 + $0x123c] sm:$0xf0] }
 0x2c3   : > { %9523 = vmatpush.bf16.msra.mxu2 %v14153_v48  ;;  %9536 = vmatpush.bf16.msra.mxu3 %v14157_v49  ;;  %v12221_v48 = vor.u32 %v16811_v39, %v12218_v40  ;;  %v8766_v49 = vsel %vm8668_vm3, %v7400_v38, 0  ;;  %v17379_v38 = vld [vmem:[%s18935_s22 + $0x1234] sm:$0xf0]  ;;  %v17298_v34 = vld [vmem:[%s18935_s22 + $0xfb4] sm:$0xf]  ;;  %v14829_v37 = vor.u32 %v17461_v26, %v14826_v27 }
 0x2c4   : > { %9549 = vmatpush.bf16.msrb.mxu0 %v14161_v53  ;;  %9562 = vmatpush.bf16.msrb.mxu1 %v14165_v54  ;;  %v11714_v53 = vsel %vm11706_vm11, %v18079_v47, %v11591_v43  ;;  %v16112_v54 = vld [vmem:[%s18935_s22 + $0x1ee0] sm:$0xf]  ;;  %v14170_v39 = vld [vmem:[%s18935_s22 + $0x1238] sm:$0xf0]  ;;  %v14176_v40 = vld [vmem:[%s18935_s22 + $0xfb8] sm:$0xf] }
 0x2c5   : > { %v11716_v56 = vsel %vm8668_vm3, %v11714_v53, %v11715_v52  ;;  %v14178_v43 = vld [vmem:[%s18935_s22 + $0x1240] sm:$0xf0]  ;;  %v17217_v47 = vld [vmem:[%s18935_s22 + $0xd24] sm:$0xf0] }
 0x2c6   : > { %11872 = vst [vmem:[%s19647_s14 + $0x10] sm:$0xff] %v11716_v56  ;;  %v13528_v52 = vld [vmem:[%s18935_s22 + $0xaa8] sm:$0xf]  ;;  %v17137_v56 = vld [vmem:[%s18935_s22 + $0xaac] sm:$0xf] }
 0x2c7   : > { %9524 = vmatpush.bf16.msra.mxu2 %v13505_v63  ;;  %9537 = vmatpush.bf16.msra.mxu3 %v13509_v5  ;;  %v16113_v63 = vor.u32 %v17865_v55, %v16112_v54  ;;  %v16125_v5 = vor.u32 %v17785_v61, %v16122_v62  ;;  %v13521_v62 = vor.u32 %v17217_v47, %v13520_v46  ;;  %v12882_v13 = vld [vmem:[%s18935_s22 + $0x820] sm:$0xf0] }
 0x2c8   : > { %9550 = vmatpush.bf16.msrb.mxu0 %v13513_v6  ;;  %9563 = vmatpush.bf16.msrb.mxu1 %v13517_v7  ;;  %v17622_v6 = vld [vmem:[%s18935_s22 + $0x19d4] sm:$0xf]  ;;  %v15466_v7 = vld [vmem:[%s18935_s22 + $0x1c58] sm:$0xf0]  ;;  %v16812_v26 = vld [vmem:[%s18935_s22 + $0x84] sm:$0xf] }
 0x2c9   : > { %v15469_v15 = vor.u32 %v17622_v6, %v15466_v7  ;;  %v13533_v6 = vor.u32 %v17137_v56, %v13530_v57  ;;  %v16974_v7 = vld [vmem:[%s18935_s22 + $0x594] sm:$0xf]  ;;  %v16136_v56 = vld [vmem:[%s18935_s22 + $0x1ef8] sm:$0xf]  ;;  %v17868_v57 = vld [vmem:[%s18935_s22 + $0x217c] sm:$0xf0] }
 0x2cb   : > { %9525 = vmatpush.bf16.msra.mxu2 %v12857_v20  ;;  %9538 = vmatpush.bf16.msra.mxu3 %v12861_v21  ;;  %v15473_v20 = vor.u32 %v17704_v9, %v15472_v8  ;;  %v15477_v21 = vor.u32 %v17623_v10, %v15474_v11  ;;  %v12874_v8 = vld [vmem:[%s18935_s22 + $0x818] sm:$0xf0]  ;;  %v12880_v9 = vld [vmem:[%s18935_s22 + $0x598] sm:$0xf]  ;;  %v17056_v10 = vld [vmem:[%s18935_s22 + $0x81c] sm:$0xf0] }
 0x2cc   : > { %9551 = vmatpush.bf16.msrb.mxu0 %v12865_v23  ;;  %9564 = vmatpush.bf16.msrb.mxu1 %v12869_v24  ;;  %v14818_v23 = vld [vmem:[%s18935_s22 + $0x1748] sm:$0xf0]  ;;  %v14824_v24 = vld [vmem:[%s18935_s22 + $0x14c8] sm:$0xf]  ;;  %v16975_v11 = vld [vmem:[%s18935_s22 + $0x59c] sm:$0xf] }
 0x2cd   : > { %v14821_v31 = vor.u32 %v17460_v19, %v14818_v23  ;;  %v14825_v32 = vor.u32 %v17542_v25, %v14824_v24  ;;  %v12885_v23 = vor.u32 %v16975_v11, %v12882_v13  ;;  %v12224_v24 = vld [vmem:[%s18935_s22 + $0x80] sm:$0xf]  ;;  %v16893_v25 = vld [vmem:[%s18935_s22 + $0x304] sm:$0xf0]  ;;  %v14832_v11 = vld [vmem:[%s18935_s22 + $0x14d0] sm:$0xf] }
 0x2cf   : > { %9526 = vmatpush.bf16.msra.mxu2 %v12209_v42  ;;  %9539 = vmatpush.bf16.msra.mxu3 %v12213_v44  ;;  %v17299_v42 = vld [vmem:[%s18935_s22 + $0xfbc] sm:$0xf]  ;;  %v2278_v44 = vperm.slane %v19675_v1, 5 }
 0x2d0   : > { %9552 = vmatpush.bf16.msrb.mxu0 %v12217_v45  ;;  %9565 = vmatpush.bf16.msrb.mxu1 %v12221_v48  ;;  %v2277_v45 = vperm.slane %v19675_v1, 4  ;;  %v14169_v48 = vor.u32 %v17379_v38, %v14168_v33  ;;  %v14177_v1 = vor.u32 %v17380_v41, %v14176_v40  ;;  %v14181_v53 = vor.u32 %v17299_v42, %v14178_v43 }
 0x2d1   : > { %v12225_v41 = vor.u32 %v16893_v25, %v12224_v24  ;;  %v17544_v24 = vld [vmem:[%s18935_s22 + $0x175c] sm:$0xf0]  ;;  %v17463_v25 = vld [vmem:[%s18935_s22 + $0x14dc] sm:$0xf] }
 0x2d2   : > { %16658 = vmatmul.msk.bf16.vlgmr.msra.gmra.mxu2 %vm8664_vm9, %v19267_v12  ;;  %16659 = vmatmul.msk.bf16.vlgmr.msra.gmra.mxu3 %vm8664_vm9, %v19267_v12  ;;  %v9346_v28 = vpop.f32.mrf.mxu0  ;;  %v9359_v29 = vpop.f32.mrf.mxu1 }
 0x2d3   : > { %9571 = vmatpush.bf16.msrb.mxu2 %v8766_v49  ;;  %9584 = vmatpush.bf16.msrb.mxu3 %v8769_v50  ;;  %v9347_v35 = vadd.f32 %v9346_v28, %v2279_v16  ;;  %v9360_v36 = vadd.f32 %v9359_v29, %v2280_v17  ;;  %v14173_v49 = vor.u32 %v17298_v34, %v14170_v39  ;;  %v17136_v50 = vld [vmem:[%s18935_s22 + $0xaa4] sm:$0xf]  ;;  %v12234_v39 = vld [vmem:[%s18935_s22 + $0x310] sm:$0xf0] }
 0x2d4   : > { %9597 = vmatpush.bf16.msra.mxu0 %v8772_v51  ;;  %9610 = vmatpush.bf16.msra.mxu1 %v8775_v60  ;;  %v13522_v51 = vld [vmem:[%s18935_s22 + $0xd28] sm:$0xf0] }
 0x2d5   : > { %16660 = vmatmul.msk.bf16.vlgmr.msrb.gmra.mxu0 %vm8664_vm9, %v19267_v12  ;;  %16661 = vmatmul.msk.bf16.vlgmr.msrb.gmra.mxu1 %vm8664_vm9, %v19267_v12  ;;  %18080 = vtanh.f32 %v9347_v35  ;;  %v9320_v54 = vpop.f32.mrf.mxu2  ;;  %v9333_v55 = vpop.f32.mrf.mxu3  ;;  %v2161_v60 = vld [vmem:[%s18935_s22 + $0x2408] sm:$0xff] }
 0x2d6   : > { %18082 = vtanh.f32 %v9360_v36  ;;  %v9334_v58 = vadd.f32 %v9333_v55, %v2278_v44  ;;  %v9321_v61 = vadd.f32 %v9320_v54, %v2277_v45  ;;  %v6110_v16 = vunpack.c.l.b16 %v2161_v60  ;;  %v17786_v54 = vld [vmem:[%s18935_s22 + $0x1ef4] sm:$0xf] }
 0x2d7   : > { %9572 = vmatpush.bf16.msrb.mxu2 %v16113_v63  ;;  %9585 = vmatpush.bf16.msrb.mxu3 %v16117_v0  ;;  %v12872_v63 = vld [vmem:[%s18935_s22 + $0x590] sm:$0xf]  ;;  %v17055_v0 = vld [vmem:[%s18935_s22 + $0x814] sm:$0xf0]  ;;  %v6111_v27 = vunpack.c.h.b16 %v2161_v60  ;;  %v16138_v60 = vld [vmem:[%s18935_s22 + $0x2180] sm:$0xf0] }
 0x2d8   : > { %9598 = vmatpush.bf16.msra.mxu0 %v16121_v4  ;;  %9611 = vmatpush.bf16.msra.mxu1 %v16125_v5  ;;  %v13525_v4 = vor.u32 %v17136_v50, %v13522_v51  ;;  %v13529_v5 = vor.u32 %v17218_v22, %v13528_v52  ;;  %18084 = vtanh.f32 %v9334_v58  ;;  %v12873_v19 = vor.u32 %v17055_v0, %v12872_v63  ;;  %v16130_v22 = vld [vmem:[%s18935_s22 + $0x2178] sm:$0xf0]  ;;  %v15480_v63 = vld [vmem:[%s18935_s22 + $0x19e0] sm:$0xf]  ;;  %v17705_v0 = vld [vmem:[%s18935_s22 + $0x1c64] sm:$0xf0] }
 0x2d9   : > { %18086 = vtanh.f32 %v9321_v61  ;;  %v7406_v34 = vpack.c.b16 %v6110_v16, %v6110_v16  ;;  %v7407_v45 = vpack.c.b16 %v6111_v27, %v6111_v27  ;;  %v15481_v13 = vor.u32 %v17705_v0, %v15480_v63  ;;  %v17057_v63 = vld [vmem:[%s18935_s22 + $0x824] sm:$0xf0] }
 0x2da   : > { %v9348_v2 = vpop.f32.mrf.mxu0  ;;  %v9361_v3 = vpop.f32.mrf.mxu1 }
 0x2db   : > { %9573 = vmatpush.bf16.msrb.mxu2 %v15465_v14  ;;  %9586 = vmatpush.bf16.msrb.mxu3 %v15469_v15  ;;  %v6108_v14 = vunpack.c.l.b16 %v2160_v59  ;;  %v6109_v15 = vunpack.c.h.b16 %v2160_v59  ;;  %v18081_v17 = vpop.eup %18080  ;;  %v8784_v50 = vsel %vm8668_vm3, %v7406_v34, 0  ;;  %v8787_v58 = vsel %vm8668_vm3, %v7407_v45, 0  ;;  %v17787_v59 = vld [vmem:[%s18935_s22 + $0x1efc] sm:$0xf]  ;;  %v17624_v2 = vld [vmem:[%s18935_s22 + $0x19e4] sm:$0xf] }
 0x2dc   : > { %9599 = vmatpush.bf16.msra.mxu0 %v15473_v20  ;;  %9612 = vmatpush.bf16.msra.mxu1 %v15477_v21  ;;  %v18083_v18 = vpop.eup %18082  ;;  %v12877_v20 = vor.u32 %v16974_v7, %v12874_v8  ;;  %v12881_v21 = vor.u32 %v17056_v10, %v12880_v9  ;;  %v11595_v35 = vrot.slane %v18081_v17, 4  ;;  %v16137_v3 = vor.u32 %v17868_v57, %v16136_v56  ;;  %v19831_v7 = vld [vmem:[%s19570_s13 + $0x10] sm:$0xff]  ;;  %v15490_v10 = vld [vmem:[%s18935_s22 + $0x1c70] sm:$0xf0]  ;;  %v17543_v17 = vld [vmem:[%s18935_s22 + $0x1754] sm:$0xf0] }
 0x2dd   : > { %v9322_v28 = vpop.f32.mrf.mxu2  ;;  %v9335_v29 = vpop.f32.mrf.mxu3  ;;  %v7404_v33 = vpack.c.b16 %v6108_v14, %v6108_v14  ;;  %v7405_v38 = vpack.c.b16 %v6109_v15, %v6109_v15  ;;  %v11596_v36 = vrot.slane %v18083_v18, 2  ;;  %v17706_v8 = vld [vmem:[%s18935_s22 + $0x1c6c] sm:$0xf0]  ;;  %v17625_v9 = vld [vmem:[%s18935_s22 + $0x19ec] sm:$0xf]  ;;  %v2283_v15 = vperm.slane %v19831_v7, 2 }
 0x2de   : > { %v18085_v40 = vpop.eup %18084  ;;  %v2284_v16 = vperm.slane %v19831_v7, 3  ;;  %v17462_v18 = vld [vmem:[%s18935_s22 + $0x14d4] sm:$0xf]  ;;  %v14833_v29 = vor.u32 %v17543_v17, %v14832_v11  ;;  %v13536_v45 = vld [vmem:[%s18935_s22 + $0xab0] sm:$0xf] }
 0x2df   : > { %9574 = vmatpush.bf16.msrb.mxu2 %v14817_v30  ;;  %9587 = vmatpush.bf16.msrb.mxu3 %v14821_v31  ;;  %v12226_v30 = vld [vmem:[%s18935_s22 + $0x308] sm:$0xf0]  ;;  %v12232_v31 = vld [vmem:[%s18935_s22 + $0x88] sm:$0xf]  ;;  %v11594_v42 = vrot.slane %v18085_v40, 6  ;;  %v18087_v46 = vpop.eup %18086  ;;  %v11718_v51 = vsel %vm11708_vm10, %v11595_v35, %v11596_v36 }
 0x2e0   : > { %9600 = vmatpush.bf16.msra.mxu0 %v14825_v32  ;;  %9613 = vmatpush.bf16.msra.mxu1 %v14829_v37  ;;  %v16894_v32 = vld [vmem:[%s18935_s22 + $0x30c] sm:$0xf0]  ;;  %v16813_v37 = vld [vmem:[%s18935_s22 + $0x8c] sm:$0xf]  ;;  %v12229_v43 = vor.u32 %v16812_v26, %v12226_v30  ;;  %v14842_v26 = vld [vmem:[%s18935_s22 + $0x1760] sm:$0xf0] }
 0x2e1   : > { %v12233_v44 = vor.u32 %v16894_v32, %v12232_v31  ;;  %v12237_v47 = vor.u32 %v16813_v37, %v12234_v39  ;;  %v11717_v52 = vsel %vm11706_vm11, %v18087_v46, %v11594_v42  ;;  %v14184_v32 = vld [vmem:[%s18935_s22 + $0xfc0] sm:$0xf]  ;;  %v14845_v36 = vor.u32 %v17463_v25, %v14842_v26  ;;  %v14186_v37 = vld [vmem:[%s18935_s22 + $0x1248] sm:$0xf0]  ;;  %v14192_v39 = vld [vmem:[%s18935_s22 + $0xfc8] sm:$0xf] }
 0x2e2   : > { %v11719_v55 = vsel %vm8668_vm3, %v11717_v52, %v11718_v51  ;;  %v17382_v40 = vld [vmem:[%s18935_s22 + $0x124c] sm:$0xf0]  ;;  %v14194_v42 = vld [vmem:[%s18935_s22 + $0x1250] sm:$0xf0]  ;;  %v17219_v46 = vld [vmem:[%s18935_s22 + $0xd34] sm:$0xf0] }
 0x2e3   : > { %9575 = vmatpush.bf16.msrb.mxu2 %v14169_v48  ;;  %9588 = vmatpush.bf16.msrb.mxu3 %v14173_v49  ;;  %v8778_v48 = vsel %vm8668_vm3, %v7404_v33, 0  ;;  %v8781_v49 = vsel %vm8668_vm3, %v7405_v38, 0  ;;  %11873 = vst [vmem:[%s19647_s14 + $0x18] sm:$0xff] %v11719_v55  ;;  %v17381_v33 = vld [vmem:[%s18935_s22 + $0x1244] sm:$0xf0]  ;;  %v14193_v52 = vor.u32 %v17382_v40, %v14192_v39 }
 0x2e4   : > { %9601 = vmatpush.bf16.msra.mxu0 %v14177_v1  ;;  %9614 = vmatpush.bf16.msra.mxu1 %v14181_v53  ;;  %v16128_v1 = vld [vmem:[%s18935_s22 + $0x1ef0] sm:$0xf]  ;;  %v17867_v53 = vld [vmem:[%s18935_s22 + $0x2174] sm:$0xf0]  ;;  %v17300_v38 = vld [vmem:[%s18935_s22 + $0xfc4] sm:$0xf] }
 0x2e5   : > { %v16129_v61 = vor.u32 %v17867_v53, %v16128_v1  ;;  %v13544_v51 = vld [vmem:[%s18935_s22 + $0xab8] sm:$0xf]  ;;  %v17220_v55 = vld [vmem:[%s18935_s22 + $0xd3c] sm:$0xf0]  ;;  %v13546_v56 = vld [vmem:[%s18935_s22 + $0xd40] sm:$0xf0] }
 0x2e6   : > { %v16977_v11 = vld [vmem:[%s18935_s22 + $0x5ac] sm:$0xf]  ;;  %v16895_v25 = vld [vmem:[%s18935_s22 + $0x314] sm:$0xf0]  ;;  %v16814_v26 = vld [vmem:[%s18935_s22 + $0x94] sm:$0xf] }
 0x2e7   : > { %9576 = vmatpush.bf16.msrb.mxu2 %v13521_v62  ;;  %9589 = vmatpush.bf16.msrb.mxu3 %v13525_v4  ;;  %v16133_v62 = vor.u32 %v17786_v54, %v16130_v22  ;;  %v16141_v4 = vor.u32 %v17787_v59, %v16138_v60  ;;  %v17139_v22 = vld [vmem:[%s18935_s22 + $0xabc] sm:$0xf]  ;;  %v12250_v39 = vld [vmem:[%s18935_s22 + $0x320] sm:$0xf0] }
 0x2e8   : > { %9602 = vmatpush.bf16.msra.mxu0 %v13529_v5  ;;  %9615 = vmatpush.bf16.msra.mxu1 %v13533_v6  ;;  %v15482_v5 = vld [vmem:[%s18935_s22 + $0x1c68] sm:$0xf0]  ;;  %v15488_v6 = vld [vmem:[%s18935_s22 + $0x19e8] sm:$0xf]  ;;  %v2163_v59 = vld [vmem:[%s18935_s22 + $0x2418] sm:$0xff] }
 0x2e9   : > { %v15485_v14 = vor.u32 %v17624_v2, %v15482_v5  ;;  %v13549_v5 = vor.u32 %v17139_v22, %v13546_v56  ;;  %v16146_v22 = vld [vmem:[%s18935_s22 + $0x2188] sm:$0xf0]  ;;  %v16152_v56 = vld [vmem:[%s18935_s22 + $0x1f08] sm:$0xf] }
 0x2eb   : > { %9577 = vmatpush.bf16.msrb.mxu2 %v12873_v19  ;;  %9590 = vmatpush.bf16.msrb.mxu3 %v12877_v20  ;;  %v15489_v19 = vor.u32 %v17706_v8, %v15488_v6  ;;  %v15493_v20 = vor.u32 %v17625_v9, %v15490_v10  ;;  %v16976_v6 = vld [vmem:[%s18935_s22 + $0x5a4] sm:$0xf]  ;;  %v12890_v8 = vld [vmem:[%s18935_s22 + $0x828] sm:$0xf0]  ;;  %v12896_v9 = vld [vmem:[%s18935_s22 + $0x5a8] sm:$0xf] }
 0x2ec   : > { %9603 = vmatpush.bf16.msra.mxu0 %v12881_v21  ;;  %9616 = vmatpush.bf16.msra.mxu1 %v12885_v23  ;;  %v14834_v21 = vld [vmem:[%s18935_s22 + $0x1758] sm:$0xf0]  ;;  %v14840_v23 = vld [vmem:[%s18935_s22 + $0x14d8] sm:$0xf]  ;;  %v17058_v10 = vld [vmem:[%s18935_s22 + $0x82c] sm:$0xf0] }
 0x2ed   : > { %v14837_v30 = vor.u32 %v17462_v18, %v14834_v21  ;;  %v14841_v31 = vor.u32 %v17544_v24, %v14840_v23  ;;  %v12897_v21 = vor.u32 %v17058_v10, %v12896_v9  ;;  %v12240_v24 = vld [vmem:[%s18935_s22 + $0x90] sm:$0xf]  ;;  %v17627_v9 = vld [vmem:[%s18935_s22 + $0x19fc] sm:$0xf]  ;;  %v15506_v10 = vld [vmem:[%s18935_s22 + $0x1c80] sm:$0xf0] }
 0x2ef   : > { %9578 = vmatpush.bf16.msrb.mxu2 %v12225_v41  ;;  %9591 = vmatpush.bf16.msrb.mxu3 %v12229_v43  ;;  %v17301_v41 = vld [vmem:[%s18935_s22 + $0xfcc] sm:$0xf]  ;;  %v2282_v43 = vperm.slane %v19831_v7, 1 }
 0x2f0   : > { %9604 = vmatpush.bf16.msra.mxu0 %v12233_v44  ;;  %9617 = vmatpush.bf16.msra.mxu1 %v12237_v47  ;;  %v2281_v44 = vperm.slane %v19831_v7, 0  ;;  %v14185_v47 = vor.u32 %v17381_v33, %v14184_v32  ;;  %v14197_v1 = vor.u32 %v17301_v41, %v14194_v42  ;;  %v16896_v32 = vld [vmem:[%s18935_s22 + $0x31c] sm:$0xf0]  ;;  %v12241_v41 = vor.u32 %v16895_v25, %v12240_v24  ;;  %v17546_v24 = vld [vmem:[%s18935_s22 + $0x176c] sm:$0xf0] }
 0x2f1   : > { %v17465_v25 = vld [vmem:[%s18935_s22 + $0x14ec] sm:$0xf] }
 0x2f2   : > { %16662 = vmatmul.msk.bf16.vlgmr.msrb.gmra.mxu2 %vm8664_vm9, %v19267_v12  ;;  %16663 = vmatmul.msk.bf16.vlgmr.msrb.gmra.mxu3 %vm8664_vm9, %v19267_v12  ;;  %v9398_v27 = vpop.f32.mrf.mxu0  ;;  %v9411_v28 = vpop.f32.mrf.mxu1 }
 0x2f3   : > { %9623 = vmatpush.bf16.msra.mxu2 %v8778_v48  ;;  %9636 = vmatpush.bf16.msra.mxu3 %v8781_v49  ;;  %v9399_v34 = vadd.f32 %v9398_v27, %v2283_v15  ;;  %v9412_v35 = vadd.f32 %v9411_v28, %v2284_v16  ;;  %v14189_v48 = vor.u32 %v17300_v38, %v14186_v37  ;;  %v17138_v49 = vld [vmem:[%s18935_s22 + $0xab4] sm:$0xf]  ;;  %v6114_v16 = vunpack.c.l.b16 %v2163_v59  ;;  %v16815_v37 = vld [vmem:[%s18935_s22 + $0x9c] sm:$0xf] }
 0x2f4   : > { %9649 = vmatpush.bf16.msrb.mxu0 %v8784_v50  ;;  %9662 = vmatpush.bf16.msrb.mxu1 %v8787_v58  ;;  %v13538_v50 = vld [vmem:[%s18935_s22 + $0xd38] sm:$0xf0]  ;;  %v2162_v58 = vld [vmem:[%s18935_s22 + $0x2410] sm:$0xff]  ;;  %v6115_v27 = vunpack.c.h.b16 %v2163_v59  ;;  %v17789_v59 = vld [vmem:[%s18935_s22 + $0x1f0c] sm:$0xf] }
 0x2f5   : > { %16664 = vmatmul.msk.bf16.vlgmr.msra.gmra.mxu0 %vm8664_vm9, %v19267_v12  ;;  %16665 = vmatmul.msk.bf16.vlgmr.msra.gmra.mxu1 %vm8664_vm9, %v19267_v12  ;;  %18088 = vtanh.f32 %v9399_v34  ;;  %v9372_v53 = vpop.f32.mrf.mxu2  ;;  %v9385_v54 = vpop.f32.mrf.mxu3  ;;  %v6113_v15 = vunpack.c.h.b16 %v2162_v58  ;;  %v7410_v34 = vpack.c.b16 %v6114_v16, %v6114_v16  ;;  %v2288_v16 = vperm.slane %v19831_v7, 7 }
 0x2f6   : > { %18090 = vtanh.f32 %v9412_v35  ;;  %v9386_v57 = vadd.f32 %v9385_v54, %v2282_v43  ;;  %v9373_v60 = vadd.f32 %v9372_v53, %v2281_v44  ;;  %v17869_v53 = vld [vmem:[%s18935_s22 + $0x2184] sm:$0xf0]  ;;  %v17788_v54 = vld [vmem:[%s18935_s22 + $0x1f04] sm:$0xf] }
 0x2f7   : > { %9624 = vmatpush.bf16.msra.mxu2 %v16129_v61  ;;  %9637 = vmatpush.bf16.msra.mxu3 %v16133_v62  ;;  %v13537_v61 = vor.u32 %v17219_v46, %v13536_v45  ;;  %v12888_v62 = vld [vmem:[%s18935_s22 + $0x5a0] sm:$0xf]  ;;  %v7409_v38 = vpack.c.b16 %v6113_v15, %v6113_v15  ;;  %v7411_v45 = vpack.c.b16 %v6115_v27, %v6115_v27  ;;  %v2287_v15 = vperm.slane %v19831_v7, 6 }
 0x2f8   : > { %9650 = vmatpush.bf16.msrb.mxu0 %v16137_v3  ;;  %9663 = vmatpush.bf16.msrb.mxu1 %v16141_v4  ;;  %v13541_v3 = vor.u32 %v17138_v49, %v13538_v50  ;;  %v13545_v4 = vor.u32 %v17220_v55, %v13544_v51  ;;  %18092 = vtanh.f32 %v9386_v57  ;;  %v8796_v50 = vsel %vm8668_vm3, %v7410_v34, 0  ;;  %v17870_v57 = vld [vmem:[%s18935_s22 + $0x218c] sm:$0xf0] }
 0x2f9   : > { %18094 = vtanh.f32 %v9373_v60  ;;  %v8793_v49 = vsel %vm8668_vm3, %v7409_v38, 0  ;;  %v16154_v60 = vld [vmem:[%s18935_s22 + $0x2190] sm:$0xf0] }
 0x2fa   : > { %v9400_v0 = vpop.f32.mrf.mxu0  ;;  %v9413_v2 = vpop.f32.mrf.mxu1  ;;  %v17302_v38 = vld [vmem:[%s18935_s22 + $0xfd4] sm:$0xf] }
 0x2fb   : > { %9625 = vmatpush.bf16.msra.mxu2 %v15481_v13  ;;  %9638 = vmatpush.bf16.msra.mxu3 %v15485_v14  ;;  %v12898_v13 = vld [vmem:[%s18935_s22 + $0x830] sm:$0xf0]  ;;  %v6112_v14 = vunpack.c.l.b16 %v2162_v58  ;;  %v18089_v17 = vpop.eup %18088  ;;  %v8799_v58 = vsel %vm8668_vm3, %v7411_v45, 0  ;;  %v17707_v0 = vld [vmem:[%s18935_s22 + $0x1c74] sm:$0xf0]  ;;  %v16153_v2 = vor.u32 %v17870_v57, %v16152_v56  ;;  %v2164_v57 = vld [vmem:[%s18935_s22 + $0x2420] sm:$0xff] }
 0x2fc   : > { %9651 = vmatpush.bf16.msrb.mxu0 %v15489_v19  ;;  %9664 = vmatpush.bf16.msrb.mxu1 %v15493_v20  ;;  %v18091_v18 = vpop.eup %18090  ;;  %v12889_v19 = vor.u32 %v17057_v63, %v12888_v62  ;;  %v12893_v20 = vor.u32 %v16976_v6, %v12890_v8  ;;  %v12901_v23 = vor.u32 %v16977_v11, %v12898_v13  ;;  %v11598_v35 = vrot.slane %v18089_v17, 4  ;;  %v15496_v63 = vld [vmem:[%s18935_s22 + $0x19f0] sm:$0xf]  ;;  %v15504_v6 = vld [vmem:[%s18935_s22 + $0x19f8] sm:$0xf] }
 0x2fd   : > { %v9374_v28 = vpop.f32.mrf.mxu2  ;;  %v7408_v33 = vpack.c.b16 %v6112_v14, %v6112_v14  ;;  %v16149_v62 = vor.u32 %v17788_v54, %v16146_v22  ;;  %v17708_v8 = vld [vmem:[%s18935_s22 + $0x1c7c] sm:$0xf0]  ;;  %v15497_v13 = vor.u32 %v17707_v0, %v15496_v63  ;;  %v17545_v17 = vld [vmem:[%s18935_s22 + $0x1764] sm:$0xf0]  ;;  %v17222_v54 = vld [vmem:[%s18935_s22 + $0xd4c] sm:$0xf0] }
 0x2fe   : > { %v18093_v40 = vpop.eup %18092  ;;  %v14848_v11 = vld [vmem:[%s18935_s22 + $0x14e0] sm:$0xf]  ;;  %v13562_v22 = vld [vmem:[%s18935_s22 + $0xd50] sm:$0xf0] }
 0x2ff   : > { %9626 = vmatpush.bf16.msra.mxu2 %v14833_v29  ;;  %9639 = vmatpush.bf16.msra.mxu3 %v14837_v30  ;;  %v9387_v29 = vpop.f32.mrf.mxu3  ;;  %v12242_v30 = vld [vmem:[%s18935_s22 + $0x318] sm:$0xf0]  ;;  %v11597_v42 = vrot.slane %v18093_v40, 6  ;;  %v18095_v46 = vpop.eup %18094  ;;  %v17384_v40 = vld [vmem:[%s18935_s22 + $0x125c] sm:$0xf0] }
 0x300   : > { %9652 = vmatpush.bf16.msrb.mxu0 %v14841_v31  ;;  %9665 = vmatpush.bf16.msrb.mxu1 %v14845_v36  ;;  %v12248_v31 = vld [vmem:[%s18935_s22 + $0x98] sm:$0xf]  ;;  %v11599_v36 = vrot.slane %v18091_v18, 2  ;;  %v12245_v43 = vor.u32 %v16814_v26, %v12242_v30  ;;  %v17464_v18 = vld [vmem:[%s18935_s22 + $0x14e4] sm:$0xf]  ;;  %v14849_v29 = vor.u32 %v17545_v17, %v14848_v11 }
 0x301   : > { %v12249_v44 = vor.u32 %v16896_v32, %v12248_v31  ;;  %v14858_v26 = vld [vmem:[%s18935_s22 + $0x1770] sm:$0xf0]  ;;  %v14200_v32 = vld [vmem:[%s18935_s22 + $0xfd0] sm:$0xf]  ;;  %v13552_v45 = vld [vmem:[%s18935_s22 + $0xac0] sm:$0xf] }
 0x302   : > { %v11721_v51 = vsel %vm11708_vm10, %v11598_v35, %v11599_v36  ;;  %v14861_v36 = vor.u32 %v17465_v25, %v14858_v26  ;;  %v12914_v11 = vld [vmem:[%s18935_s22 + $0x840] sm:$0xf0] }
 0x303   : > { %9627 = vmatpush.bf16.msra.mxu2 %v14185_v47  ;;  %9640 = vmatpush.bf16.msra.mxu3 %v14189_v48  ;;  %v12253_v47 = vor.u32 %v16815_v37, %v12250_v39  ;;  %v8790_v48 = vsel %vm8668_vm3, %v7408_v33, 0  ;;  %v17383_v33 = vld [vmem:[%s18935_s22 + $0x1254] sm:$0xf0]  ;;  %v14202_v37 = vld [vmem:[%s18935_s22 + $0x1258] sm:$0xf0] }
 0x304   : > { %9653 = vmatpush.bf16.msrb.mxu0 %v14193_v52  ;;  %9666 = vmatpush.bf16.msrb.mxu1 %v14197_v1  ;;  %v11720_v52 = vsel %vm11706_vm11, %v18095_v46, %v11597_v42  ;;  %v16144_v1 = vld [vmem:[%s18935_s22 + $0x1f00] sm:$0xf]  ;;  %v14208_v39 = vld [vmem:[%s18935_s22 + $0xfd8] sm:$0xf]  ;;  %v14210_v42 = vld [vmem:[%s18935_s22 + $0x1260] sm:$0xf0] }
 0x305   : > { %v11722_v55 = vsel %vm8668_vm3, %v11720_v52, %v11721_v51  ;;  %v17221_v46 = vld [vmem:[%s18935_s22 + $0xd44] sm:$0xf0]  ;;  %v16816_v25 = vld [vmem:[%s18935_s22 + $0xa4] sm:$0xf] }
 0x306   : > { %11874 = vst [vmem:[%s19647_s14 + $0x20] sm:$0xff] %v11722_v55  ;;  %v13560_v51 = vld [vmem:[%s18935_s22 + $0xac8] sm:$0xf]  ;;  %v17141_v55 = vld [vmem:[%s18935_s22 + $0xacc] sm:$0xf] }
 0x307   : > { %9628 = vmatpush.bf16.msra.mxu2 %v13537_v61  ;;  %9641 = vmatpush.bf16.msra.mxu3 %v13541_v3  ;;  %v16145_v61 = vor.u32 %v17869_v53, %v16144_v1  ;;  %v16157_v3 = vor.u32 %v17789_v59, %v16154_v60  ;;  %v13553_v60 = vor.u32 %v17221_v46, %v13552_v45 }
 0x308   : > { %9654 = vmatpush.bf16.msrb.mxu0 %v13545_v4  ;;  %9667 = vmatpush.bf16.msrb.mxu1 %v13549_v5  ;;  %v17626_v4 = vld [vmem:[%s18935_s22 + $0x19f4] sm:$0xf]  ;;  %v15498_v5 = vld [vmem:[%s18935_s22 + $0x1c78] sm:$0xf0] }
 0x309   : > { %v15501_v14 = vor.u32 %v17626_v4, %v15498_v5  ;;  %v13565_v4 = vor.u32 %v17141_v55, %v13562_v22  ;;  %v16978_v5 = vld [vmem:[%s18935_s22 + $0x5b4] sm:$0xf]  ;;  %v16168_v55 = vld [vmem:[%s18935_s22 + $0x1f18] sm:$0xf]  ;;  %v17872_v22 = vld [vmem:[%s18935_s22 + $0x219c] sm:$0xf0] }
 0x30b   : > { %9629 = vmatpush.bf16.msra.mxu2 %v12889_v19  ;;  %9642 = vmatpush.bf16.msra.mxu3 %v12893_v20  ;;  %v15505_v19 = vor.u32 %v17708_v8, %v15504_v6  ;;  %v15509_v20 = vor.u32 %v17627_v9, %v15506_v10  ;;  %v12906_v6 = vld [vmem:[%s18935_s22 + $0x838] sm:$0xf0]  ;;  %v12912_v8 = vld [vmem:[%s18935_s22 + $0x5b8] sm:$0xf]  ;;  %v17060_v9 = vld [vmem:[%s18935_s22 + $0x83c] sm:$0xf0] }
 0x30c   : > { %9655 = vmatpush.bf16.msrb.mxu0 %v12897_v21  ;;  %9668 = vmatpush.bf16.msrb.mxu1 %v12901_v23  ;;  %v14850_v21 = vld [vmem:[%s18935_s22 + $0x1768] sm:$0xf0]  ;;  %v14856_v23 = vld [vmem:[%s18935_s22 + $0x14e8] sm:$0xf]  ;;  %v16979_v10 = vld [vmem:[%s18935_s22 + $0x5bc] sm:$0xf] }
 0x30d   : > { %v14853_v30 = vor.u32 %v17464_v18, %v14850_v21  ;;  %v14857_v31 = vor.u32 %v17546_v24, %v14856_v23  ;;  %v12917_v21 = vor.u32 %v16979_v10, %v12914_v11  ;;  %v12256_v23 = vld [vmem:[%s18935_s22 + $0xa0] sm:$0xf]  ;;  %v16897_v24 = vld [vmem:[%s18935_s22 + $0x324] sm:$0xf0]  ;;  %v14864_v10 = vld [vmem:[%s18935_s22 + $0x14f0] sm:$0xf] }
 0x30f   : > { %9630 = vmatpush.bf16.msra.mxu2 %v12241_v41  ;;  %9643 = vmatpush.bf16.msra.mxu3 %v12245_v43  ;;  %v17303_v41 = vld [vmem:[%s18935_s22 + $0xfdc] sm:$0xf]  ;;  %v2286_v43 = vperm.slane %v19831_v7, 5 }
 0x310   : > { %9656 = vmatpush.bf16.msrb.mxu0 %v12249_v44  ;;  %9669 = vmatpush.bf16.msrb.mxu1 %v12253_v47  ;;  %v2285_v44 = vperm.slane %v19831_v7, 4  ;;  %v14201_v47 = vor.u32 %v17383_v33, %v14200_v32  ;;  %v14209_v7 = vor.u32 %v17384_v40, %v14208_v39  ;;  %v14213_v52 = vor.u32 %v17303_v41, %v14210_v42 }
 0x311   : > { %v12257_v40 = vor.u32 %v16897_v24, %v12256_v23  ;;  %v17548_v23 = vld [vmem:[%s18935_s22 + $0x177c] sm:$0xf0]  ;;  %v17467_v24 = vld [vmem:[%s18935_s22 + $0x14fc] sm:$0xf] }
 0x312   : > { %16666 = vmatmul.msk.bf16.vlgmr.msra.gmra.mxu2 %vm8664_vm9, %v19267_v12  ;;  %16667 = vmatmul.msk.bf16.vlgmr.msra.gmra.mxu3 %vm8664_vm9, %v19267_v12  ;;  %v9450_v27 = vpop.f32.mrf.mxu0  ;;  %v9463_v28 = vpop.f32.mrf.mxu1 }
 0x313   : > { %9675 = vmatpush.bf16.msrb.mxu2 %v8790_v48  ;;  %9688 = vmatpush.bf16.msrb.mxu3 %v8793_v49  ;;  %v9451_v34 = vadd.f32 %v9450_v27, %v2287_v15  ;;  %v9464_v35 = vadd.f32 %v9463_v28, %v2288_v16  ;;  %v14205_v48 = vor.u32 %v17302_v38, %v14202_v37  ;;  %v17140_v49 = vld [vmem:[%s18935_s22 + $0xac4] sm:$0xf]  ;;  %v12266_v37 = vld [vmem:[%s18935_s22 + $0x330] sm:$0xf0] }
 0x314   : > { %9701 = vmatpush.bf16.msra.mxu0 %v8796_v50  ;;  %9714 = vmatpush.bf16.msra.mxu1 %v8799_v58  ;;  %v13554_v50 = vld [vmem:[%s18935_s22 + $0xd48] sm:$0xf0] }
 0x315   : > { %16668 = vmatmul.msk.bf16.vlgmr.msrb.gmra.mxu0 %vm8664_vm9, %v19267_v12  ;;  %16669 = vmatmul.msk.bf16.vlgmr.msrb.gmra.mxu1 %vm8664_vm9, %v19267_v12  ;;  %18096 = vtanh.f32 %v9451_v34  ;;  %v9424_v1 = vpop.f32.mrf.mxu2  ;;  %v9437_v53 = vpop.f32.mrf.mxu3  ;;  %v2165_v58 = vld [vmem:[%s18935_s22 + $0x2428] sm:$0xff] }
 0x316   : > { %18098 = vtanh.f32 %v9464_v35  ;;  %v9438_v56 = vadd.f32 %v9437_v53, %v2286_v43  ;;  %v9425_v59 = vadd.f32 %v9424_v1, %v2285_v44  ;;  %v6118_v15 = vunpack.c.l.b16 %v2165_v58  ;;  %v17790_v1 = vld [vmem:[%s18935_s22 + $0x1f14] sm:$0xf] }
 0x317   : > { %9676 = vmatpush.bf16.msrb.mxu2 %v16145_v61  ;;  %9689 = vmatpush.bf16.msrb.mxu3 %v16149_v62  ;;  %v12904_v61 = vld [vmem:[%s18935_s22 + $0x5b0] sm:$0xf]  ;;  %v17059_v62 = vld [vmem:[%s18935_s22 + $0x834] sm:$0xf0]  ;;  %v6119_v26 = vunpack.c.h.b16 %v2165_v58  ;;  %v16170_v58 = vld [vmem:[%s18935_s22 + $0x21a0] sm:$0xf0] }
 0x318   : > { %9702 = vmatpush.bf16.msra.mxu0 %v16153_v2  ;;  %9715 = vmatpush.bf16.msra.mxu1 %v16157_v3  ;;  %v13557_v2 = vor.u32 %v17140_v49, %v13554_v50  ;;  %v13561_v3 = vor.u32 %v17222_v54, %v13560_v51  ;;  %18100 = vtanh.f32 %v9438_v56  ;;  %v12905_v18 = vor.u32 %v17059_v62, %v12904_v61  ;;  %v16162_v54 = vld [vmem:[%s18935_s22 + $0x2198] sm:$0xf0]  ;;  %v15512_v61 = vld [vmem:[%s18935_s22 + $0x1a00] sm:$0xf]  ;;  %v17709_v62 = vld [vmem:[%s18935_s22 + $0x1c84] sm:$0xf0] }
 0x319   : > { %18102 = vtanh.f32 %v9425_v59  ;;  %v7414_v38 = vpack.c.b16 %v6118_v15, %v6118_v15  ;;  %v7415_v44 = vpack.c.b16 %v6119_v26, %v6119_v26  ;;  %v15513_v11 = vor.u32 %v17709_v62, %v15512_v61  ;;  %v17061_v61 = vld [vmem:[%s18935_s22 + $0x844] sm:$0xf0] }
 0x31a   : > { %v9452_v63 = vpop.f32.mrf.mxu0  ;;  %v9465_v0 = vpop.f32.mrf.mxu1 }
 0x31b   : > { %9677 = vmatpush.bf16.msrb.mxu2 %v15497_v13  ;;  %9690 = vmatpush.bf16.msrb.mxu3 %v15501_v14  ;;  %v6116_v13 = vunpack.c.l.b16 %v2164_v57  ;;  %v6117_v14 = vunpack.c.h.b16 %v2164_v57  ;;  %v18097_v16 = vpop.eup %18096  ;;  %v8808_v49 = vsel %vm8668_vm3, %v7414_v38, 0  ;;  %v8811_v56 = vsel %vm8668_vm3, %v7415_v44, 0  ;;  %v17791_v57 = vld [vmem:[%s18935_s22 + $0x1f1c] sm:$0xf]  ;;  %v17628_v63 = vld [vmem:[%s18935_s22 + $0x1a04] sm:$0xf] }
 0x31c   : > { %9703 = vmatpush.bf16.msra.mxu0 %v15505_v19  ;;  %9716 = vmatpush.bf16.msra.mxu1 %v15509_v20  ;;  %v18099_v17 = vpop.eup %18098  ;;  %v12909_v19 = vor.u32 %v16978_v5, %v12906_v6  ;;  %v12913_v20 = vor.u32 %v17060_v9, %v12912_v8  ;;  %v11601_v34 = vrot.slane %v18097_v16, 4  ;;  %v16169_v0 = vor.u32 %v17872_v22, %v16168_v55  ;;  %v19990_v5 = vld [vmem:[%s19570_s13 + $0x18] sm:$0xff]  ;;  %v13578_v55 = vld [vmem:[%s18935_s22 + $0xd60] sm:$0xf0] }
 0x31d   : > { %v9426_v27 = vpop.f32.mrf.mxu2  ;;  %v9439_v28 = vpop.f32.mrf.mxu3  ;;  %v7412_v32 = vpack.c.b16 %v6116_v13, %v6116_v13  ;;  %v7413_v33 = vpack.c.b16 %v6117_v14, %v6117_v14  ;;  %v11602_v35 = vrot.slane %v18099_v17, 2  ;;  %v17710_v6 = vld [vmem:[%s18935_s22 + $0x1c8c] sm:$0xf0]  ;;  %v17629_v8 = vld [vmem:[%s18935_s22 + $0x1a0c] sm:$0xf]  ;;  %v2291_v14 = vperm.slane %v19990_v5, 2 }
 0x31e   : > { %v18101_v39 = vpop.eup %18100  ;;  %v15522_v9 = vld [vmem:[%s18935_s22 + $0x1c90] sm:$0xf0]  ;;  %v2292_v15 = vperm.slane %v19990_v5, 3  ;;  %v17547_v16 = vld [vmem:[%s18935_s22 + $0x1774] sm:$0xf0] }
 0x31f   : > { %9678 = vmatpush.bf16.msrb.mxu2 %v14849_v29  ;;  %9691 = vmatpush.bf16.msrb.mxu3 %v14853_v30  ;;  %v12258_v29 = vld [vmem:[%s18935_s22 + $0x328] sm:$0xf0]  ;;  %v12264_v30 = vld [vmem:[%s18935_s22 + $0xa8] sm:$0xf]  ;;  %v11600_v41 = vrot.slane %v18101_v39, 6  ;;  %v18103_v45 = vpop.eup %18102  ;;  %v11724_v50 = vsel %vm11708_vm10, %v11601_v34, %v11602_v35  ;;  %v14865_v28 = vor.u32 %v17547_v16, %v14864_v10 }
 0x320   : > { %9704 = vmatpush.bf16.msra.mxu0 %v14857_v31  ;;  %9717 = vmatpush.bf16.msra.mxu1 %v14861_v36  ;;  %v16898_v31 = vld [vmem:[%s18935_s22 + $0x32c] sm:$0xf0]  ;;  %v16817_v36 = vld [vmem:[%s18935_s22 + $0xac] sm:$0xf]  ;;  %v12261_v42 = vor.u32 %v16816_v25, %v12258_v29  ;;  %v17466_v17 = vld [vmem:[%s18935_s22 + $0x14f4] sm:$0xf] }
 0x321   : > { %v12265_v43 = vor.u32 %v16898_v31, %v12264_v30  ;;  %v12269_v46 = vor.u32 %v16817_v36, %v12266_v37  ;;  %v11723_v51 = vsel %vm11706_vm11, %v18103_v45, %v11600_v41  ;;  %v14874_v25 = vld [vmem:[%s18935_s22 + $0x1780] sm:$0xf0]  ;;  %v14216_v31 = vld [vmem:[%s18935_s22 + $0xfe0] sm:$0xf]  ;;  %v14218_v36 = vld [vmem:[%s18935_s22 + $0x1268] sm:$0xf0] }
 0x322   : > { %v11725_v53 = vsel %vm8668_vm3, %v11723_v51, %v11724_v50  ;;  %v14877_v35 = vor.u32 %v17467_v24, %v14874_v25  ;;  %v14224_v37 = vld [vmem:[%s18935_s22 + $0xfe8] sm:$0xf]  ;;  %v17386_v39 = vld [vmem:[%s18935_s22 + $0x126c] sm:$0xf0]  ;;  %v14226_v41 = vld [vmem:[%s18935_s22 + $0x1270] sm:$0xf0] }
 0x323   : > { %9679 = vmatpush.bf16.msrb.mxu2 %v14201_v47  ;;  %9692 = vmatpush.bf16.msrb.mxu3 %v14205_v48  ;;  %v8802_v47 = vsel %vm8668_vm3, %v7412_v32, 0  ;;  %v8805_v48 = vsel %vm8668_vm3, %v7413_v33, 0  ;;  %11875 = vst [vmem:[%s19647_s14 + $0x28] sm:$0xff] %v11725_v53  ;;  %v17385_v32 = vld [vmem:[%s18935_s22 + $0x1264] sm:$0xf0]  ;;  %v14225_v51 = vor.u32 %v17386_v39, %v14224_v37 }
 0x324   : > { %9705 = vmatpush.bf16.msra.mxu0 %v14209_v7  ;;  %9718 = vmatpush.bf16.msra.mxu1 %v14213_v52  ;;  %v16160_v7 = vld [vmem:[%s18935_s22 + $0x1f10] sm:$0xf]  ;;  %v17871_v52 = vld [vmem:[%s18935_s22 + $0x2194] sm:$0xf0]  ;;  %v17304_v33 = vld [vmem:[%s18935_s22 + $0xfe4] sm:$0xf] }
 0x325   : > { %v16161_v59 = vor.u32 %v17871_v52, %v16160_v7  ;;  %v13568_v44 = vld [vmem:[%s18935_s22 + $0xad0] sm:$0xf]  ;;  %v17223_v45 = vld [vmem:[%s18935_s22 + $0xd54] sm:$0xf0]  ;;  %v17224_v53 = vld [vmem:[%s18935_s22 + $0xd5c] sm:$0xf0] }
 0x326   : > { %v13576_v50 = vld [vmem:[%s18935_s22 + $0xad8] sm:$0xf]  ;;  %v16981_v10 = vld [vmem:[%s18935_s22 + $0x5cc] sm:$0xf]  ;;  %v16818_v25 = vld [vmem:[%s18935_s22 + $0xb4] sm:$0xf] }
 0x327   : > { %9680 = vmatpush.bf16.msrb.mxu2 %v13553_v60  ;;  %9693 = vmatpush.bf16.msrb.mxu3 %v13557_v2  ;;  %v16165_v60 = vor.u32 %v17790_v1, %v16162_v54  ;;  %v16173_v2 = vor.u32 %v17791_v57, %v16170_v58  ;;  %v17143_v54 = vld [vmem:[%s18935_s22 + $0xadc] sm:$0xf]  ;;  %v16899_v24 = vld [vmem:[%s18935_s22 + $0x334] sm:$0xf0]  ;;  %v12282_v37 = vld [vmem:[%s18935_s22 + $0x340] sm:$0xf0] }
 0x328   : > { %9706 = vmatpush.bf16.msra.mxu0 %v13561_v3  ;;  %9719 = vmatpush.bf16.msra.mxu1 %v13565_v4  ;;  %v15514_v3 = vld [vmem:[%s18935_s22 + $0x1c88] sm:$0xf0]  ;;  %v15520_v4 = vld [vmem:[%s18935_s22 + $0x1a08] sm:$0xf]  ;;  %v2167_v57 = vld [vmem:[%s18935_s22 + $0x2438] sm:$0xff] }
 0x329   : > { %v15517_v13 = vor.u32 %v17628_v63, %v15514_v3  ;;  %v13581_v3 = vor.u32 %v17143_v54, %v13578_v55  ;;  %v16178_v54 = vld [vmem:[%s18935_s22 + $0x21a8] sm:$0xf0]  ;;  %v16184_v55 = vld [vmem:[%s18935_s22 + $0x1f28] sm:$0xf] }
 0x32b   : > { %9681 = vmatpush.bf16.msrb.mxu2 %v12905_v18  ;;  %9694 = vmatpush.bf16.msrb.mxu3 %v12909_v19  ;;  %v15521_v18 = vor.u32 %v17710_v6, %v15520_v4  ;;  %v15525_v19 = vor.u32 %v17629_v8, %v15522_v9  ;;  %v16980_v4 = vld [vmem:[%s18935_s22 + $0x5c4] sm:$0xf]  ;;  %v12922_v6 = vld [vmem:[%s18935_s22 + $0x848] sm:$0xf0]  ;;  %v12928_v8 = vld [vmem:[%s18935_s22 + $0x5c8] sm:$0xf] }
 0x32c   : > { %9707 = vmatpush.bf16.msra.mxu0 %v12913_v20  ;;  %9720 = vmatpush.bf16.msra.mxu1 %v12917_v21  ;;  %v14866_v20 = vld [vmem:[%s18935_s22 + $0x1778] sm:$0xf0]  ;;  %v14872_v21 = vld [vmem:[%s18935_s22 + $0x14f8] sm:$0xf]  ;;  %v17062_v9 = vld [vmem:[%s18935_s22 + $0x84c] sm:$0xf0] }
 0x32d   : > { %v14869_v29 = vor.u32 %v17466_v17, %v14866_v20  ;;  %v14873_v30 = vor.u32 %v17548_v23, %v14872_v21  ;;  %v12929_v20 = vor.u32 %v17062_v9, %v12928_v8  ;;  %v12272_v23 = vld [vmem:[%s18935_s22 + $0xb0] sm:$0xf]  ;;  %v17631_v8 = vld [vmem:[%s18935_s22 + $0x1a1c] sm:$0xf]  ;;  %v15538_v9 = vld [vmem:[%s18935_s22 + $0x1ca0] sm:$0xf0] }
 0x32f   : > { %9682 = vmatpush.bf16.msrb.mxu2 %v12257_v40  ;;  %9695 = vmatpush.bf16.msrb.mxu3 %v12261_v42  ;;  %v17305_v40 = vld [vmem:[%s18935_s22 + $0xfec] sm:$0xf]  ;;  %v2290_v42 = vperm.slane %v19990_v5, 1 }
 0x330   : > { %9708 = vmatpush.bf16.msra.mxu0 %v12265_v43  ;;  %9721 = vmatpush.bf16.msra.mxu1 %v12269_v46  ;;  %v2289_v43 = vperm.slane %v19990_v5, 0  ;;  %v14217_v46 = vor.u32 %v17385_v32, %v14216_v31  ;;  %v14229_v7 = vor.u32 %v17305_v40, %v14226_v41  ;;  %v16900_v31 = vld [vmem:[%s18935_s22 + $0x33c] sm:$0xf0]  ;;  %v12273_v40 = vor.u32 %v16899_v24, %v12272_v23  ;;  %v17550_v23 = vld [vmem:[%s18935_s22 + $0x178c] sm:$0xf0] }
 0x331   : > { %v17469_v24 = vld [vmem:[%s18935_s22 + $0x150c] sm:$0xf] }
 0x332   : > { %16670 = vmatmul.msk.bf16.vlgmr.msrb.gmra.mxu2 %vm8664_vm9, %v19267_v12  ;;  %16671 = vmatmul.msk.bf16.vlgmr.msrb.gmra.mxu3 %vm8664_vm9, %v19267_v12  ;;  %v9502_v26 = vpop.f32.mrf.mxu0  ;;  %v9515_v27 = vpop.f32.mrf.mxu1 }
 0x333   : > { %9727 = vmatpush.bf16.msra.mxu2 %v8802_v47  ;;  %9740 = vmatpush.bf16.msra.mxu3 %v8805_v48  ;;  %v9503_v38 = vadd.f32 %v9502_v26, %v2291_v14  ;;  %v9516_v34 = vadd.f32 %v9515_v27, %v2292_v15  ;;  %v14221_v47 = vor.u32 %v17304_v33, %v14218_v36  ;;  %v17142_v48 = vld [vmem:[%s18935_s22 + $0xad4] sm:$0xf]  ;;  %v6122_v15 = vunpack.c.l.b16 %v2167_v57  ;;  %v16819_v36 = vld [vmem:[%s18935_s22 + $0xbc] sm:$0xf] }
 0x334   : > { %9753 = vmatpush.bf16.msrb.mxu0 %v8808_v49  ;;  %9766 = vmatpush.bf16.msrb.mxu1 %v8811_v56  ;;  %v13570_v49 = vld [vmem:[%s18935_s22 + $0xd58] sm:$0xf0]  ;;  %v2166_v56 = vld [vmem:[%s18935_s22 + $0x2430] sm:$0xff]  ;;  %v6123_v26 = vunpack.c.h.b16 %v2167_v57  ;;  %v17793_v57 = vld [vmem:[%s18935_s22 + $0x1f2c] sm:$0xf] }
 0x335   : > { %16672 = vmatmul.msk.bf16.vlgmr.msra.gmra.mxu0 %vm8664_vm9, %v19267_v12  ;;  %16673 = vmatmul.msk.bf16.vlgmr.msra.gmra.mxu1 %vm8664_vm9, %v19267_v12  ;;  %18104 = vtanh.f32 %v9503_v38  ;;  %v9476_v52 = vpop.f32.mrf.mxu2  ;;  %v9489_v1 = vpop.f32.mrf.mxu3  ;;  %v6121_v14 = vunpack.c.h.b16 %v2166_v56  ;;  %v7418_v38 = vpack.c.b16 %v6122_v15, %v6122_v15  ;;  %v2296_v15 = vperm.slane %v19990_v5, 7 }
 0x336   : > { %18106 = vtanh.f32 %v9516_v34  ;;  %v9490_v22 = vadd.f32 %v9489_v1, %v2290_v42  ;;  %v9477_v58 = vadd.f32 %v9476_v52, %v2289_v43  ;;  %v17873_v52 = vld [vmem:[%s18935_s22 + $0x21a4] sm:$0xf0]  ;;  %v17792_v1 = vld [vmem:[%s18935_s22 + $0x1f24] sm:$0xf] }
 0x337   : > { %9728 = vmatpush.bf16.msra.mxu2 %v16161_v59  ;;  %9741 = vmatpush.bf16.msra.mxu3 %v16165_v60  ;;  %v13569_v59 = vor.u32 %v17223_v45, %v13568_v44  ;;  %v12920_v60 = vld [vmem:[%s18935_s22 + $0x5c0] sm:$0xf]  ;;  %v7417_v33 = vpack.c.b16 %v6121_v14, %v6121_v14  ;;  %v7419_v44 = vpack.c.b16 %v6123_v26, %v6123_v26  ;;  %v2295_v14 = vperm.slane %v19990_v5, 6 }
 0x338   : > { %9754 = vmatpush.bf16.msrb.mxu0 %v16169_v0  ;;  %9767 = vmatpush.bf16.msrb.mxu1 %v16173_v2  ;;  %v13573_v0 = vor.u32 %v17142_v48, %v13570_v49  ;;  %v13577_v2 = vor.u32 %v17224_v53, %v13576_v50  ;;  %18108 = vtanh.f32 %v9490_v22  ;;  %v8820_v49 = vsel %vm8668_vm3, %v7418_v38, 0  ;;  %v17874_v22 = vld [vmem:[%s18935_s22 + $0x21ac] sm:$0xf0] }
 0x339   : > { %18110 = vtanh.f32 %v9477_v58  ;;  %v8817_v48 = vsel %vm8668_vm3, %v7417_v33, 0  ;;  %v16186_v58 = vld [vmem:[%s18935_s22 + $0x21b0] sm:$0xf0] }
 0x33a   : > { %v9504_v62 = vpop.f32.mrf.mxu0  ;;  %v9517_v63 = vpop.f32.mrf.mxu1  ;;  %v17306_v33 = vld [vmem:[%s18935_s22 + $0xff4] sm:$0xf] }
 0x33b   : > { %9729 = vmatpush.bf16.msra.mxu2 %v15513_v11  ;;  %9742 = vmatpush.bf16.msra.mxu3 %v15517_v13  ;;  %v12930_v11 = vld [vmem:[%s18935_s22 + $0x850] sm:$0xf0]  ;;  %v6120_v13 = vunpack.c.l.b16 %v2166_v56  ;;  %v18105_v16 = vpop.eup %18104  ;;  %v8823_v56 = vsel %vm8668_vm3, %v7419_v44, 0  ;;  %v17711_v62 = vld [vmem:[%s18935_s22 + $0x1c94] sm:$0xf0]  ;;  %v16185_v63 = vor.u32 %v17874_v22, %v16184_v55  ;;  %v2168_v22 = vld [vmem:[%s18935_s22 + $0x2440] sm:$0xff] }
 0x33c   : > { %9755 = vmatpush.bf16.msrb.mxu0 %v15521_v18  ;;  %9768 = vmatpush.bf16.msrb.mxu1 %v15525_v19  ;;  %v18107_v17 = vpop.eup %18106  ;;  %v12921_v18 = vor.u32 %v17061_v61, %v12920_v60  ;;  %v12925_v19 = vor.u32 %v16980_v4, %v12922_v6  ;;  %v12933_v21 = vor.u32 %v16981_v10, %v12930_v11  ;;  %v11604_v34 = vrot.slane %v18105_v16, 4  ;;  %v15528_v61 = vld [vmem:[%s18935_s22 + $0x1a10] sm:$0xf]  ;;  %v15536_v4 = vld [vmem:[%s18935_s22 + $0x1a18] sm:$0xf] }
 0x33d   : > { %v9478_v27 = vpop.f32.mrf.mxu2  ;;  %v7416_v32 = vpack.c.b16 %v6120_v13, %v6120_v13  ;;  %v16181_v60 = vor.u32 %v17792_v1, %v16178_v54  ;;  %v17712_v6 = vld [vmem:[%s18935_s22 + $0x1c9c] sm:$0xf0]  ;;  %v15529_v11 = vor.u32 %v17711_v62, %v15528_v61  ;;  %v17549_v16 = vld [vmem:[%s18935_s22 + $0x1784] sm:$0xf0]  ;;  %v17226_v1 = vld [vmem:[%s18935_s22 + $0xd6c] sm:$0xf0] }
 0x33e   : > { %v18109_v39 = vpop.eup %18108  ;;  %v14880_v10 = vld [vmem:[%s18935_s22 + $0x1500] sm:$0xf]  ;;  %v13594_v54 = vld [vmem:[%s18935_s22 + $0xd70] sm:$0xf0] }
 0x33f   : > { %9730 = vmatpush.bf16.msra.mxu2 %v14865_v28  ;;  %9743 = vmatpush.bf16.msra.mxu3 %v14869_v29  ;;  %v9491_v28 = vpop.f32.mrf.mxu3  ;;  %v12274_v29 = vld [vmem:[%s18935_s22 + $0x338] sm:$0xf0]  ;;  %v11603_v41 = vrot.slane %v18109_v39, 6  ;;  %v18111_v45 = vpop.eup %18110  ;;  %v17388_v39 = vld [vmem:[%s18935_s22 + $0x127c] sm:$0xf0] }
 0x340   : > { %9756 = vmatpush.bf16.msrb.mxu0 %v14873_v30  ;;  %9769 = vmatpush.bf16.msrb.mxu1 %v14877_v35  ;;  %v12280_v30 = vld [vmem:[%s18935_s22 + $0xb8] sm:$0xf]  ;;  %v11605_v35 = vrot.slane %v18107_v17, 2  ;;  %v12277_v42 = vor.u32 %v16818_v25, %v12274_v29  ;;  %v17468_v17 = vld [vmem:[%s18935_s22 + $0x1504] sm:$0xf]  ;;  %v14881_v28 = vor.u32 %v17549_v16, %v14880_v10 }
 0x341   : > { %v12281_v43 = vor.u32 %v16900_v31, %v12280_v30  ;;  %v14890_v25 = vld [vmem:[%s18935_s22 + $0x1790] sm:$0xf0]  ;;  %v14232_v31 = vld [vmem:[%s18935_s22 + $0xff0] sm:$0xf]  ;;  %v13584_v44 = vld [vmem:[%s18935_s22 + $0xae0] sm:$0xf] }
 0x342   : > { %v11727_v50 = vsel %vm11708_vm10, %v11604_v34, %v11605_v35  ;;  %v14893_v35 = vor.u32 %v17469_v24, %v14890_v25  ;;  %v12946_v10 = vld [vmem:[%s18935_s22 + $0x860] sm:$0xf0] }
 0x343   : > { %9731 = vmatpush.bf16.msra.mxu2 %v14217_v46  ;;  %9744 = vmatpush.bf16.msra.mxu3 %v14221_v47  ;;  %v12285_v46 = vor.u32 %v16819_v36, %v12282_v37  ;;  %v8814_v47 = vsel %vm8668_vm3, %v7416_v32, 0  ;;  %v17387_v32 = vld [vmem:[%s18935_s22 + $0x1274] sm:$0xf0]  ;;  %v14234_v36 = vld [vmem:[%s18935_s22 + $0x1278] sm:$0xf0] }
 0x344   : > { %9757 = vmatpush.bf16.msrb.mxu0 %v14225_v51  ;;  %9770 = vmatpush.bf16.msrb.mxu1 %v14229_v7  ;;  %v11726_v51 = vsel %vm11706_vm11, %v18111_v45, %v11603_v41  ;;  %v16176_v7 = vld [vmem:[%s18935_s22 + $0x1f20] sm:$0xf]  ;;  %v14240_v37 = vld [vmem:[%s18935_s22 + $0xff8] sm:$0xf]  ;;  %v14242_v41 = vld [vmem:[%s18935_s22 + $0x1280] sm:$0xf0] }
 0x345   : > { %v11728_v53 = vsel %vm8668_vm3, %v11726_v51, %v11727_v50  ;;  %v17225_v45 = vld [vmem:[%s18935_s22 + $0xd64] sm:$0xf0]  ;;  %v16820_v24 = vld [vmem:[%s18935_s22 + $0xc4] sm:$0xf] }
 0x346   : > { %11876 = vst [vmem:[%s19647_s14 + $0x30] sm:$0xff] %v11728_v53  ;;  %v13592_v50 = vld [vmem:[%s18935_s22 + $0xae8] sm:$0xf]  ;;  %v17145_v53 = vld [vmem:[%s18935_s22 + $0xaec] sm:$0xf] }
 0x347   : > { %9732 = vmatpush.bf16.msra.mxu2 %v13569_v59  ;;  %9745 = vmatpush.bf16.msra.mxu3 %v13573_v0  ;;  %v16177_v59 = vor.u32 %v17873_v52, %v16176_v7  ;;  %v16189_v0 = vor.u32 %v17793_v57, %v16186_v58  ;;  %v13585_v58 = vor.u32 %v17225_v45, %v13584_v44 }
 0x348   : > { %9758 = vmatpush.bf16.msrb.mxu0 %v13577_v2  ;;  %9771 = vmatpush.bf16.msrb.mxu1 %v13581_v3  ;;  %v17630_v2 = vld [vmem:[%s18935_s22 + $0x1a14] sm:$0xf]  ;;  %v15530_v3 = vld [vmem:[%s18935_s22 + $0x1c98] sm:$0xf0] }
 0x349   : > { %v15533_v13 = vor.u32 %v17630_v2, %v15530_v3  ;;  %v13597_v2 = vor.u32 %v17145_v53, %v13594_v54  ;;  %v16982_v3 = vld [vmem:[%s18935_s22 + $0x5d4] sm:$0xf]  ;;  %v16200_v53 = vld [vmem:[%s18935_s22 + $0x1f38] sm:$0xf]  ;;  %v17876_v54 = vld [vmem:[%s18935_s22 + $0x21bc] sm:$0xf0] }
 0x34b   : > { %9733 = vmatpush.bf16.msra.mxu2 %v12921_v18  ;;  %9746 = vmatpush.bf16.msra.mxu3 %v12925_v19  ;;  %v15537_v18 = vor.u32 %v17712_v6, %v15536_v4  ;;  %v15541_v19 = vor.u32 %v17631_v8, %v15538_v9  ;;  %v12938_v4 = vld [vmem:[%s18935_s22 + $0x858] sm:$0xf0]  ;;  %v12944_v6 = vld [vmem:[%s18935_s22 + $0x5d8] sm:$0xf]  ;;  %v17064_v8 = vld [vmem:[%s18935_s22 + $0x85c] sm:$0xf0] }
 0x34c   : > { %9759 = vmatpush.bf16.msrb.mxu0 %v12929_v20  ;;  %9772 = vmatpush.bf16.msrb.mxu1 %v12933_v21  ;;  %v14882_v20 = vld [vmem:[%s18935_s22 + $0x1788] sm:$0xf0]  ;;  %v14888_v21 = vld [vmem:[%s18935_s22 + $0x1508] sm:$0xf]  ;;  %v16983_v9 = vld [vmem:[%s18935_s22 + $0x5dc] sm:$0xf] }
 0x34d   : > { %v14885_v29 = vor.u32 %v17468_v17, %v14882_v20  ;;  %v14889_v30 = vor.u32 %v17550_v23, %v14888_v21  ;;  %v12949_v20 = vor.u32 %v16983_v9, %v12946_v10  ;;  %v12288_v21 = vld [vmem:[%s18935_s22 + $0xc0] sm:$0xf]  ;;  %v16901_v23 = vld [vmem:[%s18935_s22 + $0x344] sm:$0xf0]  ;;  %v14896_v9 = vld [vmem:[%s18935_s22 + $0x1510] sm:$0xf] }
 0x34f   : > { %9734 = vmatpush.bf16.msra.mxu2 %v12273_v40  ;;  %9747 = vmatpush.bf16.msra.mxu3 %v12277_v42  ;;  %v17307_v40 = vld [vmem:[%s18935_s22 + $0xffc] sm:$0xf]  ;;  %v2294_v42 = vperm.slane %v19990_v5, 5 }
 0x350   : > { %9760 = vmatpush.bf16.msrb.mxu0 %v12281_v43  ;;  %9773 = vmatpush.bf16.msrb.mxu1 %v12285_v46  ;;  %v2293_v43 = vperm.slane %v19990_v5, 4  ;;  %v14233_v46 = vor.u32 %v17387_v32, %v14232_v31  ;;  %v14241_v5 = vor.u32 %v17388_v39, %v14240_v37  ;;  %v14245_v51 = vor.u32 %v17307_v40, %v14242_v41 }
 0x351   : > { %v12289_v39 = vor.u32 %v16901_v23, %v12288_v21  ;;  %v17552_v21 = vld [vmem:[%s18935_s22 + $0x179c] sm:$0xf0]  ;;  %v17471_v23 = vld [vmem:[%s18935_s22 + $0x151c] sm:$0xf] }
 0x352   : > { %16674 = vmatmul.msk.bf16.vlgmr.msra.gmra.mxu2 %vm8664_vm9, %v19267_v12  ;;  %16675 = vmatmul.msk.bf16.vlgmr.msra.gmra.mxu3 %vm8664_vm9, %v19267_v12  ;;  %v9554_v26 = vpop.f32.mrf.mxu0  ;;  %v9567_v27 = vpop.f32.mrf.mxu1 }
 0x353   : > { %9779 = vmatpush.bf16.msrb.mxu2 %v8814_v47  ;;  %9792 = vmatpush.bf16.msrb.mxu3 %v8817_v48  ;;  %v9555_v38 = vadd.f32 %v9554_v26, %v2295_v14  ;;  %v9568_v34 = vadd.f32 %v9567_v27, %v2296_v15  ;;  %v14237_v47 = vor.u32 %v17306_v33, %v14234_v36  ;;  %v17144_v48 = vld [vmem:[%s18935_s22 + $0xae4] sm:$0xf]  ;;  %v12298_v36 = vld [vmem:[%s18935_s22 + $0x350] sm:$0xf0] }
 0x354   : > { %9805 = vmatpush.bf16.msra.mxu0 %v8820_v49  ;;  %9818 = vmatpush.bf16.msra.mxu1 %v8823_v56  ;;  %v13586_v49 = vld [vmem:[%s18935_s22 + $0xd68] sm:$0xf0] }
 0x355   : > { %16676 = vmatmul.msk.bf16.vlgmr.msrb.gmra.mxu0 %vm8664_vm9, %v19267_v12  ;;  %16677 = vmatmul.msk.bf16.vlgmr.msrb.gmra.mxu1 %vm8664_vm9, %v19267_v12  ;;  %18112 = vtanh.f32 %v9555_v38  ;;  %v9528_v7 = vpop.f32.mrf.mxu2  ;;  %v9541_v52 = vpop.f32.mrf.mxu3  ;;  %v2169_v56 = vld [vmem:[%s18935_s22 + $0x2448] sm:$0xff] }
 0x356   : > { %18114 = vtanh.f32 %v9568_v34  ;;  %v9542_v55 = vadd.f32 %v9541_v52, %v2294_v42  ;;  %v9529_v57 = vadd.f32 %v9528_v7, %v2293_v43  ;;  %v6126_v14 = vunpack.c.l.b16 %v2169_v56  ;;  %v17794_v7 = vld [vmem:[%s18935_s22 + $0x1f34] sm:$0xf] }
 0x357   : > { %9780 = vmatpush.bf16.msrb.mxu2 %v16177_v59  ;;  %9793 = vmatpush.bf16.msrb.mxu3 %v16181_v60  ;;  %v12936_v59 = vld [vmem:[%s18935_s22 + $0x5d0] sm:$0xf]  ;;  %v17063_v60 = vld [vmem:[%s18935_s22 + $0x854] sm:$0xf0]  ;;  %v6127_v25 = vunpack.c.h.b16 %v2169_v56  ;;  %v16202_v56 = vld [vmem:[%s18935_s22 + $0x21c0] sm:$0xf0] }
 0x358   : > { %9806 = vmatpush.bf16.msra.mxu0 %v16185_v63  ;;  %9819 = vmatpush.bf16.msra.mxu1 %v16189_v0  ;;  %v13589_v63 = vor.u32 %v17144_v48, %v13586_v49  ;;  %v13593_v0 = vor.u32 %v17226_v1, %v13592_v50  ;;  %18116 = vtanh.f32 %v9542_v55  ;;  %v12937_v17 = vor.u32 %v17063_v60, %v12936_v59  ;;  %v16194_v1 = vld [vmem:[%s18935_s22 + $0x21b8] sm:$0xf0]  ;;  %v15544_v59 = vld [vmem:[%s18935_s22 + $0x1a20] sm:$0xf]  ;;  %v17713_v60 = vld [vmem:[%s18935_s22 + $0x1ca4] sm:$0xf0] }
 0x359   : > { %18118 = vtanh.f32 %v9529_v57  ;;  %v7422_v33 = vpack.c.b16 %v6126_v14, %v6126_v14  ;;  %v7423_v43 = vpack.c.b16 %v6127_v25, %v6127_v25  ;;  %v15545_v10 = vor.u32 %v17713_v60, %v15544_v59  ;;  %v17065_v59 = vld [vmem:[%s18935_s22 + $0x864] sm:$0xf0] }
 0x35a   : > { %v9556_v61 = vpop.f32.mrf.mxu0  ;;  %v9569_v62 = vpop.f32.mrf.mxu1 }
 0x35b   : > { %9781 = vmatpush.bf16.msrb.mxu2 %v15529_v11  ;;  %9794 = vmatpush.bf16.msrb.mxu3 %v15533_v13  ;;  %v6124_v11 = vunpack.c.l.b16 %v2168_v22  ;;  %v6125_v13 = vunpack.c.h.b16 %v2168_v22  ;;  %v18113_v15 = vpop.eup %18112  ;;  %v8832_v48 = vsel %vm8668_vm3, %v7422_v33, 0  ;;  %v8835_v55 = vsel %vm8668_vm3, %v7423_v43, 0  ;;  %v17795_v22 = vld [vmem:[%s18935_s22 + $0x1f3c] sm:$0xf]  ;;  %v17632_v61 = vld [vmem:[%s18935_s22 + $0x1a24] sm:$0xf] }
 0x35c   : > { %9807 = vmatpush.bf16.msra.mxu0 %v15537_v18  ;;  %9820 = vmatpush.bf16.msra.mxu1 %v15541_v19  ;;  %v18115_v16 = vpop.eup %18114  ;;  %v12941_v18 = vor.u32 %v16982_v3, %v12938_v4  ;;  %v12945_v19 = vor.u32 %v17064_v8, %v12944_v6  ;;  %v11607_v38 = vrot.slane %v18113_v15, 4  ;;  %v16201_v62 = vor.u32 %v17876_v54, %v16200_v53  ;;  %v20149_v3 = vld [vmem:[%s19570_s13 + $0x20] sm:$0xff]  ;;  %v17633_v6 = vld [vmem:[%s18935_s22 + $0x1a2c] sm:$0xf]  ;;  %v13610_v53 = vld [vmem:[%s18935_s22 + $0xd80] sm:$0xf0] }
 0x35d   : > { %v9530_v26 = vpop.f32.mrf.mxu2  ;;  %v9543_v27 = vpop.f32.mrf.mxu3  ;;  %v7420_v31 = vpack.c.b16 %v6124_v11, %v6124_v11  ;;  %v7421_v32 = vpack.c.b16 %v6125_v13, %v6125_v13  ;;  %v11608_v34 = vrot.slane %v18115_v16, 2  ;;  %v17714_v4 = vld [vmem:[%s18935_s22 + $0x1cac] sm:$0xf0]  ;;  %v15554_v8 = vld [vmem:[%s18935_s22 + $0x1cb0] sm:$0xf0]  ;;  %v2299_v13 = vperm.slane %v20149_v3, 2 }
 0x35e   : > { %v18117_v37 = vpop.eup %18116  ;;  %v2300_v14 = vperm.slane %v20149_v3, 3  ;;  %v17551_v15 = vld [vmem:[%s18935_s22 + $0x1794] sm:$0xf0]  ;;  %v17470_v16 = vld [vmem:[%s18935_s22 + $0x1514] sm:$0xf] }
 0x35f   : > { %9782 = vmatpush.bf16.msrb.mxu2 %v14881_v28  ;;  %9795 = vmatpush.bf16.msrb.mxu3 %v14885_v29  ;;  %v12290_v28 = vld [vmem:[%s18935_s22 + $0x348] sm:$0xf0]  ;;  %v12296_v29 = vld [vmem:[%s18935_s22 + $0xc8] sm:$0xf]  ;;  %v11606_v40 = vrot.slane %v18117_v37, 6  ;;  %v18119_v44 = vpop.eup %18118  ;;  %v11730_v49 = vsel %vm11708_vm10, %v11607_v38, %v11608_v34  ;;  %v14897_v27 = vor.u32 %v17551_v15, %v14896_v9 }
 0x360   : > { %9808 = vmatpush.bf16.msra.mxu0 %v14889_v30  ;;  %9821 = vmatpush.bf16.msra.mxu1 %v14893_v35  ;;  %v16902_v30 = vld [vmem:[%s18935_s22 + $0x34c] sm:$0xf0]  ;;  %v16821_v35 = vld [vmem:[%s18935_s22 + $0xcc] sm:$0xf]  ;;  %v12293_v41 = vor.u32 %v16820_v24, %v12290_v28  ;;  %v14906_v24 = vld [vmem:[%s18935_s22 + $0x17a0] sm:$0xf0] }
 0x361   : > { %v12297_v42 = vor.u32 %v16902_v30, %v12296_v29  ;;  %v12301_v45 = vor.u32 %v16821_v35, %v12298_v36  ;;  %v11729_v50 = vsel %vm11706_vm11, %v18119_v44, %v11606_v40  ;;  %v14248_v30 = vld [vmem:[%s18935_s22 + $0x1000] sm:$0xf]  ;;  %v14909_v34 = vor.u32 %v17471_v23, %v14906_v24  ;;  %v14250_v35 = vld [vmem:[%s18935_s22 + $0x1288] sm:$0xf0]  ;;  %v14256_v36 = vld [vmem:[%s18935_s22 + $0x1008] sm:$0xf] }
 0x362   : > { %v11731_v52 = vsel %vm8668_vm3, %v11729_v50, %v11730_v49  ;;  %v17390_v37 = vld [vmem:[%s18935_s22 + $0x128c] sm:$0xf0]  ;;  %v14258_v40 = vld [vmem:[%s18935_s22 + $0x1290] sm:$0xf0]  ;;  %v17227_v44 = vld [vmem:[%s18935_s22 + $0xd74] sm:$0xf0] }
 0x363   : > { %9783 = vmatpush.bf16.msrb.mxu2 %v14233_v46  ;;  %9796 = vmatpush.bf16.msrb.mxu3 %v14237_v47  ;;  %v8826_v46 = vsel %vm8668_vm3, %v7420_v31, 0  ;;  %v8829_v47 = vsel %vm8668_vm3, %v7421_v32, 0  ;;  %11877 = vst [vmem:[%s19647_s14 + $0x38] sm:$0xff] %v11731_v52  ;;  %v17389_v31 = vld [vmem:[%s18935_s22 + $0x1284] sm:$0xf0]  ;;  %v14257_v50 = vor.u32 %v17390_v37, %v14256_v36 }
 0x364   : > { %9809 = vmatpush.bf16.msra.mxu0 %v14241_v5  ;;  %9822 = vmatpush.bf16.msra.mxu1 %v14245_v51  ;;  %v16192_v5 = vld [vmem:[%s18935_s22 + $0x1f30] sm:$0xf]  ;;  %v17875_v51 = vld [vmem:[%s18935_s22 + $0x21b4] sm:$0xf0]  ;;  %v17308_v32 = vld [vmem:[%s18935_s22 + $0x1004] sm:$0xf] }
 0x365   : > { %v16193_v57 = vor.u32 %v17875_v51, %v16192_v5  ;;  %v13600_v43 = vld [vmem:[%s18935_s22 + $0xaf0] sm:$0xf]  ;;  %v13608_v49 = vld [vmem:[%s18935_s22 + $0xaf8] sm:$0xf]  ;;  %v17228_v52 = vld [vmem:[%s18935_s22 + $0xd7c] sm:$0xf0] }
 0x366   : > { %v16985_v9 = vld [vmem:[%s18935_s22 + $0x5ec] sm:$0xf]  ;;  %v16903_v23 = vld [vmem:[%s18935_s22 + $0x354] sm:$0xf0]  ;;  %v16822_v24 = vld [vmem:[%s18935_s22 + $0xd4] sm:$0xf] }
 0x367   : > { %9784 = vmatpush.bf16.msrb.mxu2 %v13585_v58  ;;  %9797 = vmatpush.bf16.msrb.mxu3 %v13589_v63  ;;  %v16197_v58 = vor.u32 %v17794_v7, %v16194_v1  ;;  %v16205_v63 = vor.u32 %v17795_v22, %v16202_v56  ;;  %v17147_v1 = vld [vmem:[%s18935_s22 + $0xafc] sm:$0xf]  ;;  %v12314_v36 = vld [vmem:[%s18935_s22 + $0x360] sm:$0xf0] }
 0x368   : > { %9810 = vmatpush.bf16.msra.mxu0 %v13593_v0  ;;  %9823 = vmatpush.bf16.msra.mxu1 %v13597_v2  ;;  %v15546_v0 = vld [vmem:[%s18935_s22 + $0x1ca8] sm:$0xf0]  ;;  %v15552_v2 = vld [vmem:[%s18935_s22 + $0x1a28] sm:$0xf]  ;;  %v2171_v22 = vld [vmem:[%s18935_s22 + $0x2458] sm:$0xff] }
 0x369   : > { %v15549_v11 = vor.u32 %v17632_v61, %v15546_v0  ;;  %v13613_v0 = vor.u32 %v17147_v1, %v13610_v53  ;;  %v16210_v1 = vld [vmem:[%s18935_s22 + $0x21c8] sm:$0xf0]  ;;  %v16216_v53 = vld [vmem:[%s18935_s22 + $0x1f48] sm:$0xf] }
 0x36b   : > { %9785 = vmatpush.bf16.msrb.mxu2 %v12937_v17  ;;  %9798 = vmatpush.bf16.msrb.mxu3 %v12941_v18  ;;  %v15553_v17 = vor.u32 %v17714_v4, %v15552_v2  ;;  %v15557_v18 = vor.u32 %v17633_v6, %v15554_v8  ;;  %v16984_v2 = vld [vmem:[%s18935_s22 + $0x5e4] sm:$0xf]  ;;  %v12954_v4 = vld [vmem:[%s18935_s22 + $0x868] sm:$0xf0]  ;;  %v12960_v6 = vld [vmem:[%s18935_s22 + $0x5e8] sm:$0xf] }
 0x36c   : > { %9811 = vmatpush.bf16.msra.mxu0 %v12945_v19  ;;  %9824 = vmatpush.bf16.msra.mxu1 %v12949_v20  ;;  %v14898_v19 = vld [vmem:[%s18935_s22 + $0x1798] sm:$0xf0]  ;;  %v14904_v20 = vld [vmem:[%s18935_s22 + $0x1518] sm:$0xf]  ;;  %v17066_v8 = vld [vmem:[%s18935_s22 + $0x86c] sm:$0xf0] }
 0x36d   : > { %v14901_v28 = vor.u32 %v17470_v16, %v14898_v19  ;;  %v14905_v29 = vor.u32 %v17552_v21, %v14904_v20  ;;  %v12961_v19 = vor.u32 %v17066_v8, %v12960_v6  ;;  %v12304_v21 = vld [vmem:[%s18935_s22 + $0xd0] sm:$0xf]  ;;  %v17635_v6 = vld [vmem:[%s18935_s22 + $0x1a3c] sm:$0xf]  ;;  %v15570_v8 = vld [vmem:[%s18935_s22 + $0x1cc0] sm:$0xf0] }
 0x36f   : > { %9786 = vmatpush.bf16.msrb.mxu2 %v12289_v39  ;;  %9799 = vmatpush.bf16.msrb.mxu3 %v12293_v41  ;;  %v17309_v39 = vld [vmem:[%s18935_s22 + $0x100c] sm:$0xf]  ;;  %v2298_v41 = vperm.slane %v20149_v3, 1 }
 0x370   : > { %9812 = vmatpush.bf16.msra.mxu0 %v12297_v42  ;;  %9825 = vmatpush.bf16.msra.mxu1 %v12301_v45  ;;  %v2297_v42 = vperm.slane %v20149_v3, 0  ;;  %v14249_v45 = vor.u32 %v17389_v31, %v14248_v30  ;;  %v14261_v5 = vor.u32 %v17309_v39, %v14258_v40  ;;  %v16904_v30 = vld [vmem:[%s18935_s22 + $0x35c] sm:$0xf0]  ;;  %v12305_v39 = vor.u32 %v16903_v23, %v12304_v21  ;;  %v17554_v21 = vld [vmem:[%s18935_s22 + $0x17ac] sm:$0xf0] }
 0x371   : > { %v17473_v23 = vld [vmem:[%s18935_s22 + $0x152c] sm:$0xf] }
 0x372   : > { %16678 = vmatmul.msk.bf16.vlgmr.msrb.gmra.mxu2 %vm8664_vm9, %v19267_v12  ;;  %16679 = vmatmul.msk.bf16.vlgmr.msrb.gmra.mxu3 %vm8664_vm9, %v19267_v12  ;;  %v9606_v25 = vpop.f32.mrf.mxu0  ;;  %v9619_v26 = vpop.f32.mrf.mxu1 }
 0x373   : > { %9831 = vmatpush.bf16.msra.mxu2 %v8826_v46  ;;  %9844 = vmatpush.bf16.msra.mxu3 %v8829_v47  ;;  %v9607_v33 = vadd.f32 %v9606_v25, %v2299_v13  ;;  %v9620_v38 = vadd.f32 %v9619_v26, %v2300_v14  ;;  %v14253_v46 = vor.u32 %v17308_v32, %v14250_v35  ;;  %v17146_v47 = vld [vmem:[%s18935_s22 + $0xaf4] sm:$0xf]  ;;  %v6130_v14 = vunpack.c.l.b16 %v2171_v22  ;;  %v16823_v35 = vld [vmem:[%s18935_s22 + $0xdc] sm:$0xf] }
 0x374   : > { %9857 = vmatpush.bf16.msrb.mxu0 %v8832_v48  ;;  %9870 = vmatpush.bf16.msrb.mxu1 %v8835_v55  ;;  %v13602_v48 = vld [vmem:[%s18935_s22 + $0xd78] sm:$0xf0]  ;;  %v2170_v55 = vld [vmem:[%s18935_s22 + $0x2450] sm:$0xff]  ;;  %v6131_v25 = vunpack.c.h.b16 %v2171_v22  ;;  %v17797_v22 = vld [vmem:[%s18935_s22 + $0x1f4c] sm:$0xf] }
 0x375   : > { %16680 = vmatmul.msk.bf16.vlgmr.msra.gmra.mxu0 %vm8664_vm9, %v19267_v12  ;;  %16681 = vmatmul.msk.bf16.vlgmr.msra.gmra.mxu1 %vm8664_vm9, %v19267_v12  ;;  %18120 = vtanh.f32 %v9607_v33  ;;  %v9580_v51 = vpop.f32.mrf.mxu2  ;;  %v9593_v7 = vpop.f32.mrf.mxu3  ;;  %v6129_v13 = vunpack.c.h.b16 %v2170_v55  ;;  %v7426_v33 = vpack.c.b16 %v6130_v14, %v6130_v14  ;;  %v2304_v14 = vperm.slane %v20149_v3, 7 }
 0x376   : > { %18122 = vtanh.f32 %v9620_v38  ;;  %v9594_v54 = vadd.f32 %v9593_v7, %v2298_v41  ;;  %v9581_v56 = vadd.f32 %v9580_v51, %v2297_v42  ;;  %v17877_v51 = vld [vmem:[%s18935_s22 + $0x21c4] sm:$0xf0]  ;;  %v17796_v7 = vld [vmem:[%s18935_s22 + $0x1f44] sm:$0xf] }
 0x377   : > { %9832 = vmatpush.bf16.msra.mxu2 %v16193_v57  ;;  %9845 = vmatpush.bf16.msra.mxu3 %v16197_v58  ;;  %v13601_v57 = vor.u32 %v17227_v44, %v13600_v43  ;;  %v12952_v58 = vld [vmem:[%s18935_s22 + $0x5e0] sm:$0xf]  ;;  %v7425_v32 = vpack.c.b16 %v6129_v13, %v6129_v13  ;;  %v7427_v43 = vpack.c.b16 %v6131_v25, %v6131_v25  ;;  %v2303_v13 = vperm.slane %v20149_v3, 6 }
 0x378   : > { %9858 = vmatpush.bf16.msrb.mxu0 %v16201_v62  ;;  %9871 = vmatpush.bf16.msrb.mxu1 %v16205_v63  ;;  %v13605_v62 = vor.u32 %v17146_v47, %v13602_v48  ;;  %v13609_v63 = vor.u32 %v17228_v52, %v13608_v49  ;;  %18124 = vtanh.f32 %v9594_v54  ;;  %v8844_v48 = vsel %vm8668_vm3, %v7426_v33, 0  ;;  %v17878_v54 = vld [vmem:[%s18935_s22 + $0x21cc] sm:$0xf0] }
 0x379   : > { %18126 = vtanh.f32 %v9581_v56  ;;  %v8841_v47 = vsel %vm8668_vm3, %v7425_v32, 0  ;;  %v16218_v56 = vld [vmem:[%s18935_s22 + $0x21d0] sm:$0xf0] }
 0x37a   : > { %v9608_v60 = vpop.f32.mrf.mxu0  ;;  %v9621_v61 = vpop.f32.mrf.mxu1  ;;  %v17310_v32 = vld [vmem:[%s18935_s22 + $0x1014] sm:$0xf] }
 0x37b   : > { %9833 = vmatpush.bf16.msra.mxu2 %v15545_v10  ;;  %9846 = vmatpush.bf16.msra.mxu3 %v15549_v11  ;;  %v12962_v10 = vld [vmem:[%s18935_s22 + $0x870] sm:$0xf0]  ;;  %v6128_v11 = vunpack.c.l.b16 %v2170_v55  ;;  %v18121_v15 = vpop.eup %18120  ;;  %v8847_v55 = vsel %vm8668_vm3, %v7427_v43, 0  ;;  %v17715_v60 = vld [vmem:[%s18935_s22 + $0x1cb4] sm:$0xf0]  ;;  %v16217_v61 = vor.u32 %v17878_v54, %v16216_v53  ;;  %v2172_v54 = vld [vmem:[%s18935_s22 + $0x2460] sm:$0xff] }
 0x37c   : > { %9859 = vmatpush.bf16.msrb.mxu0 %v15553_v17  ;;  %9872 = vmatpush.bf16.msrb.mxu1 %v15557_v18  ;;  %v18123_v16 = vpop.eup %18122  ;;  %v12953_v17 = vor.u32 %v17065_v59, %v12952_v58  ;;  %v12957_v18 = vor.u32 %v16984_v2, %v12954_v4  ;;  %v12965_v20 = vor.u32 %v16985_v9, %v12962_v10  ;;  %v11610_v38 = vrot.slane %v18121_v15, 4  ;;  %v15560_v59 = vld [vmem:[%s18935_s22 + $0x1a30] sm:$0xf]  ;;  %v15568_v2 = vld [vmem:[%s18935_s22 + $0x1a38] sm:$0xf] }
 0x37d   : > { %v9582_v26 = vpop.f32.mrf.mxu2  ;;  %v7424_v31 = vpack.c.b16 %v6128_v11, %v6128_v11  ;;  %v16213_v58 = vor.u32 %v17796_v7, %v16210_v1  ;;  %v17716_v4 = vld [vmem:[%s18935_s22 + $0x1cbc] sm:$0xf0]  ;;  %v15561_v10 = vor.u32 %v17715_v60, %v15560_v59  ;;  %v17553_v15 = vld [vmem:[%s18935_s22 + $0x17a4] sm:$0xf0]  ;;  %v17230_v7 = vld [vmem:[%s18935_s22 + $0xd8c] sm:$0xf0] }
 0x37e   : > { %v18125_v37 = vpop.eup %18124  ;;  %v14912_v9 = vld [vmem:[%s18935_s22 + $0x1520] sm:$0xf]  ;;  %v13626_v1 = vld [vmem:[%s18935_s22 + $0xd90] sm:$0xf0] }
 0x37f   : > { %9834 = vmatpush.bf16.msra.mxu2 %v14897_v27  ;;  %9847 = vmatpush.bf16.msra.mxu3 %v14901_v28  ;;  %v9595_v27 = vpop.f32.mrf.mxu3  ;;  %v12306_v28 = vld [vmem:[%s18935_s22 + $0x358] sm:$0xf0]  ;;  %v11609_v40 = vrot.slane %v18125_v37, 6  ;;  %v18127_v44 = vpop.eup %18126  ;;  %v17392_v37 = vld [vmem:[%s18935_s22 + $0x129c] sm:$0xf0] }
 0x380   : > { %9860 = vmatpush.bf16.msrb.mxu0 %v14905_v29  ;;  %9873 = vmatpush.bf16.msrb.mxu1 %v14909_v34  ;;  %v12312_v29 = vld [vmem:[%s18935_s22 + $0xd8] sm:$0xf]  ;;  %v11611_v34 = vrot.slane %v18123_v16, 2  ;;  %v12309_v41 = vor.u32 %v16822_v24, %v12306_v28  ;;  %v17472_v16 = vld [vmem:[%s18935_s22 + $0x1524] sm:$0xf]  ;;  %v14913_v27 = vor.u32 %v17553_v15, %v14912_v9 }
 0x381   : > { %v12313_v42 = vor.u32 %v16904_v30, %v12312_v29  ;;  %v14922_v24 = vld [vmem:[%s18935_s22 + $0x17b0] sm:$0xf0]  ;;  %v14264_v30 = vld [vmem:[%s18935_s22 + $0x1010] sm:$0xf]  ;;  %v13616_v43 = vld [vmem:[%s18935_s22 + $0xb00] sm:$0xf] }
 0x382   : > { %v11733_v49 = vsel %vm11708_vm10, %v11610_v38, %v11611_v34  ;;  %v14925_v34 = vor.u32 %v17473_v23, %v14922_v24  ;;  %v12978_v9 = vld [vmem:[%s18935_s22 + $0x880] sm:$0xf0] }
 0x383   : > { %9835 = vmatpush.bf16.msra.mxu2 %v14249_v45  ;;  %9848 = vmatpush.bf16.msra.mxu3 %v14253_v46  ;;  %v12317_v45 = vor.u32 %v16823_v35, %v12314_v36  ;;  %v8838_v46 = vsel %vm8668_vm3, %v7424_v31, 0  ;;  %v17391_v31 = vld [vmem:[%s18935_s22 + $0x1294] sm:$0xf0]  ;;  %v14266_v35 = vld [vmem:[%s18935_s22 + $0x1298] sm:$0xf0] }
 0x384   : > { %9861 = vmatpush.bf16.msrb.mxu0 %v14257_v50  ;;  %9874 = vmatpush.bf16.msrb.mxu1 %v14261_v5  ;;  %v11732_v50 = vsel %vm11706_vm11, %v18127_v44, %v11609_v40  ;;  %v16208_v5 = vld [vmem:[%s18935_s22 + $0x1f40] sm:$0xf]  ;;  %v14272_v36 = vld [vmem:[%s18935_s22 + $0x1018] sm:$0xf]  ;;  %v14274_v40 = vld [vmem:[%s18935_s22 + $0x12a0] sm:$0xf0] }
 0x385   : > { %v11734_v52 = vsel %vm8668_vm3, %v11732_v50, %v11733_v49  ;;  %v17229_v44 = vld [vmem:[%s18935_s22 + $0xd84] sm:$0xf0]  ;;  %v16824_v23 = vld [vmem:[%s18935_s22 + $0xe4] sm:$0xf] }
 0x386   : > { %11878 = vst [vmem:[%s19647_s14 + $0x40] sm:$0xff] %v11734_v52  ;;  %v13624_v49 = vld [vmem:[%s18935_s22 + $0xb08] sm:$0xf]  ;;  %v17149_v52 = vld [vmem:[%s18935_s22 + $0xb0c] sm:$0xf] }
 0x387   : > { %9836 = vmatpush.bf16.msra.mxu2 %v13601_v57  ;;  %9849 = vmatpush.bf16.msra.mxu3 %v13605_v62  ;;  %v16209_v57 = vor.u32 %v17877_v51, %v16208_v5  ;;  %v16221_v62 = vor.u32 %v17797_v22, %v16218_v56  ;;  %v13617_v56 = vor.u32 %v17229_v44, %v13616_v43 }
 0x388   : > { %9862 = vmatpush.bf16.msrb.mxu0 %v13609_v63  ;;  %9875 = vmatpush.bf16.msrb.mxu1 %v13613_v0  ;;  %v17634_v63 = vld [vmem:[%s18935_s22 + $0x1a34] sm:$0xf]  ;;  %v15562_v0 = vld [vmem:[%s18935_s22 + $0x1cb8] sm:$0xf0] }
 0x389   : > { %v15565_v11 = vor.u32 %v17634_v63, %v15562_v0  ;;  %v13629_v63 = vor.u32 %v17149_v52, %v13626_v1  ;;  %v16986_v0 = vld [vmem:[%s18935_s22 + $0x5f4] sm:$0xf]  ;;  %v16232_v52 = vld [vmem:[%s18935_s22 + $0x1f58] sm:$0xf]  ;;  %v17880_v1 = vld [vmem:[%s18935_s22 + $0x21dc] sm:$0xf0] }
 0x38b   : > { %9837 = vmatpush.bf16.msra.mxu2 %v12953_v17  ;;  %9850 = vmatpush.bf16.msra.mxu3 %v12957_v18  ;;  %v15569_v17 = vor.u32 %v17716_v4, %v15568_v2  ;;  %v15573_v18 = vor.u32 %v17635_v6, %v15570_v8  ;;  %v12970_v2 = vld [vmem:[%s18935_s22 + $0x878] sm:$0xf0]  ;;  %v12976_v4 = vld [vmem:[%s18935_s22 + $0x5f8] sm:$0xf]  ;;  %v17068_v6 = vld [vmem:[%s18935_s22 + $0x87c] sm:$0xf0] }
 0x38c   : > { %9863 = vmatpush.bf16.msrb.mxu0 %v12961_v19  ;;  %9876 = vmatpush.bf16.msrb.mxu1 %v12965_v20  ;;  %v14914_v19 = vld [vmem:[%s18935_s22 + $0x17a8] sm:$0xf0]  ;;  %v14920_v20 = vld [vmem:[%s18935_s22 + $0x1528] sm:$0xf]  ;;  %v16987_v8 = vld [vmem:[%s18935_s22 + $0x5fc] sm:$0xf] }
 0x38d   : > { %v14917_v28 = vor.u32 %v17472_v16, %v14914_v19  ;;  %v14921_v29 = vor.u32 %v17554_v21, %v14920_v20  ;;  %v12981_v19 = vor.u32 %v16987_v8, %v12978_v9  ;;  %v12320_v20 = vld [vmem:[%s18935_s22 + $0xe0] sm:$0xf]  ;;  %v16905_v21 = vld [vmem:[%s18935_s22 + $0x364] sm:$0xf0]  ;;  %v14928_v8 = vld [vmem:[%s18935_s22 + $0x1530] sm:$0xf] }
 0x38f   : > { %9838 = vmatpush.bf16.msra.mxu2 %v12305_v39  ;;  %9851 = vmatpush.bf16.msra.mxu3 %v12309_v41  ;;  %v17311_v39 = vld [vmem:[%s18935_s22 + $0x101c] sm:$0xf]  ;;  %v2302_v41 = vperm.slane %v20149_v3, 5 }
 0x390   : > { %9864 = vmatpush.bf16.msrb.mxu0 %v12313_v42  ;;  %9877 = vmatpush.bf16.msrb.mxu1 %v12317_v45  ;;  %v2301_v42 = vperm.slane %v20149_v3, 4  ;;  %v14265_v45 = vor.u32 %v17391_v31, %v14264_v30  ;;  %v14273_v3 = vor.u32 %v17392_v37, %v14272_v36  ;;  %v14277_v50 = vor.u32 %v17311_v39, %v14274_v40 }
 0x391   : > { %v12321_v37 = vor.u32 %v16905_v21, %v12320_v20  ;;  %v17556_v20 = vld [vmem:[%s18935_s22 + $0x17bc] sm:$0xf0]  ;;  %v17475_v21 = vld [vmem:[%s18935_s22 + $0x153c] sm:$0xf] }
 0x392   : > { %16682 = vmatmul.msk.bf16.vlgmr.msra.gmra.mxu2 %vm8664_vm9, %v19267_v12  ;;  %16683 = vmatmul.msk.bf16.vlgmr.msra.gmra.mxu3 %vm8664_vm9, %v19267_v12  ;;  %v9658_v25 = vpop.f32.mrf.mxu0  ;;  %v9671_v26 = vpop.f32.mrf.mxu1 }
 0x393   : > { %9883 = vmatpush.bf16.msrb.mxu2 %v8838_v46  ;;  %9896 = vmatpush.bf16.msrb.mxu3 %v8841_v47  ;;  %v9659_v33 = vadd.f32 %v9658_v25, %v2303_v13  ;;  %v9672_v38 = vadd.f32 %v9671_v26, %v2304_v14  ;;  %v14269_v46 = vor.u32 %v17310_v32, %v14266_v35  ;;  %v17148_v47 = vld [vmem:[%s18935_s22 + $0xb04] sm:$0xf]  ;;  %v12330_v35 = vld [vmem:[%s18935_s22 + $0x370] sm:$0xf0] }
 0x394   : > { %9909 = vmatpush.bf16.msra.mxu0 %v8844_v48  ;;  %9922 = vmatpush.bf16.msra.mxu1 %v8847_v55  ;;  %v13618_v48 = vld [vmem:[%s18935_s22 + $0xd88] sm:$0xf0] }
 0x395   : > { %16684 = vmatmul.msk.bf16.vlgmr.msrb.gmra.mxu0 %vm8664_vm9, %v19267_v12  ;;  %16685 = vmatmul.msk.bf16.vlgmr.msrb.gmra.mxu1 %vm8664_vm9, %v19267_v12  ;;  %18128 = vtanh.f32 %v9659_v33  ;;  %v9632_v5 = vpop.f32.mrf.mxu2  ;;  %v9645_v51 = vpop.f32.mrf.mxu3  ;;  %v2173_v55 = vld [vmem:[%s18935_s22 + $0x2468] sm:$0xff] }
 0x396   : > { %18130 = vtanh.f32 %v9672_v38  ;;  %v9646_v53 = vadd.f32 %v9645_v51, %v2302_v41  ;;  %v9633_v22 = vadd.f32 %v9632_v5, %v2301_v42  ;;  %v6134_v13 = vunpack.c.l.b16 %v2173_v55  ;;  %v17798_v5 = vld [vmem:[%s18935_s22 + $0x1f54] sm:$0xf] }
 0x397   : > { %9884 = vmatpush.bf16.msrb.mxu2 %v16209_v57  ;;  %9897 = vmatpush.bf16.msrb.mxu3 %v16213_v58  ;;  %v12968_v57 = vld [vmem:[%s18935_s22 + $0x5f0] sm:$0xf]  ;;  %v17067_v58 = vld [vmem:[%s18935_s22 + $0x874] sm:$0xf0]  ;;  %v6135_v24 = vunpack.c.h.b16 %v2173_v55  ;;  %v16234_v55 = vld [vmem:[%s18935_s22 + $0x21e0] sm:$0xf0] }
 0x398   : > { %9910 = vmatpush.bf16.msra.mxu0 %v16217_v61  ;;  %9923 = vmatpush.bf16.msra.mxu1 %v16221_v62  ;;  %v13621_v61 = vor.u32 %v17148_v47, %v13618_v48  ;;  %v13625_v62 = vor.u32 %v17230_v7, %v13624_v49  ;;  %18132 = vtanh.f32 %v9646_v53  ;;  %v12969_v16 = vor.u32 %v17067_v58, %v12968_v57  ;;  %v16226_v7 = vld [vmem:[%s18935_s22 + $0x21d8] sm:$0xf0]  ;;  %v15576_v57 = vld [vmem:[%s18935_s22 + $0x1a40] sm:$0xf]  ;;  %v17717_v58 = vld [vmem:[%s18935_s22 + $0x1cc4] sm:$0xf0] }
 0x399   : > { %18134 = vtanh.f32 %v9633_v22  ;;  %v7430_v32 = vpack.c.b16 %v6134_v13, %v6134_v13  ;;  %v7431_v42 = vpack.c.b16 %v6135_v24, %v6135_v24  ;;  %v15577_v9 = vor.u32 %v17717_v58, %v15576_v57  ;;  %v17069_v57 = vld [vmem:[%s18935_s22 + $0x884] sm:$0xf0] }
 0x39a   : > { %v9660_v59 = vpop.f32.mrf.mxu0  ;;  %v9673_v60 = vpop.f32.mrf.mxu1 }
 0x39b   : > { %9885 = vmatpush.bf16.msrb.mxu2 %v15561_v10  ;;  %9898 = vmatpush.bf16.msrb.mxu3 %v15565_v11  ;;  %v6132_v10 = vunpack.c.l.b16 %v2172_v54  ;;  %v6133_v11 = vunpack.c.h.b16 %v2172_v54  ;;  %v18129_v14 = vpop.eup %18128  ;;  %v8856_v47 = vsel %vm8668_vm3, %v7430_v32, 0  ;;  %v8859_v53 = vsel %vm8668_vm3, %v7431_v42, 0  ;;  %v17799_v54 = vld [vmem:[%s18935_s22 + $0x1f5c] sm:$0xf]  ;;  %v17636_v59 = vld [vmem:[%s18935_s22 + $0x1a44] sm:$0xf] }
 0x39c   : > { %9911 = vmatpush.bf16.msra.mxu0 %v15569_v17  ;;  %9924 = vmatpush.bf16.msra.mxu1 %v15573_v18  ;;  %v18131_v15 = vpop.eup %18130  ;;  %v12973_v17 = vor.u32 %v16986_v0, %v12970_v2  ;;  %v12977_v18 = vor.u32 %v17068_v6, %v12976_v4  ;;  %v11613_v33 = vrot.slane %v18129_v14, 4  ;;  %v16233_v60 = vor.u32 %v17880_v1, %v16232_v52  ;;  %v20308_v0 = vld [vmem:[%s19570_s13 + $0x28] sm:$0xff]  ;;  %v17718_v2 = vld [vmem:[%s18935_s22 + $0x1ccc] sm:$0xf0]  ;;  %v17637_v4 = vld [vmem:[%s18935_s22 + $0x1a4c] sm:$0xf] }
 0x39d   : > { %v9634_v25 = vpop.f32.mrf.mxu2  ;;  %v9647_v26 = vpop.f32.mrf.mxu3  ;;  %v7428_v30 = vpack.c.b16 %v6132_v10, %v6132_v10  ;;  %v7429_v31 = vpack.c.b16 %v6133_v11, %v6133_v11  ;;  %v11614_v38 = vrot.slane %v18131_v15, 2  ;;  %v15586_v6 = vld [vmem:[%s18935_s22 + $0x1cd0] sm:$0xf0]  ;;  %v2307_v11 = vperm.slane %v20308_v0, 2  ;;  %v17555_v14 = vld [vmem:[%s18935_s22 + $0x17b4] sm:$0xf0] }
 0x39e   : > { %v18133_v36 = vpop.eup %18132  ;;  %v2308_v13 = vperm.slane %v20308_v0, 3  ;;  %v17474_v15 = vld [vmem:[%s18935_s22 + $0x1534] sm:$0xf]  ;;  %v14929_v26 = vor.u32 %v17555_v14, %v14928_v8  ;;  %v13632_v42 = vld [vmem:[%s18935_s22 + $0xb10] sm:$0xf] }
 0x39f   : > { %9886 = vmatpush.bf16.msrb.mxu2 %v14913_v27  ;;  %9899 = vmatpush.bf16.msrb.mxu3 %v14917_v28  ;;  %v12322_v27 = vld [vmem:[%s18935_s22 + $0x368] sm:$0xf0]  ;;  %v12328_v28 = vld [vmem:[%s18935_s22 + $0xe8] sm:$0xf]  ;;  %v11612_v39 = vrot.slane %v18133_v36, 6  ;;  %v18135_v43 = vpop.eup %18134  ;;  %v11736_v48 = vsel %vm11708_vm10, %v11613_v33, %v11614_v38 }
 0x3a0   : > { %9912 = vmatpush.bf16.msra.mxu0 %v14921_v29  ;;  %9925 = vmatpush.bf16.msra.mxu1 %v14925_v34  ;;  %v16906_v29 = vld [vmem:[%s18935_s22 + $0x36c] sm:$0xf0]  ;;  %v16825_v34 = vld [vmem:[%s18935_s22 + $0xec] sm:$0xf]  ;;  %v12325_v40 = vor.u32 %v16824_v23, %v12322_v27  ;;  %v14938_v23 = vld [vmem:[%s18935_s22 + $0x17c0] sm:$0xf0] }
 0x3a1   : > { %v12329_v41 = vor.u32 %v16906_v29, %v12328_v28  ;;  %v12333_v44 = vor.u32 %v16825_v34, %v12330_v35  ;;  %v11735_v49 = vsel %vm11706_vm11, %v18135_v43, %v11612_v39  ;;  %v14280_v29 = vld [vmem:[%s18935_s22 + $0x1020] sm:$0xf]  ;;  %v14941_v38 = vor.u32 %v17475_v21, %v14938_v23  ;;  %v14282_v34 = vld [vmem:[%s18935_s22 + $0x12a8] sm:$0xf0]  ;;  %v14288_v35 = vld [vmem:[%s18935_s22 + $0x1028] sm:$0xf] }
 0x3a2   : > { %v11737_v51 = vsel %vm8668_vm3, %v11735_v49, %v11736_v48  ;;  %v17394_v36 = vld [vmem:[%s18935_s22 + $0x12ac] sm:$0xf0]  ;;  %v14290_v39 = vld [vmem:[%s18935_s22 + $0x12b0] sm:$0xf0]  ;;  %v17231_v43 = vld [vmem:[%s18935_s22 + $0xd94] sm:$0xf0] }
 0x3a3   : > { %9887 = vmatpush.bf16.msrb.mxu2 %v14265_v45  ;;  %9900 = vmatpush.bf16.msrb.mxu3 %v14269_v46  ;;  %v8850_v45 = vsel %vm8668_vm3, %v7428_v30, 0  ;;  %v8853_v46 = vsel %vm8668_vm3, %v7429_v31, 0  ;;  %11879 = vst [vmem:[%s19647_s14 + $0x48] sm:$0xff] %v11737_v51  ;;  %v17393_v30 = vld [vmem:[%s18935_s22 + $0x12a4] sm:$0xf0]  ;;  %v14289_v49 = vor.u32 %v17394_v36, %v14288_v35 }
 0x3a4   : > { %9913 = vmatpush.bf16.msra.mxu0 %v14273_v3  ;;  %9926 = vmatpush.bf16.msra.mxu1 %v14277_v50  ;;  %v16224_v3 = vld [vmem:[%s18935_s22 + $0x1f50] sm:$0xf]  ;;  %v17879_v50 = vld [vmem:[%s18935_s22 + $0x21d4] sm:$0xf0]  ;;  %v17312_v31 = vld [vmem:[%s18935_s22 + $0x1024] sm:$0xf] }
 0x3a5   : > { %v16225_v22 = vor.u32 %v17879_v50, %v16224_v3  ;;  %v13640_v48 = vld [vmem:[%s18935_s22 + $0xb18] sm:$0xf]  ;;  %v17232_v51 = vld [vmem:[%s18935_s22 + $0xd9c] sm:$0xf0]  ;;  %v13642_v52 = vld [vmem:[%s18935_s22 + $0xda0] sm:$0xf0] }
 0x3a6   : > { %v16989_v8 = vld [vmem:[%s18935_s22 + $0x60c] sm:$0xf]  ;;  %v16907_v21 = vld [vmem:[%s18935_s22 + $0x374] sm:$0xf0]  ;;  %v16826_v23 = vld [vmem:[%s18935_s22 + $0xf4] sm:$0xf] }
 0x3a7   : > { %9888 = vmatpush.bf16.msrb.mxu2 %v13617_v56  ;;  %9901 = vmatpush.bf16.msrb.mxu3 %v13621_v61  ;;  %v16229_v56 = vor.u32 %v17798_v5, %v16226_v7  ;;  %v16237_v61 = vor.u32 %v17799_v54, %v16234_v55  ;;  %v17151_v7 = vld [vmem:[%s18935_s22 + $0xb1c] sm:$0xf]  ;;  %v12346_v35 = vld [vmem:[%s18935_s22 + $0x380] sm:$0xf0] }
 0x3a8   : > { %9914 = vmatpush.bf16.msra.mxu0 %v13625_v62  ;;  %9927 = vmatpush.bf16.msra.mxu1 %v13629_v63  ;;  %v15578_v62 = vld [vmem:[%s18935_s22 + $0x1cc8] sm:$0xf0]  ;;  %v15584_v63 = vld [vmem:[%s18935_s22 + $0x1a48] sm:$0xf]  ;;  %v2175_v54 = vld [vmem:[%s18935_s22 + $0x2478] sm:$0xff] }
 0x3a9   : > { %v15581_v10 = vor.u32 %v17636_v59, %v15578_v62  ;;  %v13645_v62 = vor.u32 %v17151_v7, %v13642_v52  ;;  %v16242_v7 = vld [vmem:[%s18935_s22 + $0x21e8] sm:$0xf0]  ;;  %v16248_v52 = vld [vmem:[%s18935_s22 + $0x1f68] sm:$0xf] }
 0x3ab   : > { %9889 = vmatpush.bf16.msrb.mxu2 %v12969_v16  ;;  %9902 = vmatpush.bf16.msrb.mxu3 %v12973_v17  ;;  %v15585_v16 = vor.u32 %v17718_v2, %v15584_v63  ;;  %v15589_v17 = vor.u32 %v17637_v4, %v15586_v6  ;;  %v16988_v63 = vld [vmem:[%s18935_s22 + $0x604] sm:$0xf]  ;;  %v12986_v2 = vld [vmem:[%s18935_s22 + $0x888] sm:$0xf0]  ;;  %v12992_v4 = vld [vmem:[%s18935_s22 + $0x608] sm:$0xf] }
 0x3ac   : > { %9915 = vmatpush.bf16.msra.mxu0 %v12977_v18  ;;  %9928 = vmatpush.bf16.msra.mxu1 %v12981_v19  ;;  %v14930_v18 = vld [vmem:[%s18935_s22 + $0x17b8] sm:$0xf0]  ;;  %v14936_v19 = vld [vmem:[%s18935_s22 + $0x1538] sm:$0xf]  ;;  %v17070_v6 = vld [vmem:[%s18935_s22 + $0x88c] sm:$0xf0] }
 0x3ad   : > { %v14933_v27 = vor.u32 %v17474_v15, %v14930_v18  ;;  %v14937_v28 = vor.u32 %v17556_v20, %v14936_v19  ;;  %v12993_v18 = vor.u32 %v17070_v6, %v12992_v4  ;;  %v12336_v20 = vld [vmem:[%s18935_s22 + $0xf0] sm:$0xf]  ;;  %v17639_v4 = vld [vmem:[%s18935_s22 + $0x1a5c] sm:$0xf]  ;;  %v15602_v6 = vld [vmem:[%s18935_s22 + $0x1ce0] sm:$0xf0] }
 0x3af   : > { %9890 = vmatpush.bf16.msrb.mxu2 %v12321_v37  ;;  %9903 = vmatpush.bf16.msrb.mxu3 %v12325_v40  ;;  %v17313_v37 = vld [vmem:[%s18935_s22 + $0x102c] sm:$0xf]  ;;  %v2306_v40 = vperm.slane %v20308_v0, 1 }
 0x3b0   : > { %9916 = vmatpush.bf16.msra.mxu0 %v12329_v41  ;;  %9929 = vmatpush.bf16.msra.mxu1 %v12333_v44  ;;  %v2305_v41 = vperm.slane %v20308_v0, 0  ;;  %v14281_v44 = vor.u32 %v17393_v30, %v14280_v29  ;;  %v14293_v3 = vor.u32 %v17313_v37, %v14290_v39  ;;  %v16908_v29 = vld [vmem:[%s18935_s22 + $0x37c] sm:$0xf0]  ;;  %v12337_v37 = vor.u32 %v16907_v21, %v12336_v20  ;;  %v17558_v20 = vld [vmem:[%s18935_s22 + $0x17cc] sm:$0xf0] }
 0x3b1   : > { %v17477_v21 = vld [vmem:[%s18935_s22 + $0x154c] sm:$0xf] }
 0x3b2   : > { %16686 = vmatmul.msk.bf16.vlgmr.msrb.gmra.mxu2 %vm8664_vm9, %v19267_v12  ;;  %16687 = vmatmul.msk.bf16.vlgmr.msrb.gmra.mxu3 %vm8664_vm9, %v19267_v12  ;;  %v9710_v24 = vpop.f32.mrf.mxu0  ;;  %v9723_v25 = vpop.f32.mrf.mxu1 }
 0x3b3   : > { %9935 = vmatpush.bf16.msra.mxu2 %v8850_v45  ;;  %9948 = vmatpush.bf16.msra.mxu3 %v8853_v46  ;;  %v9711_v32 = vadd.f32 %v9710_v24, %v2307_v11  ;;  %v9724_v33 = vadd.f32 %v9723_v25, %v2308_v13  ;;  %v14285_v45 = vor.u32 %v17312_v31, %v14282_v34  ;;  %v17150_v46 = vld [vmem:[%s18935_s22 + $0xb14] sm:$0xf]  ;;  %v6138_v13 = vunpack.c.l.b16 %v2175_v54  ;;  %v16827_v34 = vld [vmem:[%s18935_s22 + $0xfc] sm:$0xf] }
 0x3b4   : > { %9961 = vmatpush.bf16.msrb.mxu0 %v8856_v47  ;;  %9974 = vmatpush.bf16.msrb.mxu1 %v8859_v53  ;;  %v13634_v47 = vld [vmem:[%s18935_s22 + $0xd98] sm:$0xf0]  ;;  %v2174_v53 = vld [vmem:[%s18935_s22 + $0x2470] sm:$0xff]  ;;  %v6139_v24 = vunpack.c.h.b16 %v2175_v54  ;;  %v17801_v54 = vld [vmem:[%s18935_s22 + $0x1f6c] sm:$0xf] }
 0x3b5   : > { %16688 = vmatmul.msk.bf16.vlgmr.msra.gmra.mxu0 %vm8664_vm9, %v19267_v12  ;;  %16689 = vmatmul.msk.bf16.vlgmr.msra.gmra.mxu1 %vm8664_vm9, %v19267_v12  ;;  %18136 = vtanh.f32 %v9711_v32  ;;  %v9684_v50 = vpop.f32.mrf.mxu2  ;;  %v9697_v5 = vpop.f32.mrf.mxu3  ;;  %v6137_v11 = vunpack.c.h.b16 %v2174_v53  ;;  %v7434_v32 = vpack.c.b16 %v6138_v13, %v6138_v13  ;;  %v2312_v13 = vperm.slane %v20308_v0, 7 }
 0x3b6   : > { %18138 = vtanh.f32 %v9724_v33  ;;  %v9698_v1 = vadd.f32 %v9697_v5, %v2306_v40  ;;  %v9685_v55 = vadd.f32 %v9684_v50, %v2305_v41  ;;  %v17881_v50 = vld [vmem:[%s18935_s22 + $0x21e4] sm:$0xf0]  ;;  %v17800_v5 = vld [vmem:[%s18935_s22 + $0x1f64] sm:$0xf] }
 0x3b7   : > { %9936 = vmatpush.bf16.msra.mxu2 %v16225_v22  ;;  %9949 = vmatpush.bf16.msra.mxu3 %v16229_v56  ;;  %v13633_v22 = vor.u32 %v17231_v43, %v13632_v42  ;;  %v12984_v56 = vld [vmem:[%s18935_s22 + $0x600] sm:$0xf]  ;;  %v7433_v31 = vpack.c.b16 %v6137_v11, %v6137_v11  ;;  %v7435_v42 = vpack.c.b16 %v6139_v24, %v6139_v24  ;;  %v2311_v11 = vperm.slane %v20308_v0, 6 }
 0x3b8   : > { %9962 = vmatpush.bf16.msrb.mxu0 %v16233_v60  ;;  %9975 = vmatpush.bf16.msrb.mxu1 %v16237_v61  ;;  %v13637_v60 = vor.u32 %v17150_v46, %v13634_v47  ;;  %v13641_v61 = vor.u32 %v17232_v51, %v13640_v48  ;;  %18140 = vtanh.f32 %v9698_v1  ;;  %v8868_v47 = vsel %vm8668_vm3, %v7434_v32, 0  ;;  %v17882_v1 = vld [vmem:[%s18935_s22 + $0x21ec] sm:$0xf0] }
 0x3b9   : > { %18142 = vtanh.f32 %v9685_v55  ;;  %v8865_v46 = vsel %vm8668_vm3, %v7433_v31, 0  ;;  %v16250_v55 = vld [vmem:[%s18935_s22 + $0x21f0] sm:$0xf0] }
 0x3ba   : > { %v9712_v58 = vpop.f32.mrf.mxu0  ;;  %v9725_v59 = vpop.f32.mrf.mxu1  ;;  %v17314_v31 = vld [vmem:[%s18935_s22 + $0x1034] sm:$0xf] }
 0x3bb   : > { %9937 = vmatpush.bf16.msra.mxu2 %v15577_v9  ;;  %9950 = vmatpush.bf16.msra.mxu3 %v15581_v10  ;;  %v12994_v9 = vld [vmem:[%s18935_s22 + $0x890] sm:$0xf0]  ;;  %v6136_v10 = vunpack.c.l.b16 %v2174_v53  ;;  %v18137_v14 = vpop.eup %18136  ;;  %v8871_v53 = vsel %vm8668_vm3, %v7435_v42, 0  ;;  %v17719_v58 = vld [vmem:[%s18935_s22 + $0x1cd4] sm:$0xf0]  ;;  %v16249_v59 = vor.u32 %v17882_v1, %v16248_v52  ;;  %v2176_v1 = vld [vmem:[%s18935_s22 + $0x2480] sm:$0xff] }
 0x3bc   : > { %9963 = vmatpush.bf16.msrb.mxu0 %v15585_v16  ;;  %9976 = vmatpush.bf16.msrb.mxu1 %v15589_v17  ;;  %v18139_v15 = vpop.eup %18138  ;;  %v12985_v16 = vor.u32 %v17069_v57, %v12984_v56  ;;  %v12989_v17 = vor.u32 %v16988_v63, %v12986_v2  ;;  %v12997_v19 = vor.u32 %v16989_v8, %v12994_v9  ;;  %v11616_v33 = vrot.slane %v18137_v14, 4  ;;  %v15592_v57 = vld [vmem:[%s18935_s22 + $0x1a50] sm:$0xf]  ;;  %v15600_v63 = vld [vmem:[%s18935_s22 + $0x1a58] sm:$0xf] }
 0x3bd   : > { %v9686_v25 = vpop.f32.mrf.mxu2  ;;  %v7432_v30 = vpack.c.b16 %v6136_v10, %v6136_v10  ;;  %v16245_v56 = vor.u32 %v17800_v5, %v16242_v7  ;;  %v17720_v2 = vld [vmem:[%s18935_s22 + $0x1cdc] sm:$0xf0]  ;;  %v15593_v9 = vor.u32 %v17719_v58, %v15592_v57  ;;  %v17557_v14 = vld [vmem:[%s18935_s22 + $0x17c4] sm:$0xf0]  ;;  %v17234_v5 = vld [vmem:[%s18935_s22 + $0xdac] sm:$0xf0] }
 0x3be   : > { %v18141_v36 = vpop.eup %18140  ;;  %v14944_v8 = vld [vmem:[%s18935_s22 + $0x1540] sm:$0xf]  ;;  %v13658_v7 = vld [vmem:[%s18935_s22 + $0xdb0] sm:$0xf0] }
 0x3bf   : > { %9938 = vmatpush.bf16.msra.mxu2 %v14929_v26  ;;  %9951 = vmatpush.bf16.msra.mxu3 %v14933_v27  ;;  %v9699_v26 = vpop.f32.mrf.mxu3  ;;  %v12338_v27 = vld [vmem:[%s18935_s22 + $0x378] sm:$0xf0]  ;;  %v11615_v39 = vrot.slane %v18141_v36, 6  ;;  %v18143_v43 = vpop.eup %18142  ;;  %v17396_v36 = vld [vmem:[%s18935_s22 + $0x12bc] sm:$0xf0] }
 0x3c0   : > { %9964 = vmatpush.bf16.msrb.mxu0 %v14937_v28  ;;  %9977 = vmatpush.bf16.msrb.mxu1 %v14941_v38  ;;  %v12344_v28 = vld [vmem:[%s18935_s22 + $0xf8] sm:$0xf]  ;;  %v11617_v38 = vrot.slane %v18139_v15, 2  ;;  %v12341_v40 = vor.u32 %v16826_v23, %v12338_v27  ;;  %v17476_v15 = vld [vmem:[%s18935_s22 + $0x1544] sm:$0xf]  ;;  %v14945_v26 = vor.u32 %v17557_v14, %v14944_v8 }
 0x3c1   : > { %v12345_v41 = vor.u32 %v16908_v29, %v12344_v28  ;;  %v14954_v23 = vld [vmem:[%s18935_s22 + $0x17d0] sm:$0xf0]  ;;  %v14296_v29 = vld [vmem:[%s18935_s22 + $0x1030] sm:$0xf]  ;;  %v13648_v42 = vld [vmem:[%s18935_s22 + $0xb20] sm:$0xf] }
 0x3c2   : > { %v11739_v48 = vsel %vm11708_vm10, %v11616_v33, %v11617_v38  ;;  %v14957_v38 = vor.u32 %v17477_v21, %v14954_v23  ;;  %v13010_v8 = vld [vmem:[%s18935_s22 + $0x8a0] sm:$0xf0] }
 0x3c3   : > { %9939 = vmatpush.bf16.msra.mxu2 %v14281_v44  ;;  %9952 = vmatpush.bf16.msra.mxu3 %v14285_v45  ;;  %v12349_v44 = vor.u32 %v16827_v34, %v12346_v35  ;;  %v8862_v45 = vsel %vm8668_vm3, %v7432_v30, 0  ;;  %v17395_v30 = vld [vmem:[%s18935_s22 + $0x12b4] sm:$0xf0]  ;;  %v14298_v34 = vld [vmem:[%s18935_s22 + $0x12b8] sm:$0xf0] }
 0x3c4   : > { %9965 = vmatpush.bf16.msrb.mxu0 %v14289_v49  ;;  %9978 = vmatpush.bf16.msrb.mxu1 %v14293_v3  ;;  %v11738_v49 = vsel %vm11706_vm11, %v18143_v43, %v11615_v39  ;;  %v16240_v3 = vld [vmem:[%s18935_s22 + $0x1f60] sm:$0xf]  ;;  %v14304_v35 = vld [vmem:[%s18935_s22 + $0x1038] sm:$0xf]  ;;  %v14306_v39 = vld [vmem:[%s18935_s22 + $0x12c0] sm:$0xf0] }
 0x3c5   : > { %v11740_v51 = vsel %vm8668_vm3, %v11738_v49, %v11739_v48  ;;  %v17233_v43 = vld [vmem:[%s18935_s22 + $0xda4] sm:$0xf0]  ;;  %v16828_v21 = vld [vmem:[%s18935_s22 + $0x104] sm:$0xf] }
 0x3c6   : > { %11880 = vst [vmem:[%s19647_s14 + $0x50] sm:$0xff] %v11740_v51  ;;  %v13656_v48 = vld [vmem:[%s18935_s22 + $0xb28] sm:$0xf]  ;;  %v17153_v51 = vld [vmem:[%s18935_s22 + $0xb2c] sm:$0xf] }
 0x3c7   : > { %9940 = vmatpush.bf16.msra.mxu2 %v13633_v22  ;;  %9953 = vmatpush.bf16.msra.mxu3 %v13637_v60  ;;  %v16241_v22 = vor.u32 %v17881_v50, %v16240_v3  ;;  %v16253_v60 = vor.u32 %v17801_v54, %v16250_v55  ;;  %v13649_v55 = vor.u32 %v17233_v43, %v13648_v42 }
 0x3c8   : > { %9966 = vmatpush.bf16.msrb.mxu0 %v13641_v61  ;;  %9979 = vmatpush.bf16.msrb.mxu1 %v13645_v62  ;;  %v17638_v61 = vld [vmem:[%s18935_s22 + $0x1a54] sm:$0xf]  ;;  %v15594_v62 = vld [vmem:[%s18935_s22 + $0x1cd8] sm:$0xf0] }
 0x3c9   : > { %v15597_v10 = vor.u32 %v17638_v61, %v15594_v62  ;;  %v13661_v61 = vor.u32 %v17153_v51, %v13658_v7  ;;  %v16990_v62 = vld [vmem:[%s18935_s22 + $0x614] sm:$0xf]  ;;  %v16264_v51 = vld [vmem:[%s18935_s22 + $0x1f78] sm:$0xf]  ;;  %v17884_v7 = vld [vmem:[%s18935_s22 + $0x21fc] sm:$0xf0] }
 0x3cb   : > { %9941 = vmatpush.bf16.msra.mxu2 %v12985_v16  ;;  %9954 = vmatpush.bf16.msra.mxu3 %v12989_v17  ;;  %v15601_v16 = vor.u32 %v17720_v2, %v15600_v63  ;;  %v15605_v17 = vor.u32 %v17639_v4, %v15602_v6  ;;  %v13002_v63 = vld [vmem:[%s18935_s22 + $0x898] sm:$0xf0]  ;;  %v13008_v2 = vld [vmem:[%s18935_s22 + $0x618] sm:$0xf]  ;;  %v17072_v4 = vld [vmem:[%s18935_s22 + $0x89c] sm:$0xf0] }
 0x3cc   : > { %9967 = vmatpush.bf16.msrb.mxu0 %v12993_v18  ;;  %9980 = vmatpush.bf16.msrb.mxu1 %v12997_v19  ;;  %v14946_v18 = vld [vmem:[%s18935_s22 + $0x17c8] sm:$0xf0]  ;;  %v14952_v19 = vld [vmem:[%s18935_s22 + $0x1548] sm:$0xf]  ;;  %v16991_v6 = vld [vmem:[%s18935_s22 + $0x61c] sm:$0xf] }
 0x3cd   : > { %v14949_v27 = vor.u32 %v17476_v15, %v14946_v18  ;;  %v14953_v28 = vor.u32 %v17558_v20, %v14952_v19  ;;  %v13013_v18 = vor.u32 %v16991_v6, %v13010_v8  ;;  %v12352_v19 = vld [vmem:[%s18935_s22 + $0x100] sm:$0xf]  ;;  %v16909_v20 = vld [vmem:[%s18935_s22 + $0x384] sm:$0xf0]  ;;  %v14960_v6 = vld [vmem:[%s18935_s22 + $0x1550] sm:$0xf] }
 0x3cf   : > { %9942 = vmatpush.bf16.msra.mxu2 %v12337_v37  ;;  %9955 = vmatpush.bf16.msra.mxu3 %v12341_v40  ;;  %v17315_v37 = vld [vmem:[%s18935_s22 + $0x103c] sm:$0xf]  ;;  %v2310_v40 = vperm.slane %v20308_v0, 5 }
 0x3d0   : > { %9968 = vmatpush.bf16.msrb.mxu0 %v12345_v41  ;;  %9981 = vmatpush.bf16.msrb.mxu1 %v12349_v44  ;;  %v2309_v41 = vperm.slane %v20308_v0, 4  ;;  %v14297_v44 = vor.u32 %v17395_v30, %v14296_v29  ;;  %v14305_v0 = vor.u32 %v17396_v36, %v14304_v35  ;;  %v14309_v49 = vor.u32 %v17315_v37, %v14306_v39 }
 0x3d1   : > { %v12353_v36 = vor.u32 %v16909_v20, %v12352_v19  ;;  %v17560_v19 = vld [vmem:[%s18935_s22 + $0x17dc] sm:$0xf0]  ;;  %v17479_v20 = vld [vmem:[%s18935_s22 + $0x155c] sm:$0xf] }
 0x3d2   : > { %16690 = vmatmul.msk.bf16.vlgmr.msra.gmra.mxu2 %vm8664_vm9, %v19267_v12  ;;  %16691 = vmatmul.msk.bf16.vlgmr.msra.gmra.mxu3 %vm8664_vm9, %v19267_v12  ;;  %v9762_v24 = vpop.f32.mrf.mxu0  ;;  %v9775_v25 = vpop.f32.mrf.mxu1 }
 0x3d3   : > { %9987 = vmatpush.bf16.msrb.mxu2 %v8862_v45  ;;  %10000 = vmatpush.bf16.msrb.mxu3 %v8865_v46  ;;  %v9763_v32 = vadd.f32 %v9762_v24, %v2311_v11  ;;  %v9776_v33 = vadd.f32 %v9775_v25, %v2312_v13  ;;  %v14301_v45 = vor.u32 %v17314_v31, %v14298_v34  ;;  %v17152_v46 = vld [vmem:[%s18935_s22 + $0xb24] sm:$0xf]  ;;  %v12362_v34 = vld [vmem:[%s18935_s22 + $0x390] sm:$0xf0] }
 0x3d4   : > { %10013 = vmatpush.bf16.msra.mxu0 %v8868_v47  ;;  %10026 = vmatpush.bf16.msra.mxu1 %v8871_v53  ;;  %v13650_v47 = vld [vmem:[%s18935_s22 + $0xda8] sm:$0xf0] }
 0x3d5   : > { %16692 = vmatmul.msk.bf16.vlgmr.msrb.gmra.mxu0 %vm8664_vm9, %v19267_v12  ;;  %16693 = vmatmul.msk.bf16.vlgmr.msrb.gmra.mxu1 %vm8664_vm9, %v19267_v12  ;;  %18144 = vtanh.f32 %v9763_v32  ;;  %v9736_v3 = vpop.f32.mrf.mxu2  ;;  %v9749_v50 = vpop.f32.mrf.mxu3  ;;  %v2177_v53 = vld [vmem:[%s18935_s22 + $0x2488] sm:$0xff] }
 0x3d6   : > { %18146 = vtanh.f32 %v9776_v33  ;;  %v9750_v52 = vadd.f32 %v9749_v50, %v2310_v40  ;;  %v9737_v54 = vadd.f32 %v9736_v3, %v2309_v41  ;;  %v6142_v11 = vunpack.c.l.b16 %v2177_v53  ;;  %v17802_v3 = vld [vmem:[%s18935_s22 + $0x1f74] sm:$0xf] }
 0x3d7   : > { %9988 = vmatpush.bf16.msrb.mxu2 %v16241_v22  ;;  %10001 = vmatpush.bf16.msrb.mxu3 %v16245_v56  ;;  %v13000_v22 = vld [vmem:[%s18935_s22 + $0x610] sm:$0xf]  ;;  %v17071_v56 = vld [vmem:[%s18935_s22 + $0x894] sm:$0xf0]  ;;  %v6143_v23 = vunpack.c.h.b16 %v2177_v53  ;;  %v16266_v53 = vld [vmem:[%s18935_s22 + $0x2200] sm:$0xf0] }
 0x3d8   : > { %10014 = vmatpush.bf16.msra.mxu0 %v16249_v59  ;;  %10027 = vmatpush.bf16.msra.mxu1 %v16253_v60  ;;  %v13653_v59 = vor.u32 %v17152_v46, %v13650_v47  ;;  %v13657_v60 = vor.u32 %v17234_v5, %v13656_v48  ;;  %18148 = vtanh.f32 %v9750_v52  ;;  %v13001_v15 = vor.u32 %v17071_v56, %v13000_v22  ;;  %v16258_v5 = vld [vmem:[%s18935_s22 + $0x21f8] sm:$0xf0]  ;;  %v15608_v22 = vld [vmem:[%s18935_s22 + $0x1a60] sm:$0xf]  ;;  %v17721_v56 = vld [vmem:[%s18935_s22 + $0x1ce4] sm:$0xf0] }
 0x3d9   : > { %18150 = vtanh.f32 %v9737_v54  ;;  %v7438_v31 = vpack.c.b16 %v6142_v11, %v6142_v11  ;;  %v7439_v41 = vpack.c.b16 %v6143_v23, %v6143_v23  ;;  %v15609_v8 = vor.u32 %v17721_v56, %v15608_v22  ;;  %v17073_v22 = vld [vmem:[%s18935_s22 + $0x8a4] sm:$0xf0] }
 0x3da   : > { %v9764_v57 = vpop.f32.mrf.mxu0  ;;  %v9777_v58 = vpop.f32.mrf.mxu1 }
 0x3db   : > { %9989 = vmatpush.bf16.msrb.mxu2 %v15593_v9  ;;  %10002 = vmatpush.bf16.msrb.mxu3 %v15597_v10  ;;  %v6140_v9 = vunpack.c.l.b16 %v2176_v1  ;;  %v6141_v10 = vunpack.c.h.b16 %v2176_v1  ;;  %v18145_v13 = vpop.eup %18144  ;;  %v8880_v46 = vsel %vm8668_vm3, %v7438_v31, 0  ;;  %v8883_v52 = vsel %vm8668_vm3, %v7439_v41, 0  ;;  %v17803_v1 = vld [vmem:[%s18935_s22 + $0x1f7c] sm:$0xf]  ;;  %v17640_v57 = vld [vmem:[%s18935_s22 + $0x1a64] sm:$0xf] }
 0x3dc   : > { %10015 = vmatpush.bf16.msra.mxu0 %v15601_v16  ;;  %10028 = vmatpush.bf16.msra.mxu1 %v15605_v17  ;;  %v18147_v14 = vpop.eup %18146  ;;  %v13005_v16 = vor.u32 %v16990_v62, %v13002_v63  ;;  %v13009_v17 = vor.u32 %v17072_v4, %v13008_v2  ;;  %v11619_v32 = vrot.slane %v18145_v13, 4  ;;  %v16265_v58 = vor.u32 %v17884_v7, %v16264_v51  ;;  %v20467_v62 = vld [vmem:[%s19570_s13 + $0x30] sm:$0xff]  ;;  %v15618_v4 = vld [vmem:[%s18935_s22 + $0x1cf0] sm:$0xf0]  ;;  %v17559_v13 = vld [vmem:[%s18935_s22 + $0x17d4] sm:$0xf0] }
 0x3dd   : > { %v9738_v24 = vpop.f32.mrf.mxu2  ;;  %v9751_v25 = vpop.f32.mrf.mxu3  ;;  %v7436_v29 = vpack.c.b16 %v6140_v9, %v6140_v9  ;;  %v7437_v30 = vpack.c.b16 %v6141_v10, %v6141_v10  ;;  %v11620_v33 = vrot.slane %v18147_v14, 2  ;;  %v17722_v63 = vld [vmem:[%s18935_s22 + $0x1cec] sm:$0xf0]  ;;  %v17641_v2 = vld [vmem:[%s18935_s22 + $0x1a6c] sm:$0xf]  ;;  %v2315_v10 = vperm.slane %v20467_v62, 2 }
 0x3de   : > { %v18149_v35 = vpop.eup %18148  ;;  %v2316_v11 = vperm.slane %v20467_v62, 3  ;;  %v17478_v14 = vld [vmem:[%s18935_s22 + $0x1554] sm:$0xf]  ;;  %v14961_v25 = vor.u32 %v17559_v13, %v14960_v6  ;;  %v13664_v41 = vld [vmem:[%s18935_s22 + $0xb30] sm:$0xf] }
 0x3df   : > { %9990 = vmatpush.bf16.msrb.mxu2 %v14945_v26  ;;  %10003 = vmatpush.bf16.msrb.mxu3 %v14949_v27  ;;  %v12354_v26 = vld [vmem:[%s18935_s22 + $0x388] sm:$0xf0]  ;;  %v12360_v27 = vld [vmem:[%s18935_s22 + $0x108] sm:$0xf]  ;;  %v11618_v37 = vrot.slane %v18149_v35, 6  ;;  %v18151_v42 = vpop.eup %18150  ;;  %v11742_v47 = vsel %vm11708_vm10, %v11619_v32, %v11620_v33 }
 0x3e0   : > { %10016 = vmatpush.bf16.msra.mxu0 %v14953_v28  ;;  %10029 = vmatpush.bf16.msra.mxu1 %v14957_v38  ;;  %v16910_v28 = vld [vmem:[%s18935_s22 + $0x38c] sm:$0xf0]  ;;  %v16829_v38 = vld [vmem:[%s18935_s22 + $0x10c] sm:$0xf]  ;;  %v12357_v39 = vor.u32 %v16828_v21, %v12354_v26  ;;  %v14970_v21 = vld [vmem:[%s18935_s22 + $0x17e0] sm:$0xf0] }
 0x3e1   : > { %v12361_v40 = vor.u32 %v16910_v28, %v12360_v27  ;;  %v12365_v43 = vor.u32 %v16829_v38, %v12362_v34  ;;  %v11741_v48 = vsel %vm11706_vm11, %v18151_v42, %v11618_v37  ;;  %v14312_v28 = vld [vmem:[%s18935_s22 + $0x1040] sm:$0xf]  ;;  %v14973_v33 = vor.u32 %v17479_v20, %v14970_v21  ;;  %v14314_v38 = vld [vmem:[%s18935_s22 + $0x12c8] sm:$0xf0]  ;;  %v14320_v34 = vld [vmem:[%s18935_s22 + $0x1048] sm:$0xf] }
 0x3e2   : > { %v11743_v50 = vsel %vm8668_vm3, %v11741_v48, %v11742_v47  ;;  %v17398_v35 = vld [vmem:[%s18935_s22 + $0x12cc] sm:$0xf0]  ;;  %v14322_v37 = vld [vmem:[%s18935_s22 + $0x12d0] sm:$0xf0]  ;;  %v17235_v42 = vld [vmem:[%s18935_s22 + $0xdb4] sm:$0xf0] }
 0x3e3   : > { %9991 = vmatpush.bf16.msrb.mxu2 %v14297_v44  ;;  %10004 = vmatpush.bf16.msrb.mxu3 %v14301_v45  ;;  %v8874_v44 = vsel %vm8668_vm3, %v7436_v29, 0  ;;  %v8877_v45 = vsel %vm8668_vm3, %v7437_v30, 0  ;;  %11881 = vst [vmem:[%s19647_s14 + $0x58] sm:$0xff] %v11743_v50  ;;  %v17397_v29 = vld [vmem:[%s18935_s22 + $0x12c4] sm:$0xf0]  ;;  %v14321_v48 = vor.u32 %v17398_v35, %v14320_v34 }
 0x3e4   : > { %10017 = vmatpush.bf16.msra.mxu0 %v14305_v0  ;;  %10030 = vmatpush.bf16.msra.mxu1 %v14309_v49  ;;  %v16256_v0 = vld [vmem:[%s18935_s22 + $0x1f70] sm:$0xf]  ;;  %v17883_v49 = vld [vmem:[%s18935_s22 + $0x21f4] sm:$0xf0]  ;;  %v17316_v30 = vld [vmem:[%s18935_s22 + $0x1044] sm:$0xf] }
 0x3e5   : > { %v16257_v54 = vor.u32 %v17883_v49, %v16256_v0  ;;  %v13672_v47 = vld [vmem:[%s18935_s22 + $0xb38] sm:$0xf]  ;;  %v17236_v50 = vld [vmem:[%s18935_s22 + $0xdbc] sm:$0xf0]  ;;  %v13674_v51 = vld [vmem:[%s18935_s22 + $0xdc0] sm:$0xf0] }
 0x3e6   : > { %v16993_v6 = vld [vmem:[%s18935_s22 + $0x62c] sm:$0xf]  ;;  %v16911_v20 = vld [vmem:[%s18935_s22 + $0x394] sm:$0xf0]  ;;  %v16830_v21 = vld [vmem:[%s18935_s22 + $0x114] sm:$0xf] }
 0x3e7   : > { %9992 = vmatpush.bf16.msrb.mxu2 %v13649_v55  ;;  %10005 = vmatpush.bf16.msrb.mxu3 %v13653_v59  ;;  %v16261_v55 = vor.u32 %v17802_v3, %v16258_v5  ;;  %v16269_v59 = vor.u32 %v17803_v1, %v16266_v53  ;;  %v17155_v5 = vld [vmem:[%s18935_s22 + $0xb3c] sm:$0xf]  ;;  %v12378_v34 = vld [vmem:[%s18935_s22 + $0x3a0] sm:$0xf0] }
 0x3e8   : > { %10018 = vmatpush.bf16.msra.mxu0 %v13657_v60  ;;  %10031 = vmatpush.bf16.msra.mxu1 %v13661_v61  ;;  %v15610_v60 = vld [vmem:[%s18935_s22 + $0x1ce8] sm:$0xf0]  ;;  %v15616_v61 = vld [vmem:[%s18935_s22 + $0x1a68] sm:$0xf]  ;;  %v2179_v1 = vld [vmem:[%s18935_s22 + $0x2498] sm:$0xff] }
 0x3e9   : > { %v15613_v9 = vor.u32 %v17640_v57, %v15610_v60  ;;  %v13677_v60 = vor.u32 %v17155_v5, %v13674_v51  ;;  %v16274_v5 = vld [vmem:[%s18935_s22 + $0x2208] sm:$0xf0]  ;;  %v16280_v51 = vld [vmem:[%s18935_s22 + $0x1f88] sm:$0xf] }
 0x3eb   : > { %9993 = vmatpush.bf16.msrb.mxu2 %v13001_v15  ;;  %10006 = vmatpush.bf16.msrb.mxu3 %v13005_v16  ;;  %v15617_v15 = vor.u32 %v17722_v63, %v15616_v61  ;;  %v15621_v16 = vor.u32 %v17641_v2, %v15618_v4  ;;  %v16992_v61 = vld [vmem:[%s18935_s22 + $0x624] sm:$0xf]  ;;  %v13018_v63 = vld [vmem:[%s18935_s22 + $0x8a8] sm:$0xf0]  ;;  %v13024_v2 = vld [vmem:[%s18935_s22 + $0x628] sm:$0xf] }
 0x3ec   : > { %10019 = vmatpush.bf16.msra.mxu0 %v13009_v17  ;;  %10032 = vmatpush.bf16.msra.mxu1 %v13013_v18  ;;  %v14962_v17 = vld [vmem:[%s18935_s22 + $0x17d8] sm:$0xf0]  ;;  %v14968_v18 = vld [vmem:[%s18935_s22 + $0x1558] sm:$0xf]  ;;  %v17074_v4 = vld [vmem:[%s18935_s22 + $0x8ac] sm:$0xf0] }
 0x3ed   : > { %v14965_v26 = vor.u32 %v17478_v14, %v14962_v17  ;;  %v14969_v27 = vor.u32 %v17560_v19, %v14968_v18  ;;  %v13025_v17 = vor.u32 %v17074_v4, %v13024_v2  ;;  %v12368_v19 = vld [vmem:[%s18935_s22 + $0x110] sm:$0xf]  ;;  %v17643_v2 = vld [vmem:[%s18935_s22 + $0x1a7c] sm:$0xf]  ;;  %v15634_v4 = vld [vmem:[%s18935_s22 + $0x1d00] sm:$0xf0] }
 0x3ef   : > { %9994 = vmatpush.bf16.msrb.mxu2 %v12353_v36  ;;  %10007 = vmatpush.bf16.msrb.mxu3 %v12357_v39  ;;  %v17317_v36 = vld [vmem:[%s18935_s22 + $0x104c] sm:$0xf]  ;;  %v2314_v39 = vperm.slane %v20467_v62, 1 }
 0x3f0   : > { %10020 = vmatpush.bf16.msra.mxu0 %v12361_v40  ;;  %10033 = vmatpush.bf16.msra.mxu1 %v12365_v43  ;;  %v2313_v40 = vperm.slane %v20467_v62, 0  ;;  %v14313_v43 = vor.u32 %v17397_v29, %v14312_v28  ;;  %v14325_v0 = vor.u32 %v17317_v36, %v14322_v37  ;;  %v16912_v28 = vld [vmem:[%s18935_s22 + $0x39c] sm:$0xf0]  ;;  %v12369_v36 = vor.u32 %v16911_v20, %v12368_v19  ;;  %v17562_v19 = vld [vmem:[%s18935_s22 + $0x17ec] sm:$0xf0] }
 0x3f1   : > { %v17481_v20 = vld [vmem:[%s18935_s22 + $0x156c] sm:$0xf] }
 0x3f2   : > { %16694 = vmatmul.msk.bf16.vlgmr.msrb.gmra.mxu2 %vm8664_vm9, %v19267_v12  ;;  %16695 = vmatmul.msk.bf16.vlgmr.msrb.gmra.mxu3 %vm8664_vm9, %v19267_v12  ;;  %v9814_v23 = vpop.f32.mrf.mxu0  ;;  %v9827_v24 = vpop.f32.mrf.mxu1 }
 0x3f3   : > { %10039 = vmatpush.bf16.msra.mxu2 %v8874_v44  ;;  %10052 = vmatpush.bf16.msra.mxu3 %v8877_v45  ;;  %v9815_v31 = vadd.f32 %v9814_v23, %v2315_v10  ;;  %v9828_v32 = vadd.f32 %v9827_v24, %v2316_v11  ;;  %v14317_v44 = vor.u32 %v17316_v30, %v14314_v38  ;;  %v17154_v45 = vld [vmem:[%s18935_s22 + $0xb34] sm:$0xf]  ;;  %v6146_v11 = vunpack.c.l.b16 %v2179_v1  ;;  %v16831_v38 = vld [vmem:[%s18935_s22 + $0x11c] sm:$0xf] }
 0x3f4   : > { %10065 = vmatpush.bf16.msrb.mxu0 %v8880_v46  ;;  %10078 = vmatpush.bf16.msrb.mxu1 %v8883_v52  ;;  %v13666_v46 = vld [vmem:[%s18935_s22 + $0xdb8] sm:$0xf0]  ;;  %v2178_v52 = vld [vmem:[%s18935_s22 + $0x2490] sm:$0xff]  ;;  %v6147_v23 = vunpack.c.h.b16 %v2179_v1  ;;  %v17805_v1 = vld [vmem:[%s18935_s22 + $0x1f8c] sm:$0xf] }
 0x3f5   : > { %16696 = vmatmul.msk.bf16.vlgmr.msra.gmra.mxu0 %vm8664_vm9, %v19267_v12  ;;  %16697 = vmatmul.msk.bf16.vlgmr.msra.gmra.mxu1 %vm8664_vm9, %v19267_v12  ;;  %18152 = vtanh.f32 %v9815_v31  ;;  %v9788_v49 = vpop.f32.mrf.mxu2  ;;  %v9801_v3 = vpop.f32.mrf.mxu3  ;;  %v6145_v10 = vunpack.c.h.b16 %v2178_v52  ;;  %v7442_v31 = vpack.c.b16 %v6146_v11, %v6146_v11  ;;  %v2320_v11 = vperm.slane %v20467_v62, 7 }
 0x3f6   : > { %18154 = vtanh.f32 %v9828_v32  ;;  %v9802_v7 = vadd.f32 %v9801_v3, %v2314_v39  ;;  %v9789_v53 = vadd.f32 %v9788_v49, %v2313_v40  ;;  %v17885_v49 = vld [vmem:[%s18935_s22 + $0x2204] sm:$0xf0]  ;;  %v17804_v3 = vld [vmem:[%s18935_s22 + $0x1f84] sm:$0xf] }
 0x3f7   : > { %10040 = vmatpush.bf16.msra.mxu2 %v16257_v54  ;;  %10053 = vmatpush.bf16.msra.mxu3 %v16261_v55  ;;  %v13665_v54 = vor.u32 %v17235_v42, %v13664_v41  ;;  %v13016_v55 = vld [vmem:[%s18935_s22 + $0x620] sm:$0xf]  ;;  %v7441_v30 = vpack.c.b16 %v6145_v10, %v6145_v10  ;;  %v7443_v41 = vpack.c.b16 %v6147_v23, %v6147_v23  ;;  %v2319_v10 = vperm.slane %v20467_v62, 6 }
 0x3f8   : > { %10066 = vmatpush.bf16.msrb.mxu0 %v16265_v58  ;;  %10079 = vmatpush.bf16.msrb.mxu1 %v16269_v59  ;;  %v13669_v58 = vor.u32 %v17154_v45, %v13666_v46  ;;  %v13673_v59 = vor.u32 %v17236_v50, %v13672_v47  ;;  %18156 = vtanh.f32 %v9802_v7  ;;  %v8892_v46 = vsel %vm8668_vm3, %v7442_v31, 0  ;;  %v17886_v7 = vld [vmem:[%s18935_s22 + $0x220c] sm:$0xf0] }
 0x3f9   : > { %18158 = vtanh.f32 %v9789_v53  ;;  %v8889_v45 = vsel %vm8668_vm3, %v7441_v30, 0  ;;  %v16282_v53 = vld [vmem:[%s18935_s22 + $0x2210] sm:$0xf0] }
 0x3fa   : > { %v9816_v56 = vpop.f32.mrf.mxu0  ;;  %v9829_v57 = vpop.f32.mrf.mxu1  ;;  %v17318_v30 = vld [vmem:[%s18935_s22 + $0x1054] sm:$0xf] }
 0x3fb   : > { %10041 = vmatpush.bf16.msra.mxu2 %v15609_v8  ;;  %10054 = vmatpush.bf16.msra.mxu3 %v15613_v9  ;;  %v13026_v8 = vld [vmem:[%s18935_s22 + $0x8b0] sm:$0xf0]  ;;  %v6144_v9 = vunpack.c.l.b16 %v2178_v52  ;;  %v18153_v13 = vpop.eup %18152  ;;  %v8895_v52 = vsel %vm8668_vm3, %v7443_v41, 0  ;;  %v17723_v56 = vld [vmem:[%s18935_s22 + $0x1cf4] sm:$0xf0]  ;;  %v16281_v57 = vor.u32 %v17886_v7, %v16280_v51  ;;  %v2180_v7 = vld [vmem:[%s18935_s22 + $0x24a0] sm:$0xff] }
 0x3fc   : > { %10067 = vmatpush.bf16.msrb.mxu0 %v15617_v15  ;;  %10080 = vmatpush.bf16.msrb.mxu1 %v15621_v16  ;;  %v18155_v14 = vpop.eup %18154  ;;  %v13017_v15 = vor.u32 %v17073_v22, %v13016_v55  ;;  %v13021_v16 = vor.u32 %v16992_v61, %v13018_v63  ;;  %v13029_v18 = vor.u32 %v16993_v6, %v13026_v8  ;;  %v11622_v32 = vrot.slane %v18153_v13, 4  ;;  %v15624_v22 = vld [vmem:[%s18935_s22 + $0x1a70] sm:$0xf]  ;;  %v15632_v61 = vld [vmem:[%s18935_s22 + $0x1a78] sm:$0xf] }
 0x3fd   : > { %v9790_v24 = vpop.f32.mrf.mxu2  ;;  %v7440_v29 = vpack.c.b16 %v6144_v9, %v6144_v9  ;;  %v16277_v55 = vor.u32 %v17804_v3, %v16274_v5  ;;  %v17724_v63 = vld [vmem:[%s18935_s22 + $0x1cfc] sm:$0xf0]  ;;  %v15625_v8 = vor.u32 %v17723_v56, %v15624_v22  ;;  %v17561_v13 = vld [vmem:[%s18935_s22 + $0x17e4] sm:$0xf0]  ;;  %v17238_v3 = vld [vmem:[%s18935_s22 + $0xdcc] sm:$0xf0] }
 0x3fe   : > { %v18157_v35 = vpop.eup %18156  ;;  %v14976_v6 = vld [vmem:[%s18935_s22 + $0x1560] sm:$0xf]  ;;  %v13690_v5 = vld [vmem:[%s18935_s22 + $0xdd0] sm:$0xf0] }
 0x3ff   : > { %10042 = vmatpush.bf16.msra.mxu2 %v14961_v25  ;;  %10055 = vmatpush.bf16.msra.mxu3 %v14965_v26  ;;  %v9803_v25 = vpop.f32.mrf.mxu3  ;;  %v12370_v26 = vld [vmem:[%s18935_s22 + $0x398] sm:$0xf0]  ;;  %v11621_v37 = vrot.slane %v18157_v35, 6  ;;  %v18159_v42 = vpop.eup %18158  ;;  %v17400_v35 = vld [vmem:[%s18935_s22 + $0x12dc] sm:$0xf0] }
 0x400   : > { %10068 = vmatpush.bf16.msrb.mxu0 %v14969_v27  ;;  %10081 = vmatpush.bf16.msrb.mxu1 %v14973_v33  ;;  %v12376_v27 = vld [vmem:[%s18935_s22 + $0x118] sm:$0xf]  ;;  %v11623_v33 = vrot.slane %v18155_v14, 2  ;;  %v12373_v39 = vor.u32 %v16830_v21, %v12370_v26  ;;  %v17480_v14 = vld [vmem:[%s18935_s22 + $0x1564] sm:$0xf]  ;;  %v14977_v25 = vor.u32 %v17561_v13, %v14976_v6 }
 0x401   : > { %v12377_v40 = vor.u32 %v16912_v28, %v12376_v27  ;;  %v14986_v21 = vld [vmem:[%s18935_s22 + $0x17f0] sm:$0xf0]  ;;  %v14328_v28 = vld [vmem:[%s18935_s22 + $0x1050] sm:$0xf]  ;;  %v13680_v41 = vld [vmem:[%s18935_s22 + $0xb40] sm:$0xf] }
 0x402   : > { %v11745_v47 = vsel %vm11708_vm10, %v11622_v32, %v11623_v33  ;;  %v14989_v33 = vor.u32 %v17481_v20, %v14986_v21  ;;  %v13042_v6 = vld [vmem:[%s18935_s22 + $0x8c0] sm:$0xf0] }
 0x403   : > { %10043 = vmatpush.bf16.msra.mxu2 %v14313_v43  ;;  %10056 = vmatpush.bf16.msra.mxu3 %v14317_v44  ;;  %v12381_v43 = vor.u32 %v16831_v38, %v12378_v34  ;;  %v8886_v44 = vsel %vm8668_vm3, %v7440_v29, 0  ;;  %v17399_v29 = vld [vmem:[%s18935_s22 + $0x12d4] sm:$0xf0]  ;;  %v14330_v38 = vld [vmem:[%s18935_s22 + $0x12d8] sm:$0xf0] }
 0x404   : > { %10069 = vmatpush.bf16.msrb.mxu0 %v14321_v48  ;;  %10082 = vmatpush.bf16.msrb.mxu1 %v14325_v0  ;;  %v11744_v48 = vsel %vm11706_vm11, %v18159_v42, %v11621_v37  ;;  %v16272_v0 = vld [vmem:[%s18935_s22 + $0x1f80] sm:$0xf]  ;;  %v14336_v34 = vld [vmem:[%s18935_s22 + $0x1058] sm:$0xf]  ;;  %v14338_v37 = vld [vmem:[%s18935_s22 + $0x12e0] sm:$0xf0] }
 0x405   : > { %v11746_v50 = vsel %vm8668_vm3, %v11744_v48, %v11745_v47  ;;  %v17237_v42 = vld [vmem:[%s18935_s22 + $0xdc4] sm:$0xf0]  ;;  %v16832_v20 = vld [vmem:[%s18935_s22 + $0x124] sm:$0xf] }
 0x406   : > { %11882 = vst [vmem:[%s19647_s14 + $0x60] sm:$0xff] %v11746_v50  ;;  %v13688_v47 = vld [vmem:[%s18935_s22 + $0xb48] sm:$0xf]  ;;  %v17157_v50 = vld [vmem:[%s18935_s22 + $0xb4c] sm:$0xf] }
 0x407   : > { %10044 = vmatpush.bf16.msra.mxu2 %v13665_v54  ;;  %10057 = vmatpush.bf16.msra.mxu3 %v13669_v58  ;;  %v16273_v54 = vor.u32 %v17885_v49, %v16272_v0  ;;  %v16285_v58 = vor.u32 %v17805_v1, %v16282_v53  ;;  %v13681_v53 = vor.u32 %v17237_v42, %v13680_v41 }
 0x408   : > { %10070 = vmatpush.bf16.msrb.mxu0 %v13673_v59  ;;  %10083 = vmatpush.bf16.msrb.mxu1 %v13677_v60  ;;  %v17642_v59 = vld [vmem:[%s18935_s22 + $0x1a74] sm:$0xf]  ;;  %v15626_v60 = vld [vmem:[%s18935_s22 + $0x1cf8] sm:$0xf0] }
 0x409   : > { %v15629_v9 = vor.u32 %v17642_v59, %v15626_v60  ;;  %v13693_v59 = vor.u32 %v17157_v50, %v13690_v5  ;;  %v16994_v60 = vld [vmem:[%s18935_s22 + $0x634] sm:$0xf]  ;;  %v16296_v50 = vld [vmem:[%s18935_s22 + $0x1f98] sm:$0xf]  ;;  %v17888_v5 = vld [vmem:[%s18935_s22 + $0x221c] sm:$0xf0] }
 0x40b   : > { %10045 = vmatpush.bf16.msra.mxu2 %v13017_v15  ;;  %10058 = vmatpush.bf16.msra.mxu3 %v13021_v16  ;;  %v15633_v15 = vor.u32 %v17724_v63, %v15632_v61  ;;  %v15637_v16 = vor.u32 %v17643_v2, %v15634_v4  ;;  %v13034_v61 = vld [vmem:[%s18935_s22 + $0x8b8] sm:$0xf0]  ;;  %v13040_v63 = vld [vmem:[%s18935_s22 + $0x638] sm:$0xf]  ;;  %v17076_v2 = vld [vmem:[%s18935_s22 + $0x8bc] sm:$0xf0] }
 0x40c   : > { %10071 = vmatpush.bf16.msrb.mxu0 %v13025_v17  ;;  %10084 = vmatpush.bf16.msrb.mxu1 %v13029_v18  ;;  %v14978_v17 = vld [vmem:[%s18935_s22 + $0x17e8] sm:$0xf0]  ;;  %v14984_v18 = vld [vmem:[%s18935_s22 + $0x1568] sm:$0xf]  ;;  %v16995_v4 = vld [vmem:[%s18935_s22 + $0x63c] sm:$0xf] }
 0x40d   : > { %v14981_v26 = vor.u32 %v17480_v14, %v14978_v17  ;;  %v14985_v27 = vor.u32 %v17562_v19, %v14984_v18  ;;  %v13045_v17 = vor.u32 %v16995_v4, %v13042_v6  ;;  %v12384_v18 = vld [vmem:[%s18935_s22 + $0x120] sm:$0xf]  ;;  %v16913_v19 = vld [vmem:[%s18935_s22 + $0x3a4] sm:$0xf0]  ;;  %v14992_v4 = vld [vmem:[%s18935_s22 + $0x1570] sm:$0xf] }
 0x40f   : > { %10046 = vmatpush.bf16.msra.mxu2 %v12369_v36  ;;  %10059 = vmatpush.bf16.msra.mxu3 %v12373_v39  ;;  %v17319_v36 = vld [vmem:[%s18935_s22 + $0x105c] sm:$0xf]  ;;  %v2318_v39 = vperm.slane %v20467_v62, 5 }
 0x410   : > { %10072 = vmatpush.bf16.msrb.mxu0 %v12377_v40  ;;  %10085 = vmatpush.bf16.msrb.mxu1 %v12381_v43  ;;  %v2317_v40 = vperm.slane %v20467_v62, 4  ;;  %v14329_v43 = vor.u32 %v17399_v29, %v14328_v28  ;;  %v14337_v62 = vor.u32 %v17400_v35, %v14336_v34  ;;  %v14341_v48 = vor.u32 %v17319_v36, %v14338_v37 }
 0x411   : > { %v12385_v35 = vor.u32 %v16913_v19, %v12384_v18  ;;  %v17564_v18 = vld [vmem:[%s18935_s22 + $0x17fc] sm:$0xf0]  ;;  %v17483_v19 = vld [vmem:[%s18935_s22 + $0x157c] sm:$0xf] }
 0x412   : > { %16698 = vmatmul.msk.bf16.vlgmr.msra.gmra.mxu2 %vm8664_vm9, %v19267_v12  ;;  %16699 = vmatmul.msk.bf16.vlgmr.msra.gmra.mxu3 %vm8664_vm9, %v19267_v12  ;;  %v9866_v23 = vpop.f32.mrf.mxu0  ;;  %v9879_v24 = vpop.f32.mrf.mxu1 }
 0x413   : > { %10091 = vmatpush.bf16.msrb.mxu2 %v8886_v44  ;;  %10104 = vmatpush.bf16.msrb.mxu3 %v8889_v45  ;;  %v9867_v31 = vadd.f32 %v9866_v23, %v2319_v10  ;;  %v9880_v32 = vadd.f32 %v9879_v24, %v2320_v11  ;;  %v14333_v44 = vor.u32 %v17318_v30, %v14330_v38  ;;  %v17156_v45 = vld [vmem:[%s18935_s22 + $0xb44] sm:$0xf]  ;;  %v12394_v38 = vld [vmem:[%s18935_s22 + $0x3b0] sm:$0xf0] }
 0x414   : > { %10117 = vmatpush.bf16.msra.mxu0 %v8892_v46  ;;  %10130 = vmatpush.bf16.msra.mxu1 %v8895_v52  ;;  %v13682_v46 = vld [vmem:[%s18935_s22 + $0xdc8] sm:$0xf0] }
 0x415   : > { %16700 = vmatmul.msk.bf16.vlgmr.msrb.gmra.mxu0 %vm8664_vm9, %v19267_v12  ;;  %16701 = vmatmul.msk.bf16.vlgmr.msrb.gmra.mxu1 %vm8664_vm9, %v19267_v12  ;;  %18160 = vtanh.f32 %v9867_v31  ;;  %v9840_v0 = vpop.f32.mrf.mxu2  ;;  %v9853_v49 = vpop.f32.mrf.mxu3  ;;  %v2181_v52 = vld [vmem:[%s18935_s22 + $0x24a8] sm:$0xff] }
 0x416   : > { %18162 = vtanh.f32 %v9880_v32  ;;  %v9854_v51 = vadd.f32 %v9853_v49, %v2318_v39  ;;  %v9841_v1 = vadd.f32 %v9840_v0, %v2317_v40  ;;  %v6150_v10 = vunpack.c.l.b16 %v2181_v52  ;;  %v17806_v0 = vld [vmem:[%s18935_s22 + $0x1f94] sm:$0xf] }
 0x417   : > { %10092 = vmatpush.bf16.msrb.mxu2 %v16273_v54  ;;  %10105 = vmatpush.bf16.msrb.mxu3 %v16277_v55  ;;  %v13032_v54 = vld [vmem:[%s18935_s22 + $0x630] sm:$0xf]  ;;  %v17075_v55 = vld [vmem:[%s18935_s22 + $0x8b4] sm:$0xf0]  ;;  %v6151_v21 = vunpack.c.h.b16 %v2181_v52  ;;  %v16298_v52 = vld [vmem:[%s18935_s22 + $0x2220] sm:$0xf0] }
 0x418   : > { %10118 = vmatpush.bf16.msra.mxu0 %v16281_v57  ;;  %10131 = vmatpush.bf16.msra.mxu1 %v16285_v58  ;;  %v13685_v57 = vor.u32 %v17156_v45, %v13682_v46  ;;  %v13689_v58 = vor.u32 %v17238_v3, %v13688_v47  ;;  %18164 = vtanh.f32 %v9854_v51  ;;  %v13033_v14 = vor.u32 %v17075_v55, %v13032_v54  ;;  %v16290_v3 = vld [vmem:[%s18935_s22 + $0x2218] sm:$0xf0]  ;;  %v15640_v54 = vld [vmem:[%s18935_s22 + $0x1a80] sm:$0xf]  ;;  %v17725_v55 = vld [vmem:[%s18935_s22 + $0x1d04] sm:$0xf0] }
 0x419   : > { %18166 = vtanh.f32 %v9841_v1  ;;  %v7446_v30 = vpack.c.b16 %v6150_v10, %v6150_v10  ;;  %v7447_v40 = vpack.c.b16 %v6151_v21, %v6151_v21  ;;  %v15641_v6 = vor.u32 %v17725_v55, %v15640_v54  ;;  %v17077_v54 = vld [vmem:[%s18935_s22 + $0x8c4] sm:$0xf0] }
 0x41a   : > { %v9868_v22 = vpop.f32.mrf.mxu0  ;;  %v9881_v56 = vpop.f32.mrf.mxu1 }
 0x41b   : > { %10093 = vmatpush.bf16.msrb.mxu2 %v15625_v8  ;;  %10106 = vmatpush.bf16.msrb.mxu3 %v15629_v9  ;;  %v6148_v8 = vunpack.c.l.b16 %v2180_v7  ;;  %v6149_v9 = vunpack.c.h.b16 %v2180_v7  ;;  %v18161_v11 = vpop.eup %18160  ;;  %v8904_v45 = vsel %vm8668_vm3, %v7446_v30, 0  ;;  %v8907_v51 = vsel %vm8668_vm3, %v7447_v40, 0  ;;  %v17807_v7 = vld [vmem:[%s18935_s22 + $0x1f9c] sm:$0xf]  ;;  %v17644_v22 = vld [vmem:[%s18935_s22 + $0x1a84] sm:$0xf] }
 0x41c   : > { %10119 = vmatpush.bf16.msra.mxu0 %v15633_v15  ;;  %10132 = vmatpush.bf16.msra.mxu1 %v15637_v16  ;;  %v18163_v13 = vpop.eup %18162  ;;  %v13037_v15 = vor.u32 %v16994_v60, %v13034_v61  ;;  %v13041_v16 = vor.u32 %v17076_v2, %v13040_v63  ;;  %v11625_v31 = vrot.slane %v18161_v11, 4  ;;  %v16297_v56 = vor.u32 %v17888_v5, %v16296_v50  ;;  %v20626_v60 = vld [vmem:[%s19570_s13 + $0x38] sm:$0xff]  ;;  %v13706_v50 = vld [vmem:[%s18935_s22 + $0xde0] sm:$0xf0] }
 0x41d   : > { %v9842_v23 = vpop.f32.mrf.mxu2  ;;  %v9855_v24 = vpop.f32.mrf.mxu3  ;;  %v7444_v28 = vpack.c.b16 %v6148_v8, %v6148_v8  ;;  %v7445_v29 = vpack.c.b16 %v6149_v9, %v6149_v9  ;;  %v11626_v32 = vrot.slane %v18163_v13, 2  ;;  %v17726_v61 = vld [vmem:[%s18935_s22 + $0x1d0c] sm:$0xf0]  ;;  %v17645_v63 = vld [vmem:[%s18935_s22 + $0x1a8c] sm:$0xf]  ;;  %v2323_v9 = vperm.slane %v20626_v60, 2 }
 0x41e   : > { %v18165_v34 = vpop.eup %18164  ;;  %v15650_v2 = vld [vmem:[%s18935_s22 + $0x1d10] sm:$0xf0]  ;;  %v2324_v10 = vperm.slane %v20626_v60, 3  ;;  %v17563_v11 = vld [vmem:[%s18935_s22 + $0x17f4] sm:$0xf0] }
 0x41f   : > { %10094 = vmatpush.bf16.msrb.mxu2 %v14977_v25  ;;  %10107 = vmatpush.bf16.msrb.mxu3 %v14981_v26  ;;  %v12386_v25 = vld [vmem:[%s18935_s22 + $0x3a8] sm:$0xf0]  ;;  %v12392_v26 = vld [vmem:[%s18935_s22 + $0x128] sm:$0xf]  ;;  %v11624_v36 = vrot.slane %v18165_v34, 6  ;;  %v18167_v41 = vpop.eup %18166  ;;  %v11748_v46 = vsel %vm11708_vm10, %v11625_v31, %v11626_v32  ;;  %v14993_v24 = vor.u32 %v17563_v11, %v14992_v4 }
 0x420   : > { %10120 = vmatpush.bf16.msra.mxu0 %v14985_v27  ;;  %10133 = vmatpush.bf16.msra.mxu1 %v14989_v33  ;;  %v16914_v27 = vld [vmem:[%s18935_s22 + $0x3ac] sm:$0xf0]  ;;  %v16833_v33 = vld [vmem:[%s18935_s22 + $0x12c] sm:$0xf]  ;;  %v12389_v37 = vor.u32 %v16832_v20, %v12386_v25  ;;  %v17482_v13 = vld [vmem:[%s18935_s22 + $0x1574] sm:$0xf] }
 0x421   : > { %v12393_v39 = vor.u32 %v16914_v27, %v12392_v26  ;;  %v12397_v42 = vor.u32 %v16833_v33, %v12394_v38  ;;  %v11747_v47 = vsel %vm11706_vm11, %v18167_v41, %v11624_v36  ;;  %v15002_v20 = vld [vmem:[%s18935_s22 + $0x1800] sm:$0xf0]  ;;  %v14344_v27 = vld [vmem:[%s18935_s22 + $0x1060] sm:$0xf]  ;;  %v14346_v33 = vld [vmem:[%s18935_s22 + $0x12e8] sm:$0xf0] }
 0x422   : > { %v11749_v49 = vsel %vm8668_vm3, %v11747_v47, %v11748_v46  ;;  %v15005_v32 = vor.u32 %v17483_v19, %v15002_v20  ;;  %v14352_v38 = vld [vmem:[%s18935_s22 + $0x1068] sm:$0xf]  ;;  %v17402_v34 = vld [vmem:[%s18935_s22 + $0x12ec] sm:$0xf0]  ;;  %v14354_v36 = vld [vmem:[%s18935_s22 + $0x12f0] sm:$0xf0] }
 0x423   : > { %10095 = vmatpush.bf16.msrb.mxu2 %v14329_v43  ;;  %10108 = vmatpush.bf16.msrb.mxu3 %v14333_v44  ;;  %v8898_v43 = vsel %vm8668_vm3, %v7444_v28, 0  ;;  %v8901_v44 = vsel %vm8668_vm3, %v7445_v29, 0  ;;  %11883 = vst [vmem:[%s19647_s14 + $0x68] sm:$0xff] %v11749_v49  ;;  %v17401_v28 = vld [vmem:[%s18935_s22 + $0x12e4] sm:$0xf0]  ;;  %v14353_v47 = vor.u32 %v17402_v34, %v14352_v38 }
 0x424   : > { %10121 = vmatpush.bf16.msra.mxu0 %v14337_v62  ;;  %10134 = vmatpush.bf16.msra.mxu1 %v14341_v48  ;;  %v16288_v62 = vld [vmem:[%s18935_s22 + $0x1f90] sm:$0xf]  ;;  %v17887_v48 = vld [vmem:[%s18935_s22 + $0x2214] sm:$0xf0]  ;;  %v17320_v29 = vld [vmem:[%s18935_s22 + $0x1064] sm:$0xf] }
 0x425   : > { %v16289_v1 = vor.u32 %v17887_v48, %v16288_v62  ;;  %v13696_v40 = vld [vmem:[%s18935_s22 + $0xb50] sm:$0xf]  ;;  %v17239_v41 = vld [vmem:[%s18935_s22 + $0xdd4] sm:$0xf0]  ;;  %v17240_v49 = vld [vmem:[%s18935_s22 + $0xddc] sm:$0xf0] }
 0x426   : > { %v13704_v46 = vld [vmem:[%s18935_s22 + $0xb58] sm:$0xf]  ;;  %v16997_v4 = vld [vmem:[%s18935_s22 + $0x64c] sm:$0xf]  ;;  %v16834_v20 = vld [vmem:[%s18935_s22 + $0x134] sm:$0xf] }
 0x427   : > { %10096 = vmatpush.bf16.msrb.mxu2 %v13681_v53  ;;  %10109 = vmatpush.bf16.msrb.mxu3 %v13685_v57  ;;  %v16293_v53 = vor.u32 %v17806_v0, %v16290_v3  ;;  %v16301_v57 = vor.u32 %v17807_v7, %v16298_v52  ;;  %v17159_v3 = vld [vmem:[%s18935_s22 + $0xb5c] sm:$0xf]  ;;  %v16915_v19 = vld [vmem:[%s18935_s22 + $0x3b4] sm:$0xf0]  ;;  %v12410_v38 = vld [vmem:[%s18935_s22 + $0x3c0] sm:$0xf0] }
 0x428   : > { %10122 = vmatpush.bf16.msra.mxu0 %v13689_v58  ;;  %10135 = vmatpush.bf16.msra.mxu1 %v13693_v59  ;;  %v15642_v58 = vld [vmem:[%s18935_s22 + $0x1d08] sm:$0xf0]  ;;  %v15648_v59 = vld [vmem:[%s18935_s22 + $0x1a88] sm:$0xf]  ;;  %v2183_v7 = vld [vmem:[%s18935_s22 + $0x24b8] sm:$0xff] }
 0x429   : > { %v15645_v8 = vor.u32 %v17644_v22, %v15642_v58  ;;  %v13709_v58 = vor.u32 %v17159_v3, %v13706_v50  ;;  %v16306_v3 = vld [vmem:[%s18935_s22 + $0x2228] sm:$0xf0]  ;;  %v16312_v50 = vld [vmem:[%s18935_s22 + $0x1fa8] sm:$0xf] }
 0x42b   : > { %10097 = vmatpush.bf16.msrb.mxu2 %v13033_v14  ;;  %10110 = vmatpush.bf16.msrb.mxu3 %v13037_v15  ;;  %v15649_v14 = vor.u32 %v17726_v61, %v15648_v59  ;;  %v15653_v15 = vor.u32 %v17645_v63, %v15650_v2  ;;  %v16996_v59 = vld [vmem:[%s18935_s22 + $0x644] sm:$0xf]  ;;  %v13050_v61 = vld [vmem:[%s18935_s22 + $0x8c8] sm:$0xf0]  ;;  %v13056_v63 = vld [vmem:[%s18935_s22 + $0x648] sm:$0xf] }
 0x42c   : > { %10123 = vmatpush.bf16.msra.mxu0 %v13041_v16  ;;  %10136 = vmatpush.bf16.msra.mxu1 %v13045_v17  ;;  %v14994_v16 = vld [vmem:[%s18935_s22 + $0x17f8] sm:$0xf0]  ;;  %v15000_v17 = vld [vmem:[%s18935_s22 + $0x1578] sm:$0xf]  ;;  %v17078_v2 = vld [vmem:[%s18935_s22 + $0x8cc] sm:$0xf0] }
 0x42d   : > { %v14997_v25 = vor.u32 %v17482_v13, %v14994_v16  ;;  %v15001_v26 = vor.u32 %v17564_v18, %v15000_v17  ;;  %v13057_v16 = vor.u32 %v17078_v2, %v13056_v63  ;;  %v12400_v18 = vld [vmem:[%s18935_s22 + $0x130] sm:$0xf]  ;;  %v17647_v63 = vld [vmem:[%s18935_s22 + $0x1a9c] sm:$0xf]  ;;  %v15666_v2 = vld [vmem:[%s18935_s22 + $0x1d20] sm:$0xf0] }
 0x42f   : > { %10098 = vmatpush.bf16.msrb.mxu2 %v12385_v35  ;;  %10111 = vmatpush.bf16.msrb.mxu3 %v12389_v37  ;;  %v17321_v35 = vld [vmem:[%s18935_s22 + $0x106c] sm:$0xf]  ;;  %v2322_v37 = vperm.slane %v20626_v60, 1 }
 0x430   : > { %10124 = vmatpush.bf16.msra.mxu0 %v12393_v39  ;;  %10137 = vmatpush.bf16.msra.mxu1 %v12397_v42  ;;  %v2321_v39 = vperm.slane %v20626_v60, 0  ;;  %v14345_v42 = vor.u32 %v17401_v28, %v14344_v27  ;;  %v14357_v62 = vor.u32 %v17321_v35, %v14354_v36  ;;  %v16916_v27 = vld [vmem:[%s18935_s22 + $0x3bc] sm:$0xf0]  ;;  %v12401_v35 = vor.u32 %v16915_v19, %v12400_v18  ;;  %v17566_v18 = vld [vmem:[%s18935_s22 + $0x180c] sm:$0xf0] }
 0x431   : > { %v17485_v19 = vld [vmem:[%s18935_s22 + $0x158c] sm:$0xf] }
 0x432   : > { %16702 = vmatmul.msk.bf16.vlgmr.msrb.gmra.mxu2 %vm8664_vm9, %v19267_v12  ;;  %16703 = vmatmul.msk.bf16.vlgmr.msrb.gmra.mxu3 %vm8664_vm9, %v19267_v12  ;;  %v9918_v21 = vpop.f32.mrf.mxu0  ;;  %v9931_v23 = vpop.f32.mrf.mxu1 }
 0x433   : > { %10143 = vmatpush.bf16.msra.mxu2 %v8898_v43  ;;  %10156 = vmatpush.bf16.msra.mxu3 %v8901_v44  ;;  %v9919_v30 = vadd.f32 %v9918_v21, %v2323_v9  ;;  %v9932_v31 = vadd.f32 %v9931_v23, %v2324_v10  ;;  %v14349_v43 = vor.u32 %v17320_v29, %v14346_v33  ;;  %v17158_v44 = vld [vmem:[%s18935_s22 + $0xb54] sm:$0xf]  ;;  %v6154_v10 = vunpack.c.l.b16 %v2183_v7  ;;  %v16835_v33 = vld [vmem:[%s18935_s22 + $0x13c] sm:$0xf] }
 0x434   : > { %10169 = vmatpush.bf16.msrb.mxu0 %v8904_v45  ;;  %10182 = vmatpush.bf16.msrb.mxu1 %v8907_v51  ;;  %v13698_v45 = vld [vmem:[%s18935_s22 + $0xdd8] sm:$0xf0]  ;;  %v2182_v51 = vld [vmem:[%s18935_s22 + $0x24b0] sm:$0xff]  ;;  %v6155_v21 = vunpack.c.h.b16 %v2183_v7  ;;  %v17809_v7 = vld [vmem:[%s18935_s22 + $0x1fac] sm:$0xf] }
 0x435   : > { %16704 = vmatmul.msk.bf16.vlgmr.msra.gmra.mxu0 %vm8664_vm9, %v19267_v12  ;;  %16705 = vmatmul.msk.bf16.vlgmr.msra.gmra.mxu1 %vm8664_vm9, %v19267_v12  ;;  %18168 = vtanh.f32 %v9919_v30  ;;  %v9892_v48 = vpop.f32.mrf.mxu2  ;;  %v9905_v0 = vpop.f32.mrf.mxu3  ;;  %v6153_v9 = vunpack.c.h.b16 %v2182_v51  ;;  %v7450_v30 = vpack.c.b16 %v6154_v10, %v6154_v10  ;;  %v2328_v10 = vperm.slane %v20626_v60, 7 }
 0x436   : > { %18170 = vtanh.f32 %v9932_v31  ;;  %v9906_v5 = vadd.f32 %v9905_v0, %v2322_v37  ;;  %v9893_v52 = vadd.f32 %v9892_v48, %v2321_v39  ;;  %v17889_v48 = vld [vmem:[%s18935_s22 + $0x2224] sm:$0xf0]  ;;  %v17808_v0 = vld [vmem:[%s18935_s22 + $0x1fa4] sm:$0xf] }
 0x437   : > { %10144 = vmatpush.bf16.msra.mxu2 %v16289_v1  ;;  %10157 = vmatpush.bf16.msra.mxu3 %v16293_v53  ;;  %v13697_v1 = vor.u32 %v17239_v41, %v13696_v40  ;;  %v13048_v53 = vld [vmem:[%s18935_s22 + $0x640] sm:$0xf]  ;;  %v7449_v29 = vpack.c.b16 %v6153_v9, %v6153_v9  ;;  %v7451_v40 = vpack.c.b16 %v6155_v21, %v6155_v21  ;;  %v2327_v9 = vperm.slane %v20626_v60, 6 }
 0x438   : > { %10170 = vmatpush.bf16.msrb.mxu0 %v16297_v56  ;;  %10183 = vmatpush.bf16.msrb.mxu1 %v16301_v57  ;;  %v13701_v56 = vor.u32 %v17158_v44, %v13698_v45  ;;  %v13705_v57 = vor.u32 %v17240_v49, %v13704_v46  ;;  %18172 = vtanh.f32 %v9906_v5  ;;  %v8916_v45 = vsel %vm8668_vm3, %v7450_v30, 0  ;;  %v17890_v5 = vld [vmem:[%s18935_s22 + $0x222c] sm:$0xf0] }
 0x439   : > { %18174 = vtanh.f32 %v9893_v52  ;;  %v8913_v44 = vsel %vm8668_vm3, %v7449_v29, 0  ;;  %v16314_v52 = vld [vmem:[%s18935_s22 + $0x2230] sm:$0xf0] }
 0x43a   : > { %v9920_v55 = vpop.f32.mrf.mxu0  ;;  %v9933_v22 = vpop.f32.mrf.mxu1  ;;  %v17322_v29 = vld [vmem:[%s18935_s22 + $0x1074] sm:$0xf] }
 0x43b   : > { %10145 = vmatpush.bf16.msra.mxu2 %v15641_v6  ;;  %10158 = vmatpush.bf16.msra.mxu3 %v15645_v8  ;;  %v13058_v6 = vld [vmem:[%s18935_s22 + $0x8d0] sm:$0xf0]  ;;  %v6152_v8 = vunpack.c.l.b16 %v2182_v51  ;;  %v18169_v11 = vpop.eup %18168  ;;  %v8919_v51 = vsel %vm8668_vm3, %v7451_v40, 0  ;;  %v17727_v55 = vld [vmem:[%s18935_s22 + $0x1d14] sm:$0xf0]  ;;  %v16313_v22 = vor.u32 %v17890_v5, %v16312_v50  ;;  %v2184_v5 = vld [vmem:[%s18935_s22 + $0x24c0] sm:$0xff] }
 0x43c   : > { %10171 = vmatpush.bf16.msrb.mxu0 %v15649_v14  ;;  %10184 = vmatpush.bf16.msrb.mxu1 %v15653_v15  ;;  %v18171_v13 = vpop.eup %18170  ;;  %v13049_v14 = vor.u32 %v17077_v54, %v13048_v53  ;;  %v13053_v15 = vor.u32 %v16996_v59, %v13050_v61  ;;  %v13061_v17 = vor.u32 %v16997_v4, %v13058_v6  ;;  %v11628_v31 = vrot.slane %v18169_v11, 4  ;;  %v15656_v54 = vld [vmem:[%s18935_s22 + $0x1a90] sm:$0xf]  ;;  %v15664_v59 = vld [vmem:[%s18935_s22 + $0x1a98] sm:$0xf] }
 0x43d   : > { %v9894_v23 = vpop.f32.mrf.mxu2  ;;  %v7448_v28 = vpack.c.b16 %v6152_v8, %v6152_v8  ;;  %v16309_v53 = vor.u32 %v17808_v0, %v16306_v3  ;;  %v17728_v61 = vld [vmem:[%s18935_s22 + $0x1d1c] sm:$0xf0]  ;;  %v15657_v6 = vor.u32 %v17727_v55, %v15656_v54  ;;  %v17565_v11 = vld [vmem:[%s18935_s22 + $0x1804] sm:$0xf0]  ;;  %v17242_v0 = vld [vmem:[%s18935_s22 + $0xdec] sm:$0xf0] }
 0x43e   : > { %v18173_v34 = vpop.eup %18172  ;;  %v15008_v4 = vld [vmem:[%s18935_s22 + $0x1580] sm:$0xf]  ;;  %v13722_v3 = vld [vmem:[%s18935_s22 + $0xdf0] sm:$0xf0] }
 0x43f   : > { %10146 = vmatpush.bf16.msra.mxu2 %v14993_v24  ;;  %10159 = vmatpush.bf16.msra.mxu3 %v14997_v25  ;;  %v9907_v24 = vpop.f32.mrf.mxu3  ;;  %v12402_v25 = vld [vmem:[%s18935_s22 + $0x3b8] sm:$0xf0]  ;;  %v11627_v36 = vrot.slane %v18173_v34, 6  ;;  %v18175_v41 = vpop.eup %18174  ;;  %v17404_v34 = vld [vmem:[%s18935_s22 + $0x12fc] sm:$0xf0] }
 0x440   : > { %10172 = vmatpush.bf16.msrb.mxu0 %v15001_v26  ;;  %10185 = vmatpush.bf16.msrb.mxu1 %v15005_v32  ;;  %v12408_v26 = vld [vmem:[%s18935_s22 + $0x138] sm:$0xf]  ;;  %v11629_v32 = vrot.slane %v18171_v13, 2  ;;  %v12405_v37 = vor.u32 %v16834_v20, %v12402_v25  ;;  %v17484_v13 = vld [vmem:[%s18935_s22 + $0x1584] sm:$0xf]  ;;  %v15009_v24 = vor.u32 %v17565_v11, %v15008_v4 }
 0x441   : > { %v12409_v39 = vor.u32 %v16916_v27, %v12408_v26  ;;  %v15018_v20 = vld [vmem:[%s18935_s22 + $0x1810] sm:$0xf0]  ;;  %v14360_v27 = vld [vmem:[%s18935_s22 + $0x1070] sm:$0xf]  ;;  %v13712_v40 = vld [vmem:[%s18935_s22 + $0xb60] sm:$0xf] }
 0x442   : > { %v11751_v46 = vsel %vm11708_vm10, %v11628_v31, %v11629_v32  ;;  %v15021_v32 = vor.u32 %v17485_v19, %v15018_v20  ;;  %v13074_v4 = vld [vmem:[%s18935_s22 + $0x8e0] sm:$0xf0] }
 0x443   : > { %10147 = vmatpush.bf16.msra.mxu2 %v14345_v42  ;;  %10160 = vmatpush.bf16.msra.mxu3 %v14349_v43  ;;  %v12413_v42 = vor.u32 %v16835_v33, %v12410_v38  ;;  %v8910_v43 = vsel %vm8668_vm3, %v7448_v28, 0  ;;  %v17403_v28 = vld [vmem:[%s18935_s22 + $0x12f4] sm:$0xf0]  ;;  %v14362_v33 = vld [vmem:[%s18935_s22 + $0x12f8] sm:$0xf0] }
 0x444   : > { %10173 = vmatpush.bf16.msrb.mxu0 %v14353_v47  ;;  %10186 = vmatpush.bf16.msrb.mxu1 %v14357_v62  ;;  %v11750_v47 = vsel %vm11706_vm11, %v18175_v41, %v11627_v36  ;;  %v16304_v62 = vld [vmem:[%s18935_s22 + $0x1fa0] sm:$0xf]  ;;  %v14368_v38 = vld [vmem:[%s18935_s22 + $0x1078] sm:$0xf]  ;;  %v14370_v36 = vld [vmem:[%s18935_s22 + $0x1300] sm:$0xf0] }
 0x445   : > { %v11752_v49 = vsel %vm8668_vm3, %v11750_v47, %v11751_v46  ;;  %v17241_v41 = vld [vmem:[%s18935_s22 + $0xde4] sm:$0xf0]  ;;  %v16836_v19 = vld [vmem:[%s18935_s22 + $0x144] sm:$0xf] }
 0x446   : > { %11884 = vst [vmem:[%s19647_s14 + $0x70] sm:$0xff] %v11752_v49  ;;  %v13720_v46 = vld [vmem:[%s18935_s22 + $0xb68] sm:$0xf]  ;;  %v17161_v49 = vld [vmem:[%s18935_s22 + $0xb6c] sm:$0xf] }
 0x447   : > { %10148 = vmatpush.bf16.msra.mxu2 %v13697_v1  ;;  %10161 = vmatpush.bf16.msra.mxu3 %v13701_v56  ;;  %v16305_v1 = vor.u32 %v17889_v48, %v16304_v62  ;;  %v16317_v56 = vor.u32 %v17809_v7, %v16314_v52  ;;  %v13713_v52 = vor.u32 %v17241_v41, %v13712_v40 }
 0x448   : > { %10174 = vmatpush.bf16.msrb.mxu0 %v13705_v57  ;;  %10187 = vmatpush.bf16.msrb.mxu1 %v13709_v58  ;;  %v17646_v57 = vld [vmem:[%s18935_s22 + $0x1a94] sm:$0xf]  ;;  %v15658_v58 = vld [vmem:[%s18935_s22 + $0x1d18] sm:$0xf0] }
 0x449   : > { %v15661_v8 = vor.u32 %v17646_v57, %v15658_v58  ;;  %v13725_v57 = vor.u32 %v17161_v49, %v13722_v3  ;;  %v16998_v58 = vld [vmem:[%s18935_s22 + $0x654] sm:$0xf]  ;;  %v16328_v49 = vld [vmem:[%s18935_s22 + $0x1fb8] sm:$0xf]  ;;  %v17892_v3 = vld [vmem:[%s18935_s22 + $0x223c] sm:$0xf0] }
 0x44b   : > { %10149 = vmatpush.bf16.msra.mxu2 %v13049_v14  ;;  %10162 = vmatpush.bf16.msra.mxu3 %v13053_v15  ;;  %v15665_v14 = vor.u32 %v17728_v61, %v15664_v59  ;;  %v15669_v15 = vor.u32 %v17647_v63, %v15666_v2  ;;  %v13066_v59 = vld [vmem:[%s18935_s22 + $0x8d8] sm:$0xf0]  ;;  %v13072_v61 = vld [vmem:[%s18935_s22 + $0x658] sm:$0xf]  ;;  %v17080_v63 = vld [vmem:[%s18935_s22 + $0x8dc] sm:$0xf0] }
 0x44c   : > { %10175 = vmatpush.bf16.msrb.mxu0 %v13057_v16  ;;  %10188 = vmatpush.bf16.msrb.mxu1 %v13061_v17  ;;  %v15010_v16 = vld [vmem:[%s18935_s22 + $0x1808] sm:$0xf0]  ;;  %v15016_v17 = vld [vmem:[%s18935_s22 + $0x1588] sm:$0xf]  ;;  %v16999_v2 = vld [vmem:[%s18935_s22 + $0x65c] sm:$0xf] }
 0x44d   : > { %v15013_v25 = vor.u32 %v17484_v13, %v15010_v16  ;;  %v15017_v26 = vor.u32 %v17566_v18, %v15016_v17  ;;  %v13077_v16 = vor.u32 %v16999_v2, %v13074_v4  ;;  %v12416_v17 = vld [vmem:[%s18935_s22 + $0x140] sm:$0xf]  ;;  %v16917_v18 = vld [vmem:[%s18935_s22 + $0x3c4] sm:$0xf0]  ;;  %v15024_v2 = vld [vmem:[%s18935_s22 + $0x1590] sm:$0xf] }
 0x44f   : > { %10150 = vmatpush.bf16.msra.mxu2 %v12401_v35  ;;  %10163 = vmatpush.bf16.msra.mxu3 %v12405_v37  ;;  %v17323_v35 = vld [vmem:[%s18935_s22 + $0x107c] sm:$0xf]  ;;  %v2326_v37 = vperm.slane %v20626_v60, 5 }
 0x450   : > { %10176 = vmatpush.bf16.msrb.mxu0 %v12409_v39  ;;  %10189 = vmatpush.bf16.msrb.mxu1 %v12413_v42  ;;  %v2325_v39 = vperm.slane %v20626_v60, 4  ;;  %v14361_v42 = vor.u32 %v17403_v28, %v14360_v27  ;;  %v14369_v60 = vor.u32 %v17404_v34, %v14368_v38  ;;  %v14373_v47 = vor.u32 %v17323_v35, %v14370_v36 }
 0x451   : > { %v12417_v34 = vor.u32 %v16917_v18, %v12416_v17  ;;  %v17568_v17 = vld [vmem:[%s18935_s22 + $0x181c] sm:$0xf0]  ;;  %v17487_v18 = vld [vmem:[%s18935_s22 + $0x159c] sm:$0xf] }
 0x452   : > { %16706 = vmatmul.msk.bf16.vlgmr.msra.gmra.mxu2 %vm8664_vm9, %v19267_v12  ;;  %16707 = vmatmul.msk.bf16.vlgmr.msra.gmra.mxu3 %vm8664_vm9, %v19267_v12  ;;  %v9970_v21 = vpop.f32.mrf.mxu0  ;;  %v9983_v23 = vpop.f32.mrf.mxu1 }
 0x453   : > { %10195 = vmatpush.bf16.msrb.mxu2 %v8910_v43  ;;  %10208 = vmatpush.bf16.msrb.mxu3 %v8913_v44  ;;  %v9971_v30 = vadd.f32 %v9970_v21, %v2327_v9  ;;  %v9984_v31 = vadd.f32 %v9983_v23, %v2328_v10  ;;  %v14365_v43 = vor.u32 %v17322_v29, %v14362_v33  ;;  %v17160_v44 = vld [vmem:[%s18935_s22 + $0xb64] sm:$0xf]  ;;  %v12426_v33 = vld [vmem:[%s18935_s22 + $0x3d0] sm:$0xf0] }
 0x454   : > { %10221 = vmatpush.bf16.msra.mxu0 %v8916_v45  ;;  %10234 = vmatpush.bf16.msra.mxu1 %v8919_v51  ;;  %v13714_v45 = vld [vmem:[%s18935_s22 + $0xde8] sm:$0xf0] }
 0x455   : > { %16708 = vmatmul.msk.bf16.vlgmr.msrb.gmra.mxu0 %vm8664_vm9, %v19267_v12  ;;  %16709 = vmatmul.msk.bf16.vlgmr.msrb.gmra.mxu1 %vm8664_vm9, %v19267_v12  ;;  %18176 = vtanh.f32 %v9971_v30  ;;  %v9944_v62 = vpop.f32.mrf.mxu2  ;;  %v9957_v48 = vpop.f32.mrf.mxu3  ;;  %v2185_v51 = vld [vmem:[%s18935_s22 + $0x24c8] sm:$0xff] }
 0x456   : > { %18178 = vtanh.f32 %v9984_v31  ;;  %v9958_v50 = vadd.f32 %v9957_v48, %v2326_v37  ;;  %v9945_v7 = vadd.f32 %v9944_v62, %v2325_v39  ;;  %v6158_v9 = vunpack.c.l.b16 %v2185_v51  ;;  %v17810_v62 = vld [vmem:[%s18935_s22 + $0x1fb4] sm:$0xf] }
 0x457   : > { %10196 = vmatpush.bf16.msrb.mxu2 %v16305_v1  ;;  %10209 = vmatpush.bf16.msrb.mxu3 %v16309_v53  ;;  %v13064_v1 = vld [vmem:[%s18935_s22 + $0x650] sm:$0xf]  ;;  %v17079_v53 = vld [vmem:[%s18935_s22 + $0x8d4] sm:$0xf0]  ;;  %v6159_v20 = vunpack.c.h.b16 %v2185_v51  ;;  %v16330_v51 = vld [vmem:[%s18935_s22 + $0x2240] sm:$0xf0] }
 0x458   : > { %10222 = vmatpush.bf16.msra.mxu0 %v16313_v22  ;;  %10235 = vmatpush.bf16.msra.mxu1 %v16317_v56  ;;  %v13717_v22 = vor.u32 %v17160_v44, %v13714_v45  ;;  %v13721_v56 = vor.u32 %v17242_v0, %v13720_v46  ;;  %18180 = vtanh.f32 %v9958_v50  ;;  %v13065_v13 = vor.u32 %v17079_v53, %v13064_v1  ;;  %v16322_v0 = vld [vmem:[%s18935_s22 + $0x2238] sm:$0xf0]  ;;  %v15672_v1 = vld [vmem:[%s18935_s22 + $0x1aa0] sm:$0xf]  ;;  %v17729_v53 = vld [vmem:[%s18935_s22 + $0x1d24] sm:$0xf0] }
 0x459   : > { %18182 = vtanh.f32 %v9945_v7  ;;  %v7454_v29 = vpack.c.b16 %v6158_v9, %v6158_v9  ;;  %v7455_v39 = vpack.c.b16 %v6159_v20, %v6159_v20  ;;  %v15673_v4 = vor.u32 %v17729_v53, %v15672_v1  ;;  %v17081_v1 = vld [vmem:[%s18935_s22 + $0x8e4] sm:$0xf0] }
 0x45a   : > { %v9972_v54 = vpop.f32.mrf.mxu0  ;;  %v9985_v55 = vpop.f32.mrf.mxu1 }
 0x45b   : > { %10197 = vmatpush.bf16.msrb.mxu2 %v15657_v6  ;;  %10210 = vmatpush.bf16.msrb.mxu3 %v15661_v8  ;;  %v6156_v6 = vunpack.c.l.b16 %v2184_v5  ;;  %v6157_v8 = vunpack.c.h.b16 %v2184_v5  ;;  %v18177_v10 = vpop.eup %18176  ;;  %v8928_v44 = vsel %vm8668_vm3, %v7454_v29, 0  ;;  %v8931_v50 = vsel %vm8668_vm3, %v7455_v39, 0  ;;  %v17811_v5 = vld [vmem:[%s18935_s22 + $0x1fbc] sm:$0xf]  ;;  %v17648_v54 = vld [vmem:[%s18935_s22 + $0x1aa4] sm:$0xf] }
 0x45c   : > { %10223 = vmatpush.bf16.msra.mxu0 %v15665_v14  ;;  %10236 = vmatpush.bf16.msra.mxu1 %v15669_v15  ;;  %v18179_v11 = vpop.eup %18178  ;;  %v13069_v14 = vor.u32 %v16998_v58, %v13066_v59  ;;  %v13073_v15 = vor.u32 %v17080_v63, %v13072_v61  ;;  %v11631_v30 = vrot.slane %v18177_v10, 4  ;;  %v16329_v55 = vor.u32 %v17892_v3, %v16328_v49  ;;  %v20785_v58 = vld [vmem:[%s19570_s13 + $0x40] sm:$0xff]  ;;  %v17649_v61 = vld [vmem:[%s18935_s22 + $0x1aac] sm:$0xf]  ;;  %v13738_v49 = vld [vmem:[%s18935_s22 + $0xe00] sm:$0xf0] }
 0x45d   : > { %v9946_v21 = vpop.f32.mrf.mxu2  ;;  %v9959_v23 = vpop.f32.mrf.mxu3  ;;  %v7452_v27 = vpack.c.b16 %v6156_v6, %v6156_v6  ;;  %v7453_v28 = vpack.c.b16 %v6157_v8, %v6157_v8  ;;  %v11632_v31 = vrot.slane %v18179_v11, 2  ;;  %v17730_v59 = vld [vmem:[%s18935_s22 + $0x1d2c] sm:$0xf0]  ;;  %v15682_v63 = vld [vmem:[%s18935_s22 + $0x1d30] sm:$0xf0]  ;;  %v2331_v8 = vperm.slane %v20785_v58, 2 }
 0x45e   : > { %v18181_v38 = vpop.eup %18180  ;;  %v2332_v9 = vperm.slane %v20785_v58, 3  ;;  %v17567_v10 = vld [vmem:[%s18935_s22 + $0x1814] sm:$0xf0]  ;;  %v17486_v11 = vld [vmem:[%s18935_s22 + $0x1594] sm:$0xf] }
 0x45f   : > { %10198 = vmatpush.bf16.msrb.mxu2 %v15009_v24  ;;  %10211 = vmatpush.bf16.msrb.mxu3 %v15013_v25  ;;  %v12418_v24 = vld [vmem:[%s18935_s22 + $0x3c8] sm:$0xf0]  ;;  %v12424_v25 = vld [vmem:[%s18935_s22 + $0x148] sm:$0xf]  ;;  %v11630_v35 = vrot.slane %v18181_v38, 6  ;;  %v18183_v40 = vpop.eup %18182  ;;  %v11754_v45 = vsel %vm11708_vm10, %v11631_v30, %v11632_v31  ;;  %v15025_v23 = vor.u32 %v17567_v10, %v15024_v2 }
 0x460   : > { %10224 = vmatpush.bf16.msra.mxu0 %v15017_v26  ;;  %10237 = vmatpush.bf16.msra.mxu1 %v15021_v32  ;;  %v16918_v26 = vld [vmem:[%s18935_s22 + $0x3cc] sm:$0xf0]  ;;  %v16837_v32 = vld [vmem:[%s18935_s22 + $0x14c] sm:$0xf]  ;;  %v12421_v36 = vor.u32 %v16836_v19, %v12418_v24  ;;  %v15034_v19 = vld [vmem:[%s18935_s22 + $0x1820] sm:$0xf0] }
 0x461   : > { %v12425_v37 = vor.u32 %v16918_v26, %v12424_v25  ;;  %v12429_v41 = vor.u32 %v16837_v32, %v12426_v33  ;;  %v11753_v46 = vsel %vm11706_vm11, %v18183_v40, %v11630_v35  ;;  %v14376_v26 = vld [vmem:[%s18935_s22 + $0x1080] sm:$0xf]  ;;  %v15037_v31 = vor.u32 %v17487_v18, %v15034_v19  ;;  %v14378_v32 = vld [vmem:[%s18935_s22 + $0x1308] sm:$0xf0]  ;;  %v14384_v33 = vld [vmem:[%s18935_s22 + $0x1088] sm:$0xf] }
 0x462   : > { %v11755_v48 = vsel %vm8668_vm3, %v11753_v46, %v11754_v45  ;;  %v17406_v38 = vld [vmem:[%s18935_s22 + $0x130c] sm:$0xf0]  ;;  %v14386_v35 = vld [vmem:[%s18935_s22 + $0x1310] sm:$0xf0]  ;;  %v17243_v40 = vld [vmem:[%s18935_s22 + $0xdf4] sm:$0xf0] }
 0x463   : > { %10199 = vmatpush.bf16.msrb.mxu2 %v14361_v42  ;;  %10212 = vmatpush.bf16.msrb.mxu3 %v14365_v43  ;;  %v8922_v42 = vsel %vm8668_vm3, %v7452_v27, 0  ;;  %v8925_v43 = vsel %vm8668_vm3, %v7453_v28, 0  ;;  %11885 = vst [vmem:[%s19647_s14 + $0x78] sm:$0xff] %v11755_v48  ;;  %v17405_v27 = vld [vmem:[%s18935_s22 + $0x1304] sm:$0xf0]  ;;  %v14385_v46 = vor.u32 %v17406_v38, %v14384_v33 }
 0x464   : > { %10225 = vmatpush.bf16.msra.mxu0 %v14369_v60  ;;  %10238 = vmatpush.bf16.msra.mxu1 %v14373_v47  ;;  %v16320_v60 = vld [vmem:[%s18935_s22 + $0x1fb0] sm:$0xf]  ;;  %v17891_v47 = vld [vmem:[%s18935_s22 + $0x2234] sm:$0xf0]  ;;  %v17324_v28 = vld [vmem:[%s18935_s22 + $0x1084] sm:$0xf] }
 0x465   : > { %v16321_v7 = vor.u32 %v17891_v47, %v16320_v60  ;;  %v13728_v39 = vld [vmem:[%s18935_s22 + $0xb70] sm:$0xf]  ;;  %v13736_v45 = vld [vmem:[%s18935_s22 + $0xb78] sm:$0xf]  ;;  %v17244_v48 = vld [vmem:[%s18935_s22 + $0xdfc] sm:$0xf0] }
 0x466   : > { %v17001_v2 = vld [vmem:[%s18935_s22 + $0x66c] sm:$0xf]  ;;  %v16919_v18 = vld [vmem:[%s18935_s22 + $0x3d4] sm:$0xf0]  ;;  %v16838_v19 = vld [vmem:[%s18935_s22 + $0x154] sm:$0xf] }
 0x467   : > { %10200 = vmatpush.bf16.msrb.mxu2 %v13713_v52  ;;  %10213 = vmatpush.bf16.msrb.mxu3 %v13717_v22  ;;  %v16325_v52 = vor.u32 %v17810_v62, %v16322_v0  ;;  %v16333_v22 = vor.u32 %v17811_v5, %v16330_v51  ;;  %v17163_v0 = vld [vmem:[%s18935_s22 + $0xb7c] sm:$0xf]  ;;  %v12442_v33 = vld [vmem:[%s18935_s22 + $0x3e0] sm:$0xf0] }
 0x468   : > { %10226 = vmatpush.bf16.msra.mxu0 %v13721_v56  ;;  %10239 = vmatpush.bf16.msra.mxu1 %v13725_v57  ;;  %v15674_v56 = vld [vmem:[%s18935_s22 + $0x1d28] sm:$0xf0]  ;;  %v15680_v57 = vld [vmem:[%s18935_s22 + $0x1aa8] sm:$0xf]  ;;  %v2187_v5 = vld [vmem:[%s18935_s22 + $0x24d8] sm:$0xff] }
 0x469   : > { %v15677_v6 = vor.u32 %v17648_v54, %v15674_v56  ;;  %v13741_v56 = vor.u32 %v17163_v0, %v13738_v49  ;;  %v16338_v0 = vld [vmem:[%s18935_s22 + $0x2248] sm:$0xf0]  ;;  %v16344_v49 = vld [vmem:[%s18935_s22 + $0x1fc8] sm:$0xf] }
 0x46b   : > { %10201 = vmatpush.bf16.msrb.mxu2 %v13065_v13  ;;  %10214 = vmatpush.bf16.msrb.mxu3 %v13069_v14  ;;  %v15681_v13 = vor.u32 %v17730_v59, %v15680_v57  ;;  %v15685_v14 = vor.u32 %v17649_v61, %v15682_v63  ;;  %v17000_v57 = vld [vmem:[%s18935_s22 + $0x664] sm:$0xf]  ;;  %v13082_v59 = vld [vmem:[%s18935_s22 + $0x8e8] sm:$0xf0]  ;;  %v13088_v61 = vld [vmem:[%s18935_s22 + $0x668] sm:$0xf] }
 0x46c   : > { %10227 = vmatpush.bf16.msra.mxu0 %v13073_v15  ;;  %10240 = vmatpush.bf16.msra.mxu1 %v13077_v16  ;;  %v15026_v15 = vld [vmem:[%s18935_s22 + $0x1818] sm:$0xf0]  ;;  %v15032_v16 = vld [vmem:[%s18935_s22 + $0x1598] sm:$0xf]  ;;  %v17082_v63 = vld [vmem:[%s18935_s22 + $0x8ec] sm:$0xf0] }
 0x46d   : > { %v15029_v24 = vor.u32 %v17486_v11, %v15026_v15  ;;  %v15033_v25 = vor.u32 %v17568_v17, %v15032_v16  ;;  %v13089_v15 = vor.u32 %v17082_v63, %v13088_v61  ;;  %v12432_v17 = vld [vmem:[%s18935_s22 + $0x150] sm:$0xf]  ;;  %v17651_v61 = vld [vmem:[%s18935_s22 + $0x1abc] sm:$0xf]  ;;  %v15698_v63 = vld [vmem:[%s18935_s22 + $0x1d40] sm:$0xf0] }
 0x46f   : > { %10202 = vmatpush.bf16.msrb.mxu2 %v12417_v34  ;;  %10215 = vmatpush.bf16.msrb.mxu3 %v12421_v36  ;;  %v17325_v34 = vld [vmem:[%s18935_s22 + $0x108c] sm:$0xf]  ;;  %v2330_v36 = vperm.slane %v20785_v58, 1 }
 0x470   : > { %10228 = vmatpush.bf16.msra.mxu0 %v12425_v37  ;;  %10241 = vmatpush.bf16.msra.mxu1 %v12429_v41  ;;  %v2329_v37 = vperm.slane %v20785_v58, 0  ;;  %v14377_v41 = vor.u32 %v17405_v27, %v14376_v26  ;;  %v14389_v60 = vor.u32 %v17325_v34, %v14386_v35  ;;  %v16920_v26 = vld [vmem:[%s18935_s22 + $0x3dc] sm:$0xf0]  ;;  %v12433_v34 = vor.u32 %v16919_v18, %v12432_v17  ;;  %v17570_v17 = vld [vmem:[%s18935_s22 + $0x182c] sm:$0xf0] }
 0x471   : > { %v17489_v18 = vld [vmem:[%s18935_s22 + $0x15ac] sm:$0xf] }
 0x472   : > { %16710 = vmatmul.msk.bf16.vlgmr.msrb.gmra.mxu2 %vm8664_vm9, %v19267_v12  ;;  %16711 = vmatmul.msk.bf16.vlgmr.msrb.gmra.mxu3 %vm8664_vm9, %v19267_v12  ;;  %v10022_v20 = vpop.f32.mrf.mxu0  ;;  %v10035_v21 = vpop.f32.mrf.mxu1 }
 0x473   : > { %10247 = vmatpush.bf16.msra.mxu2 %v8922_v42  ;;  %10260 = vmatpush.bf16.msra.mxu3 %v8925_v43  ;;  %v10023_v29 = vadd.f32 %v10022_v20, %v2331_v8  ;;  %v10036_v30 = vadd.f32 %v10035_v21, %v2332_v9  ;;  %v14381_v42 = vor.u32 %v17324_v28, %v14378_v32  ;;  %v17162_v43 = vld [vmem:[%s18935_s22 + $0xb74] sm:$0xf]  ;;  %v6162_v9 = vunpack.c.l.b16 %v2187_v5  ;;  %v16839_v32 = vld [vmem:[%s18935_s22 + $0x15c] sm:$0xf] }
 0x474   : > { %10273 = vmatpush.bf16.msrb.mxu0 %v8928_v44  ;;  %10286 = vmatpush.bf16.msrb.mxu1 %v8931_v50  ;;  %v13730_v44 = vld [vmem:[%s18935_s22 + $0xdf8] sm:$0xf0]  ;;  %v2186_v50 = vld [vmem:[%s18935_s22 + $0x24d0] sm:$0xff]  ;;  %v6163_v20 = vunpack.c.h.b16 %v2187_v5  ;;  %v17813_v5 = vld [vmem:[%s18935_s22 + $0x1fcc] sm:$0xf] }
 0x475   : > { %16712 = vmatmul.msk.bf16.vlgmr.msra.gmra.mxu0 %vm8664_vm9, %v19267_v12  ;;  %16713 = vmatmul.msk.bf16.vlgmr.msra.gmra.mxu1 %vm8664_vm9, %v19267_v12  ;;  %18184 = vtanh.f32 %v10023_v29  ;;  %v9996_v47 = vpop.f32.mrf.mxu2  ;;  %v10009_v62 = vpop.f32.mrf.mxu3  ;;  %v6161_v8 = vunpack.c.h.b16 %v2186_v50  ;;  %v7458_v29 = vpack.c.b16 %v6162_v9, %v6162_v9  ;;  %v2336_v9 = vperm.slane %v20785_v58, 7 }
 0x476   : > { %18186 = vtanh.f32 %v10036_v30  ;;  %v10010_v3 = vadd.f32 %v10009_v62, %v2330_v36  ;;  %v9997_v51 = vadd.f32 %v9996_v47, %v2329_v37  ;;  %v17893_v47 = vld [vmem:[%s18935_s22 + $0x2244] sm:$0xf0]  ;;  %v17812_v62 = vld [vmem:[%s18935_s22 + $0x1fc4] sm:$0xf] }
 0x477   : > { %10248 = vmatpush.bf16.msra.mxu2 %v16321_v7  ;;  %10261 = vmatpush.bf16.msra.mxu3 %v16325_v52  ;;  %v13729_v7 = vor.u32 %v17243_v40, %v13728_v39  ;;  %v13080_v52 = vld [vmem:[%s18935_s22 + $0x660] sm:$0xf]  ;;  %v7457_v28 = vpack.c.b16 %v6161_v8, %v6161_v8  ;;  %v7459_v39 = vpack.c.b16 %v6163_v20, %v6163_v20  ;;  %v2335_v8 = vperm.slane %v20785_v58, 6 }
 0x478   : > { %10274 = vmatpush.bf16.msrb.mxu0 %v16329_v55  ;;  %10287 = vmatpush.bf16.msrb.mxu1 %v16333_v22  ;;  %v13733_v55 = vor.u32 %v17162_v43, %v13730_v44  ;;  %v13737_v22 = vor.u32 %v17244_v48, %v13736_v45  ;;  %18188 = vtanh.f32 %v10010_v3  ;;  %v8940_v44 = vsel %vm8668_vm3, %v7458_v29, 0  ;;  %v17894_v3 = vld [vmem:[%s18935_s22 + $0x224c] sm:$0xf0] }
 0x479   : > { %18190 = vtanh.f32 %v9997_v51  ;;  %v8937_v43 = vsel %vm8668_vm3, %v7457_v28, 0  ;;  %v16346_v51 = vld [vmem:[%s18935_s22 + $0x2250] sm:$0xf0] }
 0x47a   : > { %v10024_v53 = vpop.f32.mrf.mxu0  ;;  %v10037_v54 = vpop.f32.mrf.mxu1  ;;  %v17326_v28 = vld [vmem:[%s18935_s22 + $0x1094] sm:$0xf] }
 0x47b   : > { %10249 = vmatpush.bf16.msra.mxu2 %v15673_v4  ;;  %10262 = vmatpush.bf16.msra.mxu3 %v15677_v6  ;;  %v13090_v4 = vld [vmem:[%s18935_s22 + $0x8f0] sm:$0xf0]  ;;  %v6160_v6 = vunpack.c.l.b16 %v2186_v50  ;;  %v18185_v10 = vpop.eup %18184  ;;  %v8943_v50 = vsel %vm8668_vm3, %v7459_v39, 0  ;;  %v17731_v53 = vld [vmem:[%s18935_s22 + $0x1d34] sm:$0xf0]  ;;  %v16345_v54 = vor.u32 %v17894_v3, %v16344_v49  ;;  %v2188_v3 = vld [vmem:[%s18935_s22 + $0x24e0] sm:$0xff] }
 0x47c   : > { %10275 = vmatpush.bf16.msrb.mxu0 %v15681_v13  ;;  %10288 = vmatpush.bf16.msrb.mxu1 %v15685_v14  ;;  %v18187_v11 = vpop.eup %18186  ;;  %v13081_v13 = vor.u32 %v17081_v1, %v13080_v52  ;;  %v13085_v14 = vor.u32 %v17000_v57, %v13082_v59  ;;  %v13093_v16 = vor.u32 %v17001_v2, %v13090_v4  ;;  %v11634_v30 = vrot.slane %v18185_v10, 4  ;;  %v15688_v1 = vld [vmem:[%s18935_s22 + $0x1ab0] sm:$0xf]  ;;  %v15696_v57 = vld [vmem:[%s18935_s22 + $0x1ab8] sm:$0xf] }
 0x47d   : > { %v9998_v21 = vpop.f32.mrf.mxu2  ;;  %v7456_v27 = vpack.c.b16 %v6160_v6, %v6160_v6  ;;  %v16341_v52 = vor.u32 %v17812_v62, %v16338_v0  ;;  %v17732_v59 = vld [vmem:[%s18935_s22 + $0x1d3c] sm:$0xf0]  ;;  %v15689_v4 = vor.u32 %v17731_v53, %v15688_v1  ;;  %v17569_v10 = vld [vmem:[%s18935_s22 + $0x1824] sm:$0xf0]  ;;  %v17246_v62 = vld [vmem:[%s18935_s22 + $0xe0c] sm:$0xf0] }
 0x47e   : > { %v18189_v38 = vpop.eup %18188  ;;  %v15040_v2 = vld [vmem:[%s18935_s22 + $0x15a0] sm:$0xf]  ;;  %v13754_v0 = vld [vmem:[%s18935_s22 + $0xe10] sm:$0xf0] }
 0x47f   : > { %10250 = vmatpush.bf16.msra.mxu2 %v15025_v23  ;;  %10263 = vmatpush.bf16.msra.mxu3 %v15029_v24  ;;  %v10011_v23 = vpop.f32.mrf.mxu3  ;;  %v12434_v24 = vld [vmem:[%s18935_s22 + $0x3d8] sm:$0xf0]  ;;  %v11633_v35 = vrot.slane %v18189_v38, 6  ;;  %v18191_v40 = vpop.eup %18190  ;;  %v17408_v38 = vld [vmem:[%s18935_s22 + $0x131c] sm:$0xf0] }
 0x480   : > { %10276 = vmatpush.bf16.msrb.mxu0 %v15033_v25  ;;  %10289 = vmatpush.bf16.msrb.mxu1 %v15037_v31  ;;  %v12440_v25 = vld [vmem:[%s18935_s22 + $0x158] sm:$0xf]  ;;  %v11635_v31 = vrot.slane %v18187_v11, 2  ;;  %v12437_v36 = vor.u32 %v16838_v19, %v12434_v24  ;;  %v17488_v11 = vld [vmem:[%s18935_s22 + $0x15a4] sm:$0xf]  ;;  %v15041_v23 = vor.u32 %v17569_v10, %v15040_v2 }
 0x481   : > { %v12441_v37 = vor.u32 %v16920_v26, %v12440_v25  ;;  %v15050_v19 = vld [vmem:[%s18935_s22 + $0x1830] sm:$0xf0]  ;;  %v14392_v26 = vld [vmem:[%s18935_s22 + $0x1090] sm:$0xf]  ;;  %v13744_v39 = vld [vmem:[%s18935_s22 + $0xb80] sm:$0xf] }
 0x482   : > { %v11757_v45 = vsel %vm11708_vm10, %v11634_v30, %v11635_v31  ;;  %v15053_v31 = vor.u32 %v17489_v18, %v15050_v19  ;;  %v13106_v2 = vld [vmem:[%s18935_s22 + $0x900] sm:$0xf0] }
 0x483   : > { %10251 = vmatpush.bf16.msra.mxu2 %v14377_v41  ;;  %10264 = vmatpush.bf16.msra.mxu3 %v14381_v42  ;;  %v12445_v41 = vor.u32 %v16839_v32, %v12442_v33  ;;  %v8934_v42 = vsel %vm8668_vm3, %v7456_v27, 0  ;;  %v17407_v27 = vld [vmem:[%s18935_s22 + $0x1314] sm:$0xf0]  ;;  %v14394_v32 = vld [vmem:[%s18935_s22 + $0x1318] sm:$0xf0] }
 0x484   : > { %10277 = vmatpush.bf16.msrb.mxu0 %v14385_v46  ;;  %10290 = vmatpush.bf16.msrb.mxu1 %v14389_v60  ;;  %v11756_v46 = vsel %vm11706_vm11, %v18191_v40, %v11633_v35  ;;  %v16336_v60 = vld [vmem:[%s18935_s22 + $0x1fc0] sm:$0xf]  ;;  %v14400_v33 = vld [vmem:[%s18935_s22 + $0x1098] sm:$0xf]  ;;  %v14402_v35 = vld [vmem:[%s18935_s22 + $0x1320] sm:$0xf0] }
 0x485   : > { %v11758_v48 = vsel %vm8668_vm3, %v11756_v46, %v11757_v45  ;;  %v17245_v40 = vld [vmem:[%s18935_s22 + $0xe04] sm:$0xf0]  ;;  %v16840_v18 = vld [vmem:[%s18935_s22 + $0x164] sm:$0xf] }
 0x486   : > { %11886 = vst [vmem:[%s19647_s14 + $0x80] sm:$0xff] %v11758_v48  ;;  %v13752_v45 = vld [vmem:[%s18935_s22 + $0xb88] sm:$0xf]  ;;  %v17165_v48 = vld [vmem:[%s18935_s22 + $0xb8c] sm:$0xf] }
 0x487   : > { %10252 = vmatpush.bf16.msra.mxu2 %v13729_v7  ;;  %10265 = vmatpush.bf16.msra.mxu3 %v13733_v55  ;;  %v16337_v7 = vor.u32 %v17893_v47, %v16336_v60  ;;  %v16349_v55 = vor.u32 %v17813_v5, %v16346_v51  ;;  %v13745_v51 = vor.u32 %v17245_v40, %v13744_v39 }
 0x488   : > { %10278 = vmatpush.bf16.msrb.mxu0 %v13737_v22  ;;  %10291 = vmatpush.bf16.msrb.mxu1 %v13741_v56  ;;  %v17650_v22 = vld [vmem:[%s18935_s22 + $0x1ab4] sm:$0xf]  ;;  %v15690_v56 = vld [vmem:[%s18935_s22 + $0x1d38] sm:$0xf0] }
 0x489   : > { %v15693_v6 = vor.u32 %v17650_v22, %v15690_v56  ;;  %v13757_v22 = vor.u32 %v17165_v48, %v13754_v0  ;;  %v17002_v56 = vld [vmem:[%s18935_s22 + $0x674] sm:$0xf]  ;;  %v16360_v48 = vld [vmem:[%s18935_s22 + $0x1fd8] sm:$0xf]  ;;  %v17896_v0 = vld [vmem:[%s18935_s22 + $0x225c] sm:$0xf0] }
 0x48b   : > { %10253 = vmatpush.bf16.msra.mxu2 %v13081_v13  ;;  %10266 = vmatpush.bf16.msra.mxu3 %v13085_v14  ;;  %v15697_v13 = vor.u32 %v17732_v59, %v15696_v57  ;;  %v15701_v14 = vor.u32 %v17651_v61, %v15698_v63  ;;  %v13098_v57 = vld [vmem:[%s18935_s22 + $0x8f8] sm:$0xf0]  ;;  %v13104_v59 = vld [vmem:[%s18935_s22 + $0x678] sm:$0xf]  ;;  %v17084_v61 = vld [vmem:[%s18935_s22 + $0x8fc] sm:$0xf0] }
 0x48c   : > { %10279 = vmatpush.bf16.msrb.mxu0 %v13089_v15  ;;  %10292 = vmatpush.bf16.msrb.mxu1 %v13093_v16  ;;  %v15042_v15 = vld [vmem:[%s18935_s22 + $0x1828] sm:$0xf0]  ;;  %v15048_v16 = vld [vmem:[%s18935_s22 + $0x15a8] sm:$0xf]  ;;  %v17003_v63 = vld [vmem:[%s18935_s22 + $0x67c] sm:$0xf] }
 0x48d   : > { %v15045_v24 = vor.u32 %v17488_v11, %v15042_v15  ;;  %v15049_v25 = vor.u32 %v17570_v17, %v15048_v16  ;;  %v13109_v15 = vor.u32 %v17003_v63, %v13106_v2  ;;  %v12448_v16 = vld [vmem:[%s18935_s22 + $0x160] sm:$0xf]  ;;  %v16921_v17 = vld [vmem:[%s18935_s22 + $0x3e4] sm:$0xf0]  ;;  %v15056_v63 = vld [vmem:[%s18935_s22 + $0x15b0] sm:$0xf] }
 0x48f   : > { %10254 = vmatpush.bf16.msra.mxu2 %v12433_v34  ;;  %10267 = vmatpush.bf16.msra.mxu3 %v12437_v36  ;;  %v17327_v34 = vld [vmem:[%s18935_s22 + $0x109c] sm:$0xf]  ;;  %v2334_v36 = vperm.slane %v20785_v58, 5 }
 0x490   : > { %10280 = vmatpush.bf16.msrb.mxu0 %v12441_v37  ;;  %10293 = vmatpush.bf16.msrb.mxu1 %v12445_v41  ;;  %v2333_v37 = vperm.slane %v20785_v58, 4  ;;  %v14393_v41 = vor.u32 %v17407_v27, %v14392_v26  ;;  %v14401_v58 = vor.u32 %v17408_v38, %v14400_v33  ;;  %v14405_v46 = vor.u32 %v17327_v34, %v14402_v35 }
 0x491   : > { %v12449_v38 = vor.u32 %v16921_v17, %v12448_v16  ;;  %v17572_v16 = vld [vmem:[%s18935_s22 + $0x183c] sm:$0xf0]  ;;  %v17491_v17 = vld [vmem:[%s18935_s22 + $0x15bc] sm:$0xf] }
 0x492   : > { %16714 = vmatmul.msk.bf16.vlgmr.msra.gmra.mxu2 %vm8664_vm9, %v19267_v12  ;;  %16715 = vmatmul.msk.bf16.vlgmr.msra.gmra.mxu3 %vm8664_vm9, %v19267_v12  ;;  %v10074_v20 = vpop.f32.mrf.mxu0  ;;  %v10087_v21 = vpop.f32.mrf.mxu1 }
 0x493   : > { %10299 = vmatpush.bf16.msrb.mxu2 %v8934_v42  ;;  %10312 = vmatpush.bf16.msrb.mxu3 %v8937_v43  ;;  %v10075_v29 = vadd.f32 %v10074_v20, %v2335_v8  ;;  %v10088_v30 = vadd.f32 %v10087_v21, %v2336_v9  ;;  %v14397_v42 = vor.u32 %v17326_v28, %v14394_v32  ;;  %v17164_v43 = vld [vmem:[%s18935_s22 + $0xb84] sm:$0xf]  ;;  %v12458_v32 = vld [vmem:[%s18935_s22 + $0x3f0] sm:$0xf0] }
 0x494   : > { %10325 = vmatpush.bf16.msra.mxu0 %v8940_v44  ;;  %10338 = vmatpush.bf16.msra.mxu1 %v8943_v50  ;;  %v13746_v44 = vld [vmem:[%s18935_s22 + $0xe08] sm:$0xf0] }
 0x495   : > { %16716 = vmatmul.msk.bf16.vlgmr.msrb.gmra.mxu0 %vm8664_vm9, %v19267_v12  ;;  %16717 = vmatmul.msk.bf16.vlgmr.msrb.gmra.mxu1 %vm8664_vm9, %v19267_v12  ;;  %18192 = vtanh.f32 %v10075_v29  ;;  %v10048_v60 = vpop.f32.mrf.mxu2  ;;  %v10061_v47 = vpop.f32.mrf.mxu3  ;;  %v2189_v50 = vld [vmem:[%s18935_s22 + $0x24e8] sm:$0xff] }
 0x496   : > { %18194 = vtanh.f32 %v10088_v30  ;;  %v10062_v49 = vadd.f32 %v10061_v47, %v2334_v36  ;;  %v10049_v5 = vadd.f32 %v10048_v60, %v2333_v37  ;;  %v6166_v8 = vunpack.c.l.b16 %v2189_v50  ;;  %v17814_v60 = vld [vmem:[%s18935_s22 + $0x1fd4] sm:$0xf] }
 0x497   : > { %10300 = vmatpush.bf16.msrb.mxu2 %v16337_v7  ;;  %10313 = vmatpush.bf16.msrb.mxu3 %v16341_v52  ;;  %v13096_v7 = vld [vmem:[%s18935_s22 + $0x670] sm:$0xf]  ;;  %v17083_v52 = vld [vmem:[%s18935_s22 + $0x8f4] sm:$0xf0]  ;;  %v6167_v19 = vunpack.c.h.b16 %v2189_v50  ;;  %v16362_v50 = vld [vmem:[%s18935_s22 + $0x2260] sm:$0xf0] }
 0x498   : > { %10326 = vmatpush.bf16.msra.mxu0 %v16345_v54  ;;  %10339 = vmatpush.bf16.msra.mxu1 %v16349_v55  ;;  %v13749_v54 = vor.u32 %v17164_v43, %v13746_v44  ;;  %v13753_v55 = vor.u32 %v17246_v62, %v13752_v45  ;;  %18196 = vtanh.f32 %v10062_v49  ;;  %v13097_v11 = vor.u32 %v17083_v52, %v13096_v7  ;;  %v16354_v62 = vld [vmem:[%s18935_s22 + $0x2258] sm:$0xf0]  ;;  %v15704_v7 = vld [vmem:[%s18935_s22 + $0x1ac0] sm:$0xf]  ;;  %v17733_v52 = vld [vmem:[%s18935_s22 + $0x1d44] sm:$0xf0] }
 0x499   : > { %18198 = vtanh.f32 %v10049_v5  ;;  %v7462_v28 = vpack.c.b16 %v6166_v8, %v6166_v8  ;;  %v7463_v37 = vpack.c.b16 %v6167_v19, %v6167_v19  ;;  %v15705_v2 = vor.u32 %v17733_v52, %v15704_v7  ;;  %v17085_v7 = vld [vmem:[%s18935_s22 + $0x904] sm:$0xf0] }
 0x49a   : > { %v10076_v1 = vpop.f32.mrf.mxu0  ;;  %v10089_v53 = vpop.f32.mrf.mxu1 }
 0x49b   : > { %10301 = vmatpush.bf16.msrb.mxu2 %v15689_v4  ;;  %10314 = vmatpush.bf16.msrb.mxu3 %v15693_v6  ;;  %v6164_v4 = vunpack.c.l.b16 %v2188_v3  ;;  %v6165_v6 = vunpack.c.h.b16 %v2188_v3  ;;  %v18193_v9 = vpop.eup %18192  ;;  %v8952_v43 = vsel %vm8668_vm3, %v7462_v28, 0  ;;  %v8955_v49 = vsel %vm8668_vm3, %v7463_v37, 0  ;;  %v17815_v3 = vld [vmem:[%s18935_s22 + $0x1fdc] sm:$0xf]  ;;  %v17652_v1 = vld [vmem:[%s18935_s22 + $0x1ac4] sm:$0xf] }
 0x49c   : > { %10327 = vmatpush.bf16.msra.mxu0 %v15697_v13  ;;  %10340 = vmatpush.bf16.msra.mxu1 %v15701_v14  ;;  %v18195_v10 = vpop.eup %18194  ;;  %v13101_v13 = vor.u32 %v17002_v56, %v13098_v57  ;;  %v13105_v14 = vor.u32 %v17084_v61, %v13104_v59  ;;  %v11637_v29 = vrot.slane %v18193_v9, 4  ;;  %v16361_v53 = vor.u32 %v17896_v0, %v16360_v48  ;;  %v20944_v56 = vld [vmem:[%s19570_s13 + $0x48] sm:$0xff]  ;;  %v17734_v57 = vld [vmem:[%s18935_s22 + $0x1d4c] sm:$0xf0]  ;;  %v17653_v59 = vld [vmem:[%s18935_s22 + $0x1acc] sm:$0xf] }
 0x49d   : > { %v10050_v20 = vpop.f32.mrf.mxu2  ;;  %v10063_v21 = vpop.f32.mrf.mxu3  ;;  %v7460_v26 = vpack.c.b16 %v6164_v4, %v6164_v4  ;;  %v7461_v27 = vpack.c.b16 %v6165_v6, %v6165_v6  ;;  %v11638_v30 = vrot.slane %v18195_v10, 2  ;;  %v15714_v61 = vld [vmem:[%s18935_s22 + $0x1d50] sm:$0xf0]  ;;  %v2339_v6 = vperm.slane %v20944_v56, 2  ;;  %v17571_v9 = vld [vmem:[%s18935_s22 + $0x1834] sm:$0xf0] }
 0x49e   : > { %v18197_v33 = vpop.eup %18196  ;;  %v2340_v8 = vperm.slane %v20944_v56, 3  ;;  %v17490_v10 = vld [vmem:[%s18935_s22 + $0x15b4] sm:$0xf]  ;;  %v15057_v21 = vor.u32 %v17571_v9, %v15056_v63  ;;  %v13760_v37 = vld [vmem:[%s18935_s22 + $0xb90] sm:$0xf] }
 0x49f   : > { %10302 = vmatpush.bf16.msrb.mxu2 %v15041_v23  ;;  %10315 = vmatpush.bf16.msrb.mxu3 %v15045_v24  ;;  %v12450_v23 = vld [vmem:[%s18935_s22 + $0x3e8] sm:$0xf0]  ;;  %v12456_v24 = vld [vmem:[%s18935_s22 + $0x168] sm:$0xf]  ;;  %v11636_v34 = vrot.slane %v18197_v33, 6  ;;  %v18199_v39 = vpop.eup %18198  ;;  %v11760_v44 = vsel %vm11708_vm10, %v11637_v29, %v11638_v30 }
 0x4a0   : > { %10328 = vmatpush.bf16.msra.mxu0 %v15049_v25  ;;  %10341 = vmatpush.bf16.msra.mxu1 %v15053_v31  ;;  %v16922_v25 = vld [vmem:[%s18935_s22 + $0x3ec] sm:$0xf0]  ;;  %v16841_v31 = vld [vmem:[%s18935_s22 + $0x16c] sm:$0xf]  ;;  %v12453_v35 = vor.u32 %v16840_v18, %v12450_v23  ;;  %v15066_v18 = vld [vmem:[%s18935_s22 + $0x1840] sm:$0xf0] }
 0x4a1   : > { %v12457_v36 = vor.u32 %v16922_v25, %v12456_v24  ;;  %v12461_v40 = vor.u32 %v16841_v31, %v12458_v32  ;;  %v11759_v45 = vsel %vm11706_vm11, %v18199_v39, %v11636_v34  ;;  %v14408_v25 = vld [vmem:[%s18935_s22 + $0x10a0] sm:$0xf]  ;;  %v15069_v30 = vor.u32 %v17491_v17, %v15066_v18  ;;  %v14410_v31 = vld [vmem:[%s18935_s22 + $0x1328] sm:$0xf0]  ;;  %v14416_v32 = vld [vmem:[%s18935_s22 + $0x10a8] sm:$0xf] }
 0x4a2   : > { %v11761_v47 = vsel %vm8668_vm3, %v11759_v45, %v11760_v44  ;;  %v17410_v33 = vld [vmem:[%s18935_s22 + $0x132c] sm:$0xf0]  ;;  %v14418_v34 = vld [vmem:[%s18935_s22 + $0x1330] sm:$0xf0]  ;;  %v17247_v39 = vld [vmem:[%s18935_s22 + $0xe14] sm:$0xf0] }
 0x4a3   : > { %10303 = vmatpush.bf16.msrb.mxu2 %v14393_v41  ;;  %10316 = vmatpush.bf16.msrb.mxu3 %v14397_v42  ;;  %v8946_v41 = vsel %vm8668_vm3, %v7460_v26, 0  ;;  %v8949_v42 = vsel %vm8668_vm3, %v7461_v27, 0  ;;  %11887 = vst [vmem:[%s19647_s14 + $0x88] sm:$0xff] %v11761_v47  ;;  %v17409_v26 = vld [vmem:[%s18935_s22 + $0x1324] sm:$0xf0]  ;;  %v14417_v45 = vor.u32 %v17410_v33, %v14416_v32 }
 0x4a4   : > { %10329 = vmatpush.bf16.msra.mxu0 %v14401_v58  ;;  %10342 = vmatpush.bf16.msra.mxu1 %v14405_v46  ;;  %v16352_v58 = vld [vmem:[%s18935_s22 + $0x1fd0] sm:$0xf]  ;;  %v17895_v46 = vld [vmem:[%s18935_s22 + $0x2254] sm:$0xf0]  ;;  %v17328_v27 = vld [vmem:[%s18935_s22 + $0x10a4] sm:$0xf] }
 0x4a5   : > { %v16353_v5 = vor.u32 %v17895_v46, %v16352_v58  ;;  %v13768_v44 = vld [vmem:[%s18935_s22 + $0xb98] sm:$0xf]  ;;  %v17248_v47 = vld [vmem:[%s18935_s22 + $0xe1c] sm:$0xf0]  ;;  %v13770_v48 = vld [vmem:[%s18935_s22 + $0xe20] sm:$0xf0] }
 0x4a6   : > { %v17005_v63 = vld [vmem:[%s18935_s22 + $0x68c] sm:$0xf]  ;;  %v16923_v17 = vld [vmem:[%s18935_s22 + $0x3f4] sm:$0xf0]  ;;  %v16842_v18 = vld [vmem:[%s18935_s22 + $0x174] sm:$0xf] }
 0x4a7   : > { %10304 = vmatpush.bf16.msrb.mxu2 %v13745_v51  ;;  %10317 = vmatpush.bf16.msrb.mxu3 %v13749_v54  ;;  %v16357_v51 = vor.u32 %v17814_v60, %v16354_v62  ;;  %v16365_v54 = vor.u32 %v17815_v3, %v16362_v50  ;;  %v17167_v62 = vld [vmem:[%s18935_s22 + $0xb9c] sm:$0xf]  ;;  %v12474_v32 = vld [vmem:[%s18935_s22 + $0x400] sm:$0xf0] }
 0x4a8   : > { %10330 = vmatpush.bf16.msra.mxu0 %v13753_v55  ;;  %10343 = vmatpush.bf16.msra.mxu1 %v13757_v22  ;;  %v15706_v55 = vld [vmem:[%s18935_s22 + $0x1d48] sm:$0xf0]  ;;  %v15712_v22 = vld [vmem:[%s18935_s22 + $0x1ac8] sm:$0xf]  ;;  %v2191_v3 = vld [vmem:[%s18935_s22 + $0x24f8] sm:$0xff] }
 0x4a9   : > { %v15709_v4 = vor.u32 %v17652_v1, %v15706_v55  ;;  %v13773_v55 = vor.u32 %v17167_v62, %v13770_v48  ;;  %v16370_v62 = vld [vmem:[%s18935_s22 + $0x2268] sm:$0xf0]  ;;  %v16376_v48 = vld [vmem:[%s18935_s22 + $0x1fe8] sm:$0xf] }
 0x4ab   : > { %10305 = vmatpush.bf16.msrb.mxu2 %v13097_v11  ;;  %10318 = vmatpush.bf16.msrb.mxu3 %v13101_v13  ;;  %v15713_v11 = vor.u32 %v17734_v57, %v15712_v22  ;;  %v15717_v13 = vor.u32 %v17653_v59, %v15714_v61  ;;  %v17004_v22 = vld [vmem:[%s18935_s22 + $0x684] sm:$0xf]  ;;  %v13114_v57 = vld [vmem:[%s18935_s22 + $0x908] sm:$0xf0]  ;;  %v13120_v59 = vld [vmem:[%s18935_s22 + $0x688] sm:$0xf] }
 0x4ac   : > { %10331 = vmatpush.bf16.msra.mxu0 %v13105_v14  ;;  %10344 = vmatpush.bf16.msra.mxu1 %v13109_v15  ;;  %v15058_v14 = vld [vmem:[%s18935_s22 + $0x1838] sm:$0xf0]  ;;  %v15064_v15 = vld [vmem:[%s18935_s22 + $0x15b8] sm:$0xf]  ;;  %v17086_v61 = vld [vmem:[%s18935_s22 + $0x90c] sm:$0xf0] }
 0x4ad   : > { %v15061_v23 = vor.u32 %v17490_v10, %v15058_v14  ;;  %v15065_v24 = vor.u32 %v17572_v16, %v15064_v15  ;;  %v13121_v14 = vor.u32 %v17086_v61, %v13120_v59  ;;  %v12464_v16 = vld [vmem:[%s18935_s22 + $0x170] sm:$0xf]  ;;  %v17655_v59 = vld [vmem:[%s18935_s22 + $0x1adc] sm:$0xf]  ;;  %v15730_v61 = vld [vmem:[%s18935_s22 + $0x1d60] sm:$0xf0] }
 0x4af   : > { %10306 = vmatpush.bf16.msrb.mxu2 %v12449_v38  ;;  %10319 = vmatpush.bf16.msrb.mxu3 %v12453_v35  ;;  %v17329_v38 = vld [vmem:[%s18935_s22 + $0x10ac] sm:$0xf]  ;;  %v2338_v35 = vperm.slane %v20944_v56, 1 }
 0x4b0   : > { %10332 = vmatpush.bf16.msra.mxu0 %v12457_v36  ;;  %10345 = vmatpush.bf16.msra.mxu1 %v12461_v40  ;;  %v2337_v36 = vperm.slane %v20944_v56, 0  ;;  %v14409_v40 = vor.u32 %v17409_v26, %v14408_v25  ;;  %v14421_v58 = vor.u32 %v17329_v38, %v14418_v34  ;;  %v16924_v25 = vld [vmem:[%s18935_s22 + $0x3fc] sm:$0xf0]  ;;  %v12465_v38 = vor.u32 %v16923_v17, %v12464_v16  ;;  %v17574_v16 = vld [vmem:[%s18935_s22 + $0x184c] sm:$0xf0] }
 0x4b1   : > { %v17493_v17 = vld [vmem:[%s18935_s22 + $0x15cc] sm:$0xf] }
 0x4b2   : > { %16718 = vmatmul.msk.bf16.vlgmr.msrb.gmra.mxu2 %vm8664_vm9, %v19267_v12  ;;  %16719 = vmatmul.msk.bf16.vlgmr.msrb.gmra.mxu3 %vm8664_vm9, %v19267_v12  ;;  %v10126_v19 = vpop.f32.mrf.mxu0  ;;  %v10139_v20 = vpop.f32.mrf.mxu1 }
 0x4b3   : > { %10351 = vmatpush.bf16.msra.mxu2 %v8946_v41  ;;  %10364 = vmatpush.bf16.msra.mxu3 %v8949_v42  ;;  %v10127_v28 = vadd.f32 %v10126_v19, %v2339_v6  ;;  %v10140_v29 = vadd.f32 %v10139_v20, %v2340_v8  ;;  %v14413_v41 = vor.u32 %v17328_v27, %v14410_v31  ;;  %v17166_v42 = vld [vmem:[%s18935_s22 + $0xb94] sm:$0xf]  ;;  %v6170_v8 = vunpack.c.l.b16 %v2191_v3  ;;  %v16843_v31 = vld [vmem:[%s18935_s22 + $0x17c] sm:$0xf] }
 0x4b4   : > { %10377 = vmatpush.bf16.msrb.mxu0 %v8952_v43  ;;  %10390 = vmatpush.bf16.msrb.mxu1 %v8955_v49  ;;  %v13762_v43 = vld [vmem:[%s18935_s22 + $0xe18] sm:$0xf0]  ;;  %v2190_v49 = vld [vmem:[%s18935_s22 + $0x24f0] sm:$0xff]  ;;  %v6171_v19 = vunpack.c.h.b16 %v2191_v3  ;;  %v17817_v3 = vld [vmem:[%s18935_s22 + $0x1fec] sm:$0xf] }
 0x4b5   : > { %16720 = vmatmul.msk.bf16.vlgmr.msra.gmra.mxu0 %vm8664_vm9, %v19267_v12  ;;  %16721 = vmatmul.msk.bf16.vlgmr.msra.gmra.mxu1 %vm8664_vm9, %v19267_v12  ;;  %18200 = vtanh.f32 %v10127_v28  ;;  %v10100_v46 = vpop.f32.mrf.mxu2  ;;  %v10113_v60 = vpop.f32.mrf.mxu3  ;;  %v6169_v6 = vunpack.c.h.b16 %v2190_v49  ;;  %v7466_v28 = vpack.c.b16 %v6170_v8, %v6170_v8  ;;  %v2344_v8 = vperm.slane %v20944_v56, 7 }
 0x4b6   : > { %18202 = vtanh.f32 %v10140_v29  ;;  %v10114_v0 = vadd.f32 %v10113_v60, %v2338_v35  ;;  %v10101_v50 = vadd.f32 %v10100_v46, %v2337_v36  ;;  %v17897_v46 = vld [vmem:[%s18935_s22 + $0x2264] sm:$0xf0]  ;;  %v17816_v60 = vld [vmem:[%s18935_s22 + $0x1fe4] sm:$0xf] }
 0x4b7   : > { %10352 = vmatpush.bf16.msra.mxu2 %v16353_v5  ;;  %10365 = vmatpush.bf16.msra.mxu3 %v16357_v51  ;;  %v13761_v5 = vor.u32 %v17247_v39, %v13760_v37  ;;  %v13112_v51 = vld [vmem:[%s18935_s22 + $0x680] sm:$0xf]  ;;  %v7465_v27 = vpack.c.b16 %v6169_v6, %v6169_v6  ;;  %v7467_v37 = vpack.c.b16 %v6171_v19, %v6171_v19  ;;  %v2343_v6 = vperm.slane %v20944_v56, 6 }
 0x4b8   : > { %10378 = vmatpush.bf16.msrb.mxu0 %v16361_v53  ;;  %10391 = vmatpush.bf16.msrb.mxu1 %v16365_v54  ;;  %v13765_v53 = vor.u32 %v17166_v42, %v13762_v43  ;;  %v13769_v54 = vor.u32 %v17248_v47, %v13768_v44  ;;  %18204 = vtanh.f32 %v10114_v0  ;;  %v8964_v43 = vsel %vm8668_vm3, %v7466_v28, 0  ;;  %v17898_v0 = vld [vmem:[%s18935_s22 + $0x226c] sm:$0xf0] }
 0x4b9   : > { %18206 = vtanh.f32 %v10101_v50  ;;  %v8961_v42 = vsel %vm8668_vm3, %v7465_v27, 0  ;;  %v16378_v50 = vld [vmem:[%s18935_s22 + $0x2270] sm:$0xf0] }
 0x4ba   : > { %v10128_v52 = vpop.f32.mrf.mxu0  ;;  %v10141_v1 = vpop.f32.mrf.mxu1  ;;  %v17330_v27 = vld [vmem:[%s18935_s22 + $0x10b4] sm:$0xf] }
 0x4bb   : > { %10353 = vmatpush.bf16.msra.mxu2 %v15705_v2  ;;  %10366 = vmatpush.bf16.msra.mxu3 %v15709_v4  ;;  %v13122_v2 = vld [vmem:[%s18935_s22 + $0x910] sm:$0xf0]  ;;  %v6168_v4 = vunpack.c.l.b16 %v2190_v49  ;;  %v18201_v9 = vpop.eup %18200  ;;  %v8967_v49 = vsel %vm8668_vm3, %v7467_v37, 0  ;;  %v17735_v52 = vld [vmem:[%s18935_s22 + $0x1d54] sm:$0xf0]  ;;  %v16377_v1 = vor.u32 %v17898_v0, %v16376_v48  ;;  %v2192_v0 = vld [vmem:[%s18935_s22 + $0x2500] sm:$0xff] }
 0x4bc   : > { %10379 = vmatpush.bf16.msrb.mxu0 %v15713_v11  ;;  %10392 = vmatpush.bf16.msrb.mxu1 %v15717_v13  ;;  %v18203_v10 = vpop.eup %18202  ;;  %v13113_v11 = vor.u32 %v17085_v7, %v13112_v51  ;;  %v13117_v13 = vor.u32 %v17004_v22, %v13114_v57  ;;  %v13125_v15 = vor.u32 %v17005_v63, %v13122_v2  ;;  %v11640_v29 = vrot.slane %v18201_v9, 4  ;;  %v15720_v7 = vld [vmem:[%s18935_s22 + $0x1ad0] sm:$0xf]  ;;  %v15728_v22 = vld [vmem:[%s18935_s22 + $0x1ad8] sm:$0xf] }
 0x4bd   : > { %v10102_v20 = vpop.f32.mrf.mxu2  ;;  %v7464_v26 = vpack.c.b16 %v6168_v4, %v6168_v4  ;;  %v16373_v51 = vor.u32 %v17816_v60, %v16370_v62  ;;  %v17736_v57 = vld [vmem:[%s18935_s22 + $0x1d5c] sm:$0xf0]  ;;  %v15721_v2 = vor.u32 %v17735_v52, %v15720_v7  ;;  %v17573_v9 = vld [vmem:[%s18935_s22 + $0x1844] sm:$0xf0]  ;;  %v17250_v60 = vld [vmem:[%s18935_s22 + $0xe2c] sm:$0xf0] }
 0x4be   : > { %v18205_v33 = vpop.eup %18204  ;;  %v15072_v63 = vld [vmem:[%s18935_s22 + $0x15c0] sm:$0xf]  ;;  %v13786_v62 = vld [vmem:[%s18935_s22 + $0xe30] sm:$0xf0] }
 0x4bf   : > { %10354 = vmatpush.bf16.msra.mxu2 %v15057_v21  ;;  %10367 = vmatpush.bf16.msra.mxu3 %v15061_v23  ;;  %v10115_v21 = vpop.f32.mrf.mxu3  ;;  %v12466_v23 = vld [vmem:[%s18935_s22 + $0x3f8] sm:$0xf0]  ;;  %v11639_v34 = vrot.slane %v18205_v33, 6  ;;  %v18207_v39 = vpop.eup %18206  ;;  %v17412_v33 = vld [vmem:[%s18935_s22 + $0x133c] sm:$0xf0] }
 0x4c0   : > { %10380 = vmatpush.bf16.msrb.mxu0 %v15065_v24  ;;  %10393 = vmatpush.bf16.msrb.mxu1 %v15069_v30  ;;  %v12472_v24 = vld [vmem:[%s18935_s22 + $0x178] sm:$0xf]  ;;  %v11641_v30 = vrot.slane %v18203_v10, 2  ;;  %v12469_v35 = vor.u32 %v16842_v18, %v12466_v23  ;;  %v17492_v10 = vld [vmem:[%s18935_s22 + $0x15c4] sm:$0xf]  ;;  %v15073_v21 = vor.u32 %v17573_v9, %v15072_v63 }
 0x4c1   : > { %v12473_v36 = vor.u32 %v16924_v25, %v12472_v24  ;;  %v15082_v18 = vld [vmem:[%s18935_s22 + $0x1850] sm:$0xf0]  ;;  %v14424_v25 = vld [vmem:[%s18935_s22 + $0x10b0] sm:$0xf]  ;;  %v13776_v37 = vld [vmem:[%s18935_s22 + $0xba0] sm:$0xf] }
 0x4c2   : > { %v11763_v44 = vsel %vm11708_vm10, %v11640_v29, %v11641_v30  ;;  %v15085_v30 = vor.u32 %v17493_v17, %v15082_v18  ;;  %v13138_v63 = vld [vmem:[%s18935_s22 + $0x920] sm:$0xf0] }
 0x4c3   : > { %10355 = vmatpush.bf16.msra.mxu2 %v14409_v40  ;;  %10368 = vmatpush.bf16.msra.mxu3 %v14413_v41  ;;  %v12477_v40 = vor.u32 %v16843_v31, %v12474_v32  ;;  %v8958_v41 = vsel %vm8668_vm3, %v7464_v26, 0  ;;  %v17411_v26 = vld [vmem:[%s18935_s22 + $0x1334] sm:$0xf0]  ;;  %v14426_v31 = vld [vmem:[%s18935_s22 + $0x1338] sm:$0xf0] }
 0x4c4   : > { %10381 = vmatpush.bf16.msrb.mxu0 %v14417_v45  ;;  %10394 = vmatpush.bf16.msrb.mxu1 %v14421_v58  ;;  %v11762_v45 = vsel %vm11706_vm11, %v18207_v39, %v11639_v34  ;;  %v16368_v58 = vld [vmem:[%s18935_s22 + $0x1fe0] sm:$0xf]  ;;  %v14432_v32 = vld [vmem:[%s18935_s22 + $0x10b8] sm:$0xf]  ;;  %v14434_v34 = vld [vmem:[%s18935_s22 + $0x1340] sm:$0xf0] }
 0x4c5   : > { %v11764_v47 = vsel %vm8668_vm3, %v11762_v45, %v11763_v44  ;;  %v17249_v39 = vld [vmem:[%s18935_s22 + $0xe24] sm:$0xf0]  ;;  %v16844_v17 = vld [vmem:[%s18935_s22 + $0x184] sm:$0xf] }
 0x4c6   : > { %11888 = vst [vmem:[%s19647_s14 + $0x90] sm:$0xff] %v11764_v47  ;;  %v13784_v44 = vld [vmem:[%s18935_s22 + $0xba8] sm:$0xf]  ;;  %v17169_v47 = vld [vmem:[%s18935_s22 + $0xbac] sm:$0xf] }
 0x4c7   : > { %10356 = vmatpush.bf16.msra.mxu2 %v13761_v5  ;;  %10369 = vmatpush.bf16.msra.mxu3 %v13765_v53  ;;  %v16369_v5 = vor.u32 %v17897_v46, %v16368_v58  ;;  %v16381_v53 = vor.u32 %v17817_v3, %v16378_v50  ;;  %v13777_v50 = vor.u32 %v17249_v39, %v13776_v37 }
 0x4c8   : > { %10382 = vmatpush.bf16.msrb.mxu0 %v13769_v54  ;;  %10395 = vmatpush.bf16.msrb.mxu1 %v13773_v55  ;;  %v17654_v54 = vld [vmem:[%s18935_s22 + $0x1ad4] sm:$0xf]  ;;  %v15722_v55 = vld [vmem:[%s18935_s22 + $0x1d58] sm:$0xf0] }
 0x4c9   : > { %v15725_v4 = vor.u32 %v17654_v54, %v15722_v55  ;;  %v13789_v54 = vor.u32 %v17169_v47, %v13786_v62  ;;  %v17006_v55 = vld [vmem:[%s18935_s22 + $0x694] sm:$0xf]  ;;  %v16392_v47 = vld [vmem:[%s18935_s22 + $0x1ff8] sm:$0xf]  ;;  %v17900_v62 = vld [vmem:[%s18935_s22 + $0x227c] sm:$0xf0] }
 0x4cb   : > { %10357 = vmatpush.bf16.msra.mxu2 %v13113_v11  ;;  %10370 = vmatpush.bf16.msra.mxu3 %v13117_v13  ;;  %v15729_v11 = vor.u32 %v17736_v57, %v15728_v22  ;;  %v15733_v13 = vor.u32 %v17655_v59, %v15730_v61  ;;  %v13130_v22 = vld [vmem:[%s18935_s22 + $0x918] sm:$0xf0]  ;;  %v13136_v57 = vld [vmem:[%s18935_s22 + $0x698] sm:$0xf]  ;;  %v17088_v59 = vld [vmem:[%s18935_s22 + $0x91c] sm:$0xf0] }
 0x4cc   : > { %10383 = vmatpush.bf16.msrb.mxu0 %v13121_v14  ;;  %10396 = vmatpush.bf16.msrb.mxu1 %v13125_v15  ;;  %v15074_v14 = vld [vmem:[%s18935_s22 + $0x1848] sm:$0xf0]  ;;  %v15080_v15 = vld [vmem:[%s18935_s22 + $0x15c8] sm:$0xf]  ;;  %v17007_v61 = vld [vmem:[%s18935_s22 + $0x69c] sm:$0xf] }
 0x4cd   : > { %v15077_v23 = vor.u32 %v17492_v10, %v15074_v14  ;;  %v15081_v24 = vor.u32 %v17574_v16, %v15080_v15  ;;  %v13141_v14 = vor.u32 %v17007_v61, %v13138_v63  ;;  %v12480_v15 = vld [vmem:[%s18935_s22 + $0x180] sm:$0xf]  ;;  %v16925_v16 = vld [vmem:[%s18935_s22 + $0x404] sm:$0xf0]  ;;  %v15088_v61 = vld [vmem:[%s18935_s22 + $0x15d0] sm:$0xf] }
 0x4cf   : > { %10358 = vmatpush.bf16.msra.mxu2 %v12465_v38  ;;  %10371 = vmatpush.bf16.msra.mxu3 %v12469_v35  ;;  %v17331_v38 = vld [vmem:[%s18935_s22 + $0x10bc] sm:$0xf]  ;;  %v2342_v35 = vperm.slane %v20944_v56, 5 }
 0x4d0   : > { %10384 = vmatpush.bf16.msrb.mxu0 %v12473_v36  ;;  %10397 = vmatpush.bf16.msrb.mxu1 %v12477_v40  ;;  %v2341_v36 = vperm.slane %v20944_v56, 4  ;;  %v14425_v40 = vor.u32 %v17411_v26, %v14424_v25  ;;  %v14433_v56 = vor.u32 %v17412_v33, %v14432_v32  ;;  %v14437_v45 = vor.u32 %v17331_v38, %v14434_v34 }
 0x4d1   : > { %v12481_v33 = vor.u32 %v16925_v16, %v12480_v15  ;;  %v17576_v15 = vld [vmem:[%s18935_s22 + $0x185c] sm:$0xf0]  ;;  %v17495_v16 = vld [vmem:[%s18935_s22 + $0x15dc] sm:$0xf] }
 0x4d2   : > { %16722 = vmatmul.msk.bf16.vlgmr.msra.gmra.mxu2 %vm8664_vm9, %v19267_v12  ;;  %16723 = vmatmul.msk.bf16.vlgmr.msra.gmra.mxu3 %vm8664_vm9, %v19267_v12  ;;  %v10178_v19 = vpop.f32.mrf.mxu0  ;;  %v10191_v20 = vpop.f32.mrf.mxu1 }
 0x4d3   : > { %10403 = vmatpush.bf16.msrb.mxu2 %v8958_v41  ;;  %10416 = vmatpush.bf16.msrb.mxu3 %v8961_v42  ;;  %v10179_v28 = vadd.f32 %v10178_v19, %v2343_v6  ;;  %v10192_v29 = vadd.f32 %v10191_v20, %v2344_v8  ;;  %v14429_v41 = vor.u32 %v17330_v27, %v14426_v31  ;;  %v17168_v42 = vld [vmem:[%s18935_s22 + $0xba4] sm:$0xf]  ;;  %v12490_v31 = vld [vmem:[%s18935_s22 + $0x410] sm:$0xf0] }
 0x4d4   : > { %10429 = vmatpush.bf16.msra.mxu0 %v8964_v43  ;;  %10442 = vmatpush.bf16.msra.mxu1 %v8967_v49  ;;  %v13778_v43 = vld [vmem:[%s18935_s22 + $0xe28] sm:$0xf0] }
 0x4d5   : > { %16724 = vmatmul.msk.bf16.vlgmr.msrb.gmra.mxu0 %vm8664_vm9, %v19267_v12  ;;  %16725 = vmatmul.msk.bf16.vlgmr.msrb.gmra.mxu1 %vm8664_vm9, %v19267_v12  ;;  %18208 = vtanh.f32 %v10179_v28  ;;  %v10152_v58 = vpop.f32.mrf.mxu2  ;;  %v10165_v46 = vpop.f32.mrf.mxu3  ;;  %v2193_v49 = vld [vmem:[%s18935_s22 + $0x2508] sm:$0xff] }
 0x4d6   : > { %18210 = vtanh.f32 %v10192_v29  ;;  %v10166_v48 = vadd.f32 %v10165_v46, %v2342_v35  ;;  %v10153_v3 = vadd.f32 %v10152_v58, %v2341_v36  ;;  %v6174_v6 = vunpack.c.l.b16 %v2193_v49  ;;  %v17818_v58 = vld [vmem:[%s18935_s22 + $0x1ff4] sm:$0xf] }
 0x4d7   : > { %10404 = vmatpush.bf16.msrb.mxu2 %v16369_v5  ;;  %10417 = vmatpush.bf16.msrb.mxu3 %v16373_v51  ;;  %v13128_v5 = vld [vmem:[%s18935_s22 + $0x690] sm:$0xf]  ;;  %v17087_v51 = vld [vmem:[%s18935_s22 + $0x914] sm:$0xf0]  ;;  %v6175_v18 = vunpack.c.h.b16 %v2193_v49  ;;  %v16394_v49 = vld [vmem:[%s18935_s22 + $0x2280] sm:$0xf0] }
 0x4d8   : > { %10430 = vmatpush.bf16.msra.mxu0 %v16377_v1  ;;  %10443 = vmatpush.bf16.msra.mxu1 %v16381_v53  ;;  %v13781_v1 = vor.u32 %v17168_v42, %v13778_v43  ;;  %v13785_v53 = vor.u32 %v17250_v60, %v13784_v44  ;;  %18212 = vtanh.f32 %v10166_v48  ;;  %v13129_v10 = vor.u32 %v17087_v51, %v13128_v5  ;;  %v16386_v60 = vld [vmem:[%s18935_s22 + $0x2278] sm:$0xf0]  ;;  %v15736_v5 = vld [vmem:[%s18935_s22 + $0x1ae0] sm:$0xf]  ;;  %v17737_v51 = vld [vmem:[%s18935_s22 + $0x1d64] sm:$0xf0] }
 0x4d9   : > { %18214 = vtanh.f32 %v10153_v3  ;;  %v7470_v27 = vpack.c.b16 %v6174_v6, %v6174_v6  ;;  %v7471_v36 = vpack.c.b16 %v6175_v18, %v6175_v18  ;;  %v15737_v63 = vor.u32 %v17737_v51, %v15736_v5  ;;  %v17089_v5 = vld [vmem:[%s18935_s22 + $0x924] sm:$0xf0] }
 0x4da   : > { %v10180_v7 = vpop.f32.mrf.mxu0  ;;  %v10193_v52 = vpop.f32.mrf.mxu1 }
 0x4db   : > { %10405 = vmatpush.bf16.msrb.mxu2 %v15721_v2  ;;  %10418 = vmatpush.bf16.msrb.mxu3 %v15725_v4  ;;  %v6172_v2 = vunpack.c.l.b16 %v2192_v0  ;;  %v6173_v4 = vunpack.c.h.b16 %v2192_v0  ;;  %v18209_v8 = vpop.eup %18208  ;;  %v8976_v42 = vsel %vm8668_vm3, %v7470_v27, 0  ;;  %v8979_v48 = vsel %vm8668_vm3, %v7471_v36, 0  ;;  %v17819_v0 = vld [vmem:[%s18935_s22 + $0x1ffc] sm:$0xf]  ;;  %v17656_v7 = vld [vmem:[%s18935_s22 + $0x1ae4] sm:$0xf] }
 0x4dc   : > { %10431 = vmatpush.bf16.msra.mxu0 %v15729_v11  ;;  %10444 = vmatpush.bf16.msra.mxu1 %v15733_v13  ;;  %v18211_v9 = vpop.eup %18210  ;;  %v13133_v11 = vor.u32 %v17006_v55, %v13130_v22  ;;  %v13137_v13 = vor.u32 %v17088_v59, %v13136_v57  ;;  %v11643_v28 = vrot.slane %v18209_v8, 4  ;;  %v16393_v52 = vor.u32 %v17900_v62, %v16392_v47  ;;  %v21103_v55 = vld [vmem:[%s19570_s13 + $0x50] sm:$0xff]  ;;  %v15746_v59 = vld [vmem:[%s18935_s22 + $0x1d70] sm:$0xf0]  ;;  %v17575_v8 = vld [vmem:[%s18935_s22 + $0x1854] sm:$0xf0] }
 0x4dd   : > { %v10154_v19 = vpop.f32.mrf.mxu2  ;;  %v10167_v20 = vpop.f32.mrf.mxu3  ;;  %v7468_v25 = vpack.c.b16 %v6172_v2, %v6172_v2  ;;  %v7469_v26 = vpack.c.b16 %v6173_v4, %v6173_v4  ;;  %v11644_v29 = vrot.slane %v18211_v9, 2  ;;  %v17738_v22 = vld [vmem:[%s18935_s22 + $0x1d6c] sm:$0xf0]  ;;  %v17657_v57 = vld [vmem:[%s18935_s22 + $0x1aec] sm:$0xf]  ;;  %v2347_v4 = vperm.slane %v21103_v55, 2 }
 0x4de   : > { %v18213_v32 = vpop.eup %18212  ;;  %v2348_v6 = vperm.slane %v21103_v55, 3  ;;  %v17494_v9 = vld [vmem:[%s18935_s22 + $0x15d4] sm:$0xf]  ;;  %v15089_v20 = vor.u32 %v17575_v8, %v15088_v61  ;;  %v13792_v36 = vld [vmem:[%s18935_s22 + $0xbb0] sm:$0xf] }
 0x4df   : > { %10406 = vmatpush.bf16.msrb.mxu2 %v15073_v21  ;;  %10419 = vmatpush.bf16.msrb.mxu3 %v15077_v23  ;;  %v12482_v21 = vld [vmem:[%s18935_s22 + $0x408] sm:$0xf0]  ;;  %v12488_v23 = vld [vmem:[%s18935_s22 + $0x188] sm:$0xf]  ;;  %v11642_v38 = vrot.slane %v18213_v32, 6  ;;  %v18215_v37 = vpop.eup %18214  ;;  %v11766_v43 = vsel %vm11708_vm10, %v11643_v28, %v11644_v29 }
 0x4e0   : > { %10432 = vmatpush.bf16.msra.mxu0 %v15081_v24  ;;  %10445 = vmatpush.bf16.msra.mxu1 %v15085_v30  ;;  %v16926_v24 = vld [vmem:[%s18935_s22 + $0x40c] sm:$0xf0]  ;;  %v16845_v30 = vld [vmem:[%s18935_s22 + $0x18c] sm:$0xf]  ;;  %v12485_v34 = vor.u32 %v16844_v17, %v12482_v21  ;;  %v15098_v17 = vld [vmem:[%s18935_s22 + $0x1860] sm:$0xf0] }
 0x4e1   : > { %v12489_v35 = vor.u32 %v16926_v24, %v12488_v23  ;;  %v12493_v39 = vor.u32 %v16845_v30, %v12490_v31  ;;  %v11765_v44 = vsel %vm11706_vm11, %v18215_v37, %v11642_v38  ;;  %v14440_v24 = vld [vmem:[%s18935_s22 + $0x10c0] sm:$0xf]  ;;  %v15101_v29 = vor.u32 %v17495_v16, %v15098_v17  ;;  %v14442_v30 = vld [vmem:[%s18935_s22 + $0x1348] sm:$0xf0]  ;;  %v14448_v31 = vld [vmem:[%s18935_s22 + $0x10c8] sm:$0xf] }
 0x4e2   : > { %v11767_v46 = vsel %vm8668_vm3, %v11765_v44, %v11766_v43  ;;  %v17414_v32 = vld [vmem:[%s18935_s22 + $0x134c] sm:$0xf0]  ;;  %v14450_v38 = vld [vmem:[%s18935_s22 + $0x1350] sm:$0xf0]  ;;  %v17251_v37 = vld [vmem:[%s18935_s22 + $0xe34] sm:$0xf0] }
 0x4e3   : > { %10407 = vmatpush.bf16.msrb.mxu2 %v14425_v40  ;;  %10420 = vmatpush.bf16.msrb.mxu3 %v14429_v41  ;;  %v8970_v40 = vsel %vm8668_vm3, %v7468_v25, 0  ;;  %v8973_v41 = vsel %vm8668_vm3, %v7469_v26, 0  ;;  %11889 = vst [vmem:[%s19647_s14 + $0x98] sm:$0xff] %v11767_v46  ;;  %v17413_v25 = vld [vmem:[%s18935_s22 + $0x1344] sm:$0xf0]  ;;  %v14449_v44 = vor.u32 %v17414_v32, %v14448_v31 }
 0x4e4   : > { %10433 = vmatpush.bf16.msra.mxu0 %v14433_v56  ;;  %10446 = vmatpush.bf16.msra.mxu1 %v14437_v45  ;;  %v16384_v56 = vld [vmem:[%s18935_s22 + $0x1ff0] sm:$0xf]  ;;  %v17899_v45 = vld [vmem:[%s18935_s22 + $0x2274] sm:$0xf0]  ;;  %v17332_v26 = vld [vmem:[%s18935_s22 + $0x10c4] sm:$0xf] }
 0x4e5   : > { %v16385_v3 = vor.u32 %v17899_v45, %v16384_v56  ;;  %v13800_v43 = vld [vmem:[%s18935_s22 + $0xbb8] sm:$0xf]  ;;  %v17252_v46 = vld [vmem:[%s18935_s22 + $0xe3c] sm:$0xf0]  ;;  %v13802_v47 = vld [vmem:[%s18935_s22 + $0xe40] sm:$0xf0] }
 0x4e6   : > { %v17009_v61 = vld [vmem:[%s18935_s22 + $0x6ac] sm:$0xf]  ;;  %v16927_v16 = vld [vmem:[%s18935_s22 + $0x414] sm:$0xf0]  ;;  %v16846_v17 = vld [vmem:[%s18935_s22 + $0x194] sm:$0xf] }
 0x4e7   : > { %10408 = vmatpush.bf16.msrb.mxu2 %v13777_v50  ;;  %10421 = vmatpush.bf16.msrb.mxu3 %v13781_v1  ;;  %v16389_v50 = vor.u32 %v17818_v58, %v16386_v60  ;;  %v16397_v1 = vor.u32 %v17819_v0, %v16394_v49  ;;  %v17171_v60 = vld [vmem:[%s18935_s22 + $0xbbc] sm:$0xf]  ;;  %v12506_v31 = vld [vmem:[%s18935_s22 + $0x420] sm:$0xf0] }
 0x4e8   : > { %10434 = vmatpush.bf16.msra.mxu0 %v13785_v53  ;;  %10447 = vmatpush.bf16.msra.mxu1 %v13789_v54  ;;  %v15738_v53 = vld [vmem:[%s18935_s22 + $0x1d68] sm:$0xf0]  ;;  %v15744_v54 = vld [vmem:[%s18935_s22 + $0x1ae8] sm:$0xf]  ;;  %v2195_v0 = vld [vmem:[%s18935_s22 + $0x2518] sm:$0xff] }
 0x4e9   : > { %v15741_v2 = vor.u32 %v17656_v7, %v15738_v53  ;;  %v13805_v53 = vor.u32 %v17171_v60, %v13802_v47  ;;  %v16402_v60 = vld [vmem:[%s18935_s22 + $0x2288] sm:$0xf0]  ;;  %v16408_v47 = vld [vmem:[%s18935_s22 + $0x2008] sm:$0xf] }
 0x4eb   : > { %10409 = vmatpush.bf16.msrb.mxu2 %v13129_v10  ;;  %10422 = vmatpush.bf16.msrb.mxu3 %v13133_v11  ;;  %v15745_v10 = vor.u32 %v17738_v22, %v15744_v54  ;;  %v15749_v11 = vor.u32 %v17657_v57, %v15746_v59  ;;  %v17008_v54 = vld [vmem:[%s18935_s22 + $0x6a4] sm:$0xf]  ;;  %v13146_v22 = vld [vmem:[%s18935_s22 + $0x928] sm:$0xf0]  ;;  %v13152_v57 = vld [vmem:[%s18935_s22 + $0x6a8] sm:$0xf] }
 0x4ec   : > { %10435 = vmatpush.bf16.msra.mxu0 %v13137_v13  ;;  %10448 = vmatpush.bf16.msra.mxu1 %v13141_v14  ;;  %v15090_v13 = vld [vmem:[%s18935_s22 + $0x1858] sm:$0xf0]  ;;  %v15096_v14 = vld [vmem:[%s18935_s22 + $0x15d8] sm:$0xf]  ;;  %v17090_v59 = vld [vmem:[%s18935_s22 + $0x92c] sm:$0xf0] }
 0x4ed   : > { %v15093_v21 = vor.u32 %v17494_v9, %v15090_v13  ;;  %v15097_v23 = vor.u32 %v17576_v15, %v15096_v14  ;;  %v13153_v13 = vor.u32 %v17090_v59, %v13152_v57  ;;  %v12496_v15 = vld [vmem:[%s18935_s22 + $0x190] sm:$0xf]  ;;  %v17659_v57 = vld [vmem:[%s18935_s22 + $0x1afc] sm:$0xf]  ;;  %v15762_v59 = vld [vmem:[%s18935_s22 + $0x1d80] sm:$0xf0] }
 0x4ef   : > { %10410 = vmatpush.bf16.msrb.mxu2 %v12481_v33  ;;  %10423 = vmatpush.bf16.msrb.mxu3 %v12485_v34  ;;  %v17333_v33 = vld [vmem:[%s18935_s22 + $0x10cc] sm:$0xf]  ;;  %v2346_v34 = vperm.slane %v21103_v55, 1 }
 0x4f0   : > { %10436 = vmatpush.bf16.msra.mxu0 %v12489_v35  ;;  %10449 = vmatpush.bf16.msra.mxu1 %v12493_v39  ;;  %v2345_v35 = vperm.slane %v21103_v55, 0  ;;  %v14441_v39 = vor.u32 %v17413_v25, %v14440_v24  ;;  %v14453_v56 = vor.u32 %v17333_v33, %v14450_v38  ;;  %v16928_v24 = vld [vmem:[%s18935_s22 + $0x41c] sm:$0xf0]  ;;  %v12497_v33 = vor.u32 %v16927_v16, %v12496_v15  ;;  %v17578_v15 = vld [vmem:[%s18935_s22 + $0x186c] sm:$0xf0] }
 0x4f1   : > { %v17497_v16 = vld [vmem:[%s18935_s22 + $0x15ec] sm:$0xf] }
 0x4f2   : > { %16726 = vmatmul.msk.bf16.vlgmr.msrb.gmra.mxu2 %vm8664_vm9, %v19267_v12  ;;  %16727 = vmatmul.msk.bf16.vlgmr.msrb.gmra.mxu3 %vm8664_vm9, %v19267_v12  ;;  %v10230_v18 = vpop.f32.mrf.mxu0  ;;  %v10243_v19 = vpop.f32.mrf.mxu1 }
 0x4f3   : > { %10455 = vmatpush.bf16.msra.mxu2 %v8970_v40  ;;  %10468 = vmatpush.bf16.msra.mxu3 %v8973_v41  ;;  %v10231_v27 = vadd.f32 %v10230_v18, %v2347_v4  ;;  %v10244_v28 = vadd.f32 %v10243_v19, %v2348_v6  ;;  %v14445_v40 = vor.u32 %v17332_v26, %v14442_v30  ;;  %v17170_v41 = vld [vmem:[%s18935_s22 + $0xbb4] sm:$0xf]  ;;  %v6178_v6 = vunpack.c.l.b16 %v2195_v0  ;;  %v16847_v30 = vld [vmem:[%s18935_s22 + $0x19c] sm:$0xf] }
 0x4f4   : > { %10481 = vmatpush.bf16.msrb.mxu0 %v8976_v42  ;;  %10494 = vmatpush.bf16.msrb.mxu1 %v8979_v48  ;;  %v13794_v42 = vld [vmem:[%s18935_s22 + $0xe38] sm:$0xf0]  ;;  %v2194_v48 = vld [vmem:[%s18935_s22 + $0x2510] sm:$0xff]  ;;  %v6179_v18 = vunpack.c.h.b16 %v2195_v0  ;;  %v17821_v0 = vld [vmem:[%s18935_s22 + $0x200c] sm:$0xf] }
 0x4f5   : > { %16728 = vmatmul.msk.bf16.vlgmr.msra.gmra.mxu0 %vm8664_vm9, %v19267_v12  ;;  %16729 = vmatmul.msk.bf16.vlgmr.msra.gmra.mxu1 %vm8664_vm9, %v19267_v12  ;;  %18216 = vtanh.f32 %v10231_v27  ;;  %v10204_v45 = vpop.f32.mrf.mxu2  ;;  %v10217_v58 = vpop.f32.mrf.mxu3  ;;  %v6177_v4 = vunpack.c.h.b16 %v2194_v48  ;;  %v7474_v27 = vpack.c.b16 %v6178_v6, %v6178_v6  ;;  %v2352_v6 = vperm.slane %v21103_v55, 7 }
 0x4f6   : > { %18218 = vtanh.f32 %v10244_v28  ;;  %v10218_v62 = vadd.f32 %v10217_v58, %v2346_v34  ;;  %v10205_v49 = vadd.f32 %v10204_v45, %v2345_v35  ;;  %v17901_v45 = vld [vmem:[%s18935_s22 + $0x2284] sm:$0xf0]  ;;  %v17820_v58 = vld [vmem:[%s18935_s22 + $0x2004] sm:$0xf] }
 0x4f7   : > { %10456 = vmatpush.bf16.msra.mxu2 %v16385_v3  ;;  %10469 = vmatpush.bf16.msra.mxu3 %v16389_v50  ;;  %v13793_v3 = vor.u32 %v17251_v37, %v13792_v36  ;;  %v13144_v50 = vld [vmem:[%s18935_s22 + $0x6a0] sm:$0xf]  ;;  %v7473_v26 = vpack.c.b16 %v6177_v4, %v6177_v4  ;;  %v7475_v36 = vpack.c.b16 %v6179_v18, %v6179_v18  ;;  %v2351_v4 = vperm.slane %v21103_v55, 6 }
 0x4f8   : > { %10482 = vmatpush.bf16.msrb.mxu0 %v16393_v52  ;;  %10495 = vmatpush.bf16.msrb.mxu1 %v16397_v1  ;;  %v13797_v52 = vor.u32 %v17170_v41, %v13794_v42  ;;  %v13801_v1 = vor.u32 %v17252_v46, %v13800_v43  ;;  %18220 = vtanh.f32 %v10218_v62  ;;  %v8988_v42 = vsel %vm8668_vm3, %v7474_v27, 0  ;;  %v17902_v62 = vld [vmem:[%s18935_s22 + $0x228c] sm:$0xf0] }
 0x4f9   : > { %18222 = vtanh.f32 %v10205_v49  ;;  %v8985_v41 = vsel %vm8668_vm3, %v7473_v26, 0  ;;  %v16410_v49 = vld [vmem:[%s18935_s22 + $0x2290] sm:$0xf0] }
 0x4fa   : > { %v10232_v51 = vpop.f32.mrf.mxu0  ;;  %v10245_v7 = vpop.f32.mrf.mxu1  ;;  %v17334_v26 = vld [vmem:[%s18935_s22 + $0x10d4] sm:$0xf] }
 0x4fb   : > { %10457 = vmatpush.bf16.msra.mxu2 %v15737_v63  ;;  %10470 = vmatpush.bf16.msra.mxu3 %v15741_v2  ;;  %v13154_v63 = vld [vmem:[%s18935_s22 + $0x930] sm:$0xf0]  ;;  %v6176_v2 = vunpack.c.l.b16 %v2194_v48  ;;  %v18217_v8 = vpop.eup %18216  ;;  %v8991_v48 = vsel %vm8668_vm3, %v7475_v36, 0  ;;  %v17739_v51 = vld [vmem:[%s18935_s22 + $0x1d74] sm:$0xf0]  ;;  %v16409_v7 = vor.u32 %v17902_v62, %v16408_v47  ;;  %v2196_v62 = vld [vmem:[%s18935_s22 + $0x2520] sm:$0xff] }
 0x4fc   : > { %10483 = vmatpush.bf16.msrb.mxu0 %v15745_v10  ;;  %10496 = vmatpush.bf16.msrb.mxu1 %v15749_v11  ;;  %v18219_v9 = vpop.eup %18218  ;;  %v13145_v10 = vor.u32 %v17089_v5, %v13144_v50  ;;  %v13149_v11 = vor.u32 %v17008_v54, %v13146_v22  ;;  %v13157_v14 = vor.u32 %v17009_v61, %v13154_v63  ;;  %v11646_v28 = vrot.slane %v18217_v8, 4  ;;  %v15752_v5 = vld [vmem:[%s18935_s22 + $0x1af0] sm:$0xf]  ;;  %v15760_v54 = vld [vmem:[%s18935_s22 + $0x1af8] sm:$0xf] }
 0x4fd   : > { %v10206_v19 = vpop.f32.mrf.mxu2  ;;  %v7472_v25 = vpack.c.b16 %v6176_v2, %v6176_v2  ;;  %v16405_v50 = vor.u32 %v17820_v58, %v16402_v60  ;;  %v17740_v22 = vld [vmem:[%s18935_s22 + $0x1d7c] sm:$0xf0]  ;;  %v15753_v63 = vor.u32 %v17739_v51, %v15752_v5  ;;  %v17577_v8 = vld [vmem:[%s18935_s22 + $0x1864] sm:$0xf0]  ;;  %v17254_v58 = vld [vmem:[%s18935_s22 + $0xe4c] sm:$0xf0] }
 0x4fe   : > { %v18221_v32 = vpop.eup %18220  ;;  %v15104_v61 = vld [vmem:[%s18935_s22 + $0x15e0] sm:$0xf]  ;;  %v13818_v60 = vld [vmem:[%s18935_s22 + $0xe50] sm:$0xf0] }
 0x4ff   : > { %10458 = vmatpush.bf16.msra.mxu2 %v15089_v20  ;;  %10471 = vmatpush.bf16.msra.mxu3 %v15093_v21  ;;  %v10219_v20 = vpop.f32.mrf.mxu3  ;;  %v12498_v21 = vld [vmem:[%s18935_s22 + $0x418] sm:$0xf0]  ;;  %v11645_v38 = vrot.slane %v18221_v32, 6  ;;  %v18223_v37 = vpop.eup %18222  ;;  %v17416_v32 = vld [vmem:[%s18935_s22 + $0x135c] sm:$0xf0] }
 0x500   : > { %10484 = vmatpush.bf16.msrb.mxu0 %v15097_v23  ;;  %10497 = vmatpush.bf16.msrb.mxu1 %v15101_v29  ;;  %v12504_v23 = vld [vmem:[%s18935_s22 + $0x198] sm:$0xf]  ;;  %v11647_v29 = vrot.slane %v18219_v9, 2  ;;  %v12501_v34 = vor.u32 %v16846_v17, %v12498_v21  ;;  %v17496_v9 = vld [vmem:[%s18935_s22 + $0x15e4] sm:$0xf]  ;;  %v15105_v20 = vor.u32 %v17577_v8, %v15104_v61 }
 0x501   : > { %v12505_v35 = vor.u32 %v16928_v24, %v12504_v23  ;;  %v15114_v17 = vld [vmem:[%s18935_s22 + $0x1870] sm:$0xf0]  ;;  %v14456_v24 = vld [vmem:[%s18935_s22 + $0x10d0] sm:$0xf]  ;;  %v13808_v36 = vld [vmem:[%s18935_s22 + $0xbc0] sm:$0xf] }
 0x502   : > { %v11769_v43 = vsel %vm11708_vm10, %v11646_v28, %v11647_v29  ;;  %v15117_v29 = vor.u32 %v17497_v16, %v15114_v17  ;;  %v13170_v61 = vld [vmem:[%s18935_s22 + $0x940] sm:$0xf0] }
 0x503   : > { %10459 = vmatpush.bf16.msra.mxu2 %v14441_v39  ;;  %10472 = vmatpush.bf16.msra.mxu3 %v14445_v40  ;;  %v12509_v39 = vor.u32 %v16847_v30, %v12506_v31  ;;  %v8982_v40 = vsel %vm8668_vm3, %v7472_v25, 0  ;;  %v17415_v25 = vld [vmem:[%s18935_s22 + $0x1354] sm:$0xf0]  ;;  %v14458_v30 = vld [vmem:[%s18935_s22 + $0x1358] sm:$0xf0] }
 0x504   : > { %10485 = vmatpush.bf16.msrb.mxu0 %v14449_v44  ;;  %10498 = vmatpush.bf16.msrb.mxu1 %v14453_v56  ;;  %v11768_v44 = vsel %vm11706_vm11, %v18223_v37, %v11645_v38  ;;  %v16400_v56 = vld [vmem:[%s18935_s22 + $0x2000] sm:$0xf]  ;;  %v14464_v31 = vld [vmem:[%s18935_s22 + $0x10d8] sm:$0xf]  ;;  %v14466_v38 = vld [vmem:[%s18935_s22 + $0x1360] sm:$0xf0] }
 0x505   : > { %v11770_v46 = vsel %vm8668_vm3, %v11768_v44, %v11769_v43  ;;  %v17253_v37 = vld [vmem:[%s18935_s22 + $0xe44] sm:$0xf0]  ;;  %v16848_v16 = vld [vmem:[%s18935_s22 + $0x1a4] sm:$0xf] }
 0x506   : > { %11890 = vst [vmem:[%s19647_s14 + $0xa0] sm:$0xff] %v11770_v46  ;;  %v13816_v43 = vld [vmem:[%s18935_s22 + $0xbc8] sm:$0xf]  ;;  %v17173_v46 = vld [vmem:[%s18935_s22 + $0xbcc] sm:$0xf] }
 0x507   : > { %10460 = vmatpush.bf16.msra.mxu2 %v13793_v3  ;;  %10473 = vmatpush.bf16.msra.mxu3 %v13797_v52  ;;  %v16401_v3 = vor.u32 %v17901_v45, %v16400_v56  ;;  %v16413_v52 = vor.u32 %v17821_v0, %v16410_v49  ;;  %v13809_v49 = vor.u32 %v17253_v37, %v13808_v36 }
 0x508   : > { %10486 = vmatpush.bf16.msrb.mxu0 %v13801_v1  ;;  %10499 = vmatpush.bf16.msrb.mxu1 %v13805_v53  ;;  %v17658_v1 = vld [vmem:[%s18935_s22 + $0x1af4] sm:$0xf]  ;;  %v15754_v53 = vld [vmem:[%s18935_s22 + $0x1d78] sm:$0xf0] }
 0x509   : > { %v15757_v2 = vor.u32 %v17658_v1, %v15754_v53  ;;  %v13821_v1 = vor.u32 %v17173_v46, %v13818_v60  ;;  %v17010_v53 = vld [vmem:[%s18935_s22 + $0x6b4] sm:$0xf]  ;;  %v16424_v46 = vld [vmem:[%s18935_s22 + $0x2018] sm:$0xf]  ;;  %v17904_v60 = vld [vmem:[%s18935_s22 + $0x229c] sm:$0xf0] }
 0x50b   : > { %10461 = vmatpush.bf16.msra.mxu2 %v13145_v10  ;;  %10474 = vmatpush.bf16.msra.mxu3 %v13149_v11  ;;  %v15761_v10 = vor.u32 %v17740_v22, %v15760_v54  ;;  %v15765_v11 = vor.u32 %v17659_v57, %v15762_v59  ;;  %v13162_v54 = vld [vmem:[%s18935_s22 + $0x938] sm:$0xf0]  ;;  %v13168_v22 = vld [vmem:[%s18935_s22 + $0x6b8] sm:$0xf]  ;;  %v17092_v57 = vld [vmem:[%s18935_s22 + $0x93c] sm:$0xf0] }
 0x50c   : > { %10487 = vmatpush.bf16.msrb.mxu0 %v13153_v13  ;;  %10500 = vmatpush.bf16.msrb.mxu1 %v13157_v14  ;;  %v15106_v13 = vld [vmem:[%s18935_s22 + $0x1868] sm:$0xf0]  ;;  %v15112_v14 = vld [vmem:[%s18935_s22 + $0x15e8] sm:$0xf]  ;;  %v17011_v59 = vld [vmem:[%s18935_s22 + $0x6bc] sm:$0xf] }
 0x50d   : > { %v15109_v21 = vor.u32 %v17496_v9, %v15106_v13  ;;  %v15113_v23 = vor.u32 %v17578_v15, %v15112_v14  ;;  %v13173_v13 = vor.u32 %v17011_v59, %v13170_v61  ;;  %v12512_v14 = vld [vmem:[%s18935_s22 + $0x1a0] sm:$0xf]  ;;  %v16929_v15 = vld [vmem:[%s18935_s22 + $0x424] sm:$0xf0]  ;;  %v15120_v59 = vld [vmem:[%s18935_s22 + $0x15f0] sm:$0xf] }
 0x50f   : > { %10462 = vmatpush.bf16.msra.mxu2 %v12497_v33  ;;  %10475 = vmatpush.bf16.msra.mxu3 %v12501_v34  ;;  %v17335_v33 = vld [vmem:[%s18935_s22 + $0x10dc] sm:$0xf]  ;;  %v2350_v34 = vperm.slane %v21103_v55, 5 }
 0x510   : > { %10488 = vmatpush.bf16.msrb.mxu0 %v12505_v35  ;;  %10501 = vmatpush.bf16.msrb.mxu1 %v12509_v39  ;;  %v2349_v35 = vperm.slane %v21103_v55, 4  ;;  %v14457_v39 = vor.u32 %v17415_v25, %v14456_v24  ;;  %v14465_v55 = vor.u32 %v17416_v32, %v14464_v31  ;;  %v14469_v44 = vor.u32 %v17335_v33, %v14466_v38 }
 0x511   : > { %v12513_v32 = vor.u32 %v16929_v15, %v12512_v14  ;;  %v17580_v14 = vld [vmem:[%s18935_s22 + $0x187c] sm:$0xf0]  ;;  %v17499_v15 = vld [vmem:[%s18935_s22 + $0x15fc] sm:$0xf] }
 0x512   : > { %16730 = vmatmul.msk.bf16.vlgmr.msra.gmra.mxu2 %vm8664_vm9, %v19267_v12  ;;  %16731 = vmatmul.msk.bf16.vlgmr.msra.gmra.mxu3 %vm8664_vm9, %v19267_v12  ;;  %v10282_v18 = vpop.f32.mrf.mxu0  ;;  %v10295_v19 = vpop.f32.mrf.mxu1 }
 0x513   : > { %10507 = vmatpush.bf16.msrb.mxu2 %v8982_v40  ;;  %10520 = vmatpush.bf16.msrb.mxu3 %v8985_v41  ;;  %v10283_v27 = vadd.f32 %v10282_v18, %v2351_v4  ;;  %v10296_v28 = vadd.f32 %v10295_v19, %v2352_v6  ;;  %v14461_v40 = vor.u32 %v17334_v26, %v14458_v30  ;;  %v17172_v41 = vld [vmem:[%s18935_s22 + $0xbc4] sm:$0xf]  ;;  %v12522_v30 = vld [vmem:[%s18935_s22 + $0x430] sm:$0xf0] }
 0x514   : > { %10533 = vmatpush.bf16.msra.mxu0 %v8988_v42  ;;  %10546 = vmatpush.bf16.msra.mxu1 %v8991_v48  ;;  %v13810_v42 = vld [vmem:[%s18935_s22 + $0xe48] sm:$0xf0] }
 0x515   : > { %16732 = vmatmul.msk.bf16.vlgmr.msrb.gmra.mxu0 %vm8664_vm9, %v19267_v12  ;;  %16733 = vmatmul.msk.bf16.vlgmr.msrb.gmra.mxu1 %vm8664_vm9, %v19267_v12  ;;  %18224 = vtanh.f32 %v10283_v27  ;;  %v10256_v56 = vpop.f32.mrf.mxu2  ;;  %v10269_v45 = vpop.f32.mrf.mxu3  ;;  %v2197_v48 = vld [vmem:[%s18935_s22 + $0x2528] sm:$0xff] }
 0x516   : > { %18226 = vtanh.f32 %v10296_v28  ;;  %v10270_v47 = vadd.f32 %v10269_v45, %v2350_v34  ;;  %v10257_v0 = vadd.f32 %v10256_v56, %v2349_v35  ;;  %v6182_v4 = vunpack.c.l.b16 %v2197_v48  ;;  %v17822_v56 = vld [vmem:[%s18935_s22 + $0x2014] sm:$0xf] }
 0x517   : > { %10508 = vmatpush.bf16.msrb.mxu2 %v16401_v3  ;;  %10521 = vmatpush.bf16.msrb.mxu3 %v16405_v50  ;;  %v13160_v3 = vld [vmem:[%s18935_s22 + $0x6b0] sm:$0xf]  ;;  %v17091_v50 = vld [vmem:[%s18935_s22 + $0x934] sm:$0xf0]  ;;  %v6183_v17 = vunpack.c.h.b16 %v2197_v48  ;;  %v16426_v48 = vld [vmem:[%s18935_s22 + $0x22a0] sm:$0xf0] }
 0x518   : > { %10534 = vmatpush.bf16.msra.mxu0 %v16409_v7  ;;  %10547 = vmatpush.bf16.msra.mxu1 %v16413_v52  ;;  %v13813_v7 = vor.u32 %v17172_v41, %v13810_v42  ;;  %v13817_v52 = vor.u32 %v17254_v58, %v13816_v43  ;;  %18228 = vtanh.f32 %v10270_v47  ;;  %v13161_v9 = vor.u32 %v17091_v50, %v13160_v3  ;;  %v16418_v58 = vld [vmem:[%s18935_s22 + $0x2298] sm:$0xf0]  ;;  %v15768_v3 = vld [vmem:[%s18935_s22 + $0x1b00] sm:$0xf]  ;;  %v17741_v50 = vld [vmem:[%s18935_s22 + $0x1d84] sm:$0xf0] }
 0x519   : > { %18230 = vtanh.f32 %v10257_v0  ;;  %v7478_v26 = vpack.c.b16 %v6182_v4, %v6182_v4  ;;  %v7479_v35 = vpack.c.b16 %v6183_v17, %v6183_v17  ;;  %v15769_v61 = vor.u32 %v17741_v50, %v15768_v3  ;;  %v17093_v3 = vld [vmem:[%s18935_s22 + $0x944] sm:$0xf0] }
 0x51a   : > { %v10284_v5 = vpop.f32.mrf.mxu0  ;;  %v10297_v51 = vpop.f32.mrf.mxu1 }
 0x51b   : > { %10509 = vmatpush.bf16.msrb.mxu2 %v15753_v63  ;;  %10522 = vmatpush.bf16.msrb.mxu3 %v15757_v2  ;;  %v6180_v63 = vunpack.c.l.b16 %v2196_v62  ;;  %v6181_v2 = vunpack.c.h.b16 %v2196_v62  ;;  %v18225_v6 = vpop.eup %18224  ;;  %v9000_v41 = vsel %vm8668_vm3, %v7478_v26, 0  ;;  %v9003_v47 = vsel %vm8668_vm3, %v7479_v35, 0  ;;  %v17823_v62 = vld [vmem:[%s18935_s22 + $0x201c] sm:$0xf]  ;;  %v17660_v5 = vld [vmem:[%s18935_s22 + $0x1b04] sm:$0xf] }
 0x51c   : > { %10535 = vmatpush.bf16.msra.mxu0 %v15761_v10  ;;  %10548 = vmatpush.bf16.msra.mxu1 %v15765_v11  ;;  %v18227_v8 = vpop.eup %18226  ;;  %v13165_v10 = vor.u32 %v17010_v53, %v13162_v54  ;;  %v13169_v11 = vor.u32 %v17092_v57, %v13168_v22  ;;  %v11649_v27 = vrot.slane %v18225_v6, 4  ;;  %v16425_v51 = vor.u32 %v17904_v60, %v16424_v46  ;;  %v21262_v53 = vld [vmem:[%s19570_s13 + $0x58] sm:$0xff]  ;;  %v13834_v46 = vld [vmem:[%s18935_s22 + $0xe60] sm:$0xf0] }
 0x51d   : > { %v10258_v18 = vpop.f32.mrf.mxu2  ;;  %v10271_v19 = vpop.f32.mrf.mxu3  ;;  %v7476_v24 = vpack.c.b16 %v6180_v63, %v6180_v63  ;;  %v7477_v25 = vpack.c.b16 %v6181_v2, %v6181_v2  ;;  %v11650_v28 = vrot.slane %v18227_v8, 2  ;;  %v17742_v54 = vld [vmem:[%s18935_s22 + $0x1d8c] sm:$0xf0]  ;;  %v17661_v22 = vld [vmem:[%s18935_s22 + $0x1b0c] sm:$0xf]  ;;  %v2355_v2 = vperm.slane %v21262_v53, 2 }
 0x51e   : > { %v18229_v31 = vpop.eup %18228  ;;  %v15778_v57 = vld [vmem:[%s18935_s22 + $0x1d90] sm:$0xf0]  ;;  %v2356_v4 = vperm.slane %v21262_v53, 3  ;;  %v17579_v6 = vld [vmem:[%s18935_s22 + $0x1874] sm:$0xf0] }
 0x51f   : > { %10510 = vmatpush.bf16.msrb.mxu2 %v15105_v20  ;;  %10523 = vmatpush.bf16.msrb.mxu3 %v15109_v21  ;;  %v12514_v20 = vld [vmem:[%s18935_s22 + $0x428] sm:$0xf0]  ;;  %v12520_v21 = vld [vmem:[%s18935_s22 + $0x1a8] sm:$0xf]  ;;  %v11648_v33 = vrot.slane %v18229_v31, 6  ;;  %v18231_v36 = vpop.eup %18230  ;;  %v11772_v42 = vsel %vm11708_vm10, %v11649_v27, %v11650_v28  ;;  %v15121_v19 = vor.u32 %v17579_v6, %v15120_v59 }
 0x520   : > { %10536 = vmatpush.bf16.msra.mxu0 %v15113_v23  ;;  %10549 = vmatpush.bf16.msra.mxu1 %v15117_v29  ;;  %v16930_v23 = vld [vmem:[%s18935_s22 + $0x42c] sm:$0xf0]  ;;  %v16849_v29 = vld [vmem:[%s18935_s22 + $0x1ac] sm:$0xf]  ;;  %v12517_v38 = vor.u32 %v16848_v16, %v12514_v20  ;;  %v17498_v8 = vld [vmem:[%s18935_s22 + $0x15f4] sm:$0xf] }
 0x521   : > { %v12521_v34 = vor.u32 %v16930_v23, %v12520_v21  ;;  %v12525_v37 = vor.u32 %v16849_v29, %v12522_v30  ;;  %v11771_v43 = vsel %vm11706_vm11, %v18231_v36, %v11648_v33  ;;  %v15130_v16 = vld [vmem:[%s18935_s22 + $0x1880] sm:$0xf0]  ;;  %v14472_v23 = vld [vmem:[%s18935_s22 + $0x10e0] sm:$0xf]  ;;  %v14474_v29 = vld [vmem:[%s18935_s22 + $0x1368] sm:$0xf0] }
 0x522   : > { %v11773_v45 = vsel %vm8668_vm3, %v11771_v43, %v11772_v42  ;;  %v15133_v28 = vor.u32 %v17499_v15, %v15130_v16  ;;  %v14480_v30 = vld [vmem:[%s18935_s22 + $0x10e8] sm:$0xf]  ;;  %v17418_v31 = vld [vmem:[%s18935_s22 + $0x136c] sm:$0xf0]  ;;  %v14482_v33 = vld [vmem:[%s18935_s22 + $0x1370] sm:$0xf0] }
 0x523   : > { %10511 = vmatpush.bf16.msrb.mxu2 %v14457_v39  ;;  %10524 = vmatpush.bf16.msrb.mxu3 %v14461_v40  ;;  %v8994_v39 = vsel %vm8668_vm3, %v7476_v24, 0  ;;  %v8997_v40 = vsel %vm8668_vm3, %v7477_v25, 0  ;;  %11891 = vst [vmem:[%s19647_s14 + $0xa8] sm:$0xff] %v11773_v45  ;;  %v17417_v24 = vld [vmem:[%s18935_s22 + $0x1364] sm:$0xf0]  ;;  %v14481_v43 = vor.u32 %v17418_v31, %v14480_v30 }
 0x524   : > { %10537 = vmatpush.bf16.msra.mxu0 %v14465_v55  ;;  %10550 = vmatpush.bf16.msra.mxu1 %v14469_v44  ;;  %v16416_v55 = vld [vmem:[%s18935_s22 + $0x2010] sm:$0xf]  ;;  %v17903_v44 = vld [vmem:[%s18935_s22 + $0x2294] sm:$0xf0]  ;;  %v17336_v25 = vld [vmem:[%s18935_s22 + $0x10e4] sm:$0xf] }
 0x525   : > { %v16417_v0 = vor.u32 %v17903_v44, %v16416_v55  ;;  %v13824_v35 = vld [vmem:[%s18935_s22 + $0xbd0] sm:$0xf]  ;;  %v17255_v36 = vld [vmem:[%s18935_s22 + $0xe54] sm:$0xf0]  ;;  %v17256_v45 = vld [vmem:[%s18935_s22 + $0xe5c] sm:$0xf0] }
 0x526   : > { %v13832_v42 = vld [vmem:[%s18935_s22 + $0xbd8] sm:$0xf]  ;;  %v17013_v59 = vld [vmem:[%s18935_s22 + $0x6cc] sm:$0xf]  ;;  %v16850_v16 = vld [vmem:[%s18935_s22 + $0x1b4] sm:$0xf] }
 0x527   : > { %10512 = vmatpush.bf16.msrb.mxu2 %v13809_v49  ;;  %10525 = vmatpush.bf16.msrb.mxu3 %v13813_v7  ;;  %v16421_v49 = vor.u32 %v17822_v56, %v16418_v58  ;;  %v16429_v7 = vor.u32 %v17823_v62, %v16426_v48  ;;  %v17175_v58 = vld [vmem:[%s18935_s22 + $0xbdc] sm:$0xf]  ;;  %v16931_v15 = vld [vmem:[%s18935_s22 + $0x434] sm:$0xf0]  ;;  %v12538_v30 = vld [vmem:[%s18935_s22 + $0x440] sm:$0xf0] }
 0x528   : > { %10538 = vmatpush.bf16.msra.mxu0 %v13817_v52  ;;  %10551 = vmatpush.bf16.msra.mxu1 %v13821_v1  ;;  %v15770_v52 = vld [vmem:[%s18935_s22 + $0x1d88] sm:$0xf0]  ;;  %v15776_v1 = vld [vmem:[%s18935_s22 + $0x1b08] sm:$0xf]  ;;  %v2199_v62 = vld [vmem:[%s18935_s22 + $0x2538] sm:$0xff] }
 0x529   : > { %v15773_v63 = vor.u32 %v17660_v5, %v15770_v52  ;;  %v13837_v52 = vor.u32 %v17175_v58, %v13834_v46  ;;  %v16434_v58 = vld [vmem:[%s18935_s22 + $0x22a8] sm:$0xf0]  ;;  %v16440_v46 = vld [vmem:[%s18935_s22 + $0x2028] sm:$0xf] }
 0x52b   : > { %10513 = vmatpush.bf16.msrb.mxu2 %v13161_v9  ;;  %10526 = vmatpush.bf16.msrb.mxu3 %v13165_v10  ;;  %v15777_v9 = vor.u32 %v17742_v54, %v15776_v1  ;;  %v15781_v10 = vor.u32 %v17661_v22, %v15778_v57  ;;  %v17012_v1 = vld [vmem:[%s18935_s22 + $0x6c4] sm:$0xf]  ;;  %v13178_v54 = vld [vmem:[%s18935_s22 + $0x948] sm:$0xf0]  ;;  %v13184_v22 = vld [vmem:[%s18935_s22 + $0x6c8] sm:$0xf] }
 0x52c   : > { %10539 = vmatpush.bf16.msra.mxu0 %v13169_v11  ;;  %10552 = vmatpush.bf16.msra.mxu1 %v13173_v13  ;;  %v15122_v11 = vld [vmem:[%s18935_s22 + $0x1878] sm:$0xf0]  ;;  %v15128_v13 = vld [vmem:[%s18935_s22 + $0x15f8] sm:$0xf]  ;;  %v17094_v57 = vld [vmem:[%s18935_s22 + $0x94c] sm:$0xf0] }
 0x52d   : > { %v15125_v20 = vor.u32 %v17498_v8, %v15122_v11  ;;  %v15129_v21 = vor.u32 %v17580_v14, %v15128_v13  ;;  %v13185_v11 = vor.u32 %v17094_v57, %v13184_v22  ;;  %v12528_v14 = vld [vmem:[%s18935_s22 + $0x1b0] sm:$0xf]  ;;  %v17663_v22 = vld [vmem:[%s18935_s22 + $0x1b1c] sm:$0xf]  ;;  %v15794_v57 = vld [vmem:[%s18935_s22 + $0x1da0] sm:$0xf0] }
 0x52f   : > { %10514 = vmatpush.bf16.msrb.mxu2 %v12513_v32  ;;  %10527 = vmatpush.bf16.msrb.mxu3 %v12517_v38  ;;  %v17337_v32 = vld [vmem:[%s18935_s22 + $0x10ec] sm:$0xf]  ;;  %v2354_v38 = vperm.slane %v21262_v53, 1 }
 0x530   : > { %10540 = vmatpush.bf16.msra.mxu0 %v12521_v34  ;;  %10553 = vmatpush.bf16.msra.mxu1 %v12525_v37  ;;  %v2353_v34 = vperm.slane %v21262_v53, 0  ;;  %v14473_v37 = vor.u32 %v17417_v24, %v14472_v23  ;;  %v14485_v55 = vor.u32 %v17337_v32, %v14482_v33  ;;  %v16932_v23 = vld [vmem:[%s18935_s22 + $0x43c] sm:$0xf0]  ;;  %v12529_v32 = vor.u32 %v16931_v15, %v12528_v14  ;;  %v17582_v14 = vld [vmem:[%s18935_s22 + $0x188c] sm:$0xf0] }
 0x531   : > { %v17501_v15 = vld [vmem:[%s18935_s22 + $0x160c] sm:$0xf] }
 0x532   : > { %16734 = vmatmul.msk.bf16.vlgmr.msrb.gmra.mxu2 %vm8664_vm9, %v19267_v12  ;;  %16735 = vmatmul.msk.bf16.vlgmr.msrb.gmra.mxu3 %vm8664_vm9, %v19267_v12  ;;  %v10334_v17 = vpop.f32.mrf.mxu0  ;;  %v10347_v18 = vpop.f32.mrf.mxu1 }
 0x533   : > { %10559 = vmatpush.bf16.msra.mxu2 %v8994_v39  ;;  %10572 = vmatpush.bf16.msra.mxu3 %v8997_v40  ;;  %v10335_v26 = vadd.f32 %v10334_v17, %v2355_v2  ;;  %v10348_v27 = vadd.f32 %v10347_v18, %v2356_v4  ;;  %v14477_v39 = vor.u32 %v17336_v25, %v14474_v29  ;;  %v17174_v40 = vld [vmem:[%s18935_s22 + $0xbd4] sm:$0xf]  ;;  %v6186_v4 = vunpack.c.l.b16 %v2199_v62  ;;  %v16851_v29 = vld [vmem:[%s18935_s22 + $0x1bc] sm:$0xf] }
 0x534   : > { %10585 = vmatpush.bf16.msrb.mxu0 %v9000_v41  ;;  %10598 = vmatpush.bf16.msrb.mxu1 %v9003_v47  ;;  %v13826_v41 = vld [vmem:[%s18935_s22 + $0xe58] sm:$0xf0]  ;;  %v2198_v47 = vld [vmem:[%s18935_s22 + $0x2530] sm:$0xff]  ;;  %v6187_v17 = vunpack.c.h.b16 %v2199_v62  ;;  %v17825_v62 = vld [vmem:[%s18935_s22 + $0x202c] sm:$0xf] }
 0x535   : > { %16736 = vmatmul.msk.bf16.vlgmr.msra.gmra.mxu0 %vm8664_vm9, %v19267_v12  ;;  %16737 = vmatmul.msk.bf16.vlgmr.msra.gmra.mxu1 %vm8664_vm9, %v19267_v12  ;;  %18232 = vtanh.f32 %v10335_v26  ;;  %v10308_v44 = vpop.f32.mrf.mxu2  ;;  %v10321_v56 = vpop.f32.mrf.mxu3  ;;  %v6185_v2 = vunpack.c.h.b16 %v2198_v47  ;;  %v7482_v26 = vpack.c.b16 %v6186_v4, %v6186_v4  ;;  %v2360_v4 = vperm.slane %v21262_v53, 7 }
 0x536   : > { %18234 = vtanh.f32 %v10348_v27  ;;  %v10322_v60 = vadd.f32 %v10321_v56, %v2354_v38  ;;  %v10309_v48 = vadd.f32 %v10308_v44, %v2353_v34  ;;  %v17905_v44 = vld [vmem:[%s18935_s22 + $0x22a4] sm:$0xf0]  ;;  %v17824_v56 = vld [vmem:[%s18935_s22 + $0x2024] sm:$0xf] }
 0x537   : > { %10560 = vmatpush.bf16.msra.mxu2 %v16417_v0  ;;  %10573 = vmatpush.bf16.msra.mxu3 %v16421_v49  ;;  %v13825_v0 = vor.u32 %v17255_v36, %v13824_v35  ;;  %v13176_v49 = vld [vmem:[%s18935_s22 + $0x6c0] sm:$0xf]  ;;  %v7481_v25 = vpack.c.b16 %v6185_v2, %v6185_v2  ;;  %v7483_v35 = vpack.c.b16 %v6187_v17, %v6187_v17  ;;  %v2359_v2 = vperm.slane %v21262_v53, 6 }
 0x538   : > { %10586 = vmatpush.bf16.msrb.mxu0 %v16425_v51  ;;  %10599 = vmatpush.bf16.msrb.mxu1 %v16429_v7  ;;  %v13829_v51 = vor.u32 %v17174_v40, %v13826_v41  ;;  %v13833_v7 = vor.u32 %v17256_v45, %v13832_v42  ;;  %18236 = vtanh.f32 %v10322_v60  ;;  %v9012_v41 = vsel %vm8668_vm3, %v7482_v26, 0  ;;  %v17906_v60 = vld [vmem:[%s18935_s22 + $0x22ac] sm:$0xf0] }
 0x539   : > { %18238 = vtanh.f32 %v10309_v48  ;;  %v9009_v40 = vsel %vm8668_vm3, %v7481_v25, 0  ;;  %v16442_v48 = vld [vmem:[%s18935_s22 + $0x22b0] sm:$0xf0] }
 0x53a   : > { %v10336_v50 = vpop.f32.mrf.mxu0  ;;  %v10349_v5 = vpop.f32.mrf.mxu1  ;;  %v17338_v25 = vld [vmem:[%s18935_s22 + $0x10f4] sm:$0xf] }
 0x53b   : > { %10561 = vmatpush.bf16.msra.mxu2 %v15769_v61  ;;  %10574 = vmatpush.bf16.msra.mxu3 %v15773_v63  ;;  %v13186_v61 = vld [vmem:[%s18935_s22 + $0x950] sm:$0xf0]  ;;  %v6184_v63 = vunpack.c.l.b16 %v2198_v47  ;;  %v18233_v6 = vpop.eup %18232  ;;  %v9015_v47 = vsel %vm8668_vm3, %v7483_v35, 0  ;;  %v17743_v50 = vld [vmem:[%s18935_s22 + $0x1d94] sm:$0xf0]  ;;  %v16441_v5 = vor.u32 %v17906_v60, %v16440_v46  ;;  %v2200_v60 = vld [vmem:[%s18935_s22 + $0x2540] sm:$0xff] }
 0x53c   : > { %10587 = vmatpush.bf16.msrb.mxu0 %v15777_v9  ;;  %10600 = vmatpush.bf16.msrb.mxu1 %v15781_v10  ;;  %v18235_v8 = vpop.eup %18234  ;;  %v13177_v9 = vor.u32 %v17093_v3, %v13176_v49  ;;  %v13181_v10 = vor.u32 %v17012_v1, %v13178_v54  ;;  %v13189_v13 = vor.u32 %v17013_v59, %v13186_v61  ;;  %v11652_v27 = vrot.slane %v18233_v6, 4  ;;  %v15784_v3 = vld [vmem:[%s18935_s22 + $0x1b10] sm:$0xf]  ;;  %v15792_v1 = vld [vmem:[%s18935_s22 + $0x1b18] sm:$0xf] }
 0x53d   : > { %v10310_v18 = vpop.f32.mrf.mxu2  ;;  %v7480_v24 = vpack.c.b16 %v6184_v63, %v6184_v63  ;;  %v16437_v49 = vor.u32 %v17824_v56, %v16434_v58  ;;  %v17744_v54 = vld [vmem:[%s18935_s22 + $0x1d9c] sm:$0xf0]  ;;  %v15785_v61 = vor.u32 %v17743_v50, %v15784_v3  ;;  %v17581_v6 = vld [vmem:[%s18935_s22 + $0x1884] sm:$0xf0]  ;;  %v17258_v56 = vld [vmem:[%s18935_s22 + $0xe6c] sm:$0xf0] }
 0x53e   : > { %v18237_v31 = vpop.eup %18236  ;;  %v15136_v59 = vld [vmem:[%s18935_s22 + $0x1600] sm:$0xf]  ;;  %v13850_v58 = vld [vmem:[%s18935_s22 + $0xe70] sm:$0xf0] }
 0x53f   : > { %10562 = vmatpush.bf16.msra.mxu2 %v15121_v19  ;;  %10575 = vmatpush.bf16.msra.mxu3 %v15125_v20  ;;  %v10323_v19 = vpop.f32.mrf.mxu3  ;;  %v12530_v20 = vld [vmem:[%s18935_s22 + $0x438] sm:$0xf0]  ;;  %v11651_v33 = vrot.slane %v18237_v31, 6  ;;  %v18239_v36 = vpop.eup %18238  ;;  %v17420_v31 = vld [vmem:[%s18935_s22 + $0x137c] sm:$0xf0] }
 0x540   : > { %10588 = vmatpush.bf16.msrb.mxu0 %v15129_v21  ;;  %10601 = vmatpush.bf16.msrb.mxu1 %v15133_v28  ;;  %v12536_v21 = vld [vmem:[%s18935_s22 + $0x1b8] sm:$0xf]  ;;  %v11653_v28 = vrot.slane %v18235_v8, 2  ;;  %v12533_v38 = vor.u32 %v16850_v16, %v12530_v20  ;;  %v17500_v8 = vld [vmem:[%s18935_s22 + $0x1604] sm:$0xf]  ;;  %v15137_v19 = vor.u32 %v17581_v6, %v15136_v59 }
 0x541   : > { %v12537_v34 = vor.u32 %v16932_v23, %v12536_v21  ;;  %v15146_v16 = vld [vmem:[%s18935_s22 + $0x1890] sm:$0xf0]  ;;  %v14488_v23 = vld [vmem:[%s18935_s22 + $0x10f0] sm:$0xf]  ;;  %v13840_v35 = vld [vmem:[%s18935_s22 + $0xbe0] sm:$0xf] }
 0x542   : > { %v11775_v42 = vsel %vm11708_vm10, %v11652_v27, %v11653_v28  ;;  %v15149_v28 = vor.u32 %v17501_v15, %v15146_v16  ;;  %v13202_v59 = vld [vmem:[%s18935_s22 + $0x960] sm:$0xf0] }
 0x543   : > { %10563 = vmatpush.bf16.msra.mxu2 %v14473_v37  ;;  %10576 = vmatpush.bf16.msra.mxu3 %v14477_v39  ;;  %v12541_v37 = vor.u32 %v16851_v29, %v12538_v30  ;;  %v9006_v39 = vsel %vm8668_vm3, %v7480_v24, 0  ;;  %v17419_v24 = vld [vmem:[%s18935_s22 + $0x1374] sm:$0xf0]  ;;  %v14490_v29 = vld [vmem:[%s18935_s22 + $0x1378] sm:$0xf0] }
 0x544   : > { %10589 = vmatpush.bf16.msrb.mxu0 %v14481_v43  ;;  %10602 = vmatpush.bf16.msrb.mxu1 %v14485_v55  ;;  %v11774_v43 = vsel %vm11706_vm11, %v18239_v36, %v11651_v33  ;;  %v16432_v55 = vld [vmem:[%s18935_s22 + $0x2020] sm:$0xf]  ;;  %v14496_v30 = vld [vmem:[%s18935_s22 + $0x10f8] sm:$0xf]  ;;  %v14498_v33 = vld [vmem:[%s18935_s22 + $0x1380] sm:$0xf0] }
 0x545   : > { %v11776_v45 = vsel %vm8668_vm3, %v11774_v43, %v11775_v42  ;;  %v17257_v36 = vld [vmem:[%s18935_s22 + $0xe64] sm:$0xf0]  ;;  %v16852_v15 = vld [vmem:[%s18935_s22 + $0x1c4] sm:$0xf] }
 0x546   : > { %11892 = vst [vmem:[%s19647_s14 + $0xb0] sm:$0xff] %v11776_v45  ;;  %v13848_v42 = vld [vmem:[%s18935_s22 + $0xbe8] sm:$0xf]  ;;  %v17177_v45 = vld [vmem:[%s18935_s22 + $0xbec] sm:$0xf] }
 0x547   : > { %10564 = vmatpush.bf16.msra.mxu2 %v13825_v0  ;;  %10577 = vmatpush.bf16.msra.mxu3 %v13829_v51  ;;  %v16433_v0 = vor.u32 %v17905_v44, %v16432_v55  ;;  %v16445_v51 = vor.u32 %v17825_v62, %v16442_v48  ;;  %v13841_v48 = vor.u32 %v17257_v36, %v13840_v35 }
 0x548   : > { %10590 = vmatpush.bf16.msrb.mxu0 %v13833_v7  ;;  %10603 = vmatpush.bf16.msrb.mxu1 %v13837_v52  ;;  %v17662_v7 = vld [vmem:[%s18935_s22 + $0x1b14] sm:$0xf]  ;;  %v15786_v52 = vld [vmem:[%s18935_s22 + $0x1d98] sm:$0xf0] }
 0x549   : > { %v15789_v63 = vor.u32 %v17662_v7, %v15786_v52  ;;  %v13853_v7 = vor.u32 %v17177_v45, %v13850_v58  ;;  %v17014_v52 = vld [vmem:[%s18935_s22 + $0x6d4] sm:$0xf]  ;;  %v16456_v45 = vld [vmem:[%s18935_s22 + $0x2038] sm:$0xf]  ;;  %v17908_v58 = vld [vmem:[%s18935_s22 + $0x22bc] sm:$0xf0] }
 0x54b   : > { %10565 = vmatpush.bf16.msra.mxu2 %v13177_v9  ;;  %10578 = vmatpush.bf16.msra.mxu3 %v13181_v10  ;;  %v15793_v9 = vor.u32 %v17744_v54, %v15792_v1  ;;  %v15797_v10 = vor.u32 %v17663_v22, %v15794_v57  ;;  %v13194_v1 = vld [vmem:[%s18935_s22 + $0x958] sm:$0xf0]  ;;  %v13200_v54 = vld [vmem:[%s18935_s22 + $0x6d8] sm:$0xf]  ;;  %v17096_v22 = vld [vmem:[%s18935_s22 + $0x95c] sm:$0xf0] }
 0x54c   : > { %10591 = vmatpush.bf16.msrb.mxu0 %v13185_v11  ;;  %10604 = vmatpush.bf16.msrb.mxu1 %v13189_v13  ;;  %v15138_v11 = vld [vmem:[%s18935_s22 + $0x1888] sm:$0xf0]  ;;  %v15144_v13 = vld [vmem:[%s18935_s22 + $0x1608] sm:$0xf]  ;;  %v17015_v57 = vld [vmem:[%s18935_s22 + $0x6dc] sm:$0xf] }
 0x54d   : > { %v15141_v20 = vor.u32 %v17500_v8, %v15138_v11  ;;  %v15145_v21 = vor.u32 %v17582_v14, %v15144_v13  ;;  %v13205_v11 = vor.u32 %v17015_v57, %v13202_v59  ;;  %v12544_v13 = vld [vmem:[%s18935_s22 + $0x1c0] sm:$0xf]  ;;  %v16933_v14 = vld [vmem:[%s18935_s22 + $0x444] sm:$0xf0]  ;;  %v15152_v57 = vld [vmem:[%s18935_s22 + $0x1610] sm:$0xf] }
 0x54f   : > { %10566 = vmatpush.bf16.msra.mxu2 %v12529_v32  ;;  %10579 = vmatpush.bf16.msra.mxu3 %v12533_v38  ;;  %v17339_v32 = vld [vmem:[%s18935_s22 + $0x10fc] sm:$0xf]  ;;  %v2358_v38 = vperm.slane %v21262_v53, 5 }
 0x550   : > { %10592 = vmatpush.bf16.msrb.mxu0 %v12537_v34  ;;  %10605 = vmatpush.bf16.msrb.mxu1 %v12541_v37  ;;  %v2357_v34 = vperm.slane %v21262_v53, 4  ;;  %v14489_v37 = vor.u32 %v17419_v24, %v14488_v23  ;;  %v14497_v53 = vor.u32 %v17420_v31, %v14496_v30  ;;  %v14501_v43 = vor.u32 %v17339_v32, %v14498_v33 }
 0x551   : > { %v12545_v31 = vor.u32 %v16933_v14, %v12544_v13  ;;  %v17584_v13 = vld [vmem:[%s18935_s22 + $0x189c] sm:$0xf0]  ;;  %v17503_v14 = vld [vmem:[%s18935_s22 + $0x161c] sm:$0xf] }
 0x552   : > { %16738 = vmatmul.msk.bf16.vlgmr.msra.gmra.mxu2 %vm8664_vm9, %v19267_v12  ;;  %16739 = vmatmul.msk.bf16.vlgmr.msra.gmra.mxu3 %vm8664_vm9, %v19267_v12  ;;  %v10386_v17 = vpop.f32.mrf.mxu0  ;;  %v10399_v18 = vpop.f32.mrf.mxu1 }
 0x553   : > { %10611 = vmatpush.bf16.msrb.mxu2 %v9006_v39  ;;  %10624 = vmatpush.bf16.msrb.mxu3 %v9009_v40  ;;  %v10387_v26 = vadd.f32 %v10386_v17, %v2359_v2  ;;  %v10400_v27 = vadd.f32 %v10399_v18, %v2360_v4  ;;  %v14493_v39 = vor.u32 %v17338_v25, %v14490_v29  ;;  %v17176_v40 = vld [vmem:[%s18935_s22 + $0xbe4] sm:$0xf]  ;;  %v12554_v29 = vld [vmem:[%s18935_s22 + $0x450] sm:$0xf0] }
 0x554   : > { %10637 = vmatpush.bf16.msra.mxu0 %v9012_v41  ;;  %10650 = vmatpush.bf16.msra.mxu1 %v9015_v47  ;;  %v13842_v41 = vld [vmem:[%s18935_s22 + $0xe68] sm:$0xf0] }
 0x555   : > { %16740 = vmatmul.msk.bf16.vlgmr.msrb.gmra.mxu0 %vm8664_vm9, %v19267_v12  ;;  %16741 = vmatmul.msk.bf16.vlgmr.msrb.gmra.mxu1 %vm8664_vm9, %v19267_v12  ;;  %18240 = vtanh.f32 %v10387_v26  ;;  %v10360_v55 = vpop.f32.mrf.mxu2  ;;  %v10373_v44 = vpop.f32.mrf.mxu3  ;;  %v2201_v47 = vld [vmem:[%s18935_s22 + $0x2548] sm:$0xff] }
 0x556   : > { %18242 = vtanh.f32 %v10400_v27  ;;  %v10374_v46 = vadd.f32 %v10373_v44, %v2358_v38  ;;  %v10361_v62 = vadd.f32 %v10360_v55, %v2357_v34  ;;  %v6190_v2 = vunpack.c.l.b16 %v2201_v47  ;;  %v17826_v55 = vld [vmem:[%s18935_s22 + $0x2034] sm:$0xf] }
 0x557   : > { %10612 = vmatpush.bf16.msrb.mxu2 %v16433_v0  ;;  %10625 = vmatpush.bf16.msrb.mxu3 %v16437_v49  ;;  %v13192_v0 = vld [vmem:[%s18935_s22 + $0x6d0] sm:$0xf]  ;;  %v17095_v49 = vld [vmem:[%s18935_s22 + $0x954] sm:$0xf0]  ;;  %v6191_v16 = vunpack.c.h.b16 %v2201_v47  ;;  %v16458_v47 = vld [vmem:[%s18935_s22 + $0x22c0] sm:$0xf0] }
 0x558   : > { %10638 = vmatpush.bf16.msra.mxu0 %v16441_v5  ;;  %10651 = vmatpush.bf16.msra.mxu1 %v16445_v51  ;;  %v13845_v5 = vor.u32 %v17176_v40, %v13842_v41  ;;  %v13849_v51 = vor.u32 %v17258_v56, %v13848_v42  ;;  %18244 = vtanh.f32 %v10374_v46  ;;  %v13193_v8 = vor.u32 %v17095_v49, %v13192_v0  ;;  %v16450_v56 = vld [vmem:[%s18935_s22 + $0x22b8] sm:$0xf0]  ;;  %v15800_v0 = vld [vmem:[%s18935_s22 + $0x1b20] sm:$0xf]  ;;  %v17745_v49 = vld [vmem:[%s18935_s22 + $0x1da4] sm:$0xf0] }
 0x559   : > { %18246 = vtanh.f32 %v10361_v62  ;;  %v7486_v25 = vpack.c.b16 %v6190_v2, %v6190_v2  ;;  %v7487_v34 = vpack.c.b16 %v6191_v16, %v6191_v16  ;;  %v15801_v59 = vor.u32 %v17745_v49, %v15800_v0  ;;  %v17097_v0 = vld [vmem:[%s18935_s22 + $0x964] sm:$0xf0] }
 0x55a   : > { %v10388_v3 = vpop.f32.mrf.mxu0  ;;  %v10401_v50 = vpop.f32.mrf.mxu1 }
 0x55b   : > { %10613 = vmatpush.bf16.msrb.mxu2 %v15785_v61  ;;  %10626 = vmatpush.bf16.msrb.mxu3 %v15789_v63  ;;  %v6188_v61 = vunpack.c.l.b16 %v2200_v60  ;;  %v6189_v63 = vunpack.c.h.b16 %v2200_v60  ;;  %v18241_v4 = vpop.eup %18240  ;;  %v9024_v40 = vsel %vm8668_vm3, %v7486_v25, 0  ;;  %v9027_v46 = vsel %vm8668_vm3, %v7487_v34, 0  ;;  %v17827_v60 = vld [vmem:[%s18935_s22 + $0x203c] sm:$0xf]  ;;  %v17664_v3 = vld [vmem:[%s18935_s22 + $0x1b24] sm:$0xf] }
 0x55c   : > { %10639 = vmatpush.bf16.msra.mxu0 %v15793_v9  ;;  %10652 = vmatpush.bf16.msra.mxu1 %v15797_v10  ;;  %v18243_v6 = vpop.eup %18242  ;;  %v13197_v9 = vor.u32 %v17014_v52, %v13194_v1  ;;  %v13201_v10 = vor.u32 %v17096_v22, %v13200_v54  ;;  %v11655_v26 = vrot.slane %v18241_v4, 4  ;;  %v16457_v50 = vor.u32 %v17908_v58, %v16456_v45  ;;  %v21421_v52 = vld [vmem:[%s19570_s13 + $0x60] sm:$0xff]  ;;  %v17665_v54 = vld [vmem:[%s18935_s22 + $0x1b2c] sm:$0xf]  ;;  %v13866_v45 = vld [vmem:[%s18935_s22 + $0xe80] sm:$0xf0] }
 0x55d   : > { %v10362_v17 = vpop.f32.mrf.mxu2  ;;  %v10375_v18 = vpop.f32.mrf.mxu3  ;;  %v7484_v23 = vpack.c.b16 %v6188_v61, %v6188_v61  ;;  %v7485_v24 = vpack.c.b16 %v6189_v63, %v6189_v63  ;;  %v11656_v27 = vrot.slane %v18243_v6, 2  ;;  %v17746_v1 = vld [vmem:[%s18935_s22 + $0x1dac] sm:$0xf0]  ;;  %v15810_v22 = vld [vmem:[%s18935_s22 + $0x1db0] sm:$0xf0]  ;;  %v2363_v63 = vperm.slane %v21421_v52, 2 }
 0x55e   : > { %v18245_v30 = vpop.eup %18244  ;;  %v2364_v2 = vperm.slane %v21421_v52, 3  ;;  %v17583_v4 = vld [vmem:[%s18935_s22 + $0x1894] sm:$0xf0]  ;;  %v17502_v6 = vld [vmem:[%s18935_s22 + $0x1614] sm:$0xf] }
 0x55f   : > { %10614 = vmatpush.bf16.msrb.mxu2 %v15137_v19  ;;  %10627 = vmatpush.bf16.msrb.mxu3 %v15141_v20  ;;  %v12546_v19 = vld [vmem:[%s18935_s22 + $0x448] sm:$0xf0]  ;;  %v12552_v20 = vld [vmem:[%s18935_s22 + $0x1c8] sm:$0xf]  ;;  %v11654_v32 = vrot.slane %v18245_v30, 6  ;;  %v18247_v35 = vpop.eup %18246  ;;  %v11778_v41 = vsel %vm11708_vm10, %v11655_v26, %v11656_v27  ;;  %v15153_v18 = vor.u32 %v17583_v4, %v15152_v57 }
 0x560   : > { %10640 = vmatpush.bf16.msra.mxu0 %v15145_v21  ;;  %10653 = vmatpush.bf16.msra.mxu1 %v15149_v28  ;;  %v16934_v21 = vld [vmem:[%s18935_s22 + $0x44c] sm:$0xf0]  ;;  %v16853_v28 = vld [vmem:[%s18935_s22 + $0x1cc] sm:$0xf]  ;;  %v12549_v33 = vor.u32 %v16852_v15, %v12546_v19  ;;  %v15162_v15 = vld [vmem:[%s18935_s22 + $0x18a0] sm:$0xf0] }
 0x561   : > { %v12553_v38 = vor.u32 %v16934_v21, %v12552_v20  ;;  %v12557_v36 = vor.u32 %v16853_v28, %v12554_v29  ;;  %v11777_v42 = vsel %vm11706_vm11, %v18247_v35, %v11654_v32  ;;  %v14504_v21 = vld [vmem:[%s18935_s22 + $0x1100] sm:$0xf]  ;;  %v15165_v27 = vor.u32 %v17503_v14, %v15162_v15  ;;  %v14506_v28 = vld [vmem:[%s18935_s22 + $0x1388] sm:$0xf0]  ;;  %v14512_v29 = vld [vmem:[%s18935_s22 + $0x1108] sm:$0xf] }
 0x562   : > { %v11779_v44 = vsel %vm8668_vm3, %v11777_v42, %v11778_v41  ;;  %v17422_v30 = vld [vmem:[%s18935_s22 + $0x138c] sm:$0xf0]  ;;  %v14514_v32 = vld [vmem:[%s18935_s22 + $0x1390] sm:$0xf0]  ;;  %v17259_v35 = vld [vmem:[%s18935_s22 + $0xe74] sm:$0xf0] }
 0x563   : > { %10615 = vmatpush.bf16.msrb.mxu2 %v14489_v37  ;;  %10628 = vmatpush.bf16.msrb.mxu3 %v14493_v39  ;;  %v9018_v37 = vsel %vm8668_vm3, %v7484_v23, 0  ;;  %v9021_v39 = vsel %vm8668_vm3, %v7485_v24, 0  ;;  %11893 = vst [vmem:[%s19647_s14 + $0xb8] sm:$0xff] %v11779_v44  ;;  %v17421_v23 = vld [vmem:[%s18935_s22 + $0x1384] sm:$0xf0]  ;;  %v14513_v42 = vor.u32 %v17422_v30, %v14512_v29 }
 0x564   : > { %10641 = vmatpush.bf16.msra.mxu0 %v14497_v53  ;;  %10654 = vmatpush.bf16.msra.mxu1 %v14501_v43  ;;  %v16448_v53 = vld [vmem:[%s18935_s22 + $0x2030] sm:$0xf]  ;;  %v17907_v43 = vld [vmem:[%s18935_s22 + $0x22b4] sm:$0xf0]  ;;  %v17340_v24 = vld [vmem:[%s18935_s22 + $0x1104] sm:$0xf] }
 0x565   : > { %v16449_v62 = vor.u32 %v17907_v43, %v16448_v53  ;;  %v13856_v34 = vld [vmem:[%s18935_s22 + $0xbf0] sm:$0xf]  ;;  %v13864_v41 = vld [vmem:[%s18935_s22 + $0xbf8] sm:$0xf]  ;;  %v17260_v44 = vld [vmem:[%s18935_s22 + $0xe7c] sm:$0xf0] }
 0x566   : > { %v17017_v57 = vld [vmem:[%s18935_s22 + $0x6ec] sm:$0xf]  ;;  %v16935_v14 = vld [vmem:[%s18935_s22 + $0x454] sm:$0xf0]  ;;  %v16854_v15 = vld [vmem:[%s18935_s22 + $0x1d4] sm:$0xf] }
 0x567   : > { %10616 = vmatpush.bf16.msrb.mxu2 %v13841_v48  ;;  %10629 = vmatpush.bf16.msrb.mxu3 %v13845_v5  ;;  %v16453_v48 = vor.u32 %v17826_v55, %v16450_v56  ;;  %v16461_v5 = vor.u32 %v17827_v60, %v16458_v47  ;;  %v17179_v56 = vld [vmem:[%s18935_s22 + $0xbfc] sm:$0xf]  ;;  %v12570_v29 = vld [vmem:[%s18935_s22 + $0x460] sm:$0xf0] }
 0x568   : > { %10642 = vmatpush.bf16.msra.mxu0 %v13849_v51  ;;  %10655 = vmatpush.bf16.msra.mxu1 %v13853_v7  ;;  %v15802_v51 = vld [vmem:[%s18935_s22 + $0x1da8] sm:$0xf0]  ;;  %v15808_v7 = vld [vmem:[%s18935_s22 + $0x1b28] sm:$0xf]  ;;  %v2203_v60 = vld [vmem:[%s18935_s22 + $0x2558] sm:$0xff] }
 0x569   : > { %v15805_v61 = vor.u32 %v17664_v3, %v15802_v51  ;;  %v13869_v51 = vor.u32 %v17179_v56, %v13866_v45  ;;  %v16466_v56 = vld [vmem:[%s18935_s22 + $0x22c8] sm:$0xf0]  ;;  %v16472_v45 = vld [vmem:[%s18935_s22 + $0x2048] sm:$0xf] }
 0x56b   : > { %10617 = vmatpush.bf16.msrb.mxu2 %v13193_v8  ;;  %10630 = vmatpush.bf16.msrb.mxu3 %v13197_v9  ;;  %v15809_v8 = vor.u32 %v17746_v1, %v15808_v7  ;;  %v15813_v9 = vor.u32 %v17665_v54, %v15810_v22  ;;  %v17016_v7 = vld [vmem:[%s18935_s22 + $0x6e4] sm:$0xf]  ;;  %v13210_v1 = vld [vmem:[%s18935_s22 + $0x968] sm:$0xf0]  ;;  %v13216_v54 = vld [vmem:[%s18935_s22 + $0x6e8] sm:$0xf] }
 0x56c   : > { %10643 = vmatpush.bf16.msra.mxu0 %v13201_v10  ;;  %10656 = vmatpush.bf16.msra.mxu1 %v13205_v11  ;;  %v15154_v10 = vld [vmem:[%s18935_s22 + $0x1898] sm:$0xf0]  ;;  %v15160_v11 = vld [vmem:[%s18935_s22 + $0x1618] sm:$0xf]  ;;  %v17098_v22 = vld [vmem:[%s18935_s22 + $0x96c] sm:$0xf0] }
 0x56d   : > { %v15157_v19 = vor.u32 %v17502_v6, %v15154_v10  ;;  %v15161_v20 = vor.u32 %v17584_v13, %v15160_v11  ;;  %v13217_v10 = vor.u32 %v17098_v22, %v13216_v54  ;;  %v12560_v13 = vld [vmem:[%s18935_s22 + $0x1d0] sm:$0xf]  ;;  %v17667_v54 = vld [vmem:[%s18935_s22 + $0x1b3c] sm:$0xf]  ;;  %v15826_v22 = vld [vmem:[%s18935_s22 + $0x1dc0] sm:$0xf0] }
 0x56f   : > { %10618 = vmatpush.bf16.msrb.mxu2 %v12545_v31  ;;  %10631 = vmatpush.bf16.msrb.mxu3 %v12549_v33  ;;  %v17341_v31 = vld [vmem:[%s18935_s22 + $0x110c] sm:$0xf]  ;;  %v2362_v33 = vperm.slane %v21421_v52, 1 }
 0x570   : > { %10644 = vmatpush.bf16.msra.mxu0 %v12553_v38  ;;  %10657 = vmatpush.bf16.msra.mxu1 %v12557_v36  ;;  %v2361_v38 = vperm.slane %v21421_v52, 0  ;;  %v14505_v36 = vor.u32 %v17421_v23, %v14504_v21  ;;  %v14517_v53 = vor.u32 %v17341_v31, %v14514_v32  ;;  %v16936_v21 = vld [vmem:[%s18935_s22 + $0x45c] sm:$0xf0]  ;;  %v12561_v31 = vor.u32 %v16935_v14, %v12560_v13  ;;  %v17586_v13 = vld [vmem:[%s18935_s22 + $0x18ac] sm:$0xf0] }
 0x571   : > { %v17505_v14 = vld [vmem:[%s18935_s22 + $0x162c] sm:$0xf] }
 0x572   : > { %16742 = vmatmul.msk.bf16.vlgmr.msrb.gmra.mxu2 %vm8664_vm9, %v19267_v12  ;;  %16743 = vmatmul.msk.bf16.vlgmr.msrb.gmra.mxu3 %vm8664_vm9, %v19267_v12  ;;  %v10438_v16 = vpop.f32.mrf.mxu0  ;;  %v10451_v17 = vpop.f32.mrf.mxu1 }
 0x573   : > { %10663 = vmatpush.bf16.msra.mxu2 %v9018_v37  ;;  %10676 = vmatpush.bf16.msra.mxu3 %v9021_v39  ;;  %v10439_v25 = vadd.f32 %v10438_v16, %v2363_v63  ;;  %v10452_v26 = vadd.f32 %v10451_v17, %v2364_v2  ;;  %v14509_v37 = vor.u32 %v17340_v24, %v14506_v28  ;;  %v17178_v39 = vld [vmem:[%s18935_s22 + $0xbf4] sm:$0xf]  ;;  %v6194_v2 = vunpack.c.l.b16 %v2203_v60  ;;  %v16855_v28 = vld [vmem:[%s18935_s22 + $0x1dc] sm:$0xf] }
 0x574   : > { %10689 = vmatpush.bf16.msrb.mxu0 %v9024_v40  ;;  %10702 = vmatpush.bf16.msrb.mxu1 %v9027_v46  ;;  %v13858_v40 = vld [vmem:[%s18935_s22 + $0xe78] sm:$0xf0]  ;;  %v2202_v46 = vld [vmem:[%s18935_s22 + $0x2550] sm:$0xff]  ;;  %v6195_v16 = vunpack.c.h.b16 %v2203_v60  ;;  %v17829_v60 = vld [vmem:[%s18935_s22 + $0x204c] sm:$0xf] }
 0x575   : > { %16744 = vmatmul.msk.bf16.vlgmr.msra.gmra.mxu0 %vm8664_vm9, %v19267_v12  ;;  %16745 = vmatmul.msk.bf16.vlgmr.msra.gmra.mxu1 %vm8664_vm9, %v19267_v12  ;;  %18248 = vtanh.f32 %v10439_v25  ;;  %v10412_v43 = vpop.f32.mrf.mxu2  ;;  %v10425_v55 = vpop.f32.mrf.mxu3  ;;  %v6193_v63 = vunpack.c.h.b16 %v2202_v46  ;;  %v7490_v25 = vpack.c.b16 %v6194_v2, %v6194_v2  ;;  %v2368_v2 = vperm.slane %v21421_v52, 7 }
 0x576   : > { %18250 = vtanh.f32 %v10452_v26  ;;  %v10426_v58 = vadd.f32 %v10425_v55, %v2362_v33  ;;  %v10413_v47 = vadd.f32 %v10412_v43, %v2361_v38  ;;  %v17909_v43 = vld [vmem:[%s18935_s22 + $0x22c4] sm:$0xf0]  ;;  %v17828_v55 = vld [vmem:[%s18935_s22 + $0x2044] sm:$0xf] }
 0x577   : > { %10664 = vmatpush.bf16.msra.mxu2 %v16449_v62  ;;  %10677 = vmatpush.bf16.msra.mxu3 %v16453_v48  ;;  %v13857_v62 = vor.u32 %v17259_v35, %v13856_v34  ;;  %v13208_v48 = vld [vmem:[%s18935_s22 + $0x6e0] sm:$0xf]  ;;  %v7489_v24 = vpack.c.b16 %v6193_v63, %v6193_v63  ;;  %v7491_v34 = vpack.c.b16 %v6195_v16, %v6195_v16  ;;  %v2367_v63 = vperm.slane %v21421_v52, 6 }
 0x578   : > { %10690 = vmatpush.bf16.msrb.mxu0 %v16457_v50  ;;  %10703 = vmatpush.bf16.msrb.mxu1 %v16461_v5  ;;  %v13861_v50 = vor.u32 %v17178_v39, %v13858_v40  ;;  %v13865_v5 = vor.u32 %v17260_v44, %v13864_v41  ;;  %18252 = vtanh.f32 %v10426_v58  ;;  %v9036_v40 = vsel %vm8668_vm3, %v7490_v25, 0  ;;  %v17910_v58 = vld [vmem:[%s18935_s22 + $0x22cc] sm:$0xf0] }
 0x579   : > { %18254 = vtanh.f32 %v10413_v47  ;;  %v9033_v39 = vsel %vm8668_vm3, %v7489_v24, 0  ;;  %v16474_v47 = vld [vmem:[%s18935_s22 + $0x22d0] sm:$0xf0] }
 0x57a   : > { %v10440_v49 = vpop.f32.mrf.mxu0  ;;  %v10453_v3 = vpop.f32.mrf.mxu1  ;;  %v17342_v24 = vld [vmem:[%s18935_s22 + $0x1114] sm:$0xf] }
 0x57b   : > { %10665 = vmatpush.bf16.msra.mxu2 %v15801_v59  ;;  %10678 = vmatpush.bf16.msra.mxu3 %v15805_v61  ;;  %v13218_v59 = vld [vmem:[%s18935_s22 + $0x970] sm:$0xf0]  ;;  %v6192_v61 = vunpack.c.l.b16 %v2202_v46  ;;  %v18249_v4 = vpop.eup %18248  ;;  %v9039_v46 = vsel %vm8668_vm3, %v7491_v34, 0  ;;  %v17747_v49 = vld [vmem:[%s18935_s22 + $0x1db4] sm:$0xf0]  ;;  %v16473_v3 = vor.u32 %v17910_v58, %v16472_v45  ;;  %v2204_v58 = vld [vmem:[%s18935_s22 + $0x2560] sm:$0xff] }
 0x57c   : > { %10691 = vmatpush.bf16.msrb.mxu0 %v15809_v8  ;;  %10704 = vmatpush.bf16.msrb.mxu1 %v15813_v9  ;;  %v18251_v6 = vpop.eup %18250  ;;  %v13209_v8 = vor.u32 %v17097_v0, %v13208_v48  ;;  %v13213_v9 = vor.u32 %v17016_v7, %v13210_v1  ;;  %v13221_v11 = vor.u32 %v17017_v57, %v13218_v59  ;;  %v11658_v26 = vrot.slane %v18249_v4, 4  ;;  %v15816_v0 = vld [vmem:[%s18935_s22 + $0x1b30] sm:$0xf]  ;;  %v15824_v7 = vld [vmem:[%s18935_s22 + $0x1b38] sm:$0xf] }
 0x57d   : > { %v10414_v17 = vpop.f32.mrf.mxu2  ;;  %v7488_v23 = vpack.c.b16 %v6192_v61, %v6192_v61  ;;  %v16469_v48 = vor.u32 %v17828_v55, %v16466_v56  ;;  %v17748_v1 = vld [vmem:[%s18935_s22 + $0x1dbc] sm:$0xf0]  ;;  %v15817_v59 = vor.u32 %v17747_v49, %v15816_v0  ;;  %v17585_v4 = vld [vmem:[%s18935_s22 + $0x18a4] sm:$0xf0]  ;;  %v17262_v55 = vld [vmem:[%s18935_s22 + $0xe8c] sm:$0xf0] }
 0x57e   : > { %v18253_v30 = vpop.eup %18252  ;;  %v15168_v57 = vld [vmem:[%s18935_s22 + $0x1620] sm:$0xf]  ;;  %v13882_v56 = vld [vmem:[%s18935_s22 + $0xe90] sm:$0xf0] }
 0x57f   : > { %10666 = vmatpush.bf16.msra.mxu2 %v15153_v18  ;;  %10679 = vmatpush.bf16.msra.mxu3 %v15157_v19  ;;  %v10427_v18 = vpop.f32.mrf.mxu3  ;;  %v12562_v19 = vld [vmem:[%s18935_s22 + $0x458] sm:$0xf0]  ;;  %v11657_v32 = vrot.slane %v18253_v30, 6  ;;  %v18255_v35 = vpop.eup %18254  ;;  %v17424_v30 = vld [vmem:[%s18935_s22 + $0x139c] sm:$0xf0] }
 0x580   : > { %10692 = vmatpush.bf16.msrb.mxu0 %v15161_v20  ;;  %10705 = vmatpush.bf16.msrb.mxu1 %v15165_v27  ;;  %v12568_v20 = vld [vmem:[%s18935_s22 + $0x1d8] sm:$0xf]  ;;  %v11659_v27 = vrot.slane %v18251_v6, 2  ;;  %v12565_v33 = vor.u32 %v16854_v15, %v12562_v19  ;;  %v17504_v6 = vld [vmem:[%s18935_s22 + $0x1624] sm:$0xf]  ;;  %v15169_v18 = vor.u32 %v17585_v4, %v15168_v57 }
 0x581   : > { %v12569_v38 = vor.u32 %v16936_v21, %v12568_v20  ;;  %v15178_v15 = vld [vmem:[%s18935_s22 + $0x18b0] sm:$0xf0]  ;;  %v14520_v21 = vld [vmem:[%s18935_s22 + $0x1110] sm:$0xf]  ;;  %v13872_v34 = vld [vmem:[%s18935_s22 + $0xc00] sm:$0xf] }
 0x582   : > { %v11781_v41 = vsel %vm11708_vm10, %v11658_v26, %v11659_v27  ;;  %v15181_v27 = vor.u32 %v17505_v14, %v15178_v15  ;;  %v13234_v57 = vld [vmem:[%s18935_s22 + $0x980] sm:$0xf0] }
 0x583   : > { %10667 = vmatpush.bf16.msra.mxu2 %v14505_v36  ;;  %10680 = vmatpush.bf16.msra.mxu3 %v14509_v37  ;;  %v12573_v36 = vor.u32 %v16855_v28, %v12570_v29  ;;  %v9030_v37 = vsel %vm8668_vm3, %v7488_v23, 0  ;;  %v17423_v23 = vld [vmem:[%s18935_s22 + $0x1394] sm:$0xf0]  ;;  %v14522_v28 = vld [vmem:[%s18935_s22 + $0x1398] sm:$0xf0] }
 0x584   : > { %10693 = vmatpush.bf16.msrb.mxu0 %v14513_v42  ;;  %10706 = vmatpush.bf16.msrb.mxu1 %v14517_v53  ;;  %v11780_v42 = vsel %vm11706_vm11, %v18255_v35, %v11657_v32  ;;  %v16464_v53 = vld [vmem:[%s18935_s22 + $0x2040] sm:$0xf]  ;;  %v14528_v29 = vld [vmem:[%s18935_s22 + $0x1118] sm:$0xf]  ;;  %v14530_v32 = vld [vmem:[%s18935_s22 + $0x13a0] sm:$0xf0] }
 0x585   : > { %v11782_v44 = vsel %vm8668_vm3, %v11780_v42, %v11781_v41  ;;  %v17261_v35 = vld [vmem:[%s18935_s22 + $0xe84] sm:$0xf0]  ;;  %v16856_v14 = vld [vmem:[%s18935_s22 + $0x1e4] sm:$0xf] }
 0x586   : > { %11894 = vst [vmem:[%s19647_s14 + $0xc0] sm:$0xff] %v11782_v44  ;;  %v13880_v41 = vld [vmem:[%s18935_s22 + $0xc08] sm:$0xf]  ;;  %v17181_v44 = vld [vmem:[%s18935_s22 + $0xc0c] sm:$0xf] }
 0x587   : > { %10668 = vmatpush.bf16.msra.mxu2 %v13857_v62  ;;  %10681 = vmatpush.bf16.msra.mxu3 %v13861_v50  ;;  %v16465_v62 = vor.u32 %v17909_v43, %v16464_v53  ;;  %v16477_v50 = vor.u32 %v17829_v60, %v16474_v47  ;;  %v13873_v47 = vor.u32 %v17261_v35, %v13872_v34 }
 0x588   : > { %10694 = vmatpush.bf16.msrb.mxu0 %v13865_v5  ;;  %10707 = vmatpush.bf16.msrb.mxu1 %v13869_v51  ;;  %v17666_v5 = vld [vmem:[%s18935_s22 + $0x1b34] sm:$0xf]  ;;  %v15818_v51 = vld [vmem:[%s18935_s22 + $0x1db8] sm:$0xf0] }
 0x589   : > { %v15821_v61 = vor.u32 %v17666_v5, %v15818_v51  ;;  %v13885_v5 = vor.u32 %v17181_v44, %v13882_v56  ;;  %v17018_v51 = vld [vmem:[%s18935_s22 + $0x6f4] sm:$0xf]  ;;  %v16488_v44 = vld [vmem:[%s18935_s22 + $0x2058] sm:$0xf]  ;;  %v17912_v56 = vld [vmem:[%s18935_s22 + $0x22dc] sm:$0xf0] }
 0x58b   : > { %10669 = vmatpush.bf16.msra.mxu2 %v13209_v8  ;;  %10682 = vmatpush.bf16.msra.mxu3 %v13213_v9  ;;  %v15825_v8 = vor.u32 %v17748_v1, %v15824_v7  ;;  %v15829_v9 = vor.u32 %v17667_v54, %v15826_v22  ;;  %v13226_v7 = vld [vmem:[%s18935_s22 + $0x978] sm:$0xf0]  ;;  %v13232_v1 = vld [vmem:[%s18935_s22 + $0x6f8] sm:$0xf]  ;;  %v17100_v54 = vld [vmem:[%s18935_s22 + $0x97c] sm:$0xf0] }
 0x58c   : > { %10695 = vmatpush.bf16.msrb.mxu0 %v13217_v10  ;;  %10708 = vmatpush.bf16.msrb.mxu1 %v13221_v11  ;;  %v15170_v10 = vld [vmem:[%s18935_s22 + $0x18a8] sm:$0xf0]  ;;  %v15176_v11 = vld [vmem:[%s18935_s22 + $0x1628] sm:$0xf]  ;;  %v17019_v22 = vld [vmem:[%s18935_s22 + $0x6fc] sm:$0xf] }
 0x58d   : > { %v15173_v19 = vor.u32 %v17504_v6, %v15170_v10  ;;  %v15177_v20 = vor.u32 %v17586_v13, %v15176_v11  ;;  %v13237_v10 = vor.u32 %v17019_v22, %v13234_v57  ;;  %v12576_v11 = vld [vmem:[%s18935_s22 + $0x1e0] sm:$0xf]  ;;  %v16937_v13 = vld [vmem:[%s18935_s22 + $0x464] sm:$0xf0]  ;;  %v15184_v22 = vld [vmem:[%s18935_s22 + $0x1630] sm:$0xf] }
 0x58f   : > { %10670 = vmatpush.bf16.msra.mxu2 %v12561_v31  ;;  %10683 = vmatpush.bf16.msra.mxu3 %v12565_v33  ;;  %v17343_v31 = vld [vmem:[%s18935_s22 + $0x111c] sm:$0xf]  ;;  %v2366_v33 = vperm.slane %v21421_v52, 5 }
 0x590   : > { %10696 = vmatpush.bf16.msrb.mxu0 %v12569_v38  ;;  %10709 = vmatpush.bf16.msrb.mxu1 %v12573_v36  ;;  %v2365_v38 = vperm.slane %v21421_v52, 4  ;;  %v14521_v36 = vor.u32 %v17423_v23, %v14520_v21  ;;  %v14529_v52 = vor.u32 %v17424_v30, %v14528_v29  ;;  %v14533_v42 = vor.u32 %v17343_v31, %v14530_v32 }
 0x591   : > { %v12577_v30 = vor.u32 %v16937_v13, %v12576_v11  ;;  %v17588_v11 = vld [vmem:[%s18935_s22 + $0x18bc] sm:$0xf0]  ;;  %v17507_v13 = vld [vmem:[%s18935_s22 + $0x163c] sm:$0xf] }
 0x592   : > { %16746 = vmatmul.msk.bf16.vlgmr.msra.gmra.mxu2 %vm8664_vm9, %v19267_v12  ;;  %16747 = vmatmul.msk.bf16.vlgmr.msra.gmra.mxu3 %vm8664_vm9, %v19267_v12  ;;  %v10490_v16 = vpop.f32.mrf.mxu0  ;;  %v10503_v17 = vpop.f32.mrf.mxu1 }
 0x593   : > { %10715 = vmatpush.bf16.msrb.mxu2 %v9030_v37  ;;  %10728 = vmatpush.bf16.msrb.mxu3 %v9033_v39  ;;  %v10491_v25 = vadd.f32 %v10490_v16, %v2367_v63  ;;  %v10504_v26 = vadd.f32 %v10503_v17, %v2368_v2  ;;  %v14525_v37 = vor.u32 %v17342_v24, %v14522_v28  ;;  %v17180_v39 = vld [vmem:[%s18935_s22 + $0xc04] sm:$0xf]  ;;  %v12586_v28 = vld [vmem:[%s18935_s22 + $0x470] sm:$0xf0] }
 0x594   : > { %10741 = vmatpush.bf16.msra.mxu0 %v9036_v40  ;;  %10754 = vmatpush.bf16.msra.mxu1 %v9039_v46  ;;  %v13874_v40 = vld [vmem:[%s18935_s22 + $0xe88] sm:$0xf0] }
 0x595   : > { %16748 = vmatmul.msk.bf16.vlgmr.msrb.gmra.mxu0 %vm8664_vm9, %v19267_v12  ;;  %16749 = vmatmul.msk.bf16.vlgmr.msrb.gmra.mxu1 %vm8664_vm9, %v19267_v12  ;;  %18256 = vtanh.f32 %v10491_v25  ;;  %v10464_v53 = vpop.f32.mrf.mxu2  ;;  %v10477_v43 = vpop.f32.mrf.mxu3  ;;  %v2205_v46 = vld [vmem:[%s18935_s22 + $0x2568] sm:$0xff] }
 0x596   : > { %18258 = vtanh.f32 %v10504_v26  ;;  %v10478_v45 = vadd.f32 %v10477_v43, %v2366_v33  ;;  %v10465_v60 = vadd.f32 %v10464_v53, %v2365_v38  ;;  %v6198_v63 = vunpack.c.l.b16 %v2205_v46  ;;  %v17830_v53 = vld [vmem:[%s18935_s22 + $0x2054] sm:$0xf] }
 0x597   : > { %10716 = vmatpush.bf16.msrb.mxu2 %v16465_v62  ;;  %10729 = vmatpush.bf16.msrb.mxu3 %v16469_v48  ;;  %v13224_v62 = vld [vmem:[%s18935_s22 + $0x6f0] sm:$0xf]  ;;  %v17099_v48 = vld [vmem:[%s18935_s22 + $0x974] sm:$0xf0]  ;;  %v6199_v15 = vunpack.c.h.b16 %v2205_v46  ;;  %v16490_v46 = vld [vmem:[%s18935_s22 + $0x22e0] sm:$0xf0] }
 0x598   : > { %10742 = vmatpush.bf16.msra.mxu0 %v16473_v3  ;;  %10755 = vmatpush.bf16.msra.mxu1 %v16477_v50  ;;  %v13877_v3 = vor.u32 %v17180_v39, %v13874_v40  ;;  %v13881_v50 = vor.u32 %v17262_v55, %v13880_v41  ;;  %18260 = vtanh.f32 %v10478_v45  ;;  %v13225_v6 = vor.u32 %v17099_v48, %v13224_v62  ;;  %v16482_v55 = vld [vmem:[%s18935_s22 + $0x22d8] sm:$0xf0]  ;;  %v15832_v62 = vld [vmem:[%s18935_s22 + $0x1b40] sm:$0xf]  ;;  %v17749_v48 = vld [vmem:[%s18935_s22 + $0x1dc4] sm:$0xf0] }
 0x599   : > { %18262 = vtanh.f32 %v10465_v60  ;;  %v7494_v24 = vpack.c.b16 %v6198_v63, %v6198_v63  ;;  %v7495_v38 = vpack.c.b16 %v6199_v15, %v6199_v15  ;;  %v15833_v57 = vor.u32 %v17749_v48, %v15832_v62  ;;  %v17101_v62 = vld [vmem:[%s18935_s22 + $0x984] sm:$0xf0] }
 0x59a   : > { %v10492_v0 = vpop.f32.mrf.mxu0  ;;  %v10505_v49 = vpop.f32.mrf.mxu1 }
 0x59b   : > { %10717 = vmatpush.bf16.msrb.mxu2 %v15817_v59  ;;  %10730 = vmatpush.bf16.msrb.mxu3 %v15821_v61  ;;  %v6196_v59 = vunpack.c.l.b16 %v2204_v58  ;;  %v6197_v61 = vunpack.c.h.b16 %v2204_v58  ;;  %v18257_v2 = vpop.eup %18256  ;;  %v9048_v39 = vsel %vm8668_vm3, %v7494_v24, 0  ;;  %v9051_v45 = vsel %vm8668_vm3, %v7495_v38, 0  ;;  %v17831_v58 = vld [vmem:[%s18935_s22 + $0x205c] sm:$0xf]  ;;  %v17668_v0 = vld [vmem:[%s18935_s22 + $0x1b44] sm:$0xf] }
 0x59c   : > { %10743 = vmatpush.bf16.msra.mxu0 %v15825_v8  ;;  %10756 = vmatpush.bf16.msra.mxu1 %v15829_v9  ;;  %v18259_v4 = vpop.eup %18258  ;;  %v13229_v8 = vor.u32 %v17018_v51, %v13226_v7  ;;  %v13233_v9 = vor.u32 %v17100_v54, %v13232_v1  ;;  %v11661_v25 = vrot.slane %v18257_v2, 4  ;;  %v16489_v49 = vor.u32 %v17912_v56, %v16488_v44  ;;  %v21580_v51 = vld [vmem:[%s19570_s13 + $0x68] sm:$0xff]  ;;  %v17750_v7 = vld [vmem:[%s18935_s22 + $0x1dcc] sm:$0xf0]  ;;  %v17669_v1 = vld [vmem:[%s18935_s22 + $0x1b4c] sm:$0xf] }
 0x59d   : > { %v10466_v16 = vpop.f32.mrf.mxu2  ;;  %v10479_v17 = vpop.f32.mrf.mxu3  ;;  %v7492_v21 = vpack.c.b16 %v6196_v59, %v6196_v59  ;;  %v7493_v23 = vpack.c.b16 %v6197_v61, %v6197_v61  ;;  %v11662_v26 = vrot.slane %v18259_v4, 2  ;;  %v15842_v54 = vld [vmem:[%s18935_s22 + $0x1dd0] sm:$0xf0]  ;;  %v2371_v61 = vperm.slane %v21580_v51, 2  ;;  %v17587_v2 = vld [vmem:[%s18935_s22 + $0x18b4] sm:$0xf0] }
 0x59e   : > { %v18261_v29 = vpop.eup %18260  ;;  %v2372_v63 = vperm.slane %v21580_v51, 3  ;;  %v17506_v4 = vld [vmem:[%s18935_s22 + $0x1634] sm:$0xf]  ;;  %v15185_v17 = vor.u32 %v17587_v2, %v15184_v22  ;;  %v13888_v38 = vld [vmem:[%s18935_s22 + $0xc10] sm:$0xf] }
 0x59f   : > { %10718 = vmatpush.bf16.msrb.mxu2 %v15169_v18  ;;  %10731 = vmatpush.bf16.msrb.mxu3 %v15173_v19  ;;  %v12578_v18 = vld [vmem:[%s18935_s22 + $0x468] sm:$0xf0]  ;;  %v12584_v19 = vld [vmem:[%s18935_s22 + $0x1e8] sm:$0xf]  ;;  %v11660_v31 = vrot.slane %v18261_v29, 6  ;;  %v18263_v34 = vpop.eup %18262  ;;  %v11784_v40 = vsel %vm11708_vm10, %v11661_v25, %v11662_v26 }
 0x5a0   : > { %10744 = vmatpush.bf16.msra.mxu0 %v15177_v20  ;;  %10757 = vmatpush.bf16.msra.mxu1 %v15181_v27  ;;  %v16938_v20 = vld [vmem:[%s18935_s22 + $0x46c] sm:$0xf0]  ;;  %v16857_v27 = vld [vmem:[%s18935_s22 + $0x1ec] sm:$0xf]  ;;  %v12581_v32 = vor.u32 %v16856_v14, %v12578_v18  ;;  %v15194_v14 = vld [vmem:[%s18935_s22 + $0x18c0] sm:$0xf0] }
 0x5a1   : > { %v12585_v33 = vor.u32 %v16938_v20, %v12584_v19  ;;  %v12589_v35 = vor.u32 %v16857_v27, %v12586_v28  ;;  %v11783_v41 = vsel %vm11706_vm11, %v18263_v34, %v11660_v31  ;;  %v14536_v20 = vld [vmem:[%s18935_s22 + $0x1120] sm:$0xf]  ;;  %v15197_v26 = vor.u32 %v17507_v13, %v15194_v14  ;;  %v14538_v27 = vld [vmem:[%s18935_s22 + $0x13a8] sm:$0xf0]  ;;  %v14544_v28 = vld [vmem:[%s18935_s22 + $0x1128] sm:$0xf] }
 0x5a2   : > { %v11785_v43 = vsel %vm8668_vm3, %v11783_v41, %v11784_v40  ;;  %v17426_v29 = vld [vmem:[%s18935_s22 + $0x13ac] sm:$0xf0]  ;;  %v14546_v31 = vld [vmem:[%s18935_s22 + $0x13b0] sm:$0xf0]  ;;  %v17263_v34 = vld [vmem:[%s18935_s22 + $0xe94] sm:$0xf0] }
 0x5a3   : > { %10719 = vmatpush.bf16.msrb.mxu2 %v14521_v36  ;;  %10732 = vmatpush.bf16.msrb.mxu3 %v14525_v37  ;;  %v9042_v36 = vsel %vm8668_vm3, %v7492_v21, 0  ;;  %v9045_v37 = vsel %vm8668_vm3, %v7493_v23, 0  ;;  %11895 = vst [vmem:[%s19647_s14 + $0xc8] sm:$0xff] %v11785_v43  ;;  %v17425_v21 = vld [vmem:[%s18935_s22 + $0x13a4] sm:$0xf0]  ;;  %v14545_v41 = vor.u32 %v17426_v29, %v14544_v28 }
 0x5a4   : > { %10745 = vmatpush.bf16.msra.mxu0 %v14529_v52  ;;  %10758 = vmatpush.bf16.msra.mxu1 %v14533_v42  ;;  %v16480_v52 = vld [vmem:[%s18935_s22 + $0x2050] sm:$0xf]  ;;  %v17911_v42 = vld [vmem:[%s18935_s22 + $0x22d4] sm:$0xf0]  ;;  %v17344_v23 = vld [vmem:[%s18935_s22 + $0x1124] sm:$0xf] }
 0x5a5   : > { %v16481_v60 = vor.u32 %v17911_v42, %v16480_v52  ;;  %v13896_v40 = vld [vmem:[%s18935_s22 + $0xc18] sm:$0xf]  ;;  %v17264_v43 = vld [vmem:[%s18935_s22 + $0xe9c] sm:$0xf0]  ;;  %v13898_v44 = vld [vmem:[%s18935_s22 + $0xea0] sm:$0xf0] }
 0x5a6   : > { %v17021_v22 = vld [vmem:[%s18935_s22 + $0x70c] sm:$0xf]  ;;  %v16939_v13 = vld [vmem:[%s18935_s22 + $0x474] sm:$0xf0]  ;;  %v16858_v14 = vld [vmem:[%s18935_s22 + $0x1f4] sm:$0xf] }
 0x5a7   : > { %10720 = vmatpush.bf16.msrb.mxu2 %v13873_v47  ;;  %10733 = vmatpush.bf16.msrb.mxu3 %v13877_v3  ;;  %v16485_v47 = vor.u32 %v17830_v53, %v16482_v55  ;;  %v16493_v3 = vor.u32 %v17831_v58, %v16490_v46  ;;  %v17183_v55 = vld [vmem:[%s18935_s22 + $0xc1c] sm:$0xf]  ;;  %v12602_v28 = vld [vmem:[%s18935_s22 + $0x480] sm:$0xf0] }
 0x5a8   : > { %10746 = vmatpush.bf16.msra.mxu0 %v13881_v50  ;;  %10759 = vmatpush.bf16.msra.mxu1 %v13885_v5  ;;  %v15834_v50 = vld [vmem:[%s18935_s22 + $0x1dc8] sm:$0xf0]  ;;  %v15840_v5 = vld [vmem:[%s18935_s22 + $0x1b48] sm:$0xf]  ;;  %v2207_v58 = vld [vmem:[%s18935_s22 + $0x2578] sm:$0xff] }
 0x5a9   : > { %v15837_v59 = vor.u32 %v17668_v0, %v15834_v50  ;;  %v13901_v50 = vor.u32 %v17183_v55, %v13898_v44  ;;  %v16498_v55 = vld [vmem:[%s18935_s22 + $0x22e8] sm:$0xf0]  ;;  %v16504_v44 = vld [vmem:[%s18935_s22 + $0x2068] sm:$0xf] }
 0x5ab   : > { %10721 = vmatpush.bf16.msrb.mxu2 %v13225_v6  ;;  %10734 = vmatpush.bf16.msrb.mxu3 %v13229_v8  ;;  %v15841_v6 = vor.u32 %v17750_v7, %v15840_v5  ;;  %v15845_v8 = vor.u32 %v17669_v1, %v15842_v54  ;;  %v17020_v5 = vld [vmem:[%s18935_s22 + $0x704] sm:$0xf]  ;;  %v13242_v7 = vld [vmem:[%s18935_s22 + $0x988] sm:$0xf0]  ;;  %v13248_v1 = vld [vmem:[%s18935_s22 + $0x708] sm:$0xf] }
 0x5ac   : > { %10747 = vmatpush.bf16.msra.mxu0 %v13233_v9  ;;  %10760 = vmatpush.bf16.msra.mxu1 %v13237_v10  ;;  %v15186_v9 = vld [vmem:[%s18935_s22 + $0x18b8] sm:$0xf0]  ;;  %v15192_v10 = vld [vmem:[%s18935_s22 + $0x1638] sm:$0xf]  ;;  %v17102_v54 = vld [vmem:[%s18935_s22 + $0x98c] sm:$0xf0] }
 0x5ad   : > { %v15189_v18 = vor.u32 %v17506_v4, %v15186_v9  ;;  %v15193_v19 = vor.u32 %v17588_v11, %v15192_v10  ;;  %v13249_v9 = vor.u32 %v17102_v54, %v13248_v1  ;;  %v12592_v11 = vld [vmem:[%s18935_s22 + $0x1f0] sm:$0xf]  ;;  %v17671_v1 = vld [vmem:[%s18935_s22 + $0x1b5c] sm:$0xf]  ;;  %v15858_v54 = vld [vmem:[%s18935_s22 + $0x1de0] sm:$0xf0] }
 0x5af   : > { %10722 = vmatpush.bf16.msrb.mxu2 %v12577_v30  ;;  %10735 = vmatpush.bf16.msrb.mxu3 %v12581_v32  ;;  %v17345_v30 = vld [vmem:[%s18935_s22 + $0x112c] sm:$0xf]  ;;  %v2370_v32 = vperm.slane %v21580_v51, 1 }
 0x5b0   : > { %10748 = vmatpush.bf16.msra.mxu0 %v12585_v33  ;;  %10761 = vmatpush.bf16.msra.mxu1 %v12589_v35  ;;  %v2369_v33 = vperm.slane %v21580_v51, 0  ;;  %v14537_v35 = vor.u32 %v17425_v21, %v14536_v20  ;;  %v14549_v52 = vor.u32 %v17345_v30, %v14546_v31  ;;  %v16940_v20 = vld [vmem:[%s18935_s22 + $0x47c] sm:$0xf0]  ;;  %v12593_v30 = vor.u32 %v16939_v13, %v12592_v11  ;;  %v17590_v11 = vld [vmem:[%s18935_s22 + $0x18cc] sm:$0xf0] }
 0x5b1   : > { %v17509_v13 = vld [vmem:[%s18935_s22 + $0x164c] sm:$0xf] }
 0x5b2   : > { %16750 = vmatmul.msk.bf16.vlgmr.msrb.gmra.mxu2 %vm8664_vm9, %v19267_v12  ;;  %16751 = vmatmul.msk.bf16.vlgmr.msrb.gmra.mxu3 %vm8664_vm9, %v19267_v12  ;;  %v10542_v15 = vpop.f32.mrf.mxu0  ;;  %v10555_v16 = vpop.f32.mrf.mxu1 }
 0x5b3   : > { %10767 = vmatpush.bf16.msra.mxu2 %v9042_v36  ;;  %10780 = vmatpush.bf16.msra.mxu3 %v9045_v37  ;;  %v10543_v24 = vadd.f32 %v10542_v15, %v2371_v61  ;;  %v10556_v25 = vadd.f32 %v10555_v16, %v2372_v63  ;;  %v14541_v36 = vor.u32 %v17344_v23, %v14538_v27  ;;  %v17182_v37 = vld [vmem:[%s18935_s22 + $0xc14] sm:$0xf]  ;;  %v6202_v63 = vunpack.c.l.b16 %v2207_v58  ;;  %v16859_v27 = vld [vmem:[%s18935_s22 + $0x1fc] sm:$0xf] }
 0x5b4   : > { %10793 = vmatpush.bf16.msrb.mxu0 %v9048_v39  ;;  %10806 = vmatpush.bf16.msrb.mxu1 %v9051_v45  ;;  %v13890_v39 = vld [vmem:[%s18935_s22 + $0xe98] sm:$0xf0]  ;;  %v2206_v45 = vld [vmem:[%s18935_s22 + $0x2570] sm:$0xff]  ;;  %v6203_v15 = vunpack.c.h.b16 %v2207_v58  ;;  %v17833_v58 = vld [vmem:[%s18935_s22 + $0x206c] sm:$0xf] }
 0x5b5   : > { %16752 = vmatmul.msk.bf16.vlgmr.msra.gmra.mxu0 %vm8664_vm9, %v19267_v12  ;;  %16753 = vmatmul.msk.bf16.vlgmr.msra.gmra.mxu1 %vm8664_vm9, %v19267_v12  ;;  %18264 = vtanh.f32 %v10543_v24  ;;  %v10516_v42 = vpop.f32.mrf.mxu2  ;;  %v10529_v53 = vpop.f32.mrf.mxu3  ;;  %v6201_v61 = vunpack.c.h.b16 %v2206_v45  ;;  %v7498_v24 = vpack.c.b16 %v6202_v63, %v6202_v63  ;;  %v2376_v63 = vperm.slane %v21580_v51, 7 }
 0x5b6   : > { %18266 = vtanh.f32 %v10556_v25  ;;  %v10530_v56 = vadd.f32 %v10529_v53, %v2370_v32  ;;  %v10517_v46 = vadd.f32 %v10516_v42, %v2369_v33  ;;  %v17913_v42 = vld [vmem:[%s18935_s22 + $0x22e4] sm:$0xf0]  ;;  %v17832_v53 = vld [vmem:[%s18935_s22 + $0x2064] sm:$0xf] }
 0x5b7   : > { %10768 = vmatpush.bf16.msra.mxu2 %v16481_v60  ;;  %10781 = vmatpush.bf16.msra.mxu3 %v16485_v47  ;;  %v13889_v60 = vor.u32 %v17263_v34, %v13888_v38  ;;  %v13240_v47 = vld [vmem:[%s18935_s22 + $0x700] sm:$0xf]  ;;  %v7497_v23 = vpack.c.b16 %v6201_v61, %v6201_v61  ;;  %v7499_v38 = vpack.c.b16 %v6203_v15, %v6203_v15  ;;  %v2375_v61 = vperm.slane %v21580_v51, 6 }
 0x5b8   : > { %10794 = vmatpush.bf16.msrb.mxu0 %v16489_v49  ;;  %10807 = vmatpush.bf16.msrb.mxu1 %v16493_v3  ;;  %v13893_v49 = vor.u32 %v17182_v37, %v13890_v39  ;;  %v13897_v3 = vor.u32 %v17264_v43, %v13896_v40  ;;  %18268 = vtanh.f32 %v10530_v56  ;;  %v9060_v39 = vsel %vm8668_vm3, %v7498_v24, 0  ;;  %v17914_v56 = vld [vmem:[%s18935_s22 + $0x22ec] sm:$0xf0] }
 0x5b9   : > { %18270 = vtanh.f32 %v10517_v46  ;;  %v9057_v37 = vsel %vm8668_vm3, %v7497_v23, 0  ;;  %v16506_v46 = vld [vmem:[%s18935_s22 + $0x22f0] sm:$0xf0] }
 0x5ba   : > { %v10544_v48 = vpop.f32.mrf.mxu0  ;;  %v10557_v0 = vpop.f32.mrf.mxu1  ;;  %v17346_v23 = vld [vmem:[%s18935_s22 + $0x1134] sm:$0xf] }
 0x5bb   : > { %10769 = vmatpush.bf16.msra.mxu2 %v15833_v57  ;;  %10782 = vmatpush.bf16.msra.mxu3 %v15837_v59  ;;  %v13250_v57 = vld [vmem:[%s18935_s22 + $0x990] sm:$0xf0]  ;;  %v6200_v59 = vunpack.c.l.b16 %v2206_v45  ;;  %v18265_v2 = vpop.eup %18264  ;;  %v9063_v45 = vsel %vm8668_vm3, %v7499_v38, 0  ;;  %v17751_v48 = vld [vmem:[%s18935_s22 + $0x1dd4] sm:$0xf0]  ;;  %v16505_v0 = vor.u32 %v17914_v56, %v16504_v44  ;;  %v2208_v56 = vld [vmem:[%s18935_s22 + $0x2580] sm:$0xff] }
 0x5bc   : > { %10795 = vmatpush.bf16.msrb.mxu0 %v15841_v6  ;;  %10808 = vmatpush.bf16.msrb.mxu1 %v15845_v8  ;;  %v18267_v4 = vpop.eup %18266  ;;  %v13241_v6 = vor.u32 %v17101_v62, %v13240_v47  ;;  %v13245_v8 = vor.u32 %v17020_v5, %v13242_v7  ;;  %v13253_v10 = vor.u32 %v17021_v22, %v13250_v57  ;;  %v11664_v25 = vrot.slane %v18265_v2, 4  ;;  %v15848_v62 = vld [vmem:[%s18935_s22 + $0x1b50] sm:$0xf]  ;;  %v15856_v5 = vld [vmem:[%s18935_s22 + $0x1b58] sm:$0xf] }
 0x5bd   : > { %v10518_v16 = vpop.f32.mrf.mxu2  ;;  %v7496_v21 = vpack.c.b16 %v6200_v59, %v6200_v59  ;;  %v16501_v47 = vor.u32 %v17832_v53, %v16498_v55  ;;  %v17752_v7 = vld [vmem:[%s18935_s22 + $0x1ddc] sm:$0xf0]  ;;  %v15849_v57 = vor.u32 %v17751_v48, %v15848_v62  ;;  %v17589_v2 = vld [vmem:[%s18935_s22 + $0x18c4] sm:$0xf0]  ;;  %v17266_v53 = vld [vmem:[%s18935_s22 + $0xeac] sm:$0xf0] }
 0x5be   : > { %v18269_v29 = vpop.eup %18268  ;;  %v15200_v22 = vld [vmem:[%s18935_s22 + $0x1640] sm:$0xf]  ;;  %v13914_v55 = vld [vmem:[%s18935_s22 + $0xeb0] sm:$0xf0] }
 0x5bf   : > { %10770 = vmatpush.bf16.msra.mxu2 %v15185_v17  ;;  %10783 = vmatpush.bf16.msra.mxu3 %v15189_v18  ;;  %v10531_v17 = vpop.f32.mrf.mxu3  ;;  %v12594_v18 = vld [vmem:[%s18935_s22 + $0x478] sm:$0xf0]  ;;  %v11663_v31 = vrot.slane %v18269_v29, 6  ;;  %v18271_v34 = vpop.eup %18270  ;;  %v17428_v29 = vld [vmem:[%s18935_s22 + $0x13bc] sm:$0xf0] }
 0x5c0   : > { %10796 = vmatpush.bf16.msrb.mxu0 %v15193_v19  ;;  %10809 = vmatpush.bf16.msrb.mxu1 %v15197_v26  ;;  %v12600_v19 = vld [vmem:[%s18935_s22 + $0x1f8] sm:$0xf]  ;;  %v11665_v26 = vrot.slane %v18267_v4, 2  ;;  %v12597_v32 = vor.u32 %v16858_v14, %v12594_v18  ;;  %v17508_v4 = vld [vmem:[%s18935_s22 + $0x1644] sm:$0xf]  ;;  %v15201_v17 = vor.u32 %v17589_v2, %v15200_v22 }
 0x5c1   : > { %v12601_v33 = vor.u32 %v16940_v20, %v12600_v19  ;;  %v15210_v14 = vld [vmem:[%s18935_s22 + $0x18d0] sm:$0xf0]  ;;  %v14552_v20 = vld [vmem:[%s18935_s22 + $0x1130] sm:$0xf]  ;;  %v13904_v38 = vld [vmem:[%s18935_s22 + $0xc20] sm:$0xf] }
 0x5c2   : > { %v11787_v40 = vsel %vm11708_vm10, %v11664_v25, %v11665_v26  ;;  %v15213_v26 = vor.u32 %v17509_v13, %v15210_v14  ;;  %v13266_v22 = vld [vmem:[%s18935_s22 + $0x9a0] sm:$0xf0] }
 0x5c3   : > { %10771 = vmatpush.bf16.msra.mxu2 %v14537_v35  ;;  %10784 = vmatpush.bf16.msra.mxu3 %v14541_v36  ;;  %v12605_v35 = vor.u32 %v16859_v27, %v12602_v28  ;;  %v9054_v36 = vsel %vm8668_vm3, %v7496_v21, 0  ;;  %v17427_v21 = vld [vmem:[%s18935_s22 + $0x13b4] sm:$0xf0]  ;;  %v14554_v27 = vld [vmem:[%s18935_s22 + $0x13b8] sm:$0xf0] }
 0x5c4   : > { %10797 = vmatpush.bf16.msrb.mxu0 %v14545_v41  ;;  %10810 = vmatpush.bf16.msrb.mxu1 %v14549_v52  ;;  %v11786_v41 = vsel %vm11706_vm11, %v18271_v34, %v11663_v31  ;;  %v16496_v52 = vld [vmem:[%s18935_s22 + $0x2060] sm:$0xf]  ;;  %v14560_v28 = vld [vmem:[%s18935_s22 + $0x1138] sm:$0xf]  ;;  %v14562_v31 = vld [vmem:[%s18935_s22 + $0x13c0] sm:$0xf0] }
 0x5c5   : > { %v11788_v43 = vsel %vm8668_vm3, %v11786_v41, %v11787_v40  ;;  %v17265_v34 = vld [vmem:[%s18935_s22 + $0xea4] sm:$0xf0]  ;;  %v16860_v13 = vld [vmem:[%s18935_s22 + $0x204] sm:$0xf] }
 0x5c6   : > { %11896 = vst [vmem:[%s19647_s14 + $0xd0] sm:$0xff] %v11788_v43  ;;  %v13912_v40 = vld [vmem:[%s18935_s22 + $0xc28] sm:$0xf]  ;;  %v17185_v43 = vld [vmem:[%s18935_s22 + $0xc2c] sm:$0xf] }
 0x5c7   : > { %10772 = vmatpush.bf16.msra.mxu2 %v13889_v60  ;;  %10785 = vmatpush.bf16.msra.mxu3 %v13893_v49  ;;  %v16497_v60 = vor.u32 %v17913_v42, %v16496_v52  ;;  %v16509_v49 = vor.u32 %v17833_v58, %v16506_v46  ;;  %v13905_v46 = vor.u32 %v17265_v34, %v13904_v38 }
 0x5c8   : > { %10798 = vmatpush.bf16.msrb.mxu0 %v13897_v3  ;;  %10811 = vmatpush.bf16.msrb.mxu1 %v13901_v50  ;;  %v17670_v3 = vld [vmem:[%s18935_s22 + $0x1b54] sm:$0xf]  ;;  %v15850_v50 = vld [vmem:[%s18935_s22 + $0x1dd8] sm:$0xf0] }
 0x5c9   : > { %v15853_v59 = vor.u32 %v17670_v3, %v15850_v50  ;;  %v13917_v3 = vor.u32 %v17185_v43, %v13914_v55  ;;  %v17022_v50 = vld [vmem:[%s18935_s22 + $0x714] sm:$0xf]  ;;  %v16520_v43 = vld [vmem:[%s18935_s22 + $0x2078] sm:$0xf]  ;;  %v17916_v55 = vld [vmem:[%s18935_s22 + $0x22fc] sm:$0xf0] }
 0x5cb   : > { %10773 = vmatpush.bf16.msra.mxu2 %v13241_v6  ;;  %10786 = vmatpush.bf16.msra.mxu3 %v13245_v8  ;;  %v15857_v6 = vor.u32 %v17752_v7, %v15856_v5  ;;  %v15861_v8 = vor.u32 %v17671_v1, %v15858_v54  ;;  %v13258_v5 = vld [vmem:[%s18935_s22 + $0x998] sm:$0xf0]  ;;  %v13264_v7 = vld [vmem:[%s18935_s22 + $0x718] sm:$0xf]  ;;  %v17104_v1 = vld [vmem:[%s18935_s22 + $0x99c] sm:$0xf0] }
 0x5cc   : > { %10799 = vmatpush.bf16.msrb.mxu0 %v13249_v9  ;;  %10812 = vmatpush.bf16.msrb.mxu1 %v13253_v10  ;;  %v15202_v9 = vld [vmem:[%s18935_s22 + $0x18c8] sm:$0xf0]  ;;  %v15208_v10 = vld [vmem:[%s18935_s22 + $0x1648] sm:$0xf]  ;;  %v17023_v54 = vld [vmem:[%s18935_s22 + $0x71c] sm:$0xf] }
 0x5cd   : > { %v15205_v18 = vor.u32 %v17508_v4, %v15202_v9  ;;  %v15209_v19 = vor.u32 %v17590_v11, %v15208_v10  ;;  %v13269_v9 = vor.u32 %v17023_v54, %v13266_v22  ;;  %v12608_v10 = vld [vmem:[%s18935_s22 + $0x200] sm:$0xf]  ;;  %v16941_v11 = vld [vmem:[%s18935_s22 + $0x484] sm:$0xf0]  ;;  %v15216_v54 = vld [vmem:[%s18935_s22 + $0x1650] sm:$0xf] }
 0x5cf   : > { %10774 = vmatpush.bf16.msra.mxu2 %v12593_v30  ;;  %10787 = vmatpush.bf16.msra.mxu3 %v12597_v32  ;;  %v17347_v30 = vld [vmem:[%s18935_s22 + $0x113c] sm:$0xf]  ;;  %v2374_v32 = vperm.slane %v21580_v51, 5 }
 0x5d0   : > { %10800 = vmatpush.bf16.msrb.mxu0 %v12601_v33  ;;  %10813 = vmatpush.bf16.msrb.mxu1 %v12605_v35  ;;  %v2373_v33 = vperm.slane %v21580_v51, 4  ;;  %v14553_v35 = vor.u32 %v17427_v21, %v14552_v20  ;;  %v14561_v51 = vor.u32 %v17428_v29, %v14560_v28  ;;  %v14565_v41 = vor.u32 %v17347_v30, %v14562_v31 }
 0x5d1   : > { %v12609_v29 = vor.u32 %v16941_v11, %v12608_v10  ;;  %v17592_v10 = vld [vmem:[%s18935_s22 + $0x18dc] sm:$0xf0]  ;;  %v17511_v11 = vld [vmem:[%s18935_s22 + $0x165c] sm:$0xf] }
 0x5d2   : > { %16754 = vmatmul.msk.bf16.vlgmr.msra.gmra.mxu2 %vm8664_vm9, %v19267_v12  ;;  %16755 = vmatmul.msk.bf16.vlgmr.msra.gmra.mxu3 %vm8664_vm9, %v19267_v12  ;;  %v10594_v15 = vpop.f32.mrf.mxu0  ;;  %v10607_v16 = vpop.f32.mrf.mxu1 }
 0x5d3   : > { %10819 = vmatpush.bf16.msrb.mxu2 %v9054_v36  ;;  %10832 = vmatpush.bf16.msrb.mxu3 %v9057_v37  ;;  %v10595_v24 = vadd.f32 %v10594_v15, %v2375_v61  ;;  %v10608_v25 = vadd.f32 %v10607_v16, %v2376_v63  ;;  %v14557_v36 = vor.u32 %v17346_v23, %v14554_v27  ;;  %v17184_v37 = vld [vmem:[%s18935_s22 + $0xc24] sm:$0xf]  ;;  %v12618_v27 = vld [vmem:[%s18935_s22 + $0x490] sm:$0xf0] }
 0x5d4   : > { %10845 = vmatpush.bf16.msra.mxu0 %v9060_v39  ;;  %10858 = vmatpush.bf16.msra.mxu1 %v9063_v45  ;;  %v13906_v39 = vld [vmem:[%s18935_s22 + $0xea8] sm:$0xf0] }
 0x5d5   : > { %16756 = vmatmul.msk.bf16.vlgmr.msrb.gmra.mxu0 %vm8664_vm9, %v19267_v12  ;;  %16757 = vmatmul.msk.bf16.vlgmr.msrb.gmra.mxu1 %vm8664_vm9, %v19267_v12  ;;  %18272 = vtanh.f32 %v10595_v24  ;;  %v10568_v52 = vpop.f32.mrf.mxu2  ;;  %v10581_v42 = vpop.f32.mrf.mxu3  ;;  %v2209_v45 = vld [vmem:[%s18935_s22 + $0x2588] sm:$0xff] }
 0x5d6   : > { %18274 = vtanh.f32 %v10608_v25  ;;  %v10582_v44 = vadd.f32 %v10581_v42, %v2374_v32  ;;  %v10569_v58 = vadd.f32 %v10568_v52, %v2373_v33  ;;  %v6206_v61 = vunpack.c.l.b16 %v2209_v45  ;;  %v17834_v52 = vld [vmem:[%s18935_s22 + $0x2074] sm:$0xf] }
 0x5d7   : > { %10820 = vmatpush.bf16.msrb.mxu2 %v16497_v60  ;;  %10833 = vmatpush.bf16.msrb.mxu3 %v16501_v47  ;;  %v13256_v60 = vld [vmem:[%s18935_s22 + $0x710] sm:$0xf]  ;;  %v17103_v47 = vld [vmem:[%s18935_s22 + $0x994] sm:$0xf0]  ;;  %v6207_v14 = vunpack.c.h.b16 %v2209_v45  ;;  %v16522_v45 = vld [vmem:[%s18935_s22 + $0x2300] sm:$0xf0] }
 0x5d8   : > { %10846 = vmatpush.bf16.msra.mxu0 %v16505_v0  ;;  %10859 = vmatpush.bf16.msra.mxu1 %v16509_v49  ;;  %v13909_v0 = vor.u32 %v17184_v37, %v13906_v39  ;;  %v13913_v49 = vor.u32 %v17266_v53, %v13912_v40  ;;  %18276 = vtanh.f32 %v10582_v44  ;;  %v13257_v4 = vor.u32 %v17103_v47, %v13256_v60  ;;  %v16514_v53 = vld [vmem:[%s18935_s22 + $0x22f8] sm:$0xf0]  ;;  %v15864_v60 = vld [vmem:[%s18935_s22 + $0x1b60] sm:$0xf]  ;;  %v17753_v47 = vld [vmem:[%s18935_s22 + $0x1de4] sm:$0xf0] }
 0x5d9   : > { %18278 = vtanh.f32 %v10569_v58  ;;  %v7502_v23 = vpack.c.b16 %v6206_v61, %v6206_v61  ;;  %v7503_v33 = vpack.c.b16 %v6207_v14, %v6207_v14  ;;  %v15865_v22 = vor.u32 %v17753_v47, %v15864_v60  ;;  %v17105_v60 = vld [vmem:[%s18935_s22 + $0x9a4] sm:$0xf0] }
 0x5da   : > { %v10596_v62 = vpop.f32.mrf.mxu0  ;;  %v10609_v48 = vpop.f32.mrf.mxu1 }
 0x5db   : > { %10821 = vmatpush.bf16.msrb.mxu2 %v15849_v57  ;;  %10834 = vmatpush.bf16.msrb.mxu3 %v15853_v59  ;;  %v6204_v57 = vunpack.c.l.b16 %v2208_v56  ;;  %v6205_v59 = vunpack.c.h.b16 %v2208_v56  ;;  %v18273_v63 = vpop.eup %18272  ;;  %v9072_v37 = vsel %vm8668_vm3, %v7502_v23, 0  ;;  %v9075_v44 = vsel %vm8668_vm3, %v7503_v33, 0  ;;  %v17835_v56 = vld [vmem:[%s18935_s22 + $0x207c] sm:$0xf]  ;;  %v17672_v62 = vld [vmem:[%s18935_s22 + $0x1b64] sm:$0xf] }
 0x5dc   : > { %10847 = vmatpush.bf16.msra.mxu0 %v15857_v6  ;;  %10860 = vmatpush.bf16.msra.mxu1 %v15861_v8  ;;  %v18275_v2 = vpop.eup %18274  ;;  %v13261_v6 = vor.u32 %v17022_v50, %v13258_v5  ;;  %v13265_v8 = vor.u32 %v17104_v1, %v13264_v7  ;;  %v11667_v24 = vrot.slane %v18273_v63, 4  ;;  %v16521_v48 = vor.u32 %v17916_v55, %v16520_v43  ;;  %v21739_v50 = vld [vmem:[%s19570_s13 + $0x70] sm:$0xff]  ;;  %v15874_v1 = vld [vmem:[%s18935_s22 + $0x1df0] sm:$0xf0]  ;;  %v17591_v63 = vld [vmem:[%s18935_s22 + $0x18d4] sm:$0xf0] }
 0x5dd   : > { %v10570_v15 = vpop.f32.mrf.mxu2  ;;  %v10583_v16 = vpop.f32.mrf.mxu3  ;;  %v7500_v20 = vpack.c.b16 %v6204_v57, %v6204_v57  ;;  %v7501_v21 = vpack.c.b16 %v6205_v59, %v6205_v59  ;;  %v11668_v25 = vrot.slane %v18275_v2, 2  ;;  %v17754_v5 = vld [vmem:[%s18935_s22 + $0x1dec] sm:$0xf0]  ;;  %v17673_v7 = vld [vmem:[%s18935_s22 + $0x1b6c] sm:$0xf]  ;;  %v2379_v59 = vperm.slane %v21739_v50, 2 }
 0x5de   : > { %v18277_v28 = vpop.eup %18276  ;;  %v2380_v61 = vperm.slane %v21739_v50, 3  ;;  %v17510_v2 = vld [vmem:[%s18935_s22 + $0x1654] sm:$0xf]  ;;  %v15217_v16 = vor.u32 %v17591_v63, %v15216_v54  ;;  %v13920_v33 = vld [vmem:[%s18935_s22 + $0xc30] sm:$0xf] }
 0x5df   : > { %10822 = vmatpush.bf16.msrb.mxu2 %v15201_v17  ;;  %10835 = vmatpush.bf16.msrb.mxu3 %v15205_v18  ;;  %v12610_v17 = vld [vmem:[%s18935_s22 + $0x488] sm:$0xf0]  ;;  %v12616_v18 = vld [vmem:[%s18935_s22 + $0x208] sm:$0xf]  ;;  %v11666_v30 = vrot.slane %v18277_v28, 6  ;;  %v18279_v38 = vpop.eup %18278  ;;  %v11790_v39 = vsel %vm11708_vm10, %v11667_v24, %v11668_v25 }
 0x5e0   : > { %10848 = vmatpush.bf16.msra.mxu0 %v15209_v19  ;;  %10861 = vmatpush.bf16.msra.mxu1 %v15213_v26  ;;  %v16942_v19 = vld [vmem:[%s18935_s22 + $0x48c] sm:$0xf0]  ;;  %v16861_v26 = vld [vmem:[%s18935_s22 + $0x20c] sm:$0xf]  ;;  %v12613_v31 = vor.u32 %v16860_v13, %v12610_v17  ;;  %v15226_v13 = vld [vmem:[%s18935_s22 + $0x18e0] sm:$0xf0] }
 0x5e1   : > { %v12617_v32 = vor.u32 %v16942_v19, %v12616_v18  ;;  %v12621_v34 = vor.u32 %v16861_v26, %v12618_v27  ;;  %v11789_v40 = vsel %vm11706_vm11, %v18279_v38, %v11666_v30  ;;  %v14568_v19 = vld [vmem:[%s18935_s22 + $0x1140] sm:$0xf]  ;;  %v15229_v25 = vor.u32 %v17511_v11, %v15226_v13  ;;  %v14570_v26 = vld [vmem:[%s18935_s22 + $0x13c8] sm:$0xf0]  ;;  %v14576_v27 = vld [vmem:[%s18935_s22 + $0x1148] sm:$0xf] }
 0x5e2   : > { %v11791_v42 = vsel %vm8668_vm3, %v11789_v40, %v11790_v39  ;;  %v17430_v28 = vld [vmem:[%s18935_s22 + $0x13cc] sm:$0xf0]  ;;  %v14578_v30 = vld [vmem:[%s18935_s22 + $0x13d0] sm:$0xf0]  ;;  %v17267_v38 = vld [vmem:[%s18935_s22 + $0xeb4] sm:$0xf0] }
 0x5e3   : > { %10823 = vmatpush.bf16.msrb.mxu2 %v14553_v35  ;;  %10836 = vmatpush.bf16.msrb.mxu3 %v14557_v36  ;;  %v9066_v35 = vsel %vm8668_vm3, %v7500_v20, 0  ;;  %v9069_v36 = vsel %vm8668_vm3, %v7501_v21, 0  ;;  %11897 = vst [vmem:[%s19647_s14 + $0xd8] sm:$0xff] %v11791_v42  ;;  %v17429_v20 = vld [vmem:[%s18935_s22 + $0x13c4] sm:$0xf0]  ;;  %v14577_v40 = vor.u32 %v17430_v28, %v14576_v27 }
 0x5e4   : > { %10849 = vmatpush.bf16.msra.mxu0 %v14561_v51  ;;  %10862 = vmatpush.bf16.msra.mxu1 %v14565_v41  ;;  %v16512_v51 = vld [vmem:[%s18935_s22 + $0x2070] sm:$0xf]  ;;  %v17915_v41 = vld [vmem:[%s18935_s22 + $0x22f4] sm:$0xf0]  ;;  %v17348_v21 = vld [vmem:[%s18935_s22 + $0x1144] sm:$0xf] }
 0x5e5   : > { %v16513_v58 = vor.u32 %v17915_v41, %v16512_v51  ;;  %v13928_v39 = vld [vmem:[%s18935_s22 + $0xc38] sm:$0xf]  ;;  %v17268_v42 = vld [vmem:[%s18935_s22 + $0xebc] sm:$0xf0]  ;;  %v13930_v43 = vld [vmem:[%s18935_s22 + $0xec0] sm:$0xf0] }
 0x5e6   : > { %v17025_v54 = vld [vmem:[%s18935_s22 + $0x72c] sm:$0xf]  ;;  %v16943_v11 = vld [vmem:[%s18935_s22 + $0x494] sm:$0xf0]  ;;  %v16862_v13 = vld [vmem:[%s18935_s22 + $0x214] sm:$0xf] }
 0x5e7   : > { %10824 = vmatpush.bf16.msrb.mxu2 %v13905_v46  ;;  %10837 = vmatpush.bf16.msrb.mxu3 %v13909_v0  ;;  %v16517_v46 = vor.u32 %v17834_v52, %v16514_v53  ;;  %v16525_v0 = vor.u32 %v17835_v56, %v16522_v45  ;;  %v17187_v53 = vld [vmem:[%s18935_s22 + $0xc3c] sm:$0xf]  ;;  %v12634_v27 = vld [vmem:[%s18935_s22 + $0x4a0] sm:$0xf0] }
 0x5e8   : > { %10850 = vmatpush.bf16.msra.mxu0 %v13913_v49  ;;  %10863 = vmatpush.bf16.msra.mxu1 %v13917_v3  ;;  %v15866_v49 = vld [vmem:[%s18935_s22 + $0x1de8] sm:$0xf0]  ;;  %v15872_v3 = vld [vmem:[%s18935_s22 + $0x1b68] sm:$0xf]  ;;  %v2211_v56 = vld [vmem:[%s18935_s22 + $0x2598] sm:$0xff] }
 0x5e9   : > { %v15869_v57 = vor.u32 %v17672_v62, %v15866_v49  ;;  %v13933_v49 = vor.u32 %v17187_v53, %v13930_v43  ;;  %v16530_v53 = vld [vmem:[%s18935_s22 + $0x2308] sm:$0xf0]  ;;  %v16536_v43 = vld [vmem:[%s18935_s22 + $0x2088] sm:$0xf] }
 0x5eb   : > { %10825 = vmatpush.bf16.msrb.mxu2 %v13257_v4  ;;  %10838 = vmatpush.bf16.msrb.mxu3 %v13261_v6  ;;  %v15873_v4 = vor.u32 %v17754_v5, %v15872_v3  ;;  %v15877_v6 = vor.u32 %v17673_v7, %v15874_v1  ;;  %v17024_v3 = vld [vmem:[%s18935_s22 + $0x724] sm:$0xf]  ;;  %v13274_v5 = vld [vmem:[%s18935_s22 + $0x9a8] sm:$0xf0]  ;;  %v13280_v7 = vld [vmem:[%s18935_s22 + $0x728] sm:$0xf] }
 0x5ec   : > { %10851 = vmatpush.bf16.msra.mxu0 %v13265_v8  ;;  %10864 = vmatpush.bf16.msra.mxu1 %v13269_v9  ;;  %v15218_v8 = vld [vmem:[%s18935_s22 + $0x18d8] sm:$0xf0]  ;;  %v15224_v9 = vld [vmem:[%s18935_s22 + $0x1658] sm:$0xf]  ;;  %v17106_v1 = vld [vmem:[%s18935_s22 + $0x9ac] sm:$0xf0] }
 0x5ed   : > { %v15221_v17 = vor.u32 %v17510_v2, %v15218_v8  ;;  %v15225_v18 = vor.u32 %v17592_v10, %v15224_v9  ;;  %v13281_v8 = vor.u32 %v17106_v1, %v13280_v7  ;;  %v12624_v10 = vld [vmem:[%s18935_s22 + $0x210] sm:$0xf]  ;;  %v17675_v7 = vld [vmem:[%s18935_s22 + $0x1b7c] sm:$0xf]  ;;  %v15890_v1 = vld [vmem:[%s18935_s22 + $0x1e00] sm:$0xf0] }
 0x5ef   : > { %10826 = vmatpush.bf16.msrb.mxu2 %v12609_v29  ;;  %10839 = vmatpush.bf16.msrb.mxu3 %v12613_v31  ;;  %v17349_v29 = vld [vmem:[%s18935_s22 + $0x114c] sm:$0xf]  ;;  %v2378_v31 = vperm.slane %v21739_v50, 1 }
 0x5f0   : > { %10852 = vmatpush.bf16.msra.mxu0 %v12617_v32  ;;  %10865 = vmatpush.bf16.msra.mxu1 %v12621_v34  ;;  %v2377_v32 = vperm.slane %v21739_v50, 0  ;;  %v14569_v34 = vor.u32 %v17429_v20, %v14568_v19  ;;  %v14581_v51 = vor.u32 %v17349_v29, %v14578_v30  ;;  %v16944_v19 = vld [vmem:[%s18935_s22 + $0x49c] sm:$0xf0]  ;;  %v12625_v29 = vor.u32 %v16943_v11, %v12624_v10  ;;  %v17594_v10 = vld [vmem:[%s18935_s22 + $0x18ec] sm:$0xf0] }
 0x5f1   : > { %v17513_v11 = vld [vmem:[%s18935_s22 + $0x166c] sm:$0xf] }
 0x5f2   : > { %16758 = vmatmul.msk.bf16.vlgmr.msrb.gmra.mxu2 %vm8664_vm9, %v19267_v12  ;;  %16759 = vmatmul.msk.bf16.vlgmr.msrb.gmra.mxu3 %vm8664_vm9, %v19267_v12  ;;  %v10646_v14 = vpop.f32.mrf.mxu0  ;;  %v10659_v15 = vpop.f32.mrf.mxu1 }
 0x5f3   : > { %10871 = vmatpush.bf16.msra.mxu2 %v9066_v35  ;;  %10884 = vmatpush.bf16.msra.mxu3 %v9069_v36  ;;  %v10647_v23 = vadd.f32 %v10646_v14, %v2379_v59  ;;  %v10660_v24 = vadd.f32 %v10659_v15, %v2380_v61  ;;  %v14573_v35 = vor.u32 %v17348_v21, %v14570_v26  ;;  %v17186_v36 = vld [vmem:[%s18935_s22 + $0xc34] sm:$0xf]  ;;  %v6210_v61 = vunpack.c.l.b16 %v2211_v56  ;;  %v16863_v26 = vld [vmem:[%s18935_s22 + $0x21c] sm:$0xf] }
 0x5f4   : > { %10897 = vmatpush.bf16.msrb.mxu0 %v9072_v37  ;;  %10910 = vmatpush.bf16.msrb.mxu1 %v9075_v44  ;;  %v13922_v37 = vld [vmem:[%s18935_s22 + $0xeb8] sm:$0xf0]  ;;  %v2210_v44 = vld [vmem:[%s18935_s22 + $0x2590] sm:$0xff]  ;;  %v6211_v14 = vunpack.c.h.b16 %v2211_v56  ;;  %v17837_v56 = vld [vmem:[%s18935_s22 + $0x208c] sm:$0xf] }
 0x5f5   : > { %16760 = vmatmul.msk.bf16.vlgmr.msra.gmra.mxu0 %vm8664_vm9, %v19267_v12  ;;  %16761 = vmatmul.msk.bf16.vlgmr.msra.gmra.mxu1 %vm8664_vm9, %v19267_v12  ;;  %18280 = vtanh.f32 %v10647_v23  ;;  %v10620_v41 = vpop.f32.mrf.mxu2  ;;  %v10633_v52 = vpop.f32.mrf.mxu3  ;;  %v6209_v59 = vunpack.c.h.b16 %v2210_v44  ;;  %v7506_v23 = vpack.c.b16 %v6210_v61, %v6210_v61  ;;  %v2384_v61 = vperm.slane %v21739_v50, 7 }
 0x5f6   : > { %18282 = vtanh.f32 %v10660_v24  ;;  %v10634_v55 = vadd.f32 %v10633_v52, %v2378_v31  ;;  %v10621_v45 = vadd.f32 %v10620_v41, %v2377_v32  ;;  %v17917_v41 = vld [vmem:[%s18935_s22 + $0x2304] sm:$0xf0]  ;;  %v17836_v52 = vld [vmem:[%s18935_s22 + $0x2084] sm:$0xf] }
 0x5f7   : > { %10872 = vmatpush.bf16.msra.mxu2 %v16513_v58  ;;  %10885 = vmatpush.bf16.msra.mxu3 %v16517_v46  ;;  %v13921_v58 = vor.u32 %v17267_v38, %v13920_v33  ;;  %v13272_v46 = vld [vmem:[%s18935_s22 + $0x720] sm:$0xf]  ;;  %v7505_v21 = vpack.c.b16 %v6209_v59, %v6209_v59  ;;  %v7507_v33 = vpack.c.b16 %v6211_v14, %v6211_v14  ;;  %v2383_v59 = vperm.slane %v21739_v50, 6 }
 0x5f8   : > { %10898 = vmatpush.bf16.msrb.mxu0 %v16521_v48  ;;  %10911 = vmatpush.bf16.msrb.mxu1 %v16525_v0  ;;  %v13925_v48 = vor.u32 %v17186_v36, %v13922_v37  ;;  %v13929_v0 = vor.u32 %v17268_v42, %v13928_v39  ;;  %18284 = vtanh.f32 %v10634_v55  ;;  %v9084_v37 = vsel %vm8668_vm3, %v7506_v23, 0  ;;  %v17918_v55 = vld [vmem:[%s18935_s22 + $0x230c] sm:$0xf0] }
 0x5f9   : > { %18286 = vtanh.f32 %v10621_v45  ;;  %v9081_v36 = vsel %vm8668_vm3, %v7505_v21, 0  ;;  %v16538_v45 = vld [vmem:[%s18935_s22 + $0x2310] sm:$0xf0] }
 0x5fa   : > { %v10648_v47 = vpop.f32.mrf.mxu0  ;;  %v10661_v62 = vpop.f32.mrf.mxu1  ;;  %v17350_v21 = vld [vmem:[%s18935_s22 + $0x1154] sm:$0xf] }
 0x5fb   : > { %10873 = vmatpush.bf16.msra.mxu2 %v15865_v22  ;;  %10886 = vmatpush.bf16.msra.mxu3 %v15869_v57  ;;  %v13282_v22 = vld [vmem:[%s18935_s22 + $0x9b0] sm:$0xf0]  ;;  %v6208_v57 = vunpack.c.l.b16 %v2210_v44  ;;  %v18281_v63 = vpop.eup %18280  ;;  %v9087_v44 = vsel %vm8668_vm3, %v7507_v33, 0  ;;  %v17755_v47 = vld [vmem:[%s18935_s22 + $0x1df4] sm:$0xf0]  ;;  %v16537_v62 = vor.u32 %v17918_v55, %v16536_v43  ;;  %v2212_v55 = vld [vmem:[%s18935_s22 + $0x25a0] sm:$0xff] }
 0x5fc   : > { %10899 = vmatpush.bf16.msrb.mxu0 %v15873_v4  ;;  %10912 = vmatpush.bf16.msrb.mxu1 %v15877_v6  ;;  %v18283_v2 = vpop.eup %18282  ;;  %v13273_v4 = vor.u32 %v17105_v60, %v13272_v46  ;;  %v13277_v6 = vor.u32 %v17024_v3, %v13274_v5  ;;  %v13285_v9 = vor.u32 %v17025_v54, %v13282_v22  ;;  %v11670_v24 = vrot.slane %v18281_v63, 4  ;;  %v15880_v60 = vld [vmem:[%s18935_s22 + $0x1b70] sm:$0xf]  ;;  %v15888_v3 = vld [vmem:[%s18935_s22 + $0x1b78] sm:$0xf] }
 0x5fd   : > { %v10622_v15 = vpop.f32.mrf.mxu2  ;;  %v7504_v20 = vpack.c.b16 %v6208_v57, %v6208_v57  ;;  %v16533_v46 = vor.u32 %v17836_v52, %v16530_v53  ;;  %v17756_v5 = vld [vmem:[%s18935_s22 + $0x1dfc] sm:$0xf0]  ;;  %v15881_v22 = vor.u32 %v17755_v47, %v15880_v60  ;;  %v17593_v63 = vld [vmem:[%s18935_s22 + $0x18e4] sm:$0xf0]  ;;  %v17270_v52 = vld [vmem:[%s18935_s22 + $0xecc] sm:$0xf0] }
 0x5fe   : > { %v18285_v28 = vpop.eup %18284  ;;  %v15232_v54 = vld [vmem:[%s18935_s22 + $0x1660] sm:$0xf]  ;;  %v13946_v53 = vld [vmem:[%s18935_s22 + $0xed0] sm:$0xf0] }
 0x5ff   : > { %10874 = vmatpush.bf16.msra.mxu2 %v15217_v16  ;;  %10887 = vmatpush.bf16.msra.mxu3 %v15221_v17  ;;  %v10635_v16 = vpop.f32.mrf.mxu3  ;;  %v12626_v17 = vld [vmem:[%s18935_s22 + $0x498] sm:$0xf0]  ;;  %v11669_v30 = vrot.slane %v18285_v28, 6  ;;  %v18287_v38 = vpop.eup %18286  ;;  %v17432_v28 = vld [vmem:[%s18935_s22 + $0x13dc] sm:$0xf0] }
 0x600   : > { %10900 = vmatpush.bf16.msrb.mxu0 %v15225_v18  ;;  %10913 = vmatpush.bf16.msrb.mxu1 %v15229_v25  ;;  %v12632_v18 = vld [vmem:[%s18935_s22 + $0x218] sm:$0xf]  ;;  %v11671_v25 = vrot.slane %v18283_v2, 2  ;;  %v12629_v31 = vor.u32 %v16862_v13, %v12626_v17  ;;  %v17512_v2 = vld [vmem:[%s18935_s22 + $0x1664] sm:$0xf]  ;;  %v15233_v16 = vor.u32 %v17593_v63, %v15232_v54 }
 0x601   : > { %v12633_v32 = vor.u32 %v16944_v19, %v12632_v18  ;;  %v15242_v13 = vld [vmem:[%s18935_s22 + $0x18f0] sm:$0xf0]  ;;  %v14584_v19 = vld [vmem:[%s18935_s22 + $0x1150] sm:$0xf]  ;;  %v13936_v33 = vld [vmem:[%s18935_s22 + $0xc40] sm:$0xf] }
 0x602   : > { %v11793_v39 = vsel %vm11708_vm10, %v11670_v24, %v11671_v25  ;;  %v15245_v25 = vor.u32 %v17513_v11, %v15242_v13  ;;  %v13298_v54 = vld [vmem:[%s18935_s22 + $0x9c0] sm:$0xf0] }
 0x603   : > { %10875 = vmatpush.bf16.msra.mxu2 %v14569_v34  ;;  %10888 = vmatpush.bf16.msra.mxu3 %v14573_v35  ;;  %v12637_v34 = vor.u32 %v16863_v26, %v12634_v27  ;;  %v9078_v35 = vsel %vm8668_vm3, %v7504_v20, 0  ;;  %v17431_v20 = vld [vmem:[%s18935_s22 + $0x13d4] sm:$0xf0]  ;;  %v14586_v26 = vld [vmem:[%s18935_s22 + $0x13d8] sm:$0xf0] }
 0x604   : > { %10901 = vmatpush.bf16.msrb.mxu0 %v14577_v40  ;;  %10914 = vmatpush.bf16.msrb.mxu1 %v14581_v51  ;;  %v11792_v40 = vsel %vm11706_vm11, %v18287_v38, %v11669_v30  ;;  %v16528_v51 = vld [vmem:[%s18935_s22 + $0x2080] sm:$0xf]  ;;  %v14592_v27 = vld [vmem:[%s18935_s22 + $0x1158] sm:$0xf]  ;;  %v14594_v30 = vld [vmem:[%s18935_s22 + $0x13e0] sm:$0xf0] }
 0x605   : > { %v11794_v42 = vsel %vm8668_vm3, %v11792_v40, %v11793_v39  ;;  %v17269_v38 = vld [vmem:[%s18935_s22 + $0xec4] sm:$0xf0]  ;;  %v16864_v11 = vld [vmem:[%s18935_s22 + $0x224] sm:$0xf] }
 0x606   : > { %11898 = vst [vmem:[%s19647_s14 + $0xe0] sm:$0xff] %v11794_v42  ;;  %v13944_v39 = vld [vmem:[%s18935_s22 + $0xc48] sm:$0xf]  ;;  %v17189_v42 = vld [vmem:[%s18935_s22 + $0xc4c] sm:$0xf] }
 0x607   : > { %10876 = vmatpush.bf16.msra.mxu2 %v13921_v58  ;;  %10889 = vmatpush.bf16.msra.mxu3 %v13925_v48  ;;  %v16529_v58 = vor.u32 %v17917_v41, %v16528_v51  ;;  %v16541_v48 = vor.u32 %v17837_v56, %v16538_v45  ;;  %v13937_v45 = vor.u32 %v17269_v38, %v13936_v33 }
 0x608   : > { %10902 = vmatpush.bf16.msrb.mxu0 %v13929_v0  ;;  %10915 = vmatpush.bf16.msrb.mxu1 %v13933_v49  ;;  %v17674_v0 = vld [vmem:[%s18935_s22 + $0x1b74] sm:$0xf]  ;;  %v15882_v49 = vld [vmem:[%s18935_s22 + $0x1df8] sm:$0xf0] }
 0x609   : > { %v15885_v57 = vor.u32 %v17674_v0, %v15882_v49  ;;  %v13949_v0 = vor.u32 %v17189_v42, %v13946_v53  ;;  %v17026_v49 = vld [vmem:[%s18935_s22 + $0x734] sm:$0xf]  ;;  %v16552_v42 = vld [vmem:[%s18935_s22 + $0x2098] sm:$0xf]  ;;  %v17920_v53 = vld [vmem:[%s18935_s22 + $0x231c] sm:$0xf0] }
 0x60b   : > { %10877 = vmatpush.bf16.msra.mxu2 %v13273_v4  ;;  %10890 = vmatpush.bf16.msra.mxu3 %v13277_v6  ;;  %v15889_v4 = vor.u32 %v17756_v5, %v15888_v3  ;;  %v15893_v6 = vor.u32 %v17675_v7, %v15890_v1  ;;  %v13290_v3 = vld [vmem:[%s18935_s22 + $0x9b8] sm:$0xf0]  ;;  %v13296_v5 = vld [vmem:[%s18935_s22 + $0x738] sm:$0xf]  ;;  %v17108_v7 = vld [vmem:[%s18935_s22 + $0x9bc] sm:$0xf0] }
 0x60c   : > { %10903 = vmatpush.bf16.msrb.mxu0 %v13281_v8  ;;  %10916 = vmatpush.bf16.msrb.mxu1 %v13285_v9  ;;  %v15234_v8 = vld [vmem:[%s18935_s22 + $0x18e8] sm:$0xf0]  ;;  %v15240_v9 = vld [vmem:[%s18935_s22 + $0x1668] sm:$0xf]  ;;  %v17027_v1 = vld [vmem:[%s18935_s22 + $0x73c] sm:$0xf] }
 0x60d   : > { %v15237_v17 = vor.u32 %v17512_v2, %v15234_v8  ;;  %v15241_v18 = vor.u32 %v17594_v10, %v15240_v9  ;;  %v13301_v8 = vor.u32 %v17027_v1, %v13298_v54  ;;  %v12640_v9 = vld [vmem:[%s18935_s22 + $0x220] sm:$0xf]  ;;  %v16945_v10 = vld [vmem:[%s18935_s22 + $0x4a4] sm:$0xf0]  ;;  %v15248_v1 = vld [vmem:[%s18935_s22 + $0x1670] sm:$0xf] }
 0x60f   : > { %10878 = vmatpush.bf16.msra.mxu2 %v12625_v29  ;;  %10891 = vmatpush.bf16.msra.mxu3 %v12629_v31  ;;  %v17351_v29 = vld [vmem:[%s18935_s22 + $0x115c] sm:$0xf]  ;;  %v2382_v31 = vperm.slane %v21739_v50, 5 }
 0x610   : > { %10904 = vmatpush.bf16.msrb.mxu0 %v12633_v32  ;;  %10917 = vmatpush.bf16.msrb.mxu1 %v12637_v34  ;;  %v2381_v32 = vperm.slane %v21739_v50, 4  ;;  %v14585_v34 = vor.u32 %v17431_v20, %v14584_v19  ;;  %v14593_v50 = vor.u32 %v17432_v28, %v14592_v27  ;;  %v14597_v40 = vor.u32 %v17351_v29, %v14594_v30 }
 0x611   : > { %v12641_v28 = vor.u32 %v16945_v10, %v12640_v9  ;;  %v17596_v9 = vld [vmem:[%s18935_s22 + $0x18fc] sm:$0xf0]  ;;  %v17515_v10 = vld [vmem:[%s18935_s22 + $0x167c] sm:$0xf] }
 0x612   : > { %16762 = vmatmul.msk.bf16.vlgmr.msra.gmra.mxu2 %vm8664_vm9, %v19267_v12  ;;  %16763 = vmatmul.msk.bf16.vlgmr.msra.gmra.mxu3 %vm8664_vm9, %v19267_v12  ;;  %v10698_v14 = vpop.f32.mrf.mxu0  ;;  %v10711_v15 = vpop.f32.mrf.mxu1 }
 0x613   : > { %10923 = vmatpush.bf16.msrb.mxu2 %v9078_v35  ;;  %10936 = vmatpush.bf16.msrb.mxu3 %v9081_v36  ;;  %v10699_v23 = vadd.f32 %v10698_v14, %v2383_v59  ;;  %v10712_v24 = vadd.f32 %v10711_v15, %v2384_v61  ;;  %v14589_v35 = vor.u32 %v17350_v21, %v14586_v26  ;;  %v17188_v36 = vld [vmem:[%s18935_s22 + $0xc44] sm:$0xf]  ;;  %v12650_v26 = vld [vmem:[%s18935_s22 + $0x4b0] sm:$0xf0] }
 0x614   : > { %10949 = vmatpush.bf16.msra.mxu0 %v9084_v37  ;;  %10962 = vmatpush.bf16.msra.mxu1 %v9087_v44  ;;  %v13938_v37 = vld [vmem:[%s18935_s22 + $0xec8] sm:$0xf0] }
 0x615   : > { %16764 = vmatmul.msk.bf16.vlgmr.msrb.gmra.mxu0 %vm8664_vm9, %v19267_v12  ;;  %16765 = vmatmul.msk.bf16.vlgmr.msrb.gmra.mxu1 %vm8664_vm9, %v19267_v12  ;;  %18288 = vtanh.f32 %v10699_v23  ;;  %v10672_v51 = vpop.f32.mrf.mxu2  ;;  %v10685_v41 = vpop.f32.mrf.mxu3  ;;  %v2213_v44 = vld [vmem:[%s18935_s22 + $0x25a8] sm:$0xff] }
 0x616   : > { %18290 = vtanh.f32 %v10712_v24  ;;  %v10686_v43 = vadd.f32 %v10685_v41, %v2382_v31  ;;  %v10673_v56 = vadd.f32 %v10672_v51, %v2381_v32  ;;  %v6214_v59 = vunpack.c.l.b16 %v2213_v44  ;;  %v17838_v51 = vld [vmem:[%s18935_s22 + $0x2094] sm:$0xf] }
 0x617   : > { %10924 = vmatpush.bf16.msrb.mxu2 %v16529_v58  ;;  %10937 = vmatpush.bf16.msrb.mxu3 %v16533_v46  ;;  %v13288_v58 = vld [vmem:[%s18935_s22 + $0x730] sm:$0xf]  ;;  %v17107_v46 = vld [vmem:[%s18935_s22 + $0x9b4] sm:$0xf0]  ;;  %v6215_v13 = vunpack.c.h.b16 %v2213_v44  ;;  %v16554_v44 = vld [vmem:[%s18935_s22 + $0x2320] sm:$0xf0] }
 0x618   : > { %10950 = vmatpush.bf16.msra.mxu0 %v16537_v62  ;;  %10963 = vmatpush.bf16.msra.mxu1 %v16541_v48  ;;  %v13941_v62 = vor.u32 %v17188_v36, %v13938_v37  ;;  %v13945_v48 = vor.u32 %v17270_v52, %v13944_v39  ;;  %18292 = vtanh.f32 %v10686_v43  ;;  %v13289_v2 = vor.u32 %v17107_v46, %v13288_v58  ;;  %v16546_v52 = vld [vmem:[%s18935_s22 + $0x2318] sm:$0xf0]  ;;  %v15896_v58 = vld [vmem:[%s18935_s22 + $0x1b80] sm:$0xf]  ;;  %v17757_v46 = vld [vmem:[%s18935_s22 + $0x1e04] sm:$0xf0] }
 0x619   : > { %18294 = vtanh.f32 %v10673_v56  ;;  %v7510_v21 = vpack.c.b16 %v6214_v59, %v6214_v59  ;;  %v7511_v32 = vpack.c.b16 %v6215_v13, %v6215_v13  ;;  %v15897_v54 = vor.u32 %v17757_v46, %v15896_v58  ;;  %v17109_v58 = vld [vmem:[%s18935_s22 + $0x9c4] sm:$0xf0] }
 0x61a   : > { %v10700_v60 = vpop.f32.mrf.mxu0  ;;  %v10713_v47 = vpop.f32.mrf.mxu1 }
 0x61b   : > { %10925 = vmatpush.bf16.msrb.mxu2 %v15881_v22  ;;  %10938 = vmatpush.bf16.msrb.mxu3 %v15885_v57  ;;  %v6212_v22 = vunpack.c.l.b16 %v2212_v55  ;;  %v6213_v57 = vunpack.c.h.b16 %v2212_v55  ;;  %v18289_v61 = vpop.eup %18288  ;;  %v9096_v36 = vsel %vm8668_vm3, %v7510_v21, 0  ;;  %v9099_v43 = vsel %vm8668_vm3, %v7511_v32, 0  ;;  %v17839_v55 = vld [vmem:[%s18935_s22 + $0x209c] sm:$0xf]  ;;  %v17676_v60 = vld [vmem:[%s18935_s22 + $0x1b84] sm:$0xf] }
 0x61c   : > { %10951 = vmatpush.bf16.msra.mxu0 %v15889_v4  ;;  %10964 = vmatpush.bf16.msra.mxu1 %v15893_v6  ;;  %v18291_v63 = vpop.eup %18290  ;;  %v13293_v4 = vor.u32 %v17026_v49, %v13290_v3  ;;  %v13297_v6 = vor.u32 %v17108_v7, %v13296_v5  ;;  %v11673_v23 = vrot.slane %v18289_v61, 4  ;;  %v16553_v47 = vor.u32 %v17920_v53, %v16552_v42  ;;  %v21898_v49 = vld [vmem:[%s19570_s13 + $0x78] sm:$0xff]  ;;  %v13962_v42 = vld [vmem:[%s18935_s22 + $0xee0] sm:$0xf0] }
 0x61d   : > { %v10674_v14 = vpop.f32.mrf.mxu2  ;;  %v10687_v15 = vpop.f32.mrf.mxu3  ;;  %v7508_v19 = vpack.c.b16 %v6212_v22, %v6212_v22  ;;  %v7509_v20 = vpack.c.b16 %v6213_v57, %v6213_v57  ;;  %v11674_v24 = vrot.slane %v18291_v63, 2  ;;  %v17758_v3 = vld [vmem:[%s18935_s22 + $0x1e0c] sm:$0xf0]  ;;  %v17677_v5 = vld [vmem:[%s18935_s22 + $0x1b8c] sm:$0xf]  ;;  %v2387_v57 = vperm.slane %v21898_v49, 2 }
 0x61e   : > { %v18293_v27 = vpop.eup %18292  ;;  %v15906_v7 = vld [vmem:[%s18935_s22 + $0x1e10] sm:$0xf0]  ;;  %v2388_v59 = vperm.slane %v21898_v49, 3  ;;  %v17595_v61 = vld [vmem:[%s18935_s22 + $0x18f4] sm:$0xf0] }
 0x61f   : > { %10926 = vmatpush.bf16.msrb.mxu2 %v15233_v16  ;;  %10939 = vmatpush.bf16.msrb.mxu3 %v15237_v17  ;;  %v12642_v16 = vld [vmem:[%s18935_s22 + $0x4a8] sm:$0xf0]  ;;  %v12648_v17 = vld [vmem:[%s18935_s22 + $0x228] sm:$0xf]  ;;  %v11672_v29 = vrot.slane %v18293_v27, 6  ;;  %v18295_v33 = vpop.eup %18294  ;;  %v11796_v37 = vsel %vm11708_vm10, %v11673_v23, %v11674_v24  ;;  %v15249_v15 = vor.u32 %v17595_v61, %v15248_v1 }
 0x620   : > { %10952 = vmatpush.bf16.msra.mxu0 %v15241_v18  ;;  %10965 = vmatpush.bf16.msra.mxu1 %v15245_v25  ;;  %v16946_v18 = vld [vmem:[%s18935_s22 + $0x4ac] sm:$0xf0]  ;;  %v16865_v25 = vld [vmem:[%s18935_s22 + $0x22c] sm:$0xf]  ;;  %v12645_v30 = vor.u32 %v16864_v11, %v12642_v16  ;;  %v17514_v63 = vld [vmem:[%s18935_s22 + $0x1674] sm:$0xf] }
 0x621   : > { %v12649_v31 = vor.u32 %v16946_v18, %v12648_v17  ;;  %v12653_v38 = vor.u32 %v16865_v25, %v12650_v26  ;;  %v11795_v39 = vsel %vm11706_vm11, %v18295_v33, %v11672_v29  ;;  %v15258_v11 = vld [vmem:[%s18935_s22 + $0x1900] sm:$0xf0]  ;;  %v14600_v18 = vld [vmem:[%s18935_s22 + $0x1160] sm:$0xf]  ;;  %v14602_v25 = vld [vmem:[%s18935_s22 + $0x13e8] sm:$0xf0] }
 0x622   : > { %v11797_v41 = vsel %vm8668_vm3, %v11795_v39, %v11796_v37  ;;  %v15261_v24 = vor.u32 %v17515_v10, %v15258_v11  ;;  %v14608_v26 = vld [vmem:[%s18935_s22 + $0x1168] sm:$0xf]  ;;  %v17434_v27 = vld [vmem:[%s18935_s22 + $0x13ec] sm:$0xf0]  ;;  %v14610_v29 = vld [vmem:[%s18935_s22 + $0x13f0] sm:$0xf0] }
 0x623   : > { %10927 = vmatpush.bf16.msrb.mxu2 %v14585_v34  ;;  %10940 = vmatpush.bf16.msrb.mxu3 %v14589_v35  ;;  %v9090_v34 = vsel %vm8668_vm3, %v7508_v19, 0  ;;  %v9093_v35 = vsel %vm8668_vm3, %v7509_v20, 0  ;;  %11899 = vst [vmem:[%s19647_s14 + $0xe8] sm:$0xff] %v11797_v41  ;;  %v17433_v19 = vld [vmem:[%s18935_s22 + $0x13e4] sm:$0xf0]  ;;  %v14609_v39 = vor.u32 %v17434_v27, %v14608_v26 }
 0x624   : > { %10953 = vmatpush.bf16.msra.mxu0 %v14593_v50  ;;  %10966 = vmatpush.bf16.msra.mxu1 %v14597_v40  ;;  %v16544_v50 = vld [vmem:[%s18935_s22 + $0x2090] sm:$0xf]  ;;  %v17919_v40 = vld [vmem:[%s18935_s22 + $0x2314] sm:$0xf0]  ;;  %v17352_v20 = vld [vmem:[%s18935_s22 + $0x1164] sm:$0xf] }
 0x625   : > { %v16545_v56 = vor.u32 %v17919_v40, %v16544_v50  ;;  %v13952_v32 = vld [vmem:[%s18935_s22 + $0xc50] sm:$0xf]  ;;  %v17271_v33 = vld [vmem:[%s18935_s22 + $0xed4] sm:$0xf0]  ;;  %v17272_v41 = vld [vmem:[%s18935_s22 + $0xedc] sm:$0xf0] }
 0x626   : > { %v13960_v37 = vld [vmem:[%s18935_s22 + $0xc58] sm:$0xf]  ;;  %v17029_v1 = vld [vmem:[%s18935_s22 + $0x74c] sm:$0xf]  ;;  %v16866_v11 = vld [vmem:[%s18935_s22 + $0x234] sm:$0xf] }
 0x627   : > { %10928 = vmatpush.bf16.msrb.mxu2 %v13937_v45  ;;  %10941 = vmatpush.bf16.msrb.mxu3 %v13941_v62  ;;  %v16549_v45 = vor.u32 %v17838_v51, %v16546_v52  ;;  %v16557_v62 = vor.u32 %v17839_v55, %v16554_v44  ;;  %v17191_v52 = vld [vmem:[%s18935_s22 + $0xc5c] sm:$0xf]  ;;  %v16947_v10 = vld [vmem:[%s18935_s22 + $0x4b4] sm:$0xf0]  ;;  %v12666_v26 = vld [vmem:[%s18935_s22 + $0x4c0] sm:$0xf0] }
 0x628   : > { %10954 = vmatpush.bf16.msra.mxu0 %v13945_v48  ;;  %10967 = vmatpush.bf16.msra.mxu1 %v13949_v0  ;;  %v15898_v48 = vld [vmem:[%s18935_s22 + $0x1e08] sm:$0xf0]  ;;  %v15904_v0 = vld [vmem:[%s18935_s22 + $0x1b88] sm:$0xf]  ;;  %v2215_v55 = vld [vmem:[%s18935_s22 + $0x25b8] sm:$0xff] }
 0x629   : > { %v15901_v22 = vor.u32 %v17676_v60, %v15898_v48  ;;  %v13965_v48 = vor.u32 %v17191_v52, %v13962_v42  ;;  %v16562_v52 = vld [vmem:[%s18935_s22 + $0x2328] sm:$0xf0]  ;;  %v16568_v42 = vld [vmem:[%s18935_s22 + $0x20a8] sm:$0xf] }
 0x62b   : > { %10929 = vmatpush.bf16.msrb.mxu2 %v13289_v2  ;;  %10942 = vmatpush.bf16.msrb.mxu3 %v13293_v4  ;;  %v15905_v2 = vor.u32 %v17758_v3, %v15904_v0  ;;  %v15909_v4 = vor.u32 %v17677_v5, %v15906_v7  ;;  %v17028_v0 = vld [vmem:[%s18935_s22 + $0x744] sm:$0xf]  ;;  %v13306_v3 = vld [vmem:[%s18935_s22 + $0x9c8] sm:$0xf0]  ;;  %v13312_v5 = vld [vmem:[%s18935_s22 + $0x748] sm:$0xf] }
 0x62c   : > { %10955 = vmatpush.bf16.msra.mxu0 %v13297_v6  ;;  %10968 = vmatpush.bf16.msra.mxu1 %v13301_v8  ;;  %v15250_v6 = vld [vmem:[%s18935_s22 + $0x18f8] sm:$0xf0]  ;;  %v15256_v8 = vld [vmem:[%s18935_s22 + $0x1678] sm:$0xf]  ;;  %v17110_v7 = vld [vmem:[%s18935_s22 + $0x9cc] sm:$0xf0] }
 0x62d   : > { %v15253_v16 = vor.u32 %v17514_v63, %v15250_v6  ;;  %v15257_v17 = vor.u32 %v17596_v9, %v15256_v8  ;;  %v13313_v6 = vor.u32 %v17110_v7, %v13312_v5  ;;  %v12656_v9 = vld [vmem:[%s18935_s22 + $0x230] sm:$0xf]  ;;  %v17679_v5 = vld [vmem:[%s18935_s22 + $0x1b9c] sm:$0xf]  ;;  %v15922_v7 = vld [vmem:[%s18935_s22 + $0x1e20] sm:$0xf0] }
 0x62f   : > { %10930 = vmatpush.bf16.msrb.mxu2 %v12641_v28  ;;  %10943 = vmatpush.bf16.msrb.mxu3 %v12645_v30  ;;  %v17353_v28 = vld [vmem:[%s18935_s22 + $0x116c] sm:$0xf]  ;;  %v2386_v30 = vperm.slane %v21898_v49, 1 }
 0x630   : > { %10956 = vmatpush.bf16.msra.mxu0 %v12649_v31  ;;  %10969 = vmatpush.bf16.msra.mxu1 %v12653_v38  ;;  %v2385_v31 = vperm.slane %v21898_v49, 0  ;;  %v14601_v38 = vor.u32 %v17433_v19, %v14600_v18  ;;  %v14613_v50 = vor.u32 %v17353_v28, %v14610_v29  ;;  %v16948_v18 = vld [vmem:[%s18935_s22 + $0x4bc] sm:$0xf0]  ;;  %v12657_v28 = vor.u32 %v16947_v10, %v12656_v9  ;;  %v17598_v9 = vld [vmem:[%s18935_s22 + $0x190c] sm:$0xf0] }
 0x631   : > { %v17517_v10 = vld [vmem:[%s18935_s22 + $0x168c] sm:$0xf] }
 0x632   : > { %16766 = vmatmul.msk.bf16.vlgmr.msrb.gmra.mxu2 %vm8664_vm9, %v19267_v12  ;;  %16767 = vmatmul.msk.bf16.vlgmr.msrb.gmra.mxu3 %vm8664_vm9, %v19267_v12  ;;  %v10750_v13 = vpop.f32.mrf.mxu0  ;;  %v10763_v14 = vpop.f32.mrf.mxu1 }
 0x633   : > { %10975 = vmatpush.bf16.msra.mxu2 %v9090_v34  ;;  %10988 = vmatpush.bf16.msra.mxu3 %v9093_v35  ;;  %v10751_v21 = vadd.f32 %v10750_v13, %v2387_v57  ;;  %v10764_v23 = vadd.f32 %v10763_v14, %v2388_v59  ;;  %v14605_v34 = vor.u32 %v17352_v20, %v14602_v25  ;;  %v17190_v35 = vld [vmem:[%s18935_s22 + $0xc54] sm:$0xf]  ;;  %v6218_v59 = vunpack.c.l.b16 %v2215_v55  ;;  %v16867_v25 = vld [vmem:[%s18935_s22 + $0x23c] sm:$0xf] }
 0x634   : > { %11001 = vmatpush.bf16.msrb.mxu0 %v9096_v36  ;;  %11014 = vmatpush.bf16.msrb.mxu1 %v9099_v43  ;;  %v13954_v36 = vld [vmem:[%s18935_s22 + $0xed8] sm:$0xf0]  ;;  %v2214_v43 = vld [vmem:[%s18935_s22 + $0x25b0] sm:$0xff]  ;;  %v6219_v13 = vunpack.c.h.b16 %v2215_v55  ;;  %v17841_v55 = vld [vmem:[%s18935_s22 + $0x20ac] sm:$0xf] }
 0x635   : > { %16768 = vmatmul.msk.bf16.vlgmr.msra.gmra.mxu0 %vm8664_vm9, %v19267_v12  ;;  %16769 = vmatmul.msk.bf16.vlgmr.msra.gmra.mxu1 %vm8664_vm9, %v19267_v12  ;;  %18296 = vtanh.f32 %v10751_v21  ;;  %v10724_v40 = vpop.f32.mrf.mxu2  ;;  %v10737_v51 = vpop.f32.mrf.mxu3  ;;  %v6217_v57 = vunpack.c.h.b16 %v2214_v43  ;;  %v7514_v21 = vpack.c.b16 %v6218_v59, %v6218_v59  ;;  %v2392_v59 = vperm.slane %v21898_v49, 7 }
 0x636   : > { %18298 = vtanh.f32 %v10764_v23  ;;  %v10738_v53 = vadd.f32 %v10737_v51, %v2386_v30  ;;  %v10725_v44 = vadd.f32 %v10724_v40, %v2385_v31  ;;  %v17921_v40 = vld [vmem:[%s18935_s22 + $0x2324] sm:$0xf0]  ;;  %v17840_v51 = vld [vmem:[%s18935_s22 + $0x20a4] sm:$0xf] }
 0x637   : > { %10976 = vmatpush.bf16.msra.mxu2 %v16545_v56  ;;  %10989 = vmatpush.bf16.msra.mxu3 %v16549_v45  ;;  %v13953_v56 = vor.u32 %v17271_v33, %v13952_v32  ;;  %v13304_v45 = vld [vmem:[%s18935_s22 + $0x740] sm:$0xf]  ;;  %v7513_v20 = vpack.c.b16 %v6217_v57, %v6217_v57  ;;  %v7515_v32 = vpack.c.b16 %v6219_v13, %v6219_v13  ;;  %v2391_v57 = vperm.slane %v21898_v49, 6 }
 0x638   : > { %11002 = vmatpush.bf16.msrb.mxu0 %v16553_v47  ;;  %11015 = vmatpush.bf16.msrb.mxu1 %v16557_v62  ;;  %v13957_v47 = vor.u32 %v17190_v35, %v13954_v36  ;;  %v13961_v62 = vor.u32 %v17272_v41, %v13960_v37  ;;  %18300 = vtanh.f32 %v10738_v53  ;;  %v9108_v36 = vsel %vm8668_vm3, %v7514_v21, 0  ;;  %v17922_v53 = vld [vmem:[%s18935_s22 + $0x232c] sm:$0xf0] }
 0x639   : > { %18302 = vtanh.f32 %v10725_v44  ;;  %v9105_v35 = vsel %vm8668_vm3, %v7513_v20, 0  ;;  %v16570_v44 = vld [vmem:[%s18935_s22 + $0x2330] sm:$0xf0] }
 0x63a   : > { %v10752_v46 = vpop.f32.mrf.mxu0  ;;  %v10765_v60 = vpop.f32.mrf.mxu1  ;;  %v17354_v20 = vld [vmem:[%s18935_s22 + $0x1174] sm:$0xf] }
 0x63b   : > { %10977 = vmatpush.bf16.msra.mxu2 %v15897_v54  ;;  %10990 = vmatpush.bf16.msra.mxu3 %v15901_v22  ;;  %v13314_v54 = vld [vmem:[%s18935_s22 + $0x9d0] sm:$0xf0]  ;;  %v6216_v22 = vunpack.c.l.b16 %v2214_v43  ;;  %v18297_v61 = vpop.eup %18296  ;;  %v9111_v43 = vsel %vm8668_vm3, %v7515_v32, 0  ;;  %v17759_v46 = vld [vmem:[%s18935_s22 + $0x1e14] sm:$0xf0]  ;;  %v16569_v60 = vor.u32 %v17922_v53, %v16568_v42  ;;  %v2216_v53 = vld [vmem:[%s18935_s22 + $0x25c0] sm:$0xff] }
 0x63c   : > { %11003 = vmatpush.bf16.msrb.mxu0 %v15905_v2  ;;  %11016 = vmatpush.bf16.msrb.mxu1 %v15909_v4  ;;  %v18299_v63 = vpop.eup %18298  ;;  %v13305_v2 = vor.u32 %v17109_v58, %v13304_v45  ;;  %v13309_v4 = vor.u32 %v17028_v0, %v13306_v3  ;;  %v13317_v8 = vor.u32 %v17029_v1, %v13314_v54  ;;  %v11676_v23 = vrot.slane %v18297_v61, 4  ;;  %v15912_v58 = vld [vmem:[%s18935_s22 + $0x1b90] sm:$0xf]  ;;  %v15920_v0 = vld [vmem:[%s18935_s22 + $0x1b98] sm:$0xf] }
 0x63d   : > { %v10726_v14 = vpop.f32.mrf.mxu2  ;;  %v7512_v19 = vpack.c.b16 %v6216_v22, %v6216_v22  ;;  %v16565_v45 = vor.u32 %v17840_v51, %v16562_v52  ;;  %v17760_v3 = vld [vmem:[%s18935_s22 + $0x1e1c] sm:$0xf0]  ;;  %v15913_v54 = vor.u32 %v17759_v46, %v15912_v58  ;;  %v17597_v61 = vld [vmem:[%s18935_s22 + $0x1904] sm:$0xf0]  ;;  %v17274_v51 = vld [vmem:[%s18935_s22 + $0xeec] sm:$0xf0] }
 0x63e   : > { %v18301_v27 = vpop.eup %18300  ;;  %v15264_v1 = vld [vmem:[%s18935_s22 + $0x1680] sm:$0xf]  ;;  %v13978_v52 = vld [vmem:[%s18935_s22 + $0xef0] sm:$0xf0] }
 0x63f   : > { %10978 = vmatpush.bf16.msra.mxu2 %v15249_v15  ;;  %10991 = vmatpush.bf16.msra.mxu3 %v15253_v16  ;;  %v10739_v15 = vpop.f32.mrf.mxu3  ;;  %v12658_v16 = vld [vmem:[%s18935_s22 + $0x4b8] sm:$0xf0]  ;;  %v11675_v29 = vrot.slane %v18301_v27, 6  ;;  %v18303_v33 = vpop.eup %18302  ;;  %v17436_v27 = vld [vmem:[%s18935_s22 + $0x13fc] sm:$0xf0] }
 0x640   : > { %11004 = vmatpush.bf16.msrb.mxu0 %v15257_v17  ;;  %11017 = vmatpush.bf16.msrb.mxu1 %v15261_v24  ;;  %v12664_v17 = vld [vmem:[%s18935_s22 + $0x238] sm:$0xf]  ;;  %v11677_v24 = vrot.slane %v18299_v63, 2  ;;  %v12661_v30 = vor.u32 %v16866_v11, %v12658_v16  ;;  %v17516_v63 = vld [vmem:[%s18935_s22 + $0x1684] sm:$0xf]  ;;  %v15265_v15 = vor.u32 %v17597_v61, %v15264_v1 }
 0x641   : > { %v12665_v31 = vor.u32 %v16948_v18, %v12664_v17  ;;  %v15274_v11 = vld [vmem:[%s18935_s22 + $0x1910] sm:$0xf0]  ;;  %v14616_v18 = vld [vmem:[%s18935_s22 + $0x1170] sm:$0xf]  ;;  %v13968_v32 = vld [vmem:[%s18935_s22 + $0xc60] sm:$0xf] }
 0x642   : > { %v11799_v37 = vsel %vm11708_vm10, %v11676_v23, %v11677_v24  ;;  %v15277_v24 = vor.u32 %v17517_v10, %v15274_v11  ;;  %v13330_v1 = vld [vmem:[%s18935_s22 + $0x9e0] sm:$0xf0] }
 0x643   : > { %10979 = vmatpush.bf16.msra.mxu2 %v14601_v38  ;;  %10992 = vmatpush.bf16.msra.mxu3 %v14605_v34  ;;  %v12669_v38 = vor.u32 %v16867_v25, %v12666_v26  ;;  %v9102_v34 = vsel %vm8668_vm3, %v7512_v19, 0  ;;  %v17435_v19 = vld [vmem:[%s18935_s22 + $0x13f4] sm:$0xf0]  ;;  %v14618_v25 = vld [vmem:[%s18935_s22 + $0x13f8] sm:$0xf0] }
 0x644   : > { %11005 = vmatpush.bf16.msrb.mxu0 %v14609_v39  ;;  %11018 = vmatpush.bf16.msrb.mxu1 %v14613_v50  ;;  %v11798_v39 = vsel %vm11706_vm11, %v18303_v33, %v11675_v29  ;;  %v16560_v50 = vld [vmem:[%s18935_s22 + $0x20a0] sm:$0xf]  ;;  %v14624_v26 = vld [vmem:[%s18935_s22 + $0x1178] sm:$0xf]  ;;  %v14626_v29 = vld [vmem:[%s18935_s22 + $0x1400] sm:$0xf0] }
 0x645   : > { %v11800_v41 = vsel %vm8668_vm3, %v11798_v39, %v11799_v37  ;;  %v17273_v33 = vld [vmem:[%s18935_s22 + $0xee4] sm:$0xf0]  ;;  %v16868_v10 = vld [vmem:[%s18935_s22 + $0x244] sm:$0xf] }
 0x646   : > { %11900 = vst [vmem:[%s19647_s14 + $0xf0] sm:$0xff] %v11800_v41  ;;  %v13976_v37 = vld [vmem:[%s18935_s22 + $0xc68] sm:$0xf]  ;;  %v17193_v41 = vld [vmem:[%s18935_s22 + $0xc6c] sm:$0xf] }
 0x647   : > { %10980 = vmatpush.bf16.msra.mxu2 %v13953_v56  ;;  %10993 = vmatpush.bf16.msra.mxu3 %v13957_v47  ;;  %v16561_v56 = vor.u32 %v17921_v40, %v16560_v50  ;;  %v16573_v47 = vor.u32 %v17841_v55, %v16570_v44  ;;  %v13969_v44 = vor.u32 %v17273_v33, %v13968_v32 }
 0x648   : > { %11006 = vmatpush.bf16.msrb.mxu0 %v13961_v62  ;;  %11019 = vmatpush.bf16.msrb.mxu1 %v13965_v48  ;;  %v17678_v62 = vld [vmem:[%s18935_s22 + $0x1b94] sm:$0xf]  ;;  %v15914_v48 = vld [vmem:[%s18935_s22 + $0x1e18] sm:$0xf0] }
 0x649   : > { %v15917_v22 = vor.u32 %v17678_v62, %v15914_v48  ;;  %v13981_v62 = vor.u32 %v17193_v41, %v13978_v52  ;;  %v17030_v48 = vld [vmem:[%s18935_s22 + $0x754] sm:$0xf]  ;;  %v16584_v41 = vld [vmem:[%s18935_s22 + $0x20b8] sm:$0xf]  ;;  %v17924_v52 = vld [vmem:[%s18935_s22 + $0x233c] sm:$0xf0] }
 0x64b   : > { %10981 = vmatpush.bf16.msra.mxu2 %v13305_v2  ;;  %10994 = vmatpush.bf16.msra.mxu3 %v13309_v4  ;;  %v15921_v2 = vor.u32 %v17760_v3, %v15920_v0  ;;  %v15925_v4 = vor.u32 %v17679_v5, %v15922_v7  ;;  %v13322_v0 = vld [vmem:[%s18935_s22 + $0x9d8] sm:$0xf0]  ;;  %v13328_v3 = vld [vmem:[%s18935_s22 + $0x758] sm:$0xf]  ;;  %v17112_v5 = vld [vmem:[%s18935_s22 + $0x9dc] sm:$0xf0] }
 0x64c   : > { %11007 = vmatpush.bf16.msrb.mxu0 %v13313_v6  ;;  %11020 = vmatpush.bf16.msrb.mxu1 %v13317_v8  ;;  %v15266_v6 = vld [vmem:[%s18935_s22 + $0x1908] sm:$0xf0]  ;;  %v15272_v8 = vld [vmem:[%s18935_s22 + $0x1688] sm:$0xf]  ;;  %v17031_v7 = vld [vmem:[%s18935_s22 + $0x75c] sm:$0xf] }
 0x64d   : > { %v15269_v16 = vor.u32 %v17516_v63, %v15266_v6  ;;  %v15273_v17 = vor.u32 %v17598_v9, %v15272_v8  ;;  %v13333_v6 = vor.u32 %v17031_v7, %v13330_v1  ;;  %v12672_v8 = vld [vmem:[%s18935_s22 + $0x240] sm:$0xf]  ;;  %v16949_v9 = vld [vmem:[%s18935_s22 + $0x4c4] sm:$0xf0]  ;;  %v15280_v7 = vld [vmem:[%s18935_s22 + $0x1690] sm:$0xf] }
 0x64f   : > { %10982 = vmatpush.bf16.msra.mxu2 %v12657_v28  ;;  %10995 = vmatpush.bf16.msra.mxu3 %v12661_v30  ;;  %v17355_v28 = vld [vmem:[%s18935_s22 + $0x117c] sm:$0xf]  ;;  %v2390_v30 = vperm.slane %v21898_v49, 5 }
 0x650   : > { %11008 = vmatpush.bf16.msrb.mxu0 %v12665_v31  ;;  %11021 = vmatpush.bf16.msrb.mxu1 %v12669_v38  ;;  %v2389_v31 = vperm.slane %v21898_v49, 4  ;;  %v14617_v38 = vor.u32 %v17435_v19, %v14616_v18  ;;  %v14625_v49 = vor.u32 %v17436_v27, %v14624_v26  ;;  %v14629_v39 = vor.u32 %v17355_v28, %v14626_v29 }
 0x651   : > { %v12673_v27 = vor.u32 %v16949_v9, %v12672_v8  ;;  %v17600_v8 = vld [vmem:[%s18935_s22 + $0x191c] sm:$0xf0]  ;;  %v17519_v9 = vld [vmem:[%s18935_s22 + $0x169c] sm:$0xf] }
 0x652   : > { %16770 = vmatmul.msk.bf16.vlgmr.msra.gmra.mxu2 %vm8664_vm9, %v19267_v12  ;;  %16771 = vmatmul.msk.bf16.vlgmr.msra.gmra.mxu3 %vm8664_vm9, %v19267_v12  ;;  %v10802_v13 = vpop.f32.mrf.mxu0  ;;  %v10815_v14 = vpop.f32.mrf.mxu1 }
 0x653   : > { %11027 = vmatpush.bf16.msrb.mxu2 %v9102_v34  ;;  %11040 = vmatpush.bf16.msrb.mxu3 %v9105_v35  ;;  %v10803_v21 = vadd.f32 %v10802_v13, %v2391_v57  ;;  %v10816_v23 = vadd.f32 %v10815_v14, %v2392_v59  ;;  %v14621_v34 = vor.u32 %v17354_v20, %v14618_v25  ;;  %v17192_v35 = vld [vmem:[%s18935_s22 + $0xc64] sm:$0xf]  ;;  %v12682_v25 = vld [vmem:[%s18935_s22 + $0x4d0] sm:$0xf0] }
 0x654   : > { %11053 = vmatpush.bf16.msra.mxu0 %v9108_v36  ;;  %11066 = vmatpush.bf16.msra.mxu1 %v9111_v43  ;;  %v13970_v36 = vld [vmem:[%s18935_s22 + $0xee8] sm:$0xf0] }
 0x655   : > { %16772 = vmatmul.msk.bf16.vlgmr.msrb.gmra.mxu0 %vm8664_vm9, %v19267_v12  ;;  %16773 = vmatmul.msk.bf16.vlgmr.msrb.gmra.mxu1 %vm8664_vm9, %v19267_v12  ;;  %18304 = vtanh.f32 %v10803_v21  ;;  %v10776_v50 = vpop.f32.mrf.mxu2  ;;  %v10789_v40 = vpop.f32.mrf.mxu3  ;;  %v2217_v43 = vld [vmem:[%s18935_s22 + $0x25c8] sm:$0xff] }
 0x656   : > { %18306 = vtanh.f32 %v10816_v23  ;;  %v10790_v42 = vadd.f32 %v10789_v40, %v2390_v30  ;;  %v10777_v55 = vadd.f32 %v10776_v50, %v2389_v31  ;;  %v6222_v57 = vunpack.c.l.b16 %v2217_v43  ;;  %v17842_v50 = vld [vmem:[%s18935_s22 + $0x20b4] sm:$0xf] }
 0x657   : > { %11028 = vmatpush.bf16.msrb.mxu2 %v16561_v56  ;;  %11041 = vmatpush.bf16.msrb.mxu3 %v16565_v45  ;;  %v13320_v56 = vld [vmem:[%s18935_s22 + $0x750] sm:$0xf]  ;;  %v17111_v45 = vld [vmem:[%s18935_s22 + $0x9d4] sm:$0xf0]  ;;  %v6223_v11 = vunpack.c.h.b16 %v2217_v43  ;;  %v16586_v43 = vld [vmem:[%s18935_s22 + $0x2340] sm:$0xf0] }
 0x658   : > { %11054 = vmatpush.bf16.msra.mxu0 %v16569_v60  ;;  %11067 = vmatpush.bf16.msra.mxu1 %v16573_v47  ;;  %v13973_v60 = vor.u32 %v17192_v35, %v13970_v36  ;;  %v13977_v47 = vor.u32 %v17274_v51, %v13976_v37  ;;  %18308 = vtanh.f32 %v10790_v42  ;;  %v13321_v63 = vor.u32 %v17111_v45, %v13320_v56  ;;  %v16578_v51 = vld [vmem:[%s18935_s22 + $0x2338] sm:$0xf0]  ;;  %v15928_v56 = vld [vmem:[%s18935_s22 + $0x1ba0] sm:$0xf]  ;;  %v17761_v45 = vld [vmem:[%s18935_s22 + $0x1e24] sm:$0xf0] }
 0x659   : > { %18310 = vtanh.f32 %v10777_v55  ;;  %v7518_v20 = vpack.c.b16 %v6222_v57, %v6222_v57  ;;  %v7519_v31 = vpack.c.b16 %v6223_v11, %v6223_v11  ;;  %v15929_v1 = vor.u32 %v17761_v45, %v15928_v56  ;;  %v17113_v56 = vld [vmem:[%s18935_s22 + $0x9e4] sm:$0xf0] }
 0x65a   : > { %v10804_v58 = vpop.f32.mrf.mxu0  ;;  %v10817_v46 = vpop.f32.mrf.mxu1 }
 0x65b   : > { %11029 = vmatpush.bf16.msrb.mxu2 %v15913_v54  ;;  %11042 = vmatpush.bf16.msrb.mxu3 %v15917_v22  ;;  %v6220_v54 = vunpack.c.l.b16 %v2216_v53  ;;  %v6221_v22 = vunpack.c.h.b16 %v2216_v53  ;;  %v18305_v59 = vpop.eup %18304  ;;  %v9120_v35 = vsel %vm8668_vm3, %v7518_v20, 0  ;;  %v9123_v42 = vsel %vm8668_vm3, %v7519_v31, 0  ;;  %v17843_v53 = vld [vmem:[%s18935_s22 + $0x20bc] sm:$0xf]  ;;  %v17680_v58 = vld [vmem:[%s18935_s22 + $0x1ba4] sm:$0xf] }
 0x65c   : > { %11055 = vmatpush.bf16.msra.mxu0 %v15921_v2  ;;  %11068 = vmatpush.bf16.msra.mxu1 %v15925_v4  ;;  %v18307_v61 = vpop.eup %18306  ;;  %v13325_v2 = vor.u32 %v17030_v48, %v13322_v0  ;;  %v13329_v4 = vor.u32 %v17112_v5, %v13328_v3  ;;  %v11679_v21 = vrot.slane %v18305_v59, 4  ;;  %v16585_v46 = vor.u32 %v17924_v52, %v16584_v41  ;;  %v22057_v48 = vld [vmem:[%s19570_s13 + $0x80] sm:$0xff]  ;;  %v17681_v3 = vld [vmem:[%s18935_s22 + $0x1bac] sm:$0xf]  ;;  %v13994_v41 = vld [vmem:[%s18935_s22 + $0xf00] sm:$0xf0] }
 0x65d   : > { %v10778_v13 = vpop.f32.mrf.mxu2  ;;  %v10791_v14 = vpop.f32.mrf.mxu3  ;;  %v7516_v18 = vpack.c.b16 %v6220_v54, %v6220_v54  ;;  %v7517_v19 = vpack.c.b16 %v6221_v22, %v6221_v22  ;;  %v11680_v23 = vrot.slane %v18307_v61, 2  ;;  %v17762_v0 = vld [vmem:[%s18935_s22 + $0x1e2c] sm:$0xf0]  ;;  %v15938_v5 = vld [vmem:[%s18935_s22 + $0x1e30] sm:$0xf0]  ;;  %v2395_v22 = vperm.slane %v22057_v48, 2 }
 0x65e   : > { %v18309_v26 = vpop.eup %18308  ;;  %v2396_v57 = vperm.slane %v22057_v48, 3  ;;  %v17599_v59 = vld [vmem:[%s18935_s22 + $0x1914] sm:$0xf0]  ;;  %v17518_v61 = vld [vmem:[%s18935_s22 + $0x1694] sm:$0xf] }
 0x65f   : > { %11030 = vmatpush.bf16.msrb.mxu2 %v15265_v15  ;;  %11043 = vmatpush.bf16.msrb.mxu3 %v15269_v16  ;;  %v12674_v15 = vld [vmem:[%s18935_s22 + $0x4c8] sm:$0xf0]  ;;  %v12680_v16 = vld [vmem:[%s18935_s22 + $0x248] sm:$0xf]  ;;  %v11678_v28 = vrot.slane %v18309_v26, 6  ;;  %v18311_v32 = vpop.eup %18310  ;;  %v11802_v36 = vsel %vm11708_vm10, %v11679_v21, %v11680_v23  ;;  %v15281_v14 = vor.u32 %v17599_v59, %v15280_v7 }
 0x660   : > { %11056 = vmatpush.bf16.msra.mxu0 %v15273_v17  ;;  %11069 = vmatpush.bf16.msra.mxu1 %v15277_v24  ;;  %v16950_v17 = vld [vmem:[%s18935_s22 + $0x4cc] sm:$0xf0]  ;;  %v16869_v24 = vld [vmem:[%s18935_s22 + $0x24c] sm:$0xf]  ;;  %v12677_v29 = vor.u32 %v16868_v10, %v12674_v15  ;;  %v15290_v10 = vld [vmem:[%s18935_s22 + $0x1920] sm:$0xf0] }
 0x661   : > { %v12681_v30 = vor.u32 %v16950_v17, %v12680_v16  ;;  %v12685_v33 = vor.u32 %v16869_v24, %v12682_v25  ;;  %v11801_v37 = vsel %vm11706_vm11, %v18311_v32, %v11678_v28  ;;  %v14632_v17 = vld [vmem:[%s18935_s22 + $0x1180] sm:$0xf]  ;;  %v15293_v23 = vor.u32 %v17519_v9, %v15290_v10  ;;  %v14634_v24 = vld [vmem:[%s18935_s22 + $0x1408] sm:$0xf0]  ;;  %v14640_v25 = vld [vmem:[%s18935_s22 + $0x1188] sm:$0xf] }
 0x662   : > { %v11803_v40 = vsel %vm8668_vm3, %v11801_v37, %v11802_v36  ;;  %v17438_v26 = vld [vmem:[%s18935_s22 + $0x140c] sm:$0xf0]  ;;  %v14642_v28 = vld [vmem:[%s18935_s22 + $0x1410] sm:$0xf0]  ;;  %v17275_v32 = vld [vmem:[%s18935_s22 + $0xef4] sm:$0xf0] }
 0x663   : > { %11031 = vmatpush.bf16.msrb.mxu2 %v14617_v38  ;;  %11044 = vmatpush.bf16.msrb.mxu3 %v14621_v34  ;;  %v9114_v38 = vsel %vm8668_vm3, %v7516_v18, 0  ;;  %v9117_v34 = vsel %vm8668_vm3, %v7517_v19, 0  ;;  %11901 = vst [vmem:[%s19647_s14 + $0xf8] sm:$0xff] %v11803_v40  ;;  %v17437_v18 = vld [vmem:[%s18935_s22 + $0x1404] sm:$0xf0]  ;;  %v14641_v37 = vor.u32 %v17438_v26, %v14640_v25 }
 0x664   : > { %11057 = vmatpush.bf16.msra.mxu0 %v14625_v49  ;;  %11070 = vmatpush.bf16.msra.mxu1 %v14629_v39  ;;  %v16576_v49 = vld [vmem:[%s18935_s22 + $0x20b0] sm:$0xf]  ;;  %v17923_v39 = vld [vmem:[%s18935_s22 + $0x2334] sm:$0xf0]  ;;  %v17356_v19 = vld [vmem:[%s18935_s22 + $0x1184] sm:$0xf] }
 0x665   : > { %v16577_v55 = vor.u32 %v17923_v39, %v16576_v49  ;;  %v13984_v31 = vld [vmem:[%s18935_s22 + $0xc70] sm:$0xf]  ;;  %v13992_v36 = vld [vmem:[%s18935_s22 + $0xc78] sm:$0xf]  ;;  %v17276_v40 = vld [vmem:[%s18935_s22 + $0xefc] sm:$0xf0] }
 0x666   : > { %v17033_v7 = vld [vmem:[%s18935_s22 + $0x76c] sm:$0xf]  ;;  %v16951_v9 = vld [vmem:[%s18935_s22 + $0x4d4] sm:$0xf0]  ;;  %v16870_v10 = vld [vmem:[%s18935_s22 + $0x254] sm:$0xf] }
 0x667   : > { %11032 = vmatpush.bf16.msrb.mxu2 %v13969_v44  ;;  %11045 = vmatpush.bf16.msrb.mxu3 %v13973_v60  ;;  %v16581_v44 = vor.u32 %v17842_v50, %v16578_v51  ;;  %v16589_v60 = vor.u32 %v17843_v53, %v16586_v43  ;;  %v17195_v51 = vld [vmem:[%s18935_s22 + $0xc7c] sm:$0xf]  ;;  %v12698_v25 = vld [vmem:[%s18935_s22 + $0x4e0] sm:$0xf0] }
 0x668   : > { %11058 = vmatpush.bf16.msra.mxu0 %v13977_v47  ;;  %11071 = vmatpush.bf16.msra.mxu1 %v13981_v62  ;;  %v15930_v47 = vld [vmem:[%s18935_s22 + $0x1e28] sm:$0xf0]  ;;  %v15936_v62 = vld [vmem:[%s18935_s22 + $0x1ba8] sm:$0xf]  ;;  %v2219_v53 = vld [vmem:[%s18935_s22 + $0x25d8] sm:$0xff] }
 0x669   : > { %v15933_v54 = vor.u32 %v17680_v58, %v15930_v47  ;;  %v13997_v47 = vor.u32 %v17195_v51, %v13994_v41  ;;  %v16594_v51 = vld [vmem:[%s18935_s22 + $0x2348] sm:$0xf0]  ;;  %v16600_v41 = vld [vmem:[%s18935_s22 + $0x20c8] sm:$0xf] }
 0x66b   : > { %11033 = vmatpush.bf16.msrb.mxu2 %v13321_v63  ;;  %11046 = vmatpush.bf16.msrb.mxu3 %v13325_v2  ;;  %v15937_v63 = vor.u32 %v17762_v0, %v15936_v62  ;;  %v15941_v2 = vor.u32 %v17681_v3, %v15938_v5  ;;  %v17032_v62 = vld [vmem:[%s18935_s22 + $0x764] sm:$0xf]  ;;  %v13338_v0 = vld [vmem:[%s18935_s22 + $0x9e8] sm:$0xf0]  ;;  %v13344_v3 = vld [vmem:[%s18935_s22 + $0x768] sm:$0xf] }
 0x66c   : > { %11059 = vmatpush.bf16.msra.mxu0 %v13329_v4  ;;  %11072 = vmatpush.bf16.msra.mxu1 %v13333_v6  ;;  %v15282_v4 = vld [vmem:[%s18935_s22 + $0x1918] sm:$0xf0]  ;;  %v15288_v6 = vld [vmem:[%s18935_s22 + $0x1698] sm:$0xf]  ;;  %v17114_v5 = vld [vmem:[%s18935_s22 + $0x9ec] sm:$0xf0] }
 0x66d   : > { %v15285_v15 = vor.u32 %v17518_v61, %v15282_v4  ;;  %v15289_v16 = vor.u32 %v17600_v8, %v15288_v6  ;;  %v13345_v4 = vor.u32 %v17114_v5, %v13344_v3  ;;  %v12688_v8 = vld [vmem:[%s18935_s22 + $0x250] sm:$0xf]  ;;  %v17683_v3 = vld [vmem:[%s18935_s22 + $0x1bbc] sm:$0xf]  ;;  %v15954_v5 = vld [vmem:[%s18935_s22 + $0x1e40] sm:$0xf0] }
 0x66f   : > { %11034 = vmatpush.bf16.msrb.mxu2 %v12673_v27  ;;  %11047 = vmatpush.bf16.msrb.mxu3 %v12677_v29  ;;  %v17357_v27 = vld [vmem:[%s18935_s22 + $0x118c] sm:$0xf]  ;;  %v2394_v29 = vperm.slane %v22057_v48, 1 }
 0x670   : > { %11060 = vmatpush.bf16.msra.mxu0 %v12681_v30  ;;  %11073 = vmatpush.bf16.msra.mxu1 %v12685_v33  ;;  %v2393_v30 = vperm.slane %v22057_v48, 0  ;;  %v14633_v33 = vor.u32 %v17437_v18, %v14632_v17  ;;  %v14645_v49 = vor.u32 %v17357_v27, %v14642_v28  ;;  %v16952_v17 = vld [vmem:[%s18935_s22 + $0x4dc] sm:$0xf0]  ;;  %v12689_v27 = vor.u32 %v16951_v9, %v12688_v8  ;;  %v17602_v8 = vld [vmem:[%s18935_s22 + $0x192c] sm:$0xf0] }
 0x671   : > { %v17521_v9 = vld [vmem:[%s18935_s22 + $0x16ac] sm:$0xf] }
 0x672   : > { %16774 = vmatmul.msk.bf16.vlgmr.msrb.gmra.mxu2 %vm8664_vm9, %v19267_v12  ;;  %16775 = vmatmul.msk.bf16.vlgmr.msrb.gmra.mxu3 %vm8664_vm9, %v19267_v12  ;;  %v10854_v11 = vpop.f32.mrf.mxu0  ;;  %v10867_v13 = vpop.f32.mrf.mxu1 }
 0x673   : > { %11079 = vmatpush.bf16.msra.mxu2 %v9114_v38  ;;  %11092 = vmatpush.bf16.msra.mxu3 %v9117_v34  ;;  %v10855_v20 = vadd.f32 %v10854_v11, %v2395_v22  ;;  %v10868_v21 = vadd.f32 %v10867_v13, %v2396_v57  ;;  %v14637_v38 = vor.u32 %v17356_v19, %v14634_v24  ;;  %v17194_v34 = vld [vmem:[%s18935_s22 + $0xc74] sm:$0xf]  ;;  %v6226_v57 = vunpack.c.l.b16 %v2219_v53  ;;  %v16871_v24 = vld [vmem:[%s18935_s22 + $0x25c] sm:$0xf] }
 0x674   : > { %11105 = vmatpush.bf16.msrb.mxu0 %v9120_v35  ;;  %11118 = vmatpush.bf16.msrb.mxu1 %v9123_v42  ;;  %v13986_v35 = vld [vmem:[%s18935_s22 + $0xef8] sm:$0xf0]  ;;  %v2218_v42 = vld [vmem:[%s18935_s22 + $0x25d0] sm:$0xff]  ;;  %v6227_v11 = vunpack.c.h.b16 %v2219_v53  ;;  %v17845_v53 = vld [vmem:[%s18935_s22 + $0x20cc] sm:$0xf] }
 0x675   : > { %16776 = vmatmul.msk.bf16.vlgmr.msra.gmra.mxu0 %vm8664_vm9, %v19267_v12  ;;  %16777 = vmatmul.msk.bf16.vlgmr.msra.gmra.mxu1 %vm8664_vm9, %v19267_v12  ;;  %18312 = vtanh.f32 %v10855_v20  ;;  %v10828_v39 = vpop.f32.mrf.mxu2  ;;  %v10841_v50 = vpop.f32.mrf.mxu3  ;;  %v6225_v22 = vunpack.c.h.b16 %v2218_v42  ;;  %v7522_v20 = vpack.c.b16 %v6226_v57, %v6226_v57  ;;  %v2400_v57 = vperm.slane %v22057_v48, 7 }
 0x676   : > { %18314 = vtanh.f32 %v10868_v21  ;;  %v10842_v52 = vadd.f32 %v10841_v50, %v2394_v29  ;;  %v10829_v43 = vadd.f32 %v10828_v39, %v2393_v30  ;;  %v17925_v39 = vld [vmem:[%s18935_s22 + $0x2344] sm:$0xf0]  ;;  %v17844_v50 = vld [vmem:[%s18935_s22 + $0x20c4] sm:$0xf] }
 0x677   : > { %11080 = vmatpush.bf16.msra.mxu2 %v16577_v55  ;;  %11093 = vmatpush.bf16.msra.mxu3 %v16581_v44  ;;  %v13985_v55 = vor.u32 %v17275_v32, %v13984_v31  ;;  %v13336_v44 = vld [vmem:[%s18935_s22 + $0x760] sm:$0xf]  ;;  %v7521_v19 = vpack.c.b16 %v6225_v22, %v6225_v22  ;;  %v7523_v31 = vpack.c.b16 %v6227_v11, %v6227_v11  ;;  %v2399_v22 = vperm.slane %v22057_v48, 6 }
 0x678   : > { %11106 = vmatpush.bf16.msrb.mxu0 %v16585_v46  ;;  %11119 = vmatpush.bf16.msrb.mxu1 %v16589_v60  ;;  %v13989_v46 = vor.u32 %v17194_v34, %v13986_v35  ;;  %v13993_v60 = vor.u32 %v17276_v40, %v13992_v36  ;;  %18316 = vtanh.f32 %v10842_v52  ;;  %v9132_v35 = vsel %vm8668_vm3, %v7522_v20, 0  ;;  %v17926_v52 = vld [vmem:[%s18935_s22 + $0x234c] sm:$0xf0] }
 0x679   : > { %18318 = vtanh.f32 %v10829_v43  ;;  %v9129_v34 = vsel %vm8668_vm3, %v7521_v19, 0  ;;  %v16602_v43 = vld [vmem:[%s18935_s22 + $0x2350] sm:$0xf0] }
 0x67a   : > { %v10856_v45 = vpop.f32.mrf.mxu0  ;;  %v10869_v58 = vpop.f32.mrf.mxu1  ;;  %v17358_v19 = vld [vmem:[%s18935_s22 + $0x1194] sm:$0xf] }
 0x67b   : > { %11081 = vmatpush.bf16.msra.mxu2 %v15929_v1  ;;  %11094 = vmatpush.bf16.msra.mxu3 %v15933_v54  ;;  %v13346_v1 = vld [vmem:[%s18935_s22 + $0x9f0] sm:$0xf0]  ;;  %v6224_v54 = vunpack.c.l.b16 %v2218_v42  ;;  %v18313_v59 = vpop.eup %18312  ;;  %v9135_v42 = vsel %vm8668_vm3, %v7523_v31, 0  ;;  %v17763_v45 = vld [vmem:[%s18935_s22 + $0x1e34] sm:$0xf0]  ;;  %v16601_v58 = vor.u32 %v17926_v52, %v16600_v41  ;;  %v2220_v52 = vld [vmem:[%s18935_s22 + $0x25e0] sm:$0xff] }
 0x67c   : > { %11107 = vmatpush.bf16.msrb.mxu0 %v15937_v63  ;;  %11120 = vmatpush.bf16.msrb.mxu1 %v15941_v2  ;;  %v18315_v61 = vpop.eup %18314  ;;  %v13337_v63 = vor.u32 %v17113_v56, %v13336_v44  ;;  %v13341_v2 = vor.u32 %v17032_v62, %v13338_v0  ;;  %v13349_v6 = vor.u32 %v17033_v7, %v13346_v1  ;;  %v11682_v21 = vrot.slane %v18313_v59, 4  ;;  %v15944_v56 = vld [vmem:[%s18935_s22 + $0x1bb0] sm:$0xf]  ;;  %v15952_v62 = vld [vmem:[%s18935_s22 + $0x1bb8] sm:$0xf] }
 0x67d   : > { %v10830_v13 = vpop.f32.mrf.mxu2  ;;  %v7520_v18 = vpack.c.b16 %v6224_v54, %v6224_v54  ;;  %v16597_v44 = vor.u32 %v17844_v50, %v16594_v51  ;;  %v17764_v0 = vld [vmem:[%s18935_s22 + $0x1e3c] sm:$0xf0]  ;;  %v15945_v1 = vor.u32 %v17763_v45, %v15944_v56  ;;  %v17601_v59 = vld [vmem:[%s18935_s22 + $0x1924] sm:$0xf0]  ;;  %v17278_v50 = vld [vmem:[%s18935_s22 + $0xf0c] sm:$0xf0] }
 0x67e   : > { %v18317_v26 = vpop.eup %18316  ;;  %v15296_v7 = vld [vmem:[%s18935_s22 + $0x16a0] sm:$0xf]  ;;  %v14010_v51 = vld [vmem:[%s18935_s22 + $0xf10] sm:$0xf0] }
 0x67f   : > { %11082 = vmatpush.bf16.msra.mxu2 %v15281_v14  ;;  %11095 = vmatpush.bf16.msra.mxu3 %v15285_v15  ;;  %v10843_v14 = vpop.f32.mrf.mxu3  ;;  %v12690_v15 = vld [vmem:[%s18935_s22 + $0x4d8] sm:$0xf0]  ;;  %v11681_v28 = vrot.slane %v18317_v26, 6  ;;  %v18319_v32 = vpop.eup %18318  ;;  %v17440_v26 = vld [vmem:[%s18935_s22 + $0x141c] sm:$0xf0] }
 0x680   : > { %11108 = vmatpush.bf16.msrb.mxu0 %v15289_v16  ;;  %11121 = vmatpush.bf16.msrb.mxu1 %v15293_v23  ;;  %v12696_v16 = vld [vmem:[%s18935_s22 + $0x258] sm:$0xf]  ;;  %v11683_v23 = vrot.slane %v18315_v61, 2  ;;  %v12693_v29 = vor.u32 %v16870_v10, %v12690_v15  ;;  %v17520_v61 = vld [vmem:[%s18935_s22 + $0x16a4] sm:$0xf]  ;;  %v15297_v14 = vor.u32 %v17601_v59, %v15296_v7 }
 0x681   : > { %v12697_v30 = vor.u32 %v16952_v17, %v12696_v16  ;;  %v15306_v10 = vld [vmem:[%s18935_s22 + $0x1930] sm:$0xf0]  ;;  %v14648_v17 = vld [vmem:[%s18935_s22 + $0x1190] sm:$0xf]  ;;  %v14000_v31 = vld [vmem:[%s18935_s22 + $0xc80] sm:$0xf] }
 0x682   : > { %v11805_v36 = vsel %vm11708_vm10, %v11682_v21, %v11683_v23  ;;  %v15309_v23 = vor.u32 %v17521_v9, %v15306_v10  ;;  %v13362_v7 = vld [vmem:[%s18935_s22 + $0xa00] sm:$0xf0] }
 0x683   : > { %11083 = vmatpush.bf16.msra.mxu2 %v14633_v33  ;;  %11096 = vmatpush.bf16.msra.mxu3 %v14637_v38  ;;  %v12701_v33 = vor.u32 %v16871_v24, %v12698_v25  ;;  %v9126_v38 = vsel %vm8668_vm3, %v7520_v18, 0  ;;  %v17439_v18 = vld [vmem:[%s18935_s22 + $0x1414] sm:$0xf0]  ;;  %v14650_v24 = vld [vmem:[%s18935_s22 + $0x1418] sm:$0xf0] }
 0x684   : > { %11109 = vmatpush.bf16.msrb.mxu0 %v14641_v37  ;;  %11122 = vmatpush.bf16.msrb.mxu1 %v14645_v49  ;;  %v11804_v37 = vsel %vm11706_vm11, %v18319_v32, %v11681_v28  ;;  %v16592_v49 = vld [vmem:[%s18935_s22 + $0x20c0] sm:$0xf]  ;;  %v14656_v25 = vld [vmem:[%s18935_s22 + $0x1198] sm:$0xf]  ;;  %v14658_v28 = vld [vmem:[%s18935_s22 + $0x1420] sm:$0xf0] }
 0x685   : > { %v11806_v40 = vsel %vm8668_vm3, %v11804_v37, %v11805_v36  ;;  %v17277_v32 = vld [vmem:[%s18935_s22 + $0xf04] sm:$0xf0]  ;;  %v16872_v9 = vld [vmem:[%s18935_s22 + $0x264] sm:$0xf] }
 0x686   : > { %11902 = vst [vmem:[%s19647_s14 + $0x100] sm:$0xff] %v11806_v40  ;;  %v14008_v36 = vld [vmem:[%s18935_s22 + $0xc88] sm:$0xf]  ;;  %v17197_v40 = vld [vmem:[%s18935_s22 + $0xc8c] sm:$0xf] }
 0x687   : > { %11084 = vmatpush.bf16.msra.mxu2 %v13985_v55  ;;  %11097 = vmatpush.bf16.msra.mxu3 %v13989_v46  ;;  %v16593_v55 = vor.u32 %v17925_v39, %v16592_v49  ;;  %v16605_v46 = vor.u32 %v17845_v53, %v16602_v43  ;;  %v14001_v43 = vor.u32 %v17277_v32, %v14000_v31 }
 0x688   : > { %11110 = vmatpush.bf16.msrb.mxu0 %v13993_v60  ;;  %11123 = vmatpush.bf16.msrb.mxu1 %v13997_v47  ;;  %v17682_v60 = vld [vmem:[%s18935_s22 + $0x1bb4] sm:$0xf]  ;;  %v15946_v47 = vld [vmem:[%s18935_s22 + $0x1e38] sm:$0xf0] }
 0x689   : > { %v15949_v54 = vor.u32 %v17682_v60, %v15946_v47  ;;  %v14013_v60 = vor.u32 %v17197_v40, %v14010_v51  ;;  %v17034_v47 = vld [vmem:[%s18935_s22 + $0x774] sm:$0xf]  ;;  %v16616_v40 = vld [vmem:[%s18935_s22 + $0x20d8] sm:$0xf]  ;;  %v17928_v51 = vld [vmem:[%s18935_s22 + $0x235c] sm:$0xf0] }
 0x68b   : > { %11085 = vmatpush.bf16.msra.mxu2 %v13337_v63  ;;  %11098 = vmatpush.bf16.msra.mxu3 %v13341_v2  ;;  %v15953_v63 = vor.u32 %v17764_v0, %v15952_v62  ;;  %v15957_v2 = vor.u32 %v17683_v3, %v15954_v5  ;;  %v13354_v62 = vld [vmem:[%s18935_s22 + $0x9f8] sm:$0xf0]  ;;  %v13360_v0 = vld [vmem:[%s18935_s22 + $0x778] sm:$0xf]  ;;  %v17116_v3 = vld [vmem:[%s18935_s22 + $0x9fc] sm:$0xf0] }
 0x68c   : > { %11111 = vmatpush.bf16.msrb.mxu0 %v13345_v4  ;;  %11124 = vmatpush.bf16.msrb.mxu1 %v13349_v6  ;;  %v15298_v4 = vld [vmem:[%s18935_s22 + $0x1928] sm:$0xf0]  ;;  %v15304_v6 = vld [vmem:[%s18935_s22 + $0x16a8] sm:$0xf]  ;;  %v17035_v5 = vld [vmem:[%s18935_s22 + $0x77c] sm:$0xf] }
 0x68d   : > { %v15301_v15 = vor.u32 %v17520_v61, %v15298_v4  ;;  %v15305_v16 = vor.u32 %v17602_v8, %v15304_v6  ;;  %v13365_v4 = vor.u32 %v17035_v5, %v13362_v7  ;;  %v12704_v6 = vld [vmem:[%s18935_s22 + $0x260] sm:$0xf]  ;;  %v16953_v8 = vld [vmem:[%s18935_s22 + $0x4e4] sm:$0xf0]  ;;  %v15312_v5 = vld [vmem:[%s18935_s22 + $0x16b0] sm:$0xf] }
 0x68f   : > { %11086 = vmatpush.bf16.msra.mxu2 %v12689_v27  ;;  %11099 = vmatpush.bf16.msra.mxu3 %v12693_v29  ;;  %v17359_v27 = vld [vmem:[%s18935_s22 + $0x119c] sm:$0xf]  ;;  %v2398_v29 = vperm.slane %v22057_v48, 5 }
 0x690   : > { %11112 = vmatpush.bf16.msrb.mxu0 %v12697_v30  ;;  %11125 = vmatpush.bf16.msrb.mxu1 %v12701_v33  ;;  %v2397_v30 = vperm.slane %v22057_v48, 4  ;;  %v14649_v33 = vor.u32 %v17439_v18, %v14648_v17  ;;  %v14657_v48 = vor.u32 %v17440_v26, %v14656_v25  ;;  %v14661_v37 = vor.u32 %v17359_v27, %v14658_v28 }
 0x691   : > { %v12705_v26 = vor.u32 %v16953_v8, %v12704_v6  ;;  %v17604_v6 = vld [vmem:[%s18935_s22 + $0x193c] sm:$0xf0]  ;;  %v17523_v8 = vld [vmem:[%s18935_s22 + $0x16bc] sm:$0xf] }
 0x692   : > { %16778 = vmatmul.msk.bf16.vlgmr.msra.gmra.mxu2 %vm8664_vm9, %v19267_v12  ;;  %16779 = vmatmul.msk.bf16.vlgmr.msra.gmra.mxu3 %vm8664_vm9, %v19267_v12  ;;  %v10906_v11 = vpop.f32.mrf.mxu0  ;;  %v10919_v13 = vpop.f32.mrf.mxu1 }
 0x693   : > { %11131 = vmatpush.bf16.msrb.mxu2 %v9126_v38  ;;  %11144 = vmatpush.bf16.msrb.mxu3 %v9129_v34  ;;  %v10907_v20 = vadd.f32 %v10906_v11, %v2399_v22  ;;  %v10920_v21 = vadd.f32 %v10919_v13, %v2400_v57  ;;  %v14653_v38 = vor.u32 %v17358_v19, %v14650_v24  ;;  %v17196_v34 = vld [vmem:[%s18935_s22 + $0xc84] sm:$0xf]  ;;  %v12714_v24 = vld [vmem:[%s18935_s22 + $0x4f0] sm:$0xf0] }
 0x694   : > { %11157 = vmatpush.bf16.msra.mxu0 %v9132_v35  ;;  %11170 = vmatpush.bf16.msra.mxu1 %v9135_v42  ;;  %v14002_v35 = vld [vmem:[%s18935_s22 + $0xf08] sm:$0xf0] }
 0x695   : > { %16780 = vmatmul.msk.bf16.vlgmr.msrb.gmra.mxu0 %vm8664_vm9, %v19267_v12  ;;  %16781 = vmatmul.msk.bf16.vlgmr.msrb.gmra.mxu1 %vm8664_vm9, %v19267_v12  ;;  %18320 = vtanh.f32 %v10907_v20  ;;  %v10880_v49 = vpop.f32.mrf.mxu2  ;;  %v10893_v39 = vpop.f32.mrf.mxu3  ;;  %v2221_v42 = vld [vmem:[%s18935_s22 + $0x25e8] sm:$0xff] }
 0x696   : > { %18322 = vtanh.f32 %v10920_v21  ;;  %v10894_v41 = vadd.f32 %v10893_v39, %v2398_v29  ;;  %v10881_v53 = vadd.f32 %v10880_v49, %v2397_v30  ;;  %v6230_v22 = vunpack.c.l.b16 %v2221_v42  ;;  %v17846_v49 = vld [vmem:[%s18935_s22 + $0x20d4] sm:$0xf] }
 0x697   : > { %11132 = vmatpush.bf16.msrb.mxu2 %v16593_v55  ;;  %11145 = vmatpush.bf16.msrb.mxu3 %v16597_v44  ;;  %v13352_v55 = vld [vmem:[%s18935_s22 + $0x770] sm:$0xf]  ;;  %v17115_v44 = vld [vmem:[%s18935_s22 + $0x9f4] sm:$0xf0]  ;;  %v6231_v10 = vunpack.c.h.b16 %v2221_v42  ;;  %v16618_v42 = vld [vmem:[%s18935_s22 + $0x2360] sm:$0xf0] }
 0x698   : > { %11158 = vmatpush.bf16.msra.mxu0 %v16601_v58  ;;  %11171 = vmatpush.bf16.msra.mxu1 %v16605_v46  ;;  %v14005_v58 = vor.u32 %v17196_v34, %v14002_v35  ;;  %v14009_v46 = vor.u32 %v17278_v50, %v14008_v36  ;;  %18324 = vtanh.f32 %v10894_v41  ;;  %v13353_v61 = vor.u32 %v17115_v44, %v13352_v55  ;;  %v16610_v50 = vld [vmem:[%s18935_s22 + $0x2358] sm:$0xf0]  ;;  %v15960_v55 = vld [vmem:[%s18935_s22 + $0x1bc0] sm:$0xf]  ;;  %v17765_v44 = vld [vmem:[%s18935_s22 + $0x1e44] sm:$0xf0] }
 0x699   : > { %18326 = vtanh.f32 %v10881_v53  ;;  %v7526_v19 = vpack.c.b16 %v6230_v22, %v6230_v22  ;;  %v7527_v30 = vpack.c.b16 %v6231_v10, %v6231_v10  ;;  %v15961_v7 = vor.u32 %v17765_v44, %v15960_v55  ;;  %v13368_v44 = vld [vmem:[%s18935_s22 + $0x780] sm:$0xf] }
 0x69a   : > { %v10908_v56 = vpop.f32.mrf.mxu0  ;;  %v10921_v45 = vpop.f32.mrf.mxu1 }
 0x69b   : > { %11133 = vmatpush.bf16.msrb.mxu2 %v15945_v1  ;;  %11146 = vmatpush.bf16.msrb.mxu3 %v15949_v54  ;;  %v6228_v1 = vunpack.c.l.b16 %v2220_v52  ;;  %v6229_v54 = vunpack.c.h.b16 %v2220_v52  ;;  %v18321_v57 = vpop.eup %18320  ;;  %v9144_v34 = vsel %vm8668_vm3, %v7526_v19, 0  ;;  %v9147_v41 = vsel %vm8668_vm3, %v7527_v30, 0  ;;  %v17847_v52 = vld [vmem:[%s18935_s22 + $0x20dc] sm:$0xf]  ;;  %v17684_v56 = vld [vmem:[%s18935_s22 + $0x1bc4] sm:$0xf] }
 0x69c   : > { %11159 = vmatpush.bf16.msra.mxu0 %v15953_v63  ;;  %11172 = vmatpush.bf16.msra.mxu1 %v15957_v2  ;;  %v18323_v59 = vpop.eup %18322  ;;  %v13357_v63 = vor.u32 %v17034_v47, %v13354_v62  ;;  %v13361_v2 = vor.u32 %v17116_v3, %v13360_v0  ;;  %v11685_v20 = vrot.slane %v18321_v57, 4  ;;  %v16617_v45 = vor.u32 %v17928_v51, %v16616_v40  ;;  %v22216_v47 = vld [vmem:[%s19570_s13 + $0x88] sm:$0xff]  ;;  %v17766_v62 = vld [vmem:[%s18935_s22 + $0x1e4c] sm:$0xf0]  ;;  %v17685_v0 = vld [vmem:[%s18935_s22 + $0x1bcc] sm:$0xf] }
 0x69d   : > { %v10882_v11 = vpop.f32.mrf.mxu2  ;;  %v10895_v13 = vpop.f32.mrf.mxu3  ;;  %v7524_v17 = vpack.c.b16 %v6228_v1, %v6228_v1  ;;  %v7525_v18 = vpack.c.b16 %v6229_v54, %v6229_v54  ;;  %v11686_v21 = vrot.slane %v18323_v59, 2  ;;  %v15970_v3 = vld [vmem:[%s18935_s22 + $0x1e50] sm:$0xf0]  ;;  %v2403_v54 = vperm.slane %v22216_v47, 2  ;;  %v17603_v57 = vld [vmem:[%s18935_s22 + $0x1934] sm:$0xf0] }
 0x69e   : > { %v18325_v25 = vpop.eup %18324  ;;  %v2404_v22 = vperm.slane %v22216_v47, 3  ;;  %v17522_v59 = vld [vmem:[%s18935_s22 + $0x16b4] sm:$0xf]  ;;  %v15313_v13 = vor.u32 %v17603_v57, %v15312_v5  ;;  %v17199_v40 = vld [vmem:[%s18935_s22 + $0xc9c] sm:$0xf] }
 0x69f   : > { %11134 = vmatpush.bf16.msrb.mxu2 %v15297_v14  ;;  %11147 = vmatpush.bf16.msrb.mxu3 %v15301_v15  ;;  %v12706_v14 = vld [vmem:[%s18935_s22 + $0x4e8] sm:$0xf0]  ;;  %v12712_v15 = vld [vmem:[%s18935_s22 + $0x268] sm:$0xf]  ;;  %v11684_v27 = vrot.slane %v18325_v25, 6  ;;  %v18327_v31 = vpop.eup %18326  ;;  %v11808_v35 = vsel %vm11708_vm10, %v11685_v20, %v11686_v21 }
 0x6a0   : > { %11160 = vmatpush.bf16.msra.mxu0 %v15305_v16  ;;  %11173 = vmatpush.bf16.msra.mxu1 %v15309_v23  ;;  %v16954_v16 = vld [vmem:[%s18935_s22 + $0x4ec] sm:$0xf0]  ;;  %v16873_v23 = vld [vmem:[%s18935_s22 + $0x26c] sm:$0xf]  ;;  %v12709_v28 = vor.u32 %v16872_v9, %v12706_v14  ;;  %v15322_v9 = vld [vmem:[%s18935_s22 + $0x1940] sm:$0xf0] }
 0x6a1   : > { %v12713_v29 = vor.u32 %v16954_v16, %v12712_v15  ;;  %v12717_v32 = vor.u32 %v16873_v23, %v12714_v24  ;;  %v11807_v36 = vsel %vm11706_vm11, %v18327_v31, %v11684_v27  ;;  %v14664_v16 = vld [vmem:[%s18935_s22 + $0x11a0] sm:$0xf]  ;;  %v15325_v21 = vor.u32 %v17523_v8, %v15322_v9  ;;  %v14666_v23 = vld [vmem:[%s18935_s22 + $0x1428] sm:$0xf0]  ;;  %v14672_v24 = vld [vmem:[%s18935_s22 + $0x11a8] sm:$0xf] }
 0x6a2   : > { %v11809_v39 = vsel %vm8668_vm3, %v11807_v36, %v11808_v35  ;;  %v17442_v25 = vld [vmem:[%s18935_s22 + $0x142c] sm:$0xf0]  ;;  %v14674_v27 = vld [vmem:[%s18935_s22 + $0x1430] sm:$0xf0]  ;;  %v14026_v51 = vld [vmem:[%s18935_s22 + $0xf20] sm:$0xf0] }
 0x6a3   : > { %11135 = vmatpush.bf16.msrb.mxu2 %v14649_v33  ;;  %11148 = vmatpush.bf16.msrb.mxu3 %v14653_v38  ;;  %v9138_v33 = vsel %vm8668_vm3, %v7524_v17, 0  ;;  %v9141_v38 = vsel %vm8668_vm3, %v7525_v18, 0  ;;  %11903 = vst [vmem:[%s19647_s14 + $0x108] sm:$0xff] %v11809_v39  ;;  %v17441_v17 = vld [vmem:[%s18935_s22 + $0x1424] sm:$0xf0] }
 0x6a4   : > { %11161 = vmatpush.bf16.msra.mxu0 %v14657_v48  ;;  %11174 = vmatpush.bf16.msra.mxu1 %v14661_v37  ;;  %v16608_v48 = vld [vmem:[%s18935_s22 + $0x20d0] sm:$0xf]  ;;  %v17927_v37 = vld [vmem:[%s18935_s22 + $0x2354] sm:$0xf0]  ;;  %v17360_v18 = vld [vmem:[%s18935_s22 + $0x11a4] sm:$0xf]  ;;  %v14665_v30 = vor.u32 %v17441_v17, %v14664_v16 }
 0x6a5   : > { %v16609_v53 = vor.u32 %v17927_v37, %v16608_v48  ;;  %v14669_v31 = vor.u32 %v17360_v18, %v14666_v23  ;;  %v17198_v48 = vld [vmem:[%s18935_s22 + $0xc94] sm:$0xf]  ;;  %v14018_v37 = vld [vmem:[%s18935_s22 + $0xf18] sm:$0xf0]  ;;  %v17037_v5 = vld [vmem:[%s18935_s22 + $0x78c] sm:$0xf] }
 0x6a6   : > { %v14021_v55 = vor.u32 %v17198_v48, %v14018_v37  ;;  %v16875_v16 = vld [vmem:[%s18935_s22 + $0x27c] sm:$0xf]  ;;  %v12730_v17 = vld [vmem:[%s18935_s22 + $0x500] sm:$0xf0]  ;;  %v15976_v37 = vld [vmem:[%s18935_s22 + $0x1bd0] sm:$0xf] }
 0x6a7   : > { %11136 = vmatpush.bf16.msrb.mxu2 %v14001_v43  ;;  %11149 = vmatpush.bf16.msrb.mxu3 %v14005_v58  ;;  %v16613_v43 = vor.u32 %v17846_v49, %v16610_v50  ;;  %v16621_v58 = vor.u32 %v17847_v52, %v16618_v42  ;;  %v14024_v49 = vld [vmem:[%s18935_s22 + $0xc98] sm:$0xf]  ;;  %v17280_v50 = vld [vmem:[%s18935_s22 + $0xf1c] sm:$0xf0]  ;;  %v2222_v52 = vld [vmem:[%s18935_s22 + $0x25f0] sm:$0xff] }
 0x6a8   : > { %11162 = vmatpush.bf16.msra.mxu0 %v14009_v46  ;;  %11175 = vmatpush.bf16.msra.mxu1 %v14013_v60  ;;  %v15962_v46 = vld [vmem:[%s18935_s22 + $0x1e48] sm:$0xf0]  ;;  %v15968_v60 = vld [vmem:[%s18935_s22 + $0x1bc8] sm:$0xf] }
 0x6a9   : > { %v15965_v1 = vor.u32 %v17684_v56, %v15962_v46  ;;  %v17117_v56 = vld [vmem:[%s18935_s22 + $0xa04] sm:$0xf0]  ;;  %v17036_v46 = vld [vmem:[%s18935_s22 + $0x784] sm:$0xf] }
 0x6aa   : > { %v13369_v57 = vor.u32 %v17117_v56, %v13368_v44 }
 0x6ab   : > { %11137 = vmatpush.bf16.msrb.mxu2 %v13353_v61  ;;  %11150 = vmatpush.bf16.msrb.mxu3 %v13357_v63  ;;  %v15969_v61 = vor.u32 %v17766_v62, %v15968_v60  ;;  %v15973_v63 = vor.u32 %v17685_v0, %v15970_v3  ;;  %v13370_v60 = vld [vmem:[%s18935_s22 + $0xa08] sm:$0xf0]  ;;  %v13376_v62 = vld [vmem:[%s18935_s22 + $0x788] sm:$0xf]  ;;  %v17118_v3 = vld [vmem:[%s18935_s22 + $0xa0c] sm:$0xf0] }
 0x6ac   : > { %11163 = vmatpush.bf16.msra.mxu0 %v13361_v2  ;;  %11176 = vmatpush.bf16.msra.mxu1 %v13365_v4  ;;  %v15314_v2 = vld [vmem:[%s18935_s22 + $0x1938] sm:$0xf0]  ;;  %v15320_v4 = vld [vmem:[%s18935_s22 + $0x16b8] sm:$0xf] }
 0x6ad   : > { %v15317_v14 = vor.u32 %v17522_v59, %v15314_v2  ;;  %v15321_v15 = vor.u32 %v17604_v6, %v15320_v4  ;;  %v13373_v59 = vor.u32 %v17036_v46, %v13370_v60  ;;  %v16874_v2 = vld [vmem:[%s18935_s22 + $0x274] sm:$0xf]  ;;  %v13377_v4 = vor.u32 %v17118_v3, %v13376_v62  ;;  %v14680_v46 = vld [vmem:[%s18935_s22 + $0x11b0] sm:$0xf] }
 0x6ae   : > { %v17362_v3 = vld [vmem:[%s18935_s22 + $0x11b4] sm:$0xf] }
 0x6af   : > { %11138 = vmatpush.bf16.msrb.mxu2 %v12705_v26  ;;  %11151 = vmatpush.bf16.msrb.mxu3 %v12709_v28  ;;  %v17361_v26 = vld [vmem:[%s18935_s22 + $0x11ac] sm:$0xf]  ;;  %v2402_v28 = vperm.slane %v22216_v47, 1 }
 0x6b0   : > { %11164 = vmatpush.bf16.msra.mxu0 %v12713_v29  ;;  %11177 = vmatpush.bf16.msra.mxu1 %v12717_v32  ;;  %v2401_v29 = vperm.slane %v22216_v47, 0  ;;  %v14016_v32 = vld [vmem:[%s18935_s22 + $0xc90] sm:$0xf] }
 0x6b2   : > { %16782 = vmatmul.msk.bf16.vlgmr.msrb.gmra.mxu2 %vm8664_vm9, %v19267_v12  ;;  %16783 = vmatmul.msk.bf16.vlgmr.msrb.gmra.mxu3 %vm8664_vm9, %v19267_v12  ;;  %v10958_v10 = vpop.f32.mrf.mxu0  ;;  %v10971_v11 = vpop.f32.mrf.mxu1 }
 0x6b3   : > { %11183 = vmatpush.bf16.msra.mxu2 %v9138_v33  ;;  %11196 = vmatpush.bf16.msra.mxu3 %v9141_v38  ;;  %v10959_v19 = vadd.f32 %v10958_v10, %v2403_v54  ;;  %v10972_v20 = vadd.f32 %v10971_v11, %v2404_v22  ;;  %v17279_v33 = vld [vmem:[%s18935_s22 + $0xf14] sm:$0xf0]  ;;  %v14673_v38 = vor.u32 %v17442_v25, %v14672_v24  ;;  %v6233_v54 = vunpack.c.h.b16 %v2222_v52  ;;  %v12722_v10 = vld [vmem:[%s18935_s22 + $0x4f8] sm:$0xf0] }
 0x6b4   : > { %11209 = vmatpush.bf16.msrb.mxu0 %v9144_v34  ;;  %11222 = vmatpush.bf16.msrb.mxu1 %v9147_v41  ;;  %v14677_v34 = vor.u32 %v17361_v26, %v14674_v27  ;;  %v12728_v11 = vld [vmem:[%s18935_s22 + $0x278] sm:$0xf]  ;;  %v12725_v24 = vor.u32 %v16874_v2, %v12722_v10  ;;  %v12733_v27 = vor.u32 %v16875_v16, %v12730_v17  ;;  %v17200_v2 = vld [vmem:[%s18935_s22 + $0xca4] sm:$0xf]  ;;  %v13386_v16 = vld [vmem:[%s18935_s22 + $0xa18] sm:$0xf0] }
 0x6b5   : > { %16784 = vmatmul.msk.bf16.vlgmr.msra.gmra.mxu0 %vm8664_vm9, %v19267_v12  ;;  %16785 = vmatmul.msk.bf16.vlgmr.msra.gmra.mxu1 %vm8664_vm9, %v19267_v12  ;;  %18328 = vtanh.f32 %v10959_v19  ;;  %v10932_v35 = vpop.f32.mrf.mxu2  ;;  %v10945_v36 = vpop.f32.mrf.mxu3  ;;  %v7529_v19 = vpack.c.b16 %v6233_v54, %v6233_v54 }
 0x6b6   : > { %18330 = vtanh.f32 %v10972_v20  ;;  %v10946_v39 = vadd.f32 %v10945_v36, %v2402_v28  ;;  %v10933_v41 = vadd.f32 %v10932_v35, %v2401_v29  ;;  %v16626_v35 = vld [vmem:[%s18935_s22 + $0x2368] sm:$0xf0] }
 0x6b7   : > { %11184 = vmatpush.bf16.msra.mxu2 %v16609_v53  ;;  %11197 = vmatpush.bf16.msra.mxu3 %v16613_v43  ;;  %v14017_v43 = vor.u32 %v17279_v33, %v14016_v32  ;;  %v16624_v32 = vld [vmem:[%s18935_s22 + $0x20e0] sm:$0xf] }
 0x6b8   : > { %11210 = vmatpush.bf16.msrb.mxu0 %v16617_v45  ;;  %11223 = vmatpush.bf16.msrb.mxu1 %v16621_v58  ;;  %18332 = vtanh.f32 %v10946_v39  ;;  %v14025_v45 = vor.u32 %v17280_v50, %v14024_v49  ;;  %v14029_v58 = vor.u32 %v17199_v40, %v14026_v51  ;;  %v17767_v49 = vld [vmem:[%s18935_s22 + $0x1e54] sm:$0xf0]  ;;  %v17686_v39 = vld [vmem:[%s18935_s22 + $0x1bd4] sm:$0xf]  ;;  %v15978_v50 = vld [vmem:[%s18935_s22 + $0x1e58] sm:$0xf0] }
 0x6b9   : > { %18334 = vtanh.f32 %v10933_v41  ;;  %v15977_v40 = vor.u32 %v17767_v49, %v15976_v37  ;;  %v15981_v51 = vor.u32 %v17686_v39, %v15978_v50  ;;  %v15328_v41 = vld [vmem:[%s18935_s22 + $0x16c0] sm:$0xf] }
 0x6ba   : > { %v10960_v42 = vpop.f32.mrf.mxu0  ;;  %v10973_v53 = vpop.f32.mrf.mxu1 }
 0x6bb   : > { %11185 = vmatpush.bf16.msra.mxu2 %v15961_v7  ;;  %11198 = vmatpush.bf16.msra.mxu3 %v15965_v1  ;;  %v18329_v0 = vpop.eup %18328  ;;  %v13378_v7 = vld [vmem:[%s18935_s22 + $0xa10] sm:$0xf0]  ;;  %v6232_v1 = vunpack.c.l.b16 %v2222_v52  ;;  %v17605_v52 = vld [vmem:[%s18935_s22 + $0x1944] sm:$0xf0]  ;;  %v2407_v42 = vperm.slane %v22216_v47, 6  ;;  %v2408_v53 = vperm.slane %v22216_v47, 7 }
 0x6bc   : > { %11211 = vmatpush.bf16.msrb.mxu0 %v15969_v61  ;;  %11224 = vmatpush.bf16.msrb.mxu1 %v15973_v63  ;;  %v18331_v22 = vpop.eup %18330  ;;  %v12720_v61 = vld [vmem:[%s18935_s22 + $0x270] sm:$0xf]  ;;  %v16955_v63 = vld [vmem:[%s18935_s22 + $0x4f4] sm:$0xf0]  ;;  %v13381_v6 = vor.u32 %v17037_v5, %v13378_v7  ;;  %v14682_v5 = vld [vmem:[%s18935_s22 + $0x1438] sm:$0xf0] }
 0x6bd   : > { %v10934_v8 = vpop.f32.mrf.mxu2  ;;  %v10947_v9 = vpop.f32.mrf.mxu3  ;;  %v7528_v18 = vpack.c.b16 %v6232_v1, %v6232_v1  ;;  %v12721_v23 = vor.u32 %v16955_v63, %v12720_v61  ;;  %v2406_v7 = vperm.slane %v22216_v47, 5  ;;  %v2405_v1 = vperm.slane %v22216_v47, 4  ;;  %v17281_v63 = vld [vmem:[%s18935_s22 + $0xf24] sm:$0xf0] }
 0x6be   : > { %v18333_v20 = vpop.eup %18332 }
 0x6bf   : > { %11186 = vmatpush.bf16.msra.mxu2 %v15313_v13  ;;  %11199 = vmatpush.bf16.msra.mxu3 %v15317_v14  ;;  %v16956_v13 = vld [vmem:[%s18935_s22 + $0x4fc] sm:$0xf0]  ;;  %v11688_v14 = vrot.slane %v18329_v0, 4  ;;  %v18335_v25 = vpop.eup %18334  ;;  %v17443_v0 = vld [vmem:[%s18935_s22 + $0x1434] sm:$0xf0] }
 0x6c0   : > { %11212 = vmatpush.bf16.msrb.mxu0 %v15321_v15  ;;  %11225 = vmatpush.bf16.msrb.mxu1 %v15325_v21  ;;  %v11689_v15 = vrot.slane %v18331_v22, 2  ;;  %v11687_v21 = vrot.slane %v18333_v20, 6  ;;  %v12729_v26 = vor.u32 %v16956_v13, %v12728_v11  ;;  %v14681_v54 = vor.u32 %v17443_v0, %v14680_v46  ;;  %v13384_v13 = vld [vmem:[%s18935_s22 + $0x790] sm:$0xf] }
 0x6c1   : > { %v14685_v22 = vor.u32 %v17362_v3, %v14682_v5 }
 0x6c2   : > { %v11811_v28 = vsel %vm11708_vm10, %v11688_v14, %v11689_v15  ;;  %v11810_v29 = vsel %vm11706_vm11, %v18335_v25, %v11687_v21  ;;  %v17119_v14 = vld [vmem:[%s18935_s22 + $0xa14] sm:$0xf0]  ;;  %v17038_v15 = vld [vmem:[%s18935_s22 + $0x794] sm:$0xf]  ;;  %v12736_v21 = vld [vmem:[%s18935_s22 + $0x280] sm:$0xf] }
 0x6c3   : > { %11187 = vmatpush.bf16.msra.mxu2 %v14665_v30  ;;  %11200 = vmatpush.bf16.msra.mxu3 %v14669_v31  ;;  %v9150_v30 = vsel %vm8668_vm3, %v7528_v18, 0  ;;  %v9153_v31 = vsel %vm8668_vm3, %v7529_v19, 0  ;;  %v11812_v33 = vsel %vm8668_vm3, %v11810_v29, %v11811_v28  ;;  %v13385_v19 = vor.u32 %v17119_v14, %v13384_v13  ;;  %v16957_v25 = vld [vmem:[%s18935_s22 + $0x504] sm:$0xf0] }
 0x6c4   : > { %11213 = vmatpush.bf16.msrb.mxu0 %v14673_v38  ;;  %11226 = vmatpush.bf16.msrb.mxu1 %v14677_v34  ;;  %v17929_v38 = vld [vmem:[%s18935_s22 + $0x2364] sm:$0xf0]  ;;  %v17848_v34 = vld [vmem:[%s18935_s22 + $0x20e4] sm:$0xf]  ;;  %11904 = vst [vmem:[%s19647_s14 + $0x110] sm:$0xff] %v11812_v33  ;;  %v13389_v20 = vor.u32 %v17038_v15, %v13386_v16 }
 0x6c5   : > { %v16625_v36 = vor.u32 %v17929_v38, %v16624_v32  ;;  %v16629_v48 = vor.u32 %v17848_v34, %v16626_v35  ;;  %v12737_v32 = vor.u32 %v16957_v25, %v12736_v21 }
 0x6c7   : > { %11188 = vmatpush.bf16.msra.mxu2 %v14017_v43  ;;  %11201 = vmatpush.bf16.msra.mxu3 %v14021_v55  ;;  %v17524_v43 = vld [vmem:[%s18935_s22 + $0x16c4] sm:$0xf]  ;;  %v15330_v55 = vld [vmem:[%s18935_s22 + $0x1948] sm:$0xf0] }
 0x6c8   : > { %11214 = vmatpush.bf16.msrb.mxu0 %v14025_v45  ;;  %11227 = vmatpush.bf16.msrb.mxu1 %v14029_v58  ;;  %v15329_v45 = vor.u32 %v17605_v52, %v15328_v41  ;;  %v15333_v58 = vor.u32 %v17524_v43, %v15330_v55 }
 0x6cb   : > { %11189 = vmatpush.bf16.msra.mxu2 %v13369_v57  ;;  %11202 = vmatpush.bf16.msra.mxu3 %v13373_v59  ;;  %v14032_v57 = vld [vmem:[%s18935_s22 + $0xca0] sm:$0xf] }
 0x6cc   : > { %11215 = vmatpush.bf16.msrb.mxu0 %v13377_v4  ;;  %11228 = vmatpush.bf16.msrb.mxu1 %v13381_v6  ;;  %v14034_v4 = vld [vmem:[%s18935_s22 + $0xf28] sm:$0xf0]  ;;  %v14033_v10 = vor.u32 %v17281_v63, %v14032_v57 }
 0x6cd   : > { %v14037_v11 = vor.u32 %v17200_v2, %v14034_v4 }
 0x6cf   : > { %11190 = vmatpush.bf16.msra.mxu2 %v12721_v23  ;;  %11203 = vmatpush.bf16.msra.mxu3 %v12725_v24 }
 0x6d0   : > { %11216 = vmatpush.bf16.msrb.mxu0 %v12729_v26  ;;  %11229 = vmatpush.bf16.msrb.mxu1 %v12733_v27  ;;  %v16876_v26 = vld [vmem:[%s18935_s22 + $0x284] sm:$0xf]  ;;  %v12738_v27 = vld [vmem:[%s18935_s22 + $0x508] sm:$0xf0]  ;;  %s17930_s22 = smul.u32 324, %s18791_s16  ;;  %s11912_s16 = scalar_lea.sflag [#allocation4], %s18932_s17 }
 0x6d1   : > { %v12741_v33 = vor.u32 %v16876_v26, %v12738_v27  ;;  %v2242_v27 = vld [vmem:[%s19570_s13 + $0x98] sm:$0xff] }
 0x6d2   : > { %16786 = vmatmul.msk.bf16.vlgmr.msra.gmra.mxu2 %vm8664_vm9, %v19267_v12  ;;  %16787 = vmatmul.msk.bf16.vlgmr.msra.gmra.mxu3 %vm8664_vm9, %v19267_v12  ;;  %v11010_v44 = vpop.f32.mrf.mxu0  ;;  %v11023_v56 = vpop.f32.mrf.mxu1  ;;  %s11923_s21 = scalar_lea.hbm %s22391_s9, %s17930_s22 }
 0x6d3   : > { %11235 = vmatpush.bf16.msrb.mxu2 %v9150_v30  ;;  %11248 = vmatpush.bf16.msrb.mxu3 %v9153_v31  ;;  %v11011_v60 = vadd.f32 %v11010_v44, %v2407_v42  ;;  %v11024_v62 = vadd.f32 %v11023_v56, %v2408_v53  ;;  %s11927_s18 = sshll.u32 %s11923_s21, 4  ;;  %s11928_s18 = int_to_ptr.hbm [resolvable:$true] %s11927_s18 }
 0x6d4   : > { %16788 = vmatmul.msk.bf16.vlgmr.msrb.gmra.mxu0 %vm8664_vm9, %v19267_v12  ;;  %16789 = vmatmul.msk.bf16.vlgmr.msrb.gmra.mxu1 %vm8664_vm9, %v19267_v12  ;;  %s18634_s23 = sshra.s32 %s11928_s18, 4  ;;  %s18635_s23 = int_to_ptr.hbm [resolvable:$true] %s18634_s23 }
 0x6d5   : > { %18336 = vtanh.f32 %v11011_v60  ;;  %v10984_v59 = vpop.f32.mrf.mxu2  ;;  %v10997_v61 = vpop.f32.mrf.mxu3  ;;  %s18636_s24 = scalar_lea.hbm %s18635_s23, 324  ;;  %p18641_p0 = scmp.lt.s32.totalorder %s18635_s23, %s22391_s9 }
 0x6d6   : > { %18338 = vtanh.f32 %v11024_v62  ;;  %v10998_v6 = vadd.f32 %v10997_v61, %v2406_v7  ;;  %v10985_v8 = vadd.f32 %v10984_v59, %v2405_v1  ;;  %p18637_p12 = scmp.ne.s32.totalorder %s18635_s23, %s18636_s24  ;;  %p18642_p8 = scmp.lt.s32.totalorder %s18640_s3, %s18636_s24 }
 0x6d7   : > { %11236 = vmatpush.bf16.msrb.mxu2 %v16625_v36  ;;  %11249 = vmatpush.bf16.msrb.mxu3 %v16629_v48  ;;  %v2241_v48 = vld [vmem:[%s19570_s13 + $0x90] sm:$0xff] }
 0x6d8   : > { %18340 = vtanh.f32 %v10998_v6  ;;  %v2411_v37 = vperm.slane %v2241_v48, 2  ;;  %v2412_v49 = vperm.slane %v2241_v48, 3  ;;  %v2410_v41 = vperm.slane %v2241_v48, 1  ;;  %p18638_p10 = pnand %p18637_p12, %p18842_p13  ;;  %p18643_p2 = por %p18642_p8, %p18641_p0 }
 0x6d9   : > { %18342 = vtanh.f32 %v10985_v8  ;;  %v2409_v52 = vperm.slane %v2241_v48, 0  ;;  %v2416_v57 = vperm.slane %v2241_v48, 7  ;;  %v2414_v4 = vperm.slane %v2241_v48, 5 }
 0x6da   : > { %v11012_v47 = vpop.f32.mrf.mxu0  ;;  %v11025_v9 = vpop.f32.mrf.mxu1  ;;  %v2413_v6 = vperm.slane %v2241_v48, 4  ;;  %p18639_p11 = pneg %p18638_p10 }
 0x6db   : > { %11237 = vmatpush.bf16.msrb.mxu2 %v15977_v40  ;;  %11250 = vmatpush.bf16.msrb.mxu3 %v15981_v51  ;;  %v18337_v17 = vpop.eup %18336 }
 0x6dc   : > { %v18339_v18 = vpop.eup %18338  ;;  %v11691_v28 = vrot.slane %v18337_v17, 4  ;;  %p18644_p1 = pnand %p18643_p2, %p18639_p11 }
 0x6dd   : > { %v10986_v23 = vpop.f32.mrf.mxu2  ;;  %v10999_v24 = vpop.f32.mrf.mxu3  ;;  %v11692_v29 = vrot.slane %v18339_v18, 2 }
 0x6de   : > { %v18341_v30 = vpop.eup %18340 }
 0x6df   : > { %11238 = vmatpush.bf16.msrb.mxu2 %v15329_v45  ;;  %11251 = vmatpush.bf16.msrb.mxu3 %v15333_v58  ;;  %v11690_v31 = vrot.slane %v18341_v30, 6  ;;  %v18343_v38 = vpop.eup %18342  ;;  %v11814_v34 = vsel %vm11708_vm10, %v11691_v28, %v11692_v29  ;;  %v2419_v28 = vperm.slane %v2242_v27, 2  ;;  %v2420_v29 = vperm.slane %v2242_v27, 3 }
 0x6e1   : > { %v11813_v35 = vsel %vm11706_vm11, %v18343_v38, %v11690_v31  ;;  %v2418_v38 = vperm.slane %v2242_v27, 1 }
 0x6e2   : > { %v11815_v36 = vsel %vm8668_vm3, %v11813_v35, %v11814_v34  ;;  %v2417_v34 = vperm.slane %v2242_v27, 0 }
 0x6e3   : > { %11239 = vmatpush.bf16.msrb.mxu2 %v14681_v54  ;;  %11252 = vmatpush.bf16.msrb.mxu3 %v14685_v22  ;;  %11905 = vst [vmem:[%s19647_s14 + $0x118] sm:$0xff] %v11815_v36  ;;  %v2415_v22 = vperm.slane %v2241_v48, 6 }
 0x6e7   : > { %11240 = vmatpush.bf16.msrb.mxu2 %v14033_v10  ;;  %11253 = vmatpush.bf16.msrb.mxu3 %v14037_v11 }
 0x6eb   : > { %11241 = vmatpush.bf16.msrb.mxu2 %v13385_v19  ;;  %11254 = vmatpush.bf16.msrb.mxu3 %v13389_v20 }
 0x6ef   : > { %11242 = vmatpush.bf16.msrb.mxu2 %v12737_v32  ;;  %11255 = vmatpush.bf16.msrb.mxu3 %v12741_v33 }
 0x6f2   : > { %16790 = vmatmul.msk.bf16.vlgmr.msrb.gmra.mxu2 %vm8664_vm9, %v19267_v12  ;;  %16791 = vmatmul.msk.bf16.vlgmr.msrb.gmra.mxu3 %vm8664_vm9, %v19267_v12  ;;  %v11062_v39 = vpop.f32.mrf.mxu0  ;;  %v11075_v50 = vpop.f32.mrf.mxu1 }
 0x6f3   : > { %v11063_v40 = vadd.f32 %v11062_v39, %v2411_v37  ;;  %v11076_v51 = vadd.f32 %v11075_v50, %v2412_v49 }
 0x6f5   : > { %18344 = vtanh.f32 %v11063_v40  ;;  %v11036_v42 = vpop.f32.mrf.mxu2  ;;  %v11049_v53 = vpop.f32.mrf.mxu3 }
 0x6f6   : > { %18346 = vtanh.f32 %v11076_v51  ;;  %v11050_v43 = vadd.f32 %v11049_v53, %v2410_v41  ;;  %v11037_v55 = vadd.f32 %v11036_v42, %v2409_v52 }
 0x6f8   : > { %18348 = vtanh.f32 %v11050_v43 }
 0x6f9   : > { %18350 = vtanh.f32 %v11037_v55 }
 0x6fa   : > { %v11064_v44 = vpop.f32.mrf.mxu0  ;;  %v11077_v56 = vpop.f32.mrf.mxu1 }
 0x6fb   : > { %v18345_v12 = vpop.eup %18344 }
 0x6fc   : > { %v18347_v45 = vpop.eup %18346  ;;  %v11694_v60 = vrot.slane %v18345_v12, 4 }
 0x6fd   : > { %v11038_v58 = vpop.f32.mrf.mxu2  ;;  %v11051_v46 = vpop.f32.mrf.mxu3  ;;  %v11695_v62 = vrot.slane %v18347_v45, 2  ;;  %v2423_v45 = vperm.slane %v2242_v27, 6 }
 0x6fe   : > { %v18349_v0 = vpop.eup %18348  ;;  %v2424_v58 = vperm.slane %v2242_v27, 7 }
 0x6ff   : > { %v11693_v3 = vrot.slane %v18349_v0, 6  ;;  %v18351_v5 = vpop.eup %18350  ;;  %v11817_v7 = vsel %vm11708_vm10, %v11694_v60, %v11695_v62 }
 0x701   : > { %v11816_v1 = vsel %vm11706_vm11, %v18351_v5, %v11693_v3  ;;  %v2422_v3 = vperm.slane %v2242_v27, 5  ;;  %v2421_v5 = vperm.slane %v2242_v27, 4 }
 0x702   : > { %v11818_v54 = vsel %vm8668_vm3, %v11816_v1, %v11817_v7 }
 0x703   : > { %11906 = vst [vmem:[%s19647_s14 + $0x120] sm:$0xff] %v11818_v54 }
 0x712   : > { %v11114_v59 = vpop.f32.mrf.mxu0  ;;  %v11127_v61 = vpop.f32.mrf.mxu1 }
 0x713   : > { %v11115_v63 = vadd.f32 %v11114_v59, %v2415_v22  ;;  %v11128_v2 = vadd.f32 %v11127_v61, %v2416_v57 }
 0x715   : > { %18352 = vtanh.f32 %v11115_v63  ;;  %v11088_v8 = vpop.f32.mrf.mxu2  ;;  %v11101_v47 = vpop.f32.mrf.mxu3 }
 0x716   : > { %18354 = vtanh.f32 %v11128_v2  ;;  %v11102_v9 = vadd.f32 %v11101_v47, %v2414_v4  ;;  %v11089_v10 = vadd.f32 %v11088_v8, %v2413_v6 }
 0x718   : > { %18356 = vtanh.f32 %v11102_v9 }
 0x719   : > { %18358 = vtanh.f32 %v11089_v10 }
 0x71a   : > { %v11116_v11 = vpop.f32.mrf.mxu0  ;;  %v11129_v13 = vpop.f32.mrf.mxu1 }
 0x71b   : > { %v18353_v14 = vpop.eup %18352 }
 0x71c   : > { %v18355_v15 = vpop.eup %18354  ;;  %v11697_v18 = vrot.slane %v18353_v14, 4 }
 0x71d   : > { %v11090_v16 = vpop.f32.mrf.mxu2  ;;  %v11103_v17 = vpop.f32.mrf.mxu3  ;;  %v11698_v19 = vrot.slane %v18355_v15, 2  ;;  %v2243_v15 = vld [vmem:[%s19570_s13 + $0xa0] sm:$0x3] }
 0x71e   : > { %v18357_v20 = vpop.eup %18356  ;;  %v2426_v16 = vperm.slane %v2243_v15, 1  ;;  %v2425_v17 = vperm.slane %v2243_v15, 0 }
 0x71f   : > { %v11696_v21 = vrot.slane %v18357_v20, 6  ;;  %v18359_v23 = vpop.eup %18358  ;;  %v11820_v24 = vsel %vm11708_vm10, %v11697_v18, %v11698_v19 }
 0x721   : > { %v11819_v25 = vsel %vm11706_vm11, %v18359_v23, %v11696_v21 }
 0x722   : > { %v11821_v26 = vsel %vm8668_vm3, %v11819_v25, %v11820_v24 }
 0x723   : > { %11907 = vst [vmem:[%s19647_s14 + $0x128] sm:$0xff] %v11821_v26 }
 0x732   : > { %v11166_v30 = vpop.f32.mrf.mxu0  ;;  %v11179_v31 = vpop.f32.mrf.mxu1 }
 0x733   : > { %v11167_v32 = vadd.f32 %v11166_v30, %v2419_v28  ;;  %v11180_v33 = vadd.f32 %v11179_v31, %v2420_v29 }
 0x735   : > { %18360 = vtanh.f32 %v11167_v32  ;;  %v11140_v35 = vpop.f32.mrf.mxu2  ;;  %v11153_v36 = vpop.f32.mrf.mxu3 }
 0x736   : > { %18362 = vtanh.f32 %v11180_v33  ;;  %v11154_v48 = vadd.f32 %v11153_v36, %v2418_v38  ;;  %v11141_v37 = vadd.f32 %v11140_v35, %v2417_v34 }
 0x738   : > { %18364 = vtanh.f32 %v11154_v48 }
 0x739   : > { %18366 = vtanh.f32 %v11141_v37 }
 0x73a   : > { %v11168_v49 = vpop.f32.mrf.mxu0  ;;  %v11181_v39 = vpop.f32.mrf.mxu1 }
 0x73b   : > { %v18361_v50 = vpop.eup %18360 }
 0x73c   : > { %v18363_v40 = vpop.eup %18362  ;;  %v11700_v52 = vrot.slane %v18361_v50, 4 }
 0x73d   : > { %v11142_v51 = vpop.f32.mrf.mxu2  ;;  %v11155_v41 = vpop.f32.mrf.mxu3  ;;  %v11701_v42 = vrot.slane %v18363_v40, 2 }
 0x73e   : > { %v18365_v53 = vpop.eup %18364 }
 0x73f   : > { %v11699_v43 = vrot.slane %v18365_v53, 6  ;;  %v18367_v55 = vpop.eup %18366  ;;  %v11823_v44 = vsel %vm11708_vm10, %v11700_v52, %v11701_v42 }
 0x741   : > { %v11822_v56 = vsel %vm11706_vm11, %v18367_v55, %v11699_v43 }
 0x742   : > { %v11824_v12 = vsel %vm8668_vm3, %v11822_v56, %v11823_v44 }
 0x743   : > { %11908 = vst [vmem:[%s19647_s14 + $0x130] sm:$0xff] %v11824_v12 }
 0x751   : > { %v11218_v46 = vpop.f32.mrf.mxu0  ;;  %v11231_v60 = vpop.f32.mrf.mxu1 }
 0x752   : > { %v11219_v62 = vadd.f32 %v11218_v46, %v2423_v45  ;;  %v11232_v0 = vadd.f32 %v11231_v60, %v2424_v58 }
 0x754   : > { %18368 = vtanh.f32 %v11219_v62 }
 0x755   : > { %18370 = vtanh.f32 %v11232_v0  ;;  %v11192_v7 = vpop.f32.mrf.mxu2  ;;  %v11205_v1 = vpop.f32.mrf.mxu3 }
 0x756   : > { %v11206_v54 = vadd.f32 %v11205_v1, %v2422_v3  ;;  %v11193_v22 = vadd.f32 %v11192_v7, %v2421_v5 }
 0x758   : > { %18372 = vtanh.f32 %v11206_v54 }
 0x759   : > { %v11220_v57 = vpop.f32.mrf.mxu0  ;;  %v11233_v59 = vpop.f32.mrf.mxu1  ;;  %18374 = vtanh.f32 %v11193_v22 }
 0x75a   : > { %v18369_v61 = vpop.eup %18368 }
 0x75b   : > { %v18371_v63 = vpop.eup %18370  ;;  %v11703_v6 = vrot.slane %v18369_v61, 4 }
 0x75c   : > { %v11704_v8 = vrot.slane %v18371_v63, 2 }
 0x75d   : > { %v11194_v2 = vpop.f32.mrf.mxu2  ;;  %v11207_v4 = vpop.f32.mrf.mxu3 }
 0x75e   : > { %v18373_v47 = vpop.eup %18372  ;;  %v11826_v11 = vsel %vm11708_vm10, %v11703_v6, %v11704_v8 }
 0x75f   : > { %v11702_v9 = vrot.slane %v18373_v47, 6  ;;  %v18375_v10 = vpop.eup %18374 }
 0x761   : > { %v11825_v13 = vsel %vm11706_vm11, %v18375_v10, %v11702_v9 }
 0x762   : > { %v11827_v14 = vsel %vm8668_vm3, %v11825_v13, %v11826_v11 }
 0x763   : > { %11909 = vst [vmem:[%s19647_s14 + $0x138] sm:$0xff] %v11827_v14 }
 0x775   : > { %v11244_v18 = vpop.f32.mrf.mxu2  ;;  %v11257_v19 = vpop.f32.mrf.mxu3 }
 0x776   : > { %v11258_v20 = vadd.f32 %v11257_v19, %v2426_v16  ;;  %v11245_v21 = vadd.f32 %v11244_v18, %v2425_v17 }
 0x778   : > { %18376 = vtanh.f32 %v11258_v20 }
 0x779   : > { %18378 = vtanh.f32 %v11245_v21 }
 0x77d   : > { %v11246_v23 = vpop.f32.mrf.mxu2  ;;  %v11259_v24 = vpop.f32.mrf.mxu3 }
 0x77e   : > { %v18377_v25 = vpop.eup %18376 }
 0x77f   : > { %v11705_v26 = vrot.slane %v18377_v25, 6  ;;  %v18379_v27 = vpop.eup %18378 }
 0x781   : > { %v11828_v28 = vsel %vm11706_vm11, %v18379_v27, %v11705_v26 }
 0x782   : > { %11910 = vst [vmem:[%s19647_s14 + $0x140] sm:$0xf] %v11828_v28 }
 0x783   : > { %18647 = shalt.err (!%p18644_p1)
}
 0x784   : > { %17964 = dma.vmem_to_hbm [thread:$0]  (%p18842_p13), %s11926_s30, 5184, %s11928_s18, %s11912_s16  }
 0x785 PF: > { %s22425_s17 = sld [smem:[#allocation22_spill]]  ;;  %p18009_p6 = scmp.ge.s32.totalorder %s18702_s12, 2 }
 0x787   : > { %p17993_p9 = pnand %p18009_p6, %p18848_p4 }
 0x789   : > { %p17994_p7 = pneg %p17993_p9 }
 0x78b   : > { %s11939_s25 = sand.u32 1, %s22425_s17  }
 0x78c   : > { %s11940_s29 = scalar_lea.sflag [#allocation4], %s11939_s25 }
 0x78d   : > { %18685 = dma.done.wait (%p17994_p7), %s11940_s29, 5184  }
 0x78e   : > { %18687 = vsyncadd (%p17994_p7), %s11940_s29, 4294962112  ;;  %s22427_s12 = sld [smem:[#allocation23_spill]]  ;;  %s22429_s30 = smov %s18694_s10 }
 0x78f   : > { %s22428_s13 = sld [smem:[#allocation24_spill]]  ;;  %s22430_s10 = smov %s18698_s11 }
 0x794   : > { %p23_p3 = scmp.ge.s32.totalorder %s22427_s12, 6  }
 0x795   : > { %s22431_s11 = smov %s22428_s13 }
 0x796   :  { %25 = sbr.rel (!%p23_p3) target bundleno = 12 (0xc), region = 135 }
 0x79b   :  { %11946 = vsyncpa [#allocation3], 1 }
 0x79c   :  { %11948 = vsyncpa [#allocation3 + $0x1], 1 }
 0x79d   :  { %11949 = vsyncpa [#allocation6], 1 }
 0x79e   :  { %11950 = vsyncpa [#allocation9], 1 }
 0x79f   :  { %11951 = vsyncpa [#allocation12], 1 }
 0x7a0   :  { %11952 = vsyncpa [#allocation4], 1 }
 0x7a1   :  { %11954 = vsyncpa [#allocation4 + $0x1], 1 }

</bundles_post_ra>
